<compile_context>
chip_gen: v5e
topology: v5e:2x2
jax: 0.10.0
libtpu: 0.0.40
codegen_flags: <defaults>
</compile_context>

<pallas_src>
import functools

import jax
import jax.numpy as jnp
from jax import lax
from jax.experimental import pallas as pl
from jax.experimental.pallas import tpu as pltpu


def _round_up(v, m):
    return (v + m - 1) // m * m


def _block_kernel(x_ref, w1_ref, b1_ref, w2_ref, b2_ref, w3_ref, b3_ref,
                  *rest, H, W, Wp, Cout, has_proj):
    if has_proj:
        ws_ref, o_ref, fh_ref = rest
    else:
        ws_ref = None
        o_ref, fh_ref = rest

    rint = H * Wp              # interior rows = matmul M = output rows
    start = Wp + 1             # flat offset of pixel (0, 0)
    rfull = (H + 3) * Wp       # full padded flat buffer length

    # Pad-column mask generated in-kernel: 1 on real pixels (w < W), 0 on the
    # pad columns folded into the row pitch.
    row = lax.broadcasted_iota(jnp.int32, (rint, Cout), 0)
    mask = (row % Wp) < W

    # Zero only the halo border of the hidden scratch; done every grid step so
    # each step is independent of scratch history (megacore-safe "parallel").
    fh_ref[0:start, :] = jnp.zeros((start, Cout), jnp.float32)
    fh_ref[start + rint:rfull, :] = jnp.zeros((rfull - start - rint, Cout),
                                              jnp.float32)

    def conv3x3(src_ref, wf_ref):
        """3x3 'same' conv on a flat pitched image.

        kx is folded into the contraction dim: 3 dots with K = 3*C, tap bases
        ky*Wp sublane-aligned (Wp % 8 == 0), accumulation in the MXU f32 path.
        """
        acc = jnp.zeros((rint, Cout), dtype=jnp.float32)
        for ky in range(3):
            base = ky * Wp
            tap = jnp.concatenate(
                [src_ref[base:base + rint, :],
                 src_ref[base + 1:base + 1 + rint, :],
                 src_ref[base + 2:base + 2 + rint, :]], axis=-1)
            acc = acc + jnp.dot(tap, wf_ref[ky],
                                preferred_element_type=jnp.float32)
        return acc

    # conv1 + ReLU  (mask re-zeroes the pad columns so they keep acting as
    # the horizontal halo for the next conv)
    h = conv3x3(x_ref, w1_ref) + b1_ref[...]
    fh_ref[start:start + rint, :] = jnp.where(mask, jnp.maximum(h, 0.0), 0.0)

    # conv2 + ReLU
    h = conv3x3(fh_ref, w2_ref) + b2_ref[...]
    fh_ref[start:start + rint, :] = jnp.where(mask, jnp.maximum(h, 0.0), 0.0)

    # conv3 (no ReLU yet)
    h = conv3x3(fh_ref, w3_ref) + b3_ref[...]

    # Skip path: identity or 1x1 conv, straight from the pitched input
    # (pad-column rows of x are zero, so junk rows stay harmless).
    x_int = x_ref[start:start + rint, :]
    if has_proj:
        skip = jnp.dot(x_int, ws_ref[...], preferred_element_type=jnp.float32)
    else:
        skip = x_int

    out = jnp.maximum(h + skip, 0.0)             # (rint, Cout) f32

    # Lane-dense store: transpose once to (Cout, rint) so the lane dim is
    # H*Wp (>=128) -> dense vst + contiguous HBM writeback; result is already
    # channel-major, so the host only reshapes/slices (no output transpose).
    o_ref[...] = out.T.astype(o_ref.dtype)


@jax.jit
def block_forward(x_nchw, params):
    """Block forward pass. x_nchw: (N, Cin, H, W) f32 -> (N, Cout, H, W) f32."""
    w1, b1, w2, b2, w3, b3, ws = params
    N, Cin, H, W = x_nchw.shape
    Cout = w1.shape[-1]
    has_proj = ws is not None

    # Flat pitched layout: row pitch Wp (multiple of 8, >= W + 2),
    # 1 top / 2 bottom zero pad rows, 1 left / (Wp - W - 1) right pad columns.
    Wp = max(_round_up(W + 2, 8), 8)
    rint = H * Wp
    rfull = (H + 3) * Wp

    # Host-fused halo: the pad folds into the NHWC layout copy XLA already
    # materializes for the transpose; the kernel reads taps from this ref.
    x_nhwc = jnp.transpose(x_nchw, (0, 2, 3, 1))
    x_flat = jnp.pad(x_nhwc,
                     ((0, 0), (1, 2), (1, Wp - W - 1), (0, 0))
                     ).reshape(N, rfull, Cin)

    # Fold kx into the contraction dim: (3, 3, C, Cout) -> (3, 3*C, Cout).
    w1f = w1.reshape(3, 3 * Cin, Cout)
    w2f = w2.reshape(3, 3 * Cout, Cout)
    w3f = w3.reshape(3, 3 * Cout, Cout)
    b1r = b1.reshape(1, Cout)
    b2r = b2.reshape(1, Cout)
    b3r = b3.reshape(1, Cout)

    in_specs = [
        pl.BlockSpec((None, rfull, Cin), lambda n: (n, 0, 0)),
        pl.BlockSpec((3, 3 * Cin, Cout), lambda n: (0, 0, 0)),
        pl.BlockSpec((1, Cout), lambda n: (0, 0)),
        pl.BlockSpec((3, 3 * Cout, Cout), lambda n: (0, 0, 0)),
        pl.BlockSpec((1, Cout), lambda n: (0, 0)),
        pl.BlockSpec((3, 3 * Cout, Cout), lambda n: (0, 0, 0)),
        pl.BlockSpec((1, Cout), lambda n: (0, 0)),
    ]
    args = [x_flat, w1f, b1r, w2f, b2r, w3f, b3r]
    if has_proj:
        in_specs.append(pl.BlockSpec((Cin, Cout), lambda n: (0, 0)))
        args.append(ws)

    kernel = functools.partial(_block_kernel, H=H, W=W, Wp=Wp, Cout=Cout,
                               has_proj=has_proj)

    out_t = pl.pallas_call(
        kernel,
        out_shape=jax.ShapeDtypeStruct((N, Cout, rint), jnp.float32),
        grid_spec=pltpu.PrefetchScalarGridSpec(
            num_scalar_prefetch=0,
            grid=(N,),
            in_specs=in_specs,
            out_specs=pl.BlockSpec((None, Cout, rint), lambda n: (n, 0, 0)),
            scratch_shapes=[
                pltpu.VMEM((rfull, Cout), jnp.float32),   # pitched hidden act.
            ],
        ),
        compiler_params=pltpu.CompilerParams(
            dimension_semantics=("parallel",)),
    )(*args)

    # Kernel output is already channel-major (N, Cout, H*Wp): drop the pad
    # columns -> NCHW without any host-side transpose (fuses under jit).
    return out_t.reshape(N, Cout, H, Wp)[:, :, :, :W]


def make_params(key, n_in, n_out):
    """Deterministic synthetic parameters (HWIO conv weights)."""
    ks = jax.random.split(key, 7)
    s = 0.1
    w1 = s * jax.random.normal(ks[0], (3, 3, n_in, n_out), jnp.float32)
    b1 = s * jax.random.normal(ks[1], (n_out,), jnp.float32)
    w2 = s * jax.random.normal(ks[2], (3, 3, n_out, n_out), jnp.float32)
    b2 = s * jax.random.normal(ks[3], (n_out,), jnp.float32)
    w3 = s * jax.random.normal(ks[4], (3, 3, n_out, n_out), jnp.float32)
    b3 = s * jax.random.normal(ks[5], (n_out,), jnp.float32)
    if n_in != n_out:
        ws = s * jax.random.normal(ks[6], (n_in, n_out), jnp.float32)
    else:
        ws = None  # nn.Identity() skip -> specialized (no matmul, no input)
    return (w1, b1, w2, b2, w3, b3, ws)


def _reference_forward(x_nchw, params):
    """Pure-JAX reference (lax.conv) used only for a correctness check."""
    w1, b1, w2, b2, w3, b3, ws = params
    x = jnp.transpose(x_nchw, (0, 2, 3, 1))  # NHWC
    dn = ("NHWC", "HWIO", "NHWC")

    def c3(h, w, b):
        return lax.conv_general_dilated(h, w, (1, 1), "SAME",
                                        dimension_numbers=dn) + b

    h = jax.nn.relu(c3(x, w1, b1))
    h = jax.nn.relu(c3(h, w2, b2))
    h = c3(h, w3, b3)
    if ws is None:
        skip = x
    else:
        skip = lax.conv_general_dilated(x, ws.reshape(1, 1, *ws.shape), (1, 1),
                                        "SAME", dimension_numbers=dn)
    out = jax.nn.relu(h + skip)
    return jnp.transpose(out, (0, 3, 1, 2))


if __name__ == "__main__":
    key = jax.random.PRNGKey(0)
    k_x1, k_p1, k_x2, k_p2 = jax.random.split(key, 4)

    # Case 1: n_in != n_out -> 1x1-conv skip projection inside the kernel.
    N, n_in, n_out, H, W = 2, 4, 8, 16, 16
    x1 = jax.random.normal(k_x1, (N, n_in, H, W), jnp.float32)
    p1 = make_params(k_p1, n_in, n_out)
    out1 = jax.block_until_ready(block_forward(x1, p1))
    ref1 = _reference_forward(x1, p1)
    assert out1.shape == (N, n_out, H, W)
    assert jnp.allclose(out1, ref1, atol=1e-4, rtol=1e-4), "mismatch (proj skip)"

    # Case 2: n_in == n_out -> identity skip specialization (no ws matmul/DMA).
    x2 = jax.random.normal(k_x2, (N, n_out, H, W), jnp.float32)
    p2 = make_params(k_p2, n_out, n_out)
    out2 = jax.block_until_ready(block_forward(x2, p2))
    ref2 = _reference_forward(x2, p2)
    assert out2.shape == (N, n_out, H, W)
    assert jnp.allclose(out2, ref2, atol=1e-4, rtol=1e-4), "mismatch (identity skip)"

    print("KERNEL_OK")
</pallas_src>

<mosaic_0001>
module attributes {stable_mosaic.version = 11 : i64} {
  func.func @_block_kernel(%arg0: i32, %arg1: memref<1x456x4xf32, #tpu.memory_space<vmem>>, %arg2: memref<3x12x8xf32, #tpu.memory_space<vmem>>, %arg3: memref<1x8xf32, #tpu.memory_space<vmem>>, %arg4: memref<3x24x8xf32, #tpu.memory_space<vmem>>, %arg5: memref<1x8xf32, #tpu.memory_space<vmem>>, %arg6: memref<3x24x8xf32, #tpu.memory_space<vmem>>, %arg7: memref<1x8xf32, #tpu.memory_space<vmem>>, %arg8: memref<4x8xf32, #tpu.memory_space<vmem>>, %arg9: memref<1x8x384xf32, #tpu.memory_space<vmem>>, %arg10: memref<456x8xf32, #tpu.memory_space<vmem>>) attributes {dimension_semantics = [#tpu.dimension_semantics<parallel>], iteration_bounds = array<i64: 2>, scalar_prefetch = 0 : i64, scratch_operands = 1 : i64, tpu.core_type = #tpu.core_type<tc>, window_params = [{transform_indices = @transform_0, window_bounds = array<i64: 1, 456, 4>}, {pipeline_mode = #tpu.pipeline_mode<synchronous>, transform_indices = @transform_1, window_bounds = array<i64: 3, 12, 8>}, {pipeline_mode = #tpu.pipeline_mode<synchronous>, transform_indices = @transform_2, window_bounds = array<i64: 1, 8>}, {pipeline_mode = #tpu.pipeline_mode<synchronous>, transform_indices = @transform_3, window_bounds = array<i64: 3, 24, 8>}, {pipeline_mode = #tpu.pipeline_mode<synchronous>, transform_indices = @transform_4, window_bounds = array<i64: 1, 8>}, {pipeline_mode = #tpu.pipeline_mode<synchronous>, transform_indices = @transform_5, window_bounds = array<i64: 3, 24, 8>}, {pipeline_mode = #tpu.pipeline_mode<synchronous>, transform_indices = @transform_6, window_bounds = array<i64: 1, 8>}, {pipeline_mode = #tpu.pipeline_mode<synchronous>, transform_indices = @transform_7, window_bounds = array<i64: 4, 8>}, {transform_indices = @transform_8, window_bounds = array<i64: 1, 8, 384>}]} {
    %0 = tpu.iota {dimensions = array<i32: 0>} : vector<384x8xi32>
    %c24_i32 = arith.constant 24 : i32
    %c0_i32 = arith.constant 0 : i32
    %1 = arith.cmpi eq, %c24_i32, %c0_i32 : i32
    %c1_i32 = arith.constant 1 : i32
    %2 = arith.select %1, %c1_i32, %c24_i32 : i32
    %3 = vector.broadcast %2 : i32 to vector<384x8xi32>
    %4 = arith.remsi %0, %3 : vector<384x8xi32>
    %c0_i32_0 = arith.constant 0 : i32
    %5 = vector.broadcast %c0_i32_0 : i32 to vector<384x8xi32>
    %6 = arith.cmpi ne, %4, %5 : vector<384x8xi32>
    %c0_i32_1 = arith.constant 0 : i32
    %7 = vector.broadcast %c0_i32_1 : i32 to vector<384x8xi32>
    %8 = arith.cmpi slt, %4, %7 : vector<384x8xi32>
    %c0_i32_2 = arith.constant 0 : i32
    %9 = arith.cmpi slt, %2, %c0_i32_2 : i32
    %10 = vector.broadcast %9 : i1 to vector<384x8xi1>
    %11 = vector.broadcast %10 : vector<384x8xi1> to vector<384x8xi1>
    %12 = arith.xori %8, %11 : vector<384x8xi1>
    %13 = arith.andi %12, %6 : vector<384x8xi1>
    %14 = vector.broadcast %2 : i32 to vector<384x8xi32>
    %15 = arith.addi %4, %14 : vector<384x8xi32>
    %16 = arith.select %13, %15, %4 : vector<384x8xi1>, vector<384x8xi32>
    %c16_i32 = arith.constant 16 : i32
    %17 = vector.broadcast %c16_i32 : i32 to vector<384x8xi32>
    %18 = arith.cmpi slt, %16, %17 : vector<384x8xi32>
    %cst = arith.constant 0.000000e+00 : f32
    %19 = vector.broadcast %cst : f32 to vector<25x8xf32>
    %c0 = arith.constant 0 : index
    %c0_3 = arith.constant 0 : index
    %20 = vector.load %arg10[%c0, %c0_3] : memref<456x8xf32, #tpu.memory_space<vmem>>, vector<25x8xf32>
    tpu.vector_store %arg10[%c0, %c0_3], %19 {strides = array<i32>} : memref<456x8xf32, #tpu.memory_space<vmem>>, vector<25x8xf32>,
    %cst_4 = arith.constant 0.000000e+00 : f32
    %21 = vector.broadcast %cst_4 : f32 to vector<47x8xf32>
    %c409 = arith.constant 409 : index
    %c0_5 = arith.constant 0 : index
    %22 = vector.load %arg10[%c409, %c0_5] : memref<456x8xf32, #tpu.memory_space<vmem>>, vector<47x8xf32>
    tpu.vector_store %arg10[%c409, %c0_5], %21 {strides = array<i32>} : memref<456x8xf32, #tpu.memory_space<vmem>>, vector<47x8xf32>,
    %cst_6 = arith.constant 0.000000e+00 : f32
    %23 = vector.broadcast %cst_6 : f32 to vector<384x8xf32>
    %c0_7 = arith.constant 0 : index
    %c0_8 = arith.constant 0 : index
    %c0_9 = arith.constant 0 : index
    %24 = vector.load %arg1[%c0_7, %c0_8, %c0_9] : memref<1x456x4xf32, #tpu.memory_space<vmem>>, vector<1x384x4xf32>
    %25 = vector.shape_cast %24 : vector<1x384x4xf32> to vector<384x4xf32>
    %c0_10 = arith.constant 0 : index
    %c1 = arith.constant 1 : index
    %c0_11 = arith.constant 0 : index
    %26 = vector.load %arg1[%c0_10, %c1, %c0_11] : memref<1x456x4xf32, #tpu.memory_space<vmem>>, vector<1x384x4xf32>
    %27 = vector.shape_cast %26 : vector<1x384x4xf32> to vector<384x4xf32>
    %c0_12 = arith.constant 0 : index
    %c2 = arith.constant 2 : index
    %c0_13 = arith.constant 0 : index
    %28 = vector.load %arg1[%c0_12, %c2, %c0_13] : memref<1x456x4xf32, #tpu.memory_space<vmem>>, vector<1x384x4xf32>
    %29 = vector.shape_cast %28 : vector<1x384x4xf32> to vector<384x4xf32>
    %30 = tpu.concatenate %25, %27, %29 in 1 : vector<384x4xf32>, vector<384x4xf32>, vector<384x4xf32> -> vector<384x12xf32>
    %c0_14 = arith.constant 0 : index
    %c0_15 = arith.constant 0 : index
    %c0_16 = arith.constant 0 : index
    %31 = vector.load %arg2[%c0_14, %c0_15, %c0_16] : memref<3x12x8xf32, #tpu.memory_space<vmem>>, vector<1x12x8xf32>
    %32 = vector.shape_cast %31 : vector<1x12x8xf32> to vector<12x8xf32>
    %cst_17 = arith.constant dense<0.000000e+00> : vector<384x8xf32>
    %33 = tpu.matmul %30, %32, %cst_17 {dimension_numbers = #tpu.dot_dimension_numbers<[1], [0], [0], [1], [0, 0, 1, 1], [], []>} : vector<384x12xf32>, vector<12x8xf32>, vector<384x8xf32> -> vector<384x8xf32>
    %34 = arith.addf %23, %33 : vector<384x8xf32>
    %c0_18 = arith.constant 0 : index
    %c24 = arith.constant 24 : index
    %c0_19 = arith.constant 0 : index
    %35 = vector.load %arg1[%c0_18, %c24, %c0_19] : memref<1x456x4xf32, #tpu.memory_space<vmem>>, vector<1x384x4xf32>
    %36 = vector.shape_cast %35 : vector<1x384x4xf32> to vector<384x4xf32>
    %c0_20 = arith.constant 0 : index
    %c25 = arith.constant 25 : index
    %c0_21 = arith.constant 0 : index
    %37 = vector.load %arg1[%c0_20, %c25, %c0_21] : memref<1x456x4xf32, #tpu.memory_space<vmem>>, vector<1x384x4xf32>
    %38 = vector.shape_cast %37 : vector<1x384x4xf32> to vector<384x4xf32>
    %c0_22 = arith.constant 0 : index
    %c26 = arith.constant 26 : index
    %c0_23 = arith.constant 0 : index
    %39 = vector.load %arg1[%c0_22, %c26, %c0_23] : memref<1x456x4xf32, #tpu.memory_space<vmem>>, vector<1x384x4xf32>
    %40 = vector.shape_cast %39 : vector<1x384x4xf32> to vector<384x4xf32>
    %41 = tpu.concatenate %36, %38, %40 in 1 : vector<384x4xf32>, vector<384x4xf32>, vector<384x4xf32> -> vector<384x12xf32>
    %c1_24 = arith.constant 1 : index
    %c0_25 = arith.constant 0 : index
    %c0_26 = arith.constant 0 : index
    %42 = vector.load %arg2[%c1_24, %c0_25, %c0_26] : memref<3x12x8xf32, #tpu.memory_space<vmem>>, vector<1x12x8xf32>
    %43 = vector.shape_cast %42 : vector<1x12x8xf32> to vector<12x8xf32>
    %cst_27 = arith.constant dense<0.000000e+00> : vector<384x8xf32>
    %44 = tpu.matmul %41, %43, %cst_27 {dimension_numbers = #tpu.dot_dimension_numbers<[1], [0], [0], [1], [0, 0, 1, 1], [], []>} : vector<384x12xf32>, vector<12x8xf32>, vector<384x8xf32> -> vector<384x8xf32>
    %45 = arith.addf %34, %44 : vector<384x8xf32>
    %c0_28 = arith.constant 0 : index
    %c48 = arith.constant 48 : index
    %c0_29 = arith.constant 0 : index
    %46 = vector.load %arg1[%c0_28, %c48, %c0_29] : memref<1x456x4xf32, #tpu.memory_space<vmem>>, vector<1x384x4xf32>
    %47 = vector.shape_cast %46 : vector<1x384x4xf32> to vector<384x4xf32>
    %c0_30 = arith.constant 0 : index
    %c49 = arith.constant 49 : index
    %c0_31 = arith.constant 0 : index
    %48 = vector.load %arg1[%c0_30, %c49, %c0_31] : memref<1x456x4xf32, #tpu.memory_space<vmem>>, vector<1x384x4xf32>
    %49 = vector.shape_cast %48 : vector<1x384x4xf32> to vector<384x4xf32>
    %c0_32 = arith.constant 0 : index
    %c50 = arith.constant 50 : index
    %c0_33 = arith.constant 0 : index
    %50 = vector.load %arg1[%c0_32, %c50, %c0_33] : memref<1x456x4xf32, #tpu.memory_space<vmem>>, vector<1x384x4xf32>
    %51 = vector.shape_cast %50 : vector<1x384x4xf32> to vector<384x4xf32>
    %52 = tpu.concatenate %47, %49, %51 in 1 : vector<384x4xf32>, vector<384x4xf32>, vector<384x4xf32> -> vector<384x12xf32>
    %c2_34 = arith.constant 2 : index
    %c0_35 = arith.constant 0 : index
    %c0_36 = arith.constant 0 : index
    %53 = vector.load %arg2[%c2_34, %c0_35, %c0_36] : memref<3x12x8xf32, #tpu.memory_space<vmem>>, vector<1x12x8xf32>
    %54 = vector.shape_cast %53 : vector<1x12x8xf32> to vector<12x8xf32>
    %cst_37 = arith.constant dense<0.000000e+00> : vector<384x8xf32>
    %55 = tpu.matmul %52, %54, %cst_37 {dimension_numbers = #tpu.dot_dimension_numbers<[1], [0], [0], [1], [0, 0, 1, 1], [], []>} : vector<384x12xf32>, vector<12x8xf32>, vector<384x8xf32> -> vector<384x8xf32>
    %56 = arith.addf %45, %55 : vector<384x8xf32>
    %c0_38 = arith.constant 0 : index
    %c0_39 = arith.constant 0 : index
    %57 = vector.load %arg3[%c0_38, %c0_39] : memref<1x8xf32, #tpu.memory_space<vmem>>, vector<1x8xf32>
    %58 = vector.broadcast %57 : vector<1x8xf32> to vector<384x8xf32>
    %59 = arith.addf %56, %58 : vector<384x8xf32>
    %cst_40 = arith.constant 0.000000e+00 : f32
    %60 = vector.broadcast %cst_40 : f32 to vector<384x8xf32>
    %61 = arith.maximumf %59, %60 : vector<384x8xf32>
    %cst_41 = arith.constant 0.000000e+00 : f32
    %62 = vector.broadcast %cst_41 : f32 to vector<384x8xf32>
    %63 = arith.select %18, %61, %62 : vector<384x8xi1>, vector<384x8xf32>
    %c25_42 = arith.constant 25 : index
    %c0_43 = arith.constant 0 : index
    %64 = vector.load %arg10[%c25_42, %c0_43] : memref<456x8xf32, #tpu.memory_space<vmem>>, vector<384x8xf32>
    tpu.vector_store %arg10[%c25_42, %c0_43], %63 {strides = array<i32>} : memref<456x8xf32, #tpu.memory_space<vmem>>, vector<384x8xf32>,
    %cst_44 = arith.constant 0.000000e+00 : f32
    %65 = vector.broadcast %cst_44 : f32 to vector<384x8xf32>
    %c0_45 = arith.constant 0 : index
    %c0_46 = arith.constant 0 : index
    %66 = vector.load %arg10[%c0_45, %c0_46] : memref<456x8xf32, #tpu.memory_space<vmem>>, vector<384x8xf32>
    %c1_47 = arith.constant 1 : index
    %c0_48 = arith.constant 0 : index
    %67 = vector.load %arg10[%c1_47, %c0_48] : memref<456x8xf32, #tpu.memory_space<vmem>>, vector<384x8xf32>
    %c2_49 = arith.constant 2 : index
    %c0_50 = arith.constant 0 : index
    %68 = vector.load %arg10[%c2_49, %c0_50] : memref<456x8xf32, #tpu.memory_space<vmem>>, vector<384x8xf32>
    %69 = tpu.concatenate %66, %67, %68 in 1 : vector<384x8xf32>, vector<384x8xf32>, vector<384x8xf32> -> vector<384x24xf32>
    %c0_51 = arith.constant 0 : index
    %c0_52 = arith.constant 0 : index
    %c0_53 = arith.constant 0 : index
    %70 = vector.load %arg4[%c0_51, %c0_52, %c0_53] : memref<3x24x8xf32, #tpu.memory_space<vmem>>, vector<1x24x8xf32>
    %71 = vector.shape_cast %70 : vector<1x24x8xf32> to vector<24x8xf32>
    %cst_54 = arith.constant dense<0.000000e+00> : vector<384x8xf32>
    %72 = tpu.matmul %69, %71, %cst_54 {dimension_numbers = #tpu.dot_dimension_numbers<[1], [0], [0], [1], [0, 0, 1, 1], [], []>} : vector<384x24xf32>, vector<24x8xf32>, vector<384x8xf32> -> vector<384x8xf32>
    %73 = arith.addf %65, %72 : vector<384x8xf32>
    %c24_55 = arith.constant 24 : index
    %c0_56 = arith.constant 0 : index
    %74 = vector.load %arg10[%c24_55, %c0_56] : memref<456x8xf32, #tpu.memory_space<vmem>>, vector<384x8xf32>
    %c25_57 = arith.constant 25 : index
    %c0_58 = arith.constant 0 : index
    %75 = vector.load %arg10[%c25_57, %c0_58] : memref<456x8xf32, #tpu.memory_space<vmem>>, vector<384x8xf32>
    %c26_59 = arith.constant 26 : index
    %c0_60 = arith.constant 0 : index
    %76 = vector.load %arg10[%c26_59, %c0_60] : memref<456x8xf32, #tpu.memory_space<vmem>>, vector<384x8xf32>
    %77 = tpu.concatenate %74, %75, %76 in 1 : vector<384x8xf32>, vector<384x8xf32>, vector<384x8xf32> -> vector<384x24xf32>
    %c1_61 = arith.constant 1 : index
    %c0_62 = arith.constant 0 : index
    %c0_63 = arith.constant 0 : index
    %78 = vector.load %arg4[%c1_61, %c0_62, %c0_63] : memref<3x24x8xf32, #tpu.memory_space<vmem>>, vector<1x24x8xf32>
    %79 = vector.shape_cast %78 : vector<1x24x8xf32> to vector<24x8xf32>
    %cst_64 = arith.constant dense<0.000000e+00> : vector<384x8xf32>
    %80 = tpu.matmul %77, %79, %cst_64 {dimension_numbers = #tpu.dot_dimension_numbers<[1], [0], [0], [1], [0, 0, 1, 1], [], []>} : vector<384x24xf32>, vector<24x8xf32>, vector<384x8xf32> -> vector<384x8xf32>
    %81 = arith.addf %73, %80 : vector<384x8xf32>
    %c48_65 = arith.constant 48 : index
    %c0_66 = arith.constant 0 : index
    %82 = vector.load %arg10[%c48_65, %c0_66] : memref<456x8xf32, #tpu.memory_space<vmem>>, vector<384x8xf32>
    %c49_67 = arith.constant 49 : index
    %c0_68 = arith.constant 0 : index
    %83 = vector.load %arg10[%c49_67, %c0_68] : memref<456x8xf32, #tpu.memory_space<vmem>>, vector<384x8xf32>
    %c50_69 = arith.constant 50 : index
    %c0_70 = arith.constant 0 : index
    %84 = vector.load %arg10[%c50_69, %c0_70] : memref<456x8xf32, #tpu.memory_space<vmem>>, vector<384x8xf32>
    %85 = tpu.concatenate %82, %83, %84 in 1 : vector<384x8xf32>, vector<384x8xf32>, vector<384x8xf32> -> vector<384x24xf32>
    %c2_71 = arith.constant 2 : index
    %c0_72 = arith.constant 0 : index
    %c0_73 = arith.constant 0 : index
    %86 = vector.load %arg4[%c2_71, %c0_72, %c0_73] : memref<3x24x8xf32, #tpu.memory_space<vmem>>, vector<1x24x8xf32>
    %87 = vector.shape_cast %86 : vector<1x24x8xf32> to vector<24x8xf32>
    %cst_74 = arith.constant dense<0.000000e+00> : vector<384x8xf32>
    %88 = tpu.matmul %85, %87, %cst_74 {dimension_numbers = #tpu.dot_dimension_numbers<[1], [0], [0], [1], [0, 0, 1, 1], [], []>} : vector<384x24xf32>, vector<24x8xf32>, vector<384x8xf32> -> vector<384x8xf32>
    %89 = arith.addf %81, %88 : vector<384x8xf32>
    %c0_75 = arith.constant 0 : index
    %c0_76 = arith.constant 0 : index
    %90 = vector.load %arg5[%c0_75, %c0_76] : memref<1x8xf32, #tpu.memory_space<vmem>>, vector<1x8xf32>
    %91 = vector.broadcast %90 : vector<1x8xf32> to vector<384x8xf32>
    %92 = arith.addf %89, %91 : vector<384x8xf32>
    %cst_77 = arith.constant 0.000000e+00 : f32
    %93 = vector.broadcast %cst_77 : f32 to vector<384x8xf32>
    %94 = arith.maximumf %92, %93 : vector<384x8xf32>
    %cst_78 = arith.constant 0.000000e+00 : f32
    %95 = vector.broadcast %cst_78 : f32 to vector<384x8xf32>
    %96 = arith.select %18, %94, %95 : vector<384x8xi1>, vector<384x8xf32>
    %c25_79 = arith.constant 25 : index
    %c0_80 = arith.constant 0 : index
    %97 = vector.load %arg10[%c25_79, %c0_80] : memref<456x8xf32, #tpu.memory_space<vmem>>, vector<384x8xf32>
    tpu.vector_store %arg10[%c25_79, %c0_80], %96 {strides = array<i32>} : memref<456x8xf32, #tpu.memory_space<vmem>>, vector<384x8xf32>,
    %cst_81 = arith.constant 0.000000e+00 : f32
    %98 = vector.broadcast %cst_81 : f32 to vector<384x8xf32>
    %c0_82 = arith.constant 0 : index
    %c0_83 = arith.constant 0 : index
    %99 = vector.load %arg10[%c0_82, %c0_83] : memref<456x8xf32, #tpu.memory_space<vmem>>, vector<384x8xf32>
    %c1_84 = arith.constant 1 : index
    %c0_85 = arith.constant 0 : index
    %100 = vector.load %arg10[%c1_84, %c0_85] : memref<456x8xf32, #tpu.memory_space<vmem>>, vector<384x8xf32>
    %c2_86 = arith.constant 2 : index
    %c0_87 = arith.constant 0 : index
    %101 = vector.load %arg10[%c2_86, %c0_87] : memref<456x8xf32, #tpu.memory_space<vmem>>, vector<384x8xf32>
    %102 = tpu.concatenate %99, %100, %101 in 1 : vector<384x8xf32>, vector<384x8xf32>, vector<384x8xf32> -> vector<384x24xf32>
    %c0_88 = arith.constant 0 : index
    %c0_89 = arith.constant 0 : index
    %c0_90 = arith.constant 0 : index
    %103 = vector.load %arg6[%c0_88, %c0_89, %c0_90] : memref<3x24x8xf32, #tpu.memory_space<vmem>>, vector<1x24x8xf32>
    %104 = vector.shape_cast %103 : vector<1x24x8xf32> to vector<24x8xf32>
    %cst_91 = arith.constant dense<0.000000e+00> : vector<384x8xf32>
    %105 = tpu.matmul %102, %104, %cst_91 {dimension_numbers = #tpu.dot_dimension_numbers<[1], [0], [0], [1], [0, 0, 1, 1], [], []>} : vector<384x24xf32>, vector<24x8xf32>, vector<384x8xf32> -> vector<384x8xf32>
    %106 = arith.addf %98, %105 : vector<384x8xf32>
    %c24_92 = arith.constant 24 : index
    %c0_93 = arith.constant 0 : index
    %107 = vector.load %arg10[%c24_92, %c0_93] : memref<456x8xf32, #tpu.memory_space<vmem>>, vector<384x8xf32>
    %c25_94 = arith.constant 25 : index
    %c0_95 = arith.constant 0 : index
    %108 = vector.load %arg10[%c25_94, %c0_95] : memref<456x8xf32, #tpu.memory_space<vmem>>, vector<384x8xf32>
    %c26_96 = arith.constant 26 : index
    %c0_97 = arith.constant 0 : index
    %109 = vector.load %arg10[%c26_96, %c0_97] : memref<456x8xf32, #tpu.memory_space<vmem>>, vector<384x8xf32>
    %110 = tpu.concatenate %107, %108, %109 in 1 : vector<384x8xf32>, vector<384x8xf32>, vector<384x8xf32> -> vector<384x24xf32>
    %c1_98 = arith.constant 1 : index
    %c0_99 = arith.constant 0 : index
    %c0_100 = arith.constant 0 : index
    %111 = vector.load %arg6[%c1_98, %c0_99, %c0_100] : memref<3x24x8xf32, #tpu.memory_space<vmem>>, vector<1x24x8xf32>
    %112 = vector.shape_cast %111 : vector<1x24x8xf32> to vector<24x8xf32>
    %cst_101 = arith.constant dense<0.000000e+00> : vector<384x8xf32>
    %113 = tpu.matmul %110, %112, %cst_101 {dimension_numbers = #tpu.dot_dimension_numbers<[1], [0], [0], [1], [0, 0, 1, 1], [], []>} : vector<384x24xf32>, vector<24x8xf32>, vector<384x8xf32> -> vector<384x8xf32>
    %114 = arith.addf %106, %113 : vector<384x8xf32>
    %c48_102 = arith.constant 48 : index
    %c0_103 = arith.constant 0 : index
    %115 = vector.load %arg10[%c48_102, %c0_103] : memref<456x8xf32, #tpu.memory_space<vmem>>, vector<384x8xf32>
    %c49_104 = arith.constant 49 : index
    %c0_105 = arith.constant 0 : index
    %116 = vector.load %arg10[%c49_104, %c0_105] : memref<456x8xf32, #tpu.memory_space<vmem>>, vector<384x8xf32>
    %c50_106 = arith.constant 50 : index
    %c0_107 = arith.constant 0 : index
    %117 = vector.load %arg10[%c50_106, %c0_107] : memref<456x8xf32, #tpu.memory_space<vmem>>, vector<384x8xf32>
    %118 = tpu.concatenate %115, %116, %117 in 1 : vector<384x8xf32>, vector<384x8xf32>, vector<384x8xf32> -> vector<384x24xf32>
    %c2_108 = arith.constant 2 : index
    %c0_109 = arith.constant 0 : index
    %c0_110 = arith.constant 0 : index
    %119 = vector.load %arg6[%c2_108, %c0_109, %c0_110] : memref<3x24x8xf32, #tpu.memory_space<vmem>>, vector<1x24x8xf32>
    %120 = vector.shape_cast %119 : vector<1x24x8xf32> to vector<24x8xf32>
    %cst_111 = arith.constant dense<0.000000e+00> : vector<384x8xf32>
    %121 = tpu.matmul %118, %120, %cst_111 {dimension_numbers = #tpu.dot_dimension_numbers<[1], [0], [0], [1], [0, 0, 1, 1], [], []>} : vector<384x24xf32>, vector<24x8xf32>, vector<384x8xf32> -> vector<384x8xf32>
    %122 = arith.addf %114, %121 : vector<384x8xf32>
    %c0_112 = arith.constant 0 : index
    %c0_113 = arith.constant 0 : index
    %123 = vector.load %arg7[%c0_112, %c0_113] : memref<1x8xf32, #tpu.memory_space<vmem>>, vector<1x8xf32>
    %124 = vector.broadcast %123 : vector<1x8xf32> to vector<384x8xf32>
    %125 = arith.addf %122, %124 : vector<384x8xf32>
    %c0_114 = arith.constant 0 : index
    %c25_115 = arith.constant 25 : index
    %c0_116 = arith.constant 0 : index
    %126 = vector.load %arg1[%c0_114, %c25_115, %c0_116] : memref<1x456x4xf32, #tpu.memory_space<vmem>>, vector<1x384x4xf32>
    %127 = vector.shape_cast %126 : vector<1x384x4xf32> to vector<384x4xf32>
    %c0_117 = arith.constant 0 : index
    %c0_118 = arith.constant 0 : index
    %128 = vector.load %arg8[%c0_117, %c0_118] : memref<4x8xf32, #tpu.memory_space<vmem>>, vector<4x8xf32>
    %cst_119 = arith.constant dense<0.000000e+00> : vector<384x8xf32>
    %129 = tpu.matmul %127, %128, %cst_119 {dimension_numbers = #tpu.dot_dimension_numbers<[1], [0], [0], [1], [0, 0, 1, 1], [], []>} : vector<384x4xf32>, vector<4x8xf32>, vector<384x8xf32> -> vector<384x8xf32>
    %130 = arith.addf %125, %129 : vector<384x8xf32>
    %cst_120 = arith.constant 0.000000e+00 : f32
    %131 = vector.broadcast %cst_120 : f32 to vector<384x8xf32>
    %132 = arith.maximumf %130, %131 : vector<384x8xf32>
    %133 = tpu.transpose %132, [1, 0] : vector<384x8xf32> -> vector<8x384xf32>
    %c0_121 = arith.constant 0 : index
    %c0_122 = arith.constant 0 : index
    %c0_123 = arith.constant 0 : index
    %134 = vector.load %arg9[%c0_121, %c0_122, %c0_123] : memref<1x8x384xf32, #tpu.memory_space<vmem>>, vector<1x8x384xf32>
    %135 = vector.shape_cast %134 : vector<1x8x384xf32> to vector<8x384xf32>
    %136 = vector.shape_cast %133 : vector<8x384xf32> to vector<1x8x384xf32>
    tpu.vector_store %arg9[%c0_121, %c0_122, %c0_123], %136 {strides = array<i32>} : memref<1x8x384xf32, #tpu.memory_space<vmem>>, vector<1x8x384xf32>,
    return
  }
  func.func @transform_0(%arg0: i32) -> (i32, i32, i32) {
    %c0_i32 = arith.constant 0 : i32
    %c0_i32_0 = arith.constant 0 : i32
    %c0_i32_1 = arith.constant 0 : i32
    return %arg0, %c0_i32, %c0_i32_0 : i32, i32, i32
  }
  func.func @transform_1(%arg0: i32) -> (i32, i32, i32) {
    %c0_i32 = arith.constant 0 : i32
    %c0_i32_0 = arith.constant 0 : i32
    %c0_i32_1 = arith.constant 0 : i32
    %c0_i32_2 = arith.constant 0 : i32
    return %c0_i32, %c0_i32_0, %c0_i32_1 : i32, i32, i32
  }
  func.func @transform_2(%arg0: i32) -> (i32, i32) {
    %c0_i32 = arith.constant 0 : i32
    %c0_i32_0 = arith.constant 0 : i32
    %c0_i32_1 = arith.constant 0 : i32
    return %c0_i32, %c0_i32_0 : i32, i32
  }
  func.func @transform_3(%arg0: i32) -> (i32, i32, i32) {
    %c0_i32 = arith.constant 0 : i32
    %c0_i32_0 = arith.constant 0 : i32
    %c0_i32_1 = arith.constant 0 : i32
    %c0_i32_2 = arith.constant 0 : i32
    return %c0_i32, %c0_i32_0, %c0_i32_1 : i32, i32, i32
  }
  func.func @transform_4(%arg0: i32) -> (i32, i32) {
    %c0_i32 = arith.constant 0 : i32
    %c0_i32_0 = arith.constant 0 : i32
    %c0_i32_1 = arith.constant 0 : i32
    return %c0_i32, %c0_i32_0 : i32, i32
  }
  func.func @transform_5(%arg0: i32) -> (i32, i32, i32) {
    %c0_i32 = arith.constant 0 : i32
    %c0_i32_0 = arith.constant 0 : i32
    %c0_i32_1 = arith.constant 0 : i32
    %c0_i32_2 = arith.constant 0 : i32
    return %c0_i32, %c0_i32_0, %c0_i32_1 : i32, i32, i32
  }
  func.func @transform_6(%arg0: i32) -> (i32, i32) {
    %c0_i32 = arith.constant 0 : i32
    %c0_i32_0 = arith.constant 0 : i32
    %c0_i32_1 = arith.constant 0 : i32
    return %c0_i32, %c0_i32_0 : i32, i32
  }
  func.func @transform_7(%arg0: i32) -> (i32, i32) {
    %c0_i32 = arith.constant 0 : i32
    %c0_i32_0 = arith.constant 0 : i32
    %c0_i32_1 = arith.constant 0 : i32
    return %c0_i32, %c0_i32_0 : i32, i32
  }
  func.func @transform_8(%arg0: i32) -> (i32, i32, i32) {
    %c0_i32 = arith.constant 0 : i32
    %c0_i32_0 = arith.constant 0 : i32
    %c0_i32_1 = arith.constant 0 : i32
    return %arg0, %c0_i32, %c0_i32_0 : i32, i32, i32
  }
}

</mosaic_0001>

<bundles_post_ra>
// kernel: block_forward.1
= control target key start
LH: loop header
LB: loop body
LE: loop exit
PB: predicated region body
PF: predicated region fallthrough
CT: control target
= control target key end

     0   :  { %s10094_s27 = smov 0   ;;  %s16883_s0 = inlined_call_operand.vmem [shape: f32[2,456,4], index: 0, kind: input, shape index: {}]   ;;  %s16884_s1 = inlined_call_operand.vmem [shape: f32[3,12,8], index: 1, kind: input, shape index: {}]   ;;  %s16885_s2 = inlined_call_operand.vmem [shape: f32[1,8], index: 2, kind: input, shape index: {}]   ;;  %s16886_s3 = inlined_call_operand.vmem [shape: f32[3,24,8], index: 3, kind: input, shape index: {}]   ;;  %s16887_s4 = inlined_call_operand.vmem [shape: f32[1,8], index: 4, kind: input, shape index: {}]   ;;  %s16888_s5 = inlined_call_operand.vmem [shape: f32[3,24,8], index: 5, kind: input, shape index: {}]   ;;  %s16889_s6 = inlined_call_operand.vmem [shape: f32[1,8], index: 6, kind: input, shape index: {}]   ;;  %s16890_s7 = inlined_call_operand.vmem [shape: f32[4,8], index: 7, kind: input, shape index: {}]   ;;  %s16891_s8 = inlined_call_operand.vmem [shape: f32[2,8,384], index: 8, kind: output, shape index: {}]  }
   0x1 LB: > { %s9488_s28 = sadd.s32 4294967295, %s10042_s27   ;;  %p9492_p0 = scmp.ge.s32.totalorder %s10042_s27, 1  ;;  %s10042_s27 = sphi %s10094_s27, %s18_s27  }
   0x2   : > { %p262_p1 = scmp.lt.s32.totalorder %s10042_s27, 3 }
   0x4   : > { %p263_p2 = pnand %p9492_p0, %p262_p1 }
   0x6   : > { %266 = sbr.rel (%p263_p2) target bundleno = 2445 (0x98d), region = 52 }
   0xb   : > { %p296_p3 = scmp.lt.s32.totalorder %s9488_s28, 1  ;;  %s10044_s11 = smov 4   ;;  %vm16922_vm0 = vcmask 1043456   ;;  %vm16921_vm1 = vcmask 31744   ;;  %vm16925_vm2 = vcmask 97280   ;;  %vm16924_vm3 = vcmask 64512  }
   0xc   : > { %s10045_s12 = smov 8   ;;  %vm2039_vm10 = vcmask 57344   ;;  %s10048_s9 = smov 16  }
   0xd   : > { %s18470_s28 = smov (!%p296_p3, %s9488_s28), 1 }
   0xe   : > { %s10001_s29 = smul.u32 456, %s18470_s28 }
  0x10   : > { %s10108_s10 = scalar_lea.vmem %s16883_s0, %s10001_s29 }
  0x11   : > { %v2100_v0 = vld [vmem:[%s10108_s10 + $0x21] sm:$0xff]  ;;  %v2098_v1 = vld [vmem:[%s10108_s10 + $0x11] sm:$0xff]  ;;  %v2101_v3 = vld [vmem:[%s10108_s10 + $0x29] sm:$0xff] }
  0x12   : > { %v2096_v2 = vld [vmem:[%s10108_s10 + $0x1] sm:$0xff]  ;;  %2248 = vrot.lane.b32.xlu2 %v2100_v0, %s10044_s11  ;;  %2244 = vrot.lane.b32.xlu1 %v2098_v1, %s10044_s11  ;;  %v2099_v4 = vld [vmem:[%s10108_s10 + $0x19] sm:$0xff] }
  0x13   : > { %2240 = vrot.lane.b32.xlu0 %v2096_v2, %s10044_s11  ;;  %v2097_v5 = vld [vmem:[%s10108_s10 + $0x9] sm:$0xff]  ;;  %v10123_v6 = vld [vmem:[%s10108_s10 + $0x41] sm:$0xff]  ;;  %v10126_v7 = vld [vmem:[%s10108_s10 + $0x39] sm:$0xff] }
  0x14   : > { %v10129_v8 = vld [vmem:[%s10108_s10 + $0x31] sm:$0xff]  ;;  %v10138_v9 = vld [vmem:[%s10108_s10 + $0x59] sm:$0xff]  ;;  %v10144_v11 = vld [vmem:[%s10108_s10 + $0x49] sm:$0xff] }
  0x15   : > { %v10141_v10 = vld [vmem:[%s10108_s10 + $0x51] sm:$0xff]  ;;  %v10156_v13 = vld [vmem:[%s10108_s10 + $0x69] sm:$0xff]  ;;  %v10159_v14 = vld [vmem:[%s10108_s10 + $0x61] sm:$0xff] }
  0x16   : > { %v10153_v12 = vld [vmem:[%s10108_s10 + $0x71] sm:$0xff]  ;;  %v10168_v15 = vld [vmem:[%s10108_s10 + $0x89] sm:$0xff]  ;;  %v10171_v16 = vld [vmem:[%s10108_s10 + $0x81] sm:$0xff] }
  0x17   : > { %v10174_v17 = vld [vmem:[%s10108_s10 + $0x79] sm:$0xff]  ;;  %v10183_v18 = vld [vmem:[%s10108_s10 + $0xa1] sm:$0xff]  ;;  %v10189_v20 = vld [vmem:[%s10108_s10 + $0x91] sm:$0xff] }
  0x18   : > { %v10186_v19 = vld [vmem:[%s10108_s10 + $0x99] sm:$0xff]  ;;  %v10201_v22 = vld [vmem:[%s10108_s10 + $0xb1] sm:$0xff]  ;;  %v10204_v23 = vld [vmem:[%s10108_s10 + $0xa9] sm:$0xff] }
  0x19   : > { %v10198_v21 = vld [vmem:[%s10108_s10 + $0xb9] sm:$0xff]  ;;  %v10213_v24 = vld [vmem:[%s10108_s10 + $0xd1] sm:$0xff]  ;;  %v10216_v25 = vld [vmem:[%s10108_s10 + $0xc9] sm:$0xff] }
  0x1a   : > { %2250 = vrot.lane.b32.xlu2 %v2101_v3, %s10044_s11  ;;  %2246 = vrot.lane.b32.xlu1 %v2099_v4, %s10044_s11  ;;  %v10219_v26 = vld [vmem:[%s10108_s10 + $0xc1] sm:$0xff]  ;;  %v10228_v27 = vld [vmem:[%s10108_s10 + $0xe9] sm:$0xff] }
  0x1b   : > { %2242 = vrot.lane.b32.xlu0 %v2097_v5, %s10044_s11  ;;  %v10231_v28 = vld [vmem:[%s10108_s10 + $0xe1] sm:$0xff]  ;;  %v10234_v29 = vld [vmem:[%s10108_s10 + $0xd9] sm:$0xff]  ;;  %v10249_v32 = vld [vmem:[%s10108_s10 + $0xf1] sm:$0xff] }
  0x1c   : > { %v10243_v30 = vld [vmem:[%s10108_s10 + $0x101] sm:$0xff]  ;;  %v10246_v31 = vld [vmem:[%s10108_s10 + $0xf9] sm:$0xff]  ;;  %v10261_v34 = vld [vmem:[%s10108_s10 + $0x111] sm:$0xff] }
  0x1d   : > { %v10258_v33 = vld [vmem:[%s10108_s10 + $0x119] sm:$0xff]  ;;  %17023 = vst [vmem:[#allocation4_spill] sm:$0xff] %v10261_v34  ;;  %v10264_v35 = vld [vmem:[%s10108_s10 + $0x109] sm:$0xff]  ;;  %v10275_v37 = vld [vmem:[%s10108_s10 + $0x131] sm:$0xff] }
  0x1e   : > { %17022 = vst [vmem:[#allocation3_spill] sm:$0xff] %v10258_v33  ;;  %v10278_v38 = vld [vmem:[%s10108_s10 + $0x129] sm:$0xff]  ;;  %v10281_v39 = vld [vmem:[%s10108_s10 + $0x121] sm:$0xff]  ;;  %v10298_v43 = vld [vmem:[%s10108_s10 + $0x139] sm:$0xff] }
  0x1f   : > { %17024 = vst [vmem:[#allocation5_spill] sm:$0xff] %v10264_v35  ;;  %v10292_v41 = vld [vmem:[%s10108_s10 + $0x149] sm:$0xff]  ;;  %v10295_v42 = vld [vmem:[%s10108_s10 + $0x141] sm:$0xff]  ;;  %v10312_v46 = vld [vmem:[%s10108_s10 + $0x159] sm:$0xff] }
  0x20   : > { %17025 = vst [vmem:[#allocation6_spill] sm:$0xff] %v10275_v37  ;;  %v10309_v45 = vld [vmem:[%s10108_s10 + $0x161] sm:$0xff]  ;;  %v10315_v47 = vld [vmem:[%s10108_s10 + $0x151] sm:$0xff]  ;;  %v10330_v51 = vld [vmem:[%s10108_s10 + $0x179] sm:$0xff] }
  0x21   : > { %17026 = vst [vmem:[#allocation7_spill] sm:$0xff] %v10278_v38  ;;  %v10333_v52 = vld [vmem:[%s10108_s10 + $0x171] sm:$0xff]  ;;  %v10336_v53 = vld [vmem:[%s10108_s10 + $0x169] sm:$0xff]  ;;  %v2147_v1 = vld [vmem:[%s10108_s10 + $0x1a] sm:$0xff] }
  0x22   : > { %2256 = vrot.lane.b32.xlu2 %v10123_v6, %s10044_s11  ;;  %2254 = vrot.lane.b32.xlu1 %v10126_v7, %s10044_s11  ;;  %17027 = vst [vmem:[#allocation8_spill] sm:$0xff] %v10281_v39  ;;  %v2146_v57 = vld [vmem:[%s10108_s10 + $0x12] sm:$0xff]  ;;  %v2145_v58 = vld [vmem:[%s10108_s10 + $0xa] sm:$0xff] }
  0x23   : > { %2252 = vrot.lane.b32.xlu0 %v10129_v8, %s10044_s11  ;;  %17028 = vst [vmem:[#allocation9_spill] sm:$0xff] %v10292_v41  ;;  %v2144_v59 = vld [vmem:[%s10108_s10 + $0x2] sm:$0xff]  ;;  %v2149_v63 = vld [vmem:[%s10108_s10 + $0x2a] sm:$0xff] }
  0x24   : > { %17029 = vst [vmem:[#allocation10_spill] sm:$0xff] %v10295_v42  ;;  %v2148_v0 = vld [vmem:[%s10108_s10 + $0x22] sm:$0xff] }
  0x25   : > { %17030 = vst [vmem:[#allocation11_spill] sm:$0xff] %v10298_v43  ;;  %v10375_v5 = vld [vmem:[%s10108_s10 + $0x42] sm:$0xff] }
  0x26   : > { %17031 = vst [vmem:[#allocation12_spill] sm:$0xff] %v10309_v45 }
  0x27   : > { %17032 = vst [vmem:[#allocation13_spill] sm:$0xff] %v10312_v46 }
  0x28   : > { %17033 = vst [vmem:[#allocation14_spill] sm:$0xff] %v10315_v47 }
  0x29   : > { %17034 = vst [vmem:[#allocation15_spill] sm:$0xff] %v10330_v51 }
  0x2a   : > { %2262 = vrot.lane.b32.xlu2 %v10138_v9, %s10044_s11  ;;  %2260 = vrot.lane.b32.xlu1 %v10141_v10, %s10044_s11  ;;  %17035 = vst [vmem:[#allocation16_spill] sm:$0xff] %v10333_v52 }
  0x2b   : > { %2258 = vrot.lane.b32.xlu0 %v10144_v11, %s10044_s11  ;;  %17036 = vst [vmem:[#allocation17_spill] sm:$0xff] %v10336_v53 }
  0x2c   : > { %17039 = vst [vmem:[#allocation20_spill] sm:$0xff] %v10375_v5 }
  0x32   : > { %2268 = vrot.lane.b32.xlu2 %v10153_v12, %s10044_s11  ;;  %2266 = vrot.lane.b32.xlu1 %v10156_v13, %s10044_s11 }
  0x33   : > { %2264 = vrot.lane.b32.xlu0 %v10159_v14, %s10044_s11 }
  0x3a   : > { %2274 = vrot.lane.b32.xlu2 %v10168_v15, %s10044_s11  ;;  %2272 = vrot.lane.b32.xlu1 %v10171_v16, %s10044_s11 }
  0x3b   : > { %2270 = vrot.lane.b32.xlu0 %v10174_v17, %s10044_s11 }
  0x42   : > { %2280 = vrot.lane.b32.xlu2 %v10183_v18, %s10044_s11  ;;  %2278 = vrot.lane.b32.xlu1 %v10186_v19, %s10044_s11 }
  0x43   : > { %2276 = vrot.lane.b32.xlu0 %v10189_v20, %s10044_s11 }
  0x4a   : > { %2286 = vrot.lane.b32.xlu2 %v10198_v21, %s10044_s11  ;;  %2284 = vrot.lane.b32.xlu1 %v10201_v22, %s10044_s11 }
  0x4b   : > { %2282 = vrot.lane.b32.xlu0 %v10204_v23, %s10044_s11 }
  0x52   : > { %2292 = vrot.lane.b32.xlu2 %v10213_v24, %s10044_s11  ;;  %2290 = vrot.lane.b32.xlu1 %v10216_v25, %s10044_s11 }
  0x53   : > { %2288 = vrot.lane.b32.xlu0 %v10219_v26, %s10044_s11 }
  0x5a   : > { %2298 = vrot.lane.b32.xlu2 %v10228_v27, %s10044_s11  ;;  %2296 = vrot.lane.b32.xlu1 %v10231_v28, %s10044_s11 }
  0x5b   : > { %2294 = vrot.lane.b32.xlu0 %v10234_v29, %s10044_s11 }
  0x62   : > { %2304 = vrot.lane.b32.xlu2 %v10243_v30, %s10044_s11  ;;  %2302 = vrot.lane.b32.xlu1 %v10246_v31, %s10044_s11 }
  0x63   : > { %2300 = vrot.lane.b32.xlu0 %v10249_v32, %s10044_s11 }
  0x6a   : > { %2310 = vrot.lane.b32.xlu2 %v10258_v33, %s10044_s11  ;;  %2308 = vrot.lane.b32.xlu1 %v10261_v34, %s10044_s11  ;;  %v2190_v34 = vld [vmem:[%s10108_s10 + $0x172] sm:$0xff] }
  0x6b   : > { %2306 = vrot.lane.b32.xlu0 %v10264_v35, %s10044_s11  ;;  %v2191_v35 = vld [vmem:[%s10108_s10 + $0x17a] sm:$0xff] }
  0x6c   : > { %v10272_v36 = vpop.permute.xlu2 %2248 }
  0x72   : > { %2316 = vrot.lane.b32.xlu2 %v10275_v37, %s10044_s11  ;;  %2314 = vrot.lane.b32.xlu1 %v10278_v38, %s10044_s11  ;;  %v2174_v38 = vld [vmem:[%s10108_s10 + $0xf2] sm:$0xff]  ;;  %v2183_v37 = vld [vmem:[%s10108_s10 + $0x13a] sm:$0xff] }
  0x73   : > { %2312 = vrot.lane.b32.xlu0 %v10281_v39, %s10044_s11  ;;  %v2175_v39 = vld [vmem:[%s10108_s10 + $0xfa] sm:$0xff] }
  0x74   : > { %v10289_v40 = vpop.permute.xlu2 %2250 }
  0x7a   : > { %2322 = vrot.lane.b32.xlu2 %v10292_v41, %s10044_s11  ;;  %2320 = vrot.lane.b32.xlu1 %v10295_v42, %s10044_s11  ;;  %v2169_v42 = vld [vmem:[%s10108_s10 + $0xca] sm:$0xff]  ;;  %v2168_v41 = vld [vmem:[%s10108_s10 + $0xc2] sm:$0xff] }
  0x7b   : > { %2318 = vrot.lane.b32.xlu0 %v10298_v43, %s10044_s11  ;;  %v2165_v43 = vld [vmem:[%s10108_s10 + $0xaa] sm:$0xff] }
  0x7c   : > { %v10306_v44 = vpop.permute.xlu2 %2256 }
  0x82   : > { %2328 = vrot.lane.b32.xlu2 %v10309_v45, %s10044_s11  ;;  %2326 = vrot.lane.b32.xlu1 %v10312_v46, %s10044_s11  ;;  %v2160_v46 = vld [vmem:[%s10108_s10 + $0x82] sm:$0xff]  ;;  %v2159_v45 = vld [vmem:[%s10108_s10 + $0x7a] sm:$0xff] }
  0x83   : > { %2324 = vrot.lane.b32.xlu0 %v10315_v47, %s10044_s11  ;;  %v2161_v47 = vld [vmem:[%s10108_s10 + $0x8a] sm:$0xff] }
  0x84   : > { %v10323_v48 = vpop.permute.xlu2 %2262  ;;  %v10325_v49 = vpop.permute.xlu1 %2244 }
  0x85   : > { %v10327_v50 = vpop.permute.xlu0 %2240 }
  0x8a   : > { %2334 = vrot.lane.b32.xlu2 %v10330_v51, %s10044_s11  ;;  %2332 = vrot.lane.b32.xlu1 %v10333_v52, %s10044_s11  ;;  %v2157_v52 = vld [vmem:[%s10108_s10 + $0x6a] sm:$0xff]  ;;  %v2156_v51 = vld [vmem:[%s10108_s10 + $0x62] sm:$0xff] }
  0x8b   : > { %2330 = vrot.lane.b32.xlu0 %v10336_v53, %s10044_s11  ;;  %v10402_v53 = vld [vmem:[%s10108_s10 + $0x4a] sm:$0xff] }
  0x8c   : > { %v10344_v54 = vpop.permute.xlu2 %2268  ;;  %v10346_v55 = vpop.permute.xlu1 %2246  ;;  %17045 = vst [vmem:[#allocation26_spill] sm:$0xff] %v10402_v53 }
  0x8d   : > { %v10348_v56 = vpop.permute.xlu0 %2242 }
  0x92   : > { %2436 = vrot.lane.b32.xlu2 %v2146_v57, %s10045_s12  ;;  %2434 = vrot.lane.b32.xlu1 %v2145_v58, %s10045_s12  ;;  %v10378_v57 = vld [vmem:[%s10108_s10 + $0x3a] sm:$0xff]  ;;  %v10381_v58 = vld [vmem:[%s10108_s10 + $0x32] sm:$0xff] }
  0x93   : > { %2432 = vrot.lane.b32.xlu0 %v2144_v59, %s10045_s12  ;;  %17040 = vst [vmem:[#allocation21_spill] sm:$0xff] %v10378_v57 }
  0x94   : > { %v10356_v60 = vpop.permute.xlu2 %2274  ;;  %v10358_v61 = vpop.permute.xlu1 %2254  ;;  %17041 = vst [vmem:[#allocation22_spill] sm:$0xff] %v10381_v58 }
  0x95   : > { %17037 = vst [vmem:[#allocation18_spill] sm:$0xff] %v10356_v60  ;;  %v10360_v62 = vpop.permute.xlu0 %2252  ;;  %v2162_v60 = vld [vmem:[%s10108_s10 + $0x92] sm:$0xff] }
  0x9a   : > { %2442 = vrot.lane.b32.xlu2 %v2149_v63, %s10045_s12  ;;  %2440 = vrot.lane.b32.xlu1 %v2148_v0, %s10045_s12 }
  0x9b   : > { %2438 = vrot.lane.b32.xlu0 %v2147_v1, %s10045_s12  ;;  %v10396_v1 = vld [vmem:[%s10108_s10 + $0x5a] sm:$0xff] }
  0x9c   : > { %v10368_v2 = vpop.permute.xlu2 %2280  ;;  %v10370_v3 = vpop.permute.xlu1 %2260  ;;  %17043 = vst [vmem:[#allocation24_spill] sm:$0xff] %v10396_v1 }
  0x9d   : > { %17038 = vst [vmem:[#allocation19_spill] sm:$0xff] %v10368_v2  ;;  %v10372_v4 = vpop.permute.xlu0 %2258  ;;  %v10399_v2 = vld [vmem:[%s10108_s10 + $0x52] sm:$0xff] }
  0x9e   : > { %17044 = vst [vmem:[#allocation25_spill] sm:$0xff] %v10399_v2 }
  0xa2   : > { %2448 = vrot.lane.b32.xlu2 %v10375_v5, %s10045_s12  ;;  %2446 = vrot.lane.b32.xlu1 %v10378_v57, %s10045_s12  ;;  %v2158_v5 = vld [vmem:[%s10108_s10 + $0x72] sm:$0xff] }
  0xa3   : > { %2444 = vrot.lane.b32.xlu0 %v10381_v58, %s10045_s12 }
  0xa4   : > { %v10389_v59 = vpop.permute.xlu2 %2286  ;;  %v10391_v63 = vpop.permute.xlu1 %2266 }
  0xa5   : > { %17042 = vst [vmem:[#allocation23_spill] sm:$0xff] %v10389_v59  ;;  %v10393_v0 = vpop.permute.xlu0 %2264 }
  0xaa   : > { %2454 = vrot.lane.b32.xlu2 %v10396_v1, %s10045_s12  ;;  %2452 = vrot.lane.b32.xlu1 %v10399_v2, %s10045_s12 }
  0xab   : > { %2450 = vrot.lane.b32.xlu0 %v10402_v53, %s10045_s12 }
  0xac   : > { %v10410_v59 = vpop.permute.xlu2 %2292  ;;  %v10412_v58 = vpop.permute.xlu1 %2272 }
  0xad   : > { %17046 = vst [vmem:[#allocation27_spill] sm:$0xff] %v10412_v58  ;;  %v10414_v57 = vpop.permute.xlu0 %2270  ;;  %v2171_v58 = vld [vmem:[%s10108_s10 + $0xda] sm:$0xff] }
  0xae   : > { %17047 = vst [vmem:[#allocation28_spill] sm:$0xff] %v10414_v57  ;;  %v2048_v57 = vld [vmem:[%s10108_s10] sm:$0xff] }
  0xb2   : > { %2460 = vrot.lane.b32.xlu2 %v2158_v5, %s10045_s12  ;;  %2458 = vrot.lane.b32.xlu1 %v2157_v52, %s10045_s12 }
  0xb3   : > { %2456 = vrot.lane.b32.xlu0 %v2156_v51, %s10045_s12 }
  0xb4   : > { %v10422_v2 = vpop.permute.xlu2 %2298  ;;  %v10424_v53 = vpop.permute.xlu1 %2278 }
  0xb5   : > { %17048 = vst [vmem:[#allocation29_spill] sm:$0xff] %v10424_v53  ;;  %v10426_v1 = vpop.permute.xlu0 %2276  ;;  %v2164_v53 = vld [vmem:[%s10108_s10 + $0xa2] sm:$0xff] }
  0xb6   : > { %17049 = vst [vmem:[#allocation30_spill] sm:$0xff] %v10426_v1  ;;  %v2163_v1 = vld [vmem:[%s10108_s10 + $0x9a] sm:$0xff] }
  0xba   : > { %2466 = vrot.lane.b32.xlu2 %v2161_v47, %s10045_s12  ;;  %2464 = vrot.lane.b32.xlu1 %v2160_v46, %s10045_s12 }
  0xbb   : > { %2462 = vrot.lane.b32.xlu0 %v2159_v45, %s10045_s12 }
  0xbc   : > { %v10434_v52 = vpop.permute.xlu2 %2304  ;;  %v10436_v51 = vpop.permute.xlu1 %2284 }
  0xbd   : > { %17050 = vst [vmem:[#allocation31_spill] sm:$0xff] %v10434_v52  ;;  %v10438_v5 = vpop.permute.xlu0 %2282  ;;  %v2172_v52 = vld [vmem:[%s10108_s10 + $0xe2] sm:$0xff] }
  0xbe   : > { %17051 = vst [vmem:[#allocation32_spill] sm:$0xff] %v10436_v51  ;;  %v2167_v51 = vld [vmem:[%s10108_s10 + $0xba] sm:$0xff] }
  0xbf   : > { %17052 = vst [vmem:[#allocation33_spill] sm:$0xff] %v10438_v5  ;;  %v2166_v5 = vld [vmem:[%s10108_s10 + $0xb2] sm:$0xff] }
  0xc2   : > { %2472 = vrot.lane.b32.xlu2 %v2164_v53, %s10045_s12  ;;  %2470 = vrot.lane.b32.xlu1 %v2163_v1, %s10045_s12 }
  0xc3   : > { %2468 = vrot.lane.b32.xlu0 %v2162_v60, %s10045_s12 }
  0xc4   : > { %v10446_v46 = vpop.permute.xlu2 %2310  ;;  %v10448_v45 = vpop.permute.xlu1 %2290 }
  0xc5   : > { %17053 = vst [vmem:[#allocation34_spill] sm:$0xff] %v10446_v46  ;;  %v10450_v47 = vpop.permute.xlu0 %2288  ;;  %v2170_v46 = vld [vmem:[%s10108_s10 + $0xd2] sm:$0xff] }
  0xca   : > { %2478 = vrot.lane.b32.xlu2 %v2167_v51, %s10045_s12  ;;  %2476 = vrot.lane.b32.xlu1 %v2166_v5, %s10045_s12 }
  0xcb   : > { %2474 = vrot.lane.b32.xlu0 %v2165_v43, %s10045_s12 }
  0xcc   : > { %v10458_v53 = vpop.permute.xlu2 %2316  ;;  %v10460_v60 = vpop.permute.xlu1 %2296 }
  0xcd   : > { %17054 = vst [vmem:[#allocation35_spill] sm:$0xff] %v10458_v53  ;;  %v10462_v1 = vpop.permute.xlu0 %2294  ;;  %v2173_v53 = vld [vmem:[%s10108_s10 + $0xea] sm:$0xff] }
  0xd2   : > { %2484 = vrot.lane.b32.xlu2 %v2170_v46, %s10045_s12  ;;  %2482 = vrot.lane.b32.xlu1 %v2169_v42, %s10045_s12 }
  0xd3   : > { %2480 = vrot.lane.b32.xlu0 %v2168_v41, %s10045_s12 }
  0xd4   : > { %v10470_v51 = vpop.permute.xlu2 %2322  ;;  %v10472_v43 = vpop.permute.xlu1 %2302 }
  0xd5   : > { %17055 = vst [vmem:[#allocation36_spill] sm:$0xff] %v10470_v51  ;;  %v10474_v5 = vpop.permute.xlu0 %2300  ;;  %v2176_v51 = vld [vmem:[%s10108_s10 + $0x102] sm:$0xff] }
  0xd6   : > { %17056 = vst [vmem:[#allocation37_spill] sm:$0xff] %v10472_v43  ;;  %v2188_v43 = vld [vmem:[%s10108_s10 + $0x162] sm:$0xff] }
  0xd7   : > { %17057 = vst [vmem:[#allocation38_spill] sm:$0xff] %v10474_v5 }
  0xda   : > { %2490 = vrot.lane.b32.xlu2 %v2173_v53, %s10045_s12  ;;  %2488 = vrot.lane.b32.xlu1 %v2172_v52, %s10045_s12 }
  0xdb   : > { %2486 = vrot.lane.b32.xlu0 %v2171_v58, %s10045_s12  ;;  %v2674_v58 = vld [vmem:[%s16884_s1 + $0x8] sm:$0xf] }
  0xdc   : > { %v10482_v46 = vpop.permute.xlu2 %2328  ;;  %v10484_v42 = vpop.permute.xlu1 %2308  ;;  %9546 = vmatpush.msk.msra.mxu1 %vm16922_vm0, %v2674_v58  ;;  %9999 = vmatpush.msk.msra.mxu3 %vm16922_vm0, %v2674_v58  ;;  %v9496_v58 = vld [vmem:[%s16884_s1 + $0x18] sm:$0xf] }
  0xdd   : > { %17058 = vst [vmem:[#allocation39_spill] sm:$0xff] %v10482_v46  ;;  %v10486_v41 = vpop.permute.xlu0 %2306  ;;  %9497 = vmatpush.msk.msra.mxu0 %vm16922_vm0, %v9496_v58  ;;  %9997 = vmatpush.msk.msra.mxu2 %vm16922_vm0, %v9496_v58 }
  0xde   : > { %17059 = vst [vmem:[#allocation40_spill] sm:$0xff] %v10484_v42  ;;  %v2180_v42 = vld [vmem:[%s10108_s10 + $0x122] sm:$0xff] }
  0xdf   : > { %17060 = vst [vmem:[#allocation41_spill] sm:$0xff] %v10486_v41  ;;  %v2184_v41 = vld [vmem:[%s10108_s10 + $0x142] sm:$0xff] }
  0xe2   : > { %2496 = vrot.lane.b32.xlu2 %v2176_v51, %s10045_s12  ;;  %2494 = vrot.lane.b32.xlu1 %v2175_v39, %s10045_s12  ;;  %v2673_v39 = vld [vmem:[%s16884_s1] sm:$0xff]  ;;  %v2178_v51 = vld [vmem:[%s10108_s10 + $0x112] sm:$0xff] }
  0xe3   : > { %2492 = vrot.lane.b32.xlu0 %v2174_v38, %s10045_s12  ;;  %3054 = vmatpush.msra.mxu1 %v2673_v39  ;;  %v2179_v38 = vld [vmem:[%s10108_s10 + $0x11a] sm:$0xff] }
  0xe4   : > { %v10497_v52 = vpop.permute.xlu2 %2334  ;;  %v10499_v53 = vpop.permute.xlu1 %2314  ;;  %10000 = vmatpush.msra.mxu3 %v2673_v39 }
  0xe5   : > { %17061 = vst [vmem:[#allocation42_spill] sm:$0xff] %v10497_v52  ;;  %v10503_v46 = vpop.permute.xlu0 %2312  ;;  %v2177_v52 = vld [vmem:[%s10108_s10 + $0x10a] sm:$0xff] }
  0xe6   : > { %17062 = vst [vmem:[#allocation43_spill] sm:$0xff] %v10499_v53 }
  0xe7   : > { %17063 = vst [vmem:[#allocation44_spill] sm:$0xff] %v10503_v46 }
  0xea   : > { %2502 = vrot.lane.b32.xlu2 %v2179_v38, %s10045_s12  ;;  %2500 = vrot.lane.b32.xlu1 %v2178_v51, %s10045_s12  ;;  %v2182_v38 = vld [vmem:[%s10108_s10 + $0x132] sm:$0xff]  ;;  %v2181_v51 = vld [vmem:[%s10108_s10 + $0x12a] sm:$0xff] }
  0xeb   : > { %2498 = vrot.lane.b32.xlu0 %v2177_v52, %s10045_s12  ;;  %v9495_v52 = vld [vmem:[%s16884_s1 + $0x10] sm:$0xff] }
  0xec   : > { %v10517_v53 = vpop.permute.xlu2 %2436  ;;  %v10519_v46 = vpop.permute.xlu1 %2320  ;;  %2881 = vmatpush.msra.mxu0 %v9495_v52  ;;  %9998 = vmatpush.msra.mxu2 %v9495_v52  ;;  %v2185_v52 = vld [vmem:[%s10108_s10 + $0x14a] sm:$0xff] }
  0xed   : > { %17064 = vst [vmem:[#allocation45_spill] sm:$0xff] %v10519_v46  ;;  %v10523_v39 = vpop.permute.xlu0 %2318 }
  0xee   : > { %17065 = vst [vmem:[#allocation46_spill] sm:$0xff] %v10523_v39 }
  0xf2   : > { %2508 = vrot.lane.b32.xlu2 %v2182_v38, %s10045_s12  ;;  %2506 = vrot.lane.b32.xlu1 %v2181_v51, %s10045_s12 }
  0xf3   : > { %2504 = vrot.lane.b32.xlu0 %v2180_v42, %s10045_s12 }
  0xf4   : > { %v10534_v58 = vpop.permute.xlu2 %2442  ;;  %v10536_v46 = vpop.permute.xlu1 %2326 }
  0xf5   : > { %17066 = vst [vmem:[#allocation47_spill] sm:$0xff] %v10536_v46  ;;  %v10538_v39 = vpop.permute.xlu0 %2324  ;;  %v2187_v46 = vld [vmem:[%s10108_s10 + $0x15a] sm:$0xff] }
  0xf6   : > { %17067 = vst [vmem:[#allocation48_spill] sm:$0xff] %v10538_v39  ;;  %v2186_v39 = vld [vmem:[%s10108_s10 + $0x152] sm:$0xff] }
  0xfa   : > { %2514 = vrot.lane.b32.xlu2 %v2185_v52, %s10045_s12  ;;  %2512 = vrot.lane.b32.xlu1 %v2184_v41, %s10045_s12  ;;  %v2577_v52 = vsel %vm16921_vm1, %v2048_v57, %v10327_v50 }
  0xfb   : > { %2510 = vrot.lane.b32.xlu0 %v2183_v37, %s10045_s12 }
  0xfc   : > { %v10546_v38 = vpop.permute.xlu2 %2448  ;;  %v10548_v51 = vpop.permute.xlu1 %2332 }
  0xfd   : > { %17068 = vst [vmem:[#allocation49_spill] sm:$0xff] %v10548_v51  ;;  %v10550_v42 = vpop.permute.xlu0 %2330 }
  0xfe   : > { %17069 = vst [vmem:[#allocation50_spill] sm:$0xff] %v10550_v42 }
 0x102   : > { %2520 = vrot.lane.b32.xlu2 %v2188_v43, %s10045_s12  ;;  %2518 = vrot.lane.b32.xlu1 %v2187_v46, %s10045_s12  ;;  %v2189_v43 = vld [vmem:[%s10108_s10 + $0x16a] sm:$0xff]  ;;  %v2051_v46 = vld [vmem:[%s10108_s10 + $0x18] sm:$0xff] }
 0x103   : > { %2516 = vrot.lane.b32.xlu0 %v2186_v39, %s10045_s12  ;;  %v2049_v39 = vld [vmem:[%s10108_s10 + $0x8] sm:$0xff] }
 0x104   : > { %v10559_v37 = vpop.permute.xlu2 %2454  ;;  %v2435_v41 = vpop.permute.xlu1 %2434 }
 0x105   : > { %v2433_v51 = vpop.permute.xlu0 %2432 }
 0x106   : > { %v2625_v42 = vsel %vm16924_vm3, %v2577_v52, %v2433_v51  ;;  %v2580_v51 = vsel %vm16921_vm1, %v2051_v46, %v10346_v55  ;;  %v2052_v55 = vld [vmem:[%s10108_s10 + $0x20] sm:$0xff] }
 0x107   : > { %9547 = vmatmul.msk.f32.vlgmr.msra.gmra.mxu1 %vm16925_vm2, %v2625_v42  ;;  %v2578_v42 = vsel %vm16921_vm1, %v2049_v39, %v10348_v56  ;;  %v2050_v56 = vld [vmem:[%s10108_s10 + $0x10] sm:$0xff]  ;;  %v2581_v46 = vsel %vm16921_vm1, %v2052_v55, %v10272_v36 }
 0x108   : > { %v2626_v5 = vsel %vm16924_vm3, %v2578_v42, %v2435_v41  ;;  %v2579_v39 = vsel %vm16921_vm1, %v2050_v56, %v10325_v49 }
 0x10a   : > { %2526 = vrot.lane.b32.xlu2 %v2191_v35, %s10045_s12  ;;  %2524 = vrot.lane.b32.xlu1 %v2190_v34, %s10045_s12  ;;  %v10584_v34 = vld [vmem:[%s10108_s10 + $0x191] sm:$0xff]  ;;  %v10587_v35 = vld [vmem:[%s10108_s10 + $0x189] sm:$0xff] }
 0x10b   : > { %2522 = vrot.lane.b32.xlu0 %v2189_v43, %s10045_s12  ;;  %17070 = vst [vmem:[#allocation51_spill] sm:$0xff] %v10584_v34  ;;  %v10590_v43 = vld [vmem:[%s10108_s10 + $0x181] sm:$0xff] }
 0x10c   : > { %v10573_v50 = vpop.permute.xlu2 %2460  ;;  %v2441_v57 = vpop.permute.xlu1 %2440  ;;  %17071 = vst [vmem:[#allocation52_spill] sm:$0xff] %v10587_v35 }
 0x10d   : > { %v2439_v52 = vpop.permute.xlu0 %2438  ;;  %17072 = vst [vmem:[#allocation53_spill] sm:$0xff] %v10590_v43  ;;  %v2629_v42 = vsel %vm16924_vm3, %v2581_v46, %v2441_v57 }
 0x10e   : > { %v2628_v33 = vsel %vm16924_vm3, %v2580_v51, %v2439_v52  ;;  %v2627_v52 = vsel %vm16924_vm3, %v2579_v39, %v10517_v53 }
 0x10f   : > { %9498 = vmatmul.msk.f32.vlgmr.msra.gmra.mxu0 %vm16925_vm2, %v2628_v33  ;;  %9548 = vmatmul.msk.f32.gmra.mxu1 %vm16925_vm2, %v2626_v5 }
 0x112   : > { %2691 = vrot.lane.b32.xlu2 %v10584_v34, %s10044_s11  ;;  %2689 = vrot.lane.b32.xlu1 %v10587_v35, %s10044_s11  ;;  %v2682_v35 = vld [vmem:[%s10108_s10 + $0x18a] sm:$0xff]  ;;  %v2681_v34 = vld [vmem:[%s10108_s10 + $0x182] sm:$0xff] }
 0x113   : > { %2687 = vrot.lane.b32.xlu0 %v10590_v43, %s10044_s11  ;;  %v2683_v43 = vld [vmem:[%s10108_s10 + $0x192] sm:$0xff] }
 0x114   : > { %v10600_v5 = vpop.permute.xlu2 %2466  ;;  %v2447_v41 = vpop.permute.xlu1 %2446 }
 0x115   : > { %17073 = vst [vmem:[#allocation54_spill] sm:$0xff] %v10600_v5  ;;  %v2445_v51 = vpop.permute.xlu0 %2444  ;;  %v2053_v5 = vld [vmem:[%s10108_s10 + $0x28] sm:$0xff] }
 0x116   : > { %v2582_v53 = vsel %vm16921_vm1, %v2053_v5, %v10289_v40 }
 0x117   : > { %9499 = vmatmul.msk.f32.gmra.mxu0 %vm16925_vm2, %v2629_v42  ;;  %9549 = vmatmul.msk.f32.gmra.mxu1 %vm16925_vm2, %v2627_v52  ;;  %v2630_v55 = vsel %vm16924_vm3, %v2582_v53, %v10534_v58 }
 0x11a   : > { %2703 = vrot.lane.b32.xlu2 %v2683_v43, %s10045_s12  ;;  %2701 = vrot.lane.b32.xlu1 %v2682_v35, %s10045_s12  ;;  %v10629_v43 = vld [vmem:[%s10108_s10 + $0x30] sm:$0xff] }
 0x11b   : > { %2699 = vrot.lane.b32.xlu0 %v2681_v34, %s10045_s12  ;;  %v2583_v58 = vsel %vm16921_vm1, %v10629_v43, %v10360_v62 }
 0x11c   : > { %v10618_v36 = vpop.permute.xlu2 %2472  ;;  %v10620_v49 = vpop.permute.xlu1 %2452  ;;  %v2631_v35 = vsel %vm16924_vm3, %v2583_v58, %v2445_v51 }
 0x11d   : > { %v2451_v57 = vpop.permute.xlu0 %2450 }
 0x11f   : > { %9500 = vmatmul.msk.f32.gmra.mxu0 %vm16925_vm2, %v2630_v55  ;;  %9550 = vmatmul.msk.f32.gmra.mxu1 %vm16925_vm2, %v2628_v33 }
 0x122   : > { %3396 = vrot.lane.b32.xlu2 %v10123_v6, %s10044_s11  ;;  %3394 = vrot.lane.b32.xlu1 %v10126_v7, %s10044_s11  ;;  %v10650_v6 = vld [vmem:[%s10108_s10 + $0x38] sm:$0xff] }
 0x123   : > { %3392 = vrot.lane.b32.xlu0 %v10129_v8, %s10044_s11  ;;  %v2584_v62 = vsel %vm16921_vm1, %v10650_v6, %v10358_v61 }
 0x124   : > { %v10637_v40 = vpop.permute.xlu2 %2478  ;;  %v10639_v34 = vpop.permute.xlu1 %2458  ;;  %v2632_v5 = vsel %vm16924_vm3, %v2584_v62, %v2447_v41 }
 0x125   : > { %v10644_v33 = vpop.permute.xlu0 %2456 }
 0x127   : > { %9501 = vmatmul.msk.f32.gmra.mxu0 %vm16925_vm2, %v2631_v35  ;;  %9551 = vmatmul.msk.f32.gmra.mxu1 %vm16925_vm2, %v2629_v42 }
 0x12a   : > { %3402 = vrot.lane.b32.xlu2 %v10138_v9, %s10044_s11  ;;  %3400 = vrot.lane.b32.xlu1 %v10141_v10, %s10044_s11  ;;  %v10671_v9 = vld [vmem:[%s10108_s10 + $0x40] sm:$0xff] }
 0x12b   : > { %3398 = vrot.lane.b32.xlu0 %v10144_v11, %s10044_s11  ;;  %v2585_v61 = vsel %vm16921_vm1, %v10671_v9, %v10306_v44 }
 0x12c   : > { %v10658_v7 = vpop.permute.xlu2 %2484  ;;  %v10660_v8 = vpop.permute.xlu1 %2464  ;;  %v2633_v46 = vsel %vm16924_vm3, %v2585_v61, %v10546_v38 }
 0x12d   : > { %v10665_v56 = vpop.permute.xlu0 %2462 }
 0x12f   : > { %9502 = vmatmul.msk.f32.gmra.mxu0 %vm16925_vm2, %v2632_v5  ;;  %9552 = vmatmul.msk.f32.gmra.mxu1 %vm16925_vm2, %v2630_v55 }
 0x132   : > { %3408 = vrot.lane.b32.xlu2 %v10153_v12, %s10044_s11  ;;  %3406 = vrot.lane.b32.xlu1 %v10156_v13, %s10044_s11  ;;  %v9596_v12 = vld [vmem:[%s16884_s1 + $0x28] sm:$0xf] }
 0x133   : > { %3404 = vrot.lane.b32.xlu0 %v10159_v14, %s10044_s11  ;;  %9597 = vmatpush.msk.msrb.mxu2 %vm16922_vm0, %v9596_v12  ;;  %v10697_v13 = vld [vmem:[%s10108_s10 + $0x48] sm:$0xff] }
 0x134   : > { %v10679_v10 = vpop.permute.xlu2 %2490  ;;  %v10681_v11 = vpop.permute.xlu1 %2470  ;;  %v2586_v38 = vsel %vm16921_vm1, %v10697_v13, %v10372_v4 }
 0x135   : > { %v10686_v41 = vpop.permute.xlu0 %2468  ;;  %v2634_v51 = vsel %vm16924_vm3, %v2586_v38, %v2451_v57 }
 0x137   : > { %9503 = vmatmul.msk.f32.gmra.mxu0 %vm16925_vm2, %v2633_v46  ;;  %9553 = vmatmul.msk.f32.gmra.mxu1 %vm16925_vm2, %v2631_v35 }
 0x13a   : > { %3414 = vrot.lane.b32.xlu2 %v10168_v15, %s10044_s11  ;;  %3412 = vrot.lane.b32.xlu1 %v10171_v16, %s10044_s11  ;;  %v10718_v15 = vld [vmem:[%s10108_s10 + $0x50] sm:$0xff]  ;;  %v2072_v16 = vld [vmem:[%s10108_s10 + $0xc0] sm:$0xff] }
 0x13b   : > { %3410 = vrot.lane.b32.xlu0 %v10174_v17, %s10044_s11  ;;  %v2587_v42 = vsel %vm16921_vm1, %v10718_v15, %v10370_v3  ;;  %v2601_v52 = vsel %vm16921_vm1, %v2072_v16, %v10450_v47  ;;  %v2075_v3 = vld [vmem:[%s10108_s10 + $0xd8] sm:$0xff]  ;;  %v2073_v47 = vld [vmem:[%s10108_s10 + $0xc8] sm:$0xff] }
 0x13c   : > { %v10705_v14 = vpop.permute.xlu2 %2496  ;;  %v10707_v44 = vpop.permute.xlu1 %2476 }
 0x13d   : > { %v10712_v39 = vpop.permute.xlu0 %2474 }
 0x13f   : > { %9504 = vmatmul.msk.f32.gmra.mxu0 %vm16925_vm2, %v2634_v51  ;;  %9554 = vmatmul.msk.f32.gmra.mxu1 %vm16925_vm2, %v2632_v5 }
 0x142   : > { %3420 = vrot.lane.b32.xlu2 %v10183_v18, %s10044_s11  ;;  %3418 = vrot.lane.b32.xlu1 %v10186_v19, %s10044_s11  ;;  %v2635_v18 = vsel %vm16924_vm3, %v2587_v42, %v10620_v49 }
 0x143   : > { %3416 = vrot.lane.b32.xlu0 %v10189_v20, %s10044_s11  ;;  %v10744_v20 = vld [vmem:[%s10108_s10 + $0x58] sm:$0xff] }
 0x144   : > { %v10727_v17 = vpop.permute.xlu2 %2502  ;;  %v2483_v4 = vpop.permute.xlu1 %2482  ;;  %v2588_v55 = vsel %vm16921_vm1, %v10744_v20, %v10323_v48  ;;  %v10775_v48 = vld [vmem:[%s10108_s10 + $0x60] sm:$0xff] }
 0x145   : > { %v2481_v53 = vpop.permute.xlu0 %2480  ;;  %v2636_v35 = vsel %vm16924_vm3, %v2588_v55, %v10559_v37  ;;  %v2589_v61 = vsel %vm16921_vm1, %v10775_v48, %v10393_v0  ;;  %v10807_v0 = vld [vmem:[%s10108_s10 + $0x68] sm:$0xff]  ;;  %v17079_v55 = vld [vmem:[#allocation37_spill] sm:$0xff] }
 0x146   : > { %v10737_v19 = vsel %vm16924_vm3, %v2601_v52, %v2481_v53  ;;  %v2637_v12 = vsel %vm16924_vm3, %v2589_v61, %v10644_v33  ;;  %v17075_v53 = vld [vmem:[#allocation3_spill] sm:$0xff]  ;;  %v17080_v61 = vld [vmem:[#allocation6_spill] sm:$0xff] }
 0x147   : > { %9505 = vmatmul.msk.f32.gmra.mxu0 %vm16925_vm2, %v2635_v18  ;;  %9555 = vmatmul.msk.f32.gmra.mxu1 %vm16925_vm2, %v2633_v46 }
 0x148   : > { %9571 = vmatmul.msk.f32.vlgmr.msra.gmra.mxu3 %vm16925_vm2, %v10737_v19 }
 0x14a   : > { %3426 = vrot.lane.b32.xlu2 %v10198_v21, %s10044_s11  ;;  %3424 = vrot.lane.b32.xlu1 %v10201_v22, %s10044_s11  ;;  %v2604_v21 = vsel %vm16921_vm1, %v2075_v3, %v10462_v1  ;;  %v2602_v22 = vsel %vm16921_vm1, %v2073_v47, %v10448_v45  ;;  %v2076_v45 = vld [vmem:[%s10108_s10 + $0xe0] sm:$0xff]  ;;  %v2074_v1 = vld [vmem:[%s10108_s10 + $0xd0] sm:$0xff] }
 0x14b   : > { %3422 = vrot.lane.b32.xlu0 %v10204_v23, %s10044_s11  ;;  %v10769_v62 = vsel %vm16924_vm3, %v2602_v22, %v2483_v4  ;;  %v2605_v46 = vsel %vm16921_vm1, %v2076_v45, %v10460_v60  ;;  %v17078_v47 = vld [vmem:[#allocation28_spill] sm:$0xff]  ;;  %v2064_v45 = vld [vmem:[%s10108_s10 + $0x80] sm:$0xff] }
 0x14c   : > { %v10754_v49 = vpop.permute.xlu2 %2508  ;;  %v2489_v57 = vpop.permute.xlu1 %2488 }
 0x14d   : > { %v2487_v58 = vpop.permute.xlu0 %2486  ;;  %v2653_v38 = vsel %vm16924_vm3, %v2605_v46, %v2489_v57 }
 0x14e   : > { %v2652_v23 = vsel %vm16924_vm3, %v2604_v21, %v2487_v58 }
 0x14f   : > { %9506 = vmatmul.msk.f32.gmra.mxu0 %vm16925_vm2, %v2636_v35  ;;  %9522 = vmatmul.msk.f32.vlgmr.msra.gmra.mxu2 %vm16925_vm2, %v2652_v23 }
 0x150   : > { %9556 = vmatmul.msk.f32.gmra.mxu1 %vm16925_vm2, %v2634_v51  ;;  %9572 = vmatmul.msk.f32.gmra.mxu3 %vm16925_vm2, %v10769_v62 }
 0x152   : > { %3432 = vrot.lane.b32.xlu2 %v10213_v24, %s10044_s11  ;;  %3430 = vrot.lane.b32.xlu1 %v10216_v25, %s10044_s11  ;;  %v2603_v25 = vsel %vm16921_vm1, %v2074_v1, %v10410_v59  ;;  %v2077_v59 = vld [vmem:[%s10108_s10 + $0xe8] sm:$0xff]  ;;  %v2080_v1 = vld [vmem:[%s10108_s10 + $0x100] sm:$0xff] }
 0x153   : > { %3428 = vrot.lane.b32.xlu0 %v10219_v26, %s10044_s11  ;;  %v10801_v26 = vsel %vm16924_vm3, %v2603_v25, %v10658_v7  ;;  %v2590_v7 = vsel %vm16921_vm1, %v10807_v0, %v10391_v63  ;;  %v2606_v51 = vsel %vm16921_vm1, %v2077_v59, %v10422_v2  ;;  %v2078_v2 = vld [vmem:[%s10108_s10 + $0xf0] sm:$0xff] }
 0x154   : > { %v10785_v37 = vpop.permute.xlu2 %2514  ;;  %v2495_v5 = vpop.permute.xlu1 %2494 }
 0x155   : > { %v2493_v24 = vpop.permute.xlu0 %2492 }
 0x157   : > { %9507 = vmatmul.msk.f32.gmra.mxu0 %vm16925_vm2, %v2637_v12  ;;  %9523 = vmatmul.msk.f32.gmra.mxu2 %vm16925_vm2, %v2653_v38 }
 0x158   : > { %9557 = vmatmul.msk.f32.gmra.mxu1 %vm16925_vm2, %v2635_v18  ;;  %9573 = vmatmul.msk.f32.gmra.mxu3 %vm16925_vm2, %v10801_v26  ;;  %v17076_v18 = vld [vmem:[#allocation4_spill] sm:$0xff] }
 0x15a   : > { %3438 = vrot.lane.b32.xlu2 %v10228_v27, %s10044_s11  ;;  %3436 = vrot.lane.b32.xlu1 %v10231_v28, %s10044_s11  ;;  %v2638_v27 = vsel %vm16924_vm3, %v2590_v7, %v10639_v34  ;;  %v2654_v28 = vsel %vm16924_vm3, %v2606_v51, %v10679_v10  ;;  %v17074_v10 = vld [vmem:[#allocation38_spill] sm:$0xff] }
 0x15b   : > { %3434 = vrot.lane.b32.xlu0 %v10234_v29, %s10044_s11  ;;  %v10836_v29 = vld [vmem:[%s10108_s10 + $0x70] sm:$0xff]  ;;  %v2607_v4 = vsel %vm16921_vm1, %v2078_v2, %v17074_v10  ;;  %v2081_v2 = vld [vmem:[%s10108_s10 + $0x108] sm:$0xff] }
 0x15c   : > { %v10816_v60 = vpop.permute.xlu2 %2520  ;;  %v10818_v33 = vpop.permute.xlu1 %2500  ;;  %v2591_v34 = vsel %vm16921_vm1, %v10836_v29, %v10344_v54  ;;  %v2079_v54 = vld [vmem:[%s10108_s10 + $0xf8] sm:$0xff] }
 0x15d   : > { %v10825_v16 = vpop.permute.xlu0 %2498  ;;  %v2608_v21 = vsel %vm16921_vm1, %v2079_v54, %v17079_v55  ;;  %v17091_v55 = vld [vmem:[#allocation12_spill] sm:$0xff] }
 0x15f   : > { %9508 = vmatmul.msk.f32.gmra.mxu0 %vm16925_vm2, %v2638_v27  ;;  %9524 = vmatmul.msk.f32.gmra.mxu2 %vm16925_vm2, %v2654_v28 }
 0x160   : > { %9558 = vmatmul.msk.f32.gmra.mxu1 %vm16925_vm2, %v2636_v35  ;;  %9574 = vmatmul.msk.f32.gmra.mxu3 %vm16925_vm2, %v2652_v23  ;;  %v2656_v35 = vsel %vm16924_vm3, %v2608_v21, %v2495_v5  ;;  %v17082_v5 = vld [vmem:[#allocation8_spill] sm:$0xff]  ;;  %v17092_v21 = vld [vmem:[#allocation13_spill] sm:$0xff] }
 0x162   : > { %3444 = vrot.lane.b32.xlu2 %v10243_v30, %s10044_s11  ;;  %3442 = vrot.lane.b32.xlu1 %v10246_v31, %s10044_s11  ;;  %v2639_v30 = vsel %vm16924_vm3, %v2591_v34, %v10573_v50  ;;  %v2655_v31 = vsel %vm16924_vm3, %v2607_v4, %v2493_v24  ;;  %v17077_v50 = vld [vmem:[#allocation5_spill] sm:$0xff]  ;;  %v17083_v24 = vld [vmem:[#allocation27_spill] sm:$0xff]  ;;  %v17088_v4 = vld [vmem:[#allocation18_spill] sm:$0xff] }
 0x163   : > { %3440 = vrot.lane.b32.xlu0 %v10249_v32, %s10044_s11  ;;  %v2063_v32 = vld [vmem:[%s10108_s10 + $0x78] sm:$0xff]  ;;  %v2593_v25 = vsel %vm16921_vm1, %v2064_v45, %v17083_v24  ;;  %v17087_v34 = vld [vmem:[#allocation11_spill] sm:$0xff] }
 0x164   : > { %v10845_v63 = vpop.permute.xlu1 %2506  ;;  %v10852_v42 = vpop.permute.xlu2 %2526  ;;  %v2592_v57 = vsel %vm16921_vm1, %v2063_v32, %v17078_v47  ;;  %v2641_v7 = vsel %vm16924_vm3, %v2593_v25, %v10660_v8  ;;  %v17085_v8 = vld [vmem:[#allocation9_spill] sm:$0xff]  ;;  %v2066_v47 = vld [vmem:[%s10108_s10 + $0x90] sm:$0xff] }
 0x165   : > { %v10854_v52 = vpop.permute.xlu0 %2504  ;;  %v2640_v22 = vsel %vm16924_vm3, %v2592_v57, %v10665_v56  ;;  %v17081_v56 = vld [vmem:[#allocation7_spill] sm:$0xff]  ;;  %v2082_v57 = vld [vmem:[%s10108_s10 + $0x110] sm:$0xff] }
 0x167   : > { %9509 = vmatmul.msk.f32.gmra.mxu0 %vm16925_vm2, %v2639_v30  ;;  %9525 = vmatmul.msk.f32.gmra.mxu2 %vm16925_vm2, %v2655_v31 }
 0x168   : > { %9559 = vmatmul.msk.f32.gmra.mxu1 %vm16925_vm2, %v2637_v12  ;;  %9575 = vmatmul.msk.f32.gmra.mxu3 %vm16925_vm2, %v2653_v38  ;;  %v17084_v12 = vld [vmem:[#allocation31_spill] sm:$0xff] }
 0x169   : > { %v2609_v38 = vsel %vm16921_vm1, %v2080_v1, %v17084_v12  ;;  %v17094_v1 = vld [vmem:[#allocation30_spill] sm:$0xff]  ;;  %v2067_v12 = vld [vmem:[%s10108_s10 + $0x98] sm:$0xff] }
 0x16a   : > { %3450 = vrot.lane.b32.xlu2 %v17075_v53, %s10044_s11  ;;  %3448 = vrot.lane.b32.xlu1 %v17076_v18, %s10044_s11  ;;  %v2657_v51 = vsel %vm16924_vm3, %v2609_v38, %v10705_v14  ;;  %v17086_v14 = vld [vmem:[#allocation10_spill] sm:$0xff]  ;;  %v2083_v38 = vld [vmem:[%s10108_s10 + $0x118] sm:$0xff] }
 0x16b   : > { %3446 = vrot.lane.b32.xlu0 %v17077_v50, %s10044_s11  ;;  %v17090_v53 = vld [vmem:[#allocation54_spill] sm:$0xff] }
 0x16c   : > { %v10871_v3 = vpop.permute.xlu1 %2512  ;;  %v10882_v23 = vpop.permute.xlu2 %2691 }
 0x16d   : > { %v10877_v58 = vpop.permute.xlu0 %2510 }
 0x16f   : > { %9510 = vmatmul.msk.f32.gmra.mxu0 %vm16925_vm2, %v2640_v22  ;;  %9526 = vmatmul.msk.f32.gmra.mxu2 %vm16925_vm2, %v2656_v35 }
 0x170   : > { %9560 = vmatmul.msk.f32.gmra.mxu1 %vm16925_vm2, %v2638_v27  ;;  %9576 = vmatmul.msk.f32.gmra.mxu3 %vm16925_vm2, %v2654_v28  ;;  %v10915_v28 = vld [vmem:[%s10108_s10 + $0x88] sm:$0xff] }
 0x172   : > { %3456 = vrot.lane.b32.xlu2 %v17080_v61, %s10044_s11  ;;  %3454 = vrot.lane.b32.xlu1 %v17081_v56, %s10044_s11  ;;  %v17095_v61 = vld [vmem:[#allocation40_spill] sm:$0xff] }
 0x173   : > { %3452 = vrot.lane.b32.xlu0 %v17082_v5, %s10044_s11 }
 0x174   : > { %v10896_v46 = vpop.permute.xlu1 %2518  ;;  %v10912_v27 = vpop.permute.xlu2 %2703 }
 0x175   : > { %v10902_v59 = vpop.permute.xlu0 %2516 }
 0x177   : > { %9511 = vmatmul.msk.f32.gmra.mxu0 %vm16925_vm2, %v2641_v7  ;;  %9527 = vmatmul.msk.f32.gmra.mxu2 %vm16925_vm2, %v2657_v51 }
 0x178   : > { %9561 = vmatmul.msk.f32.gmra.mxu1 %vm16925_vm2, %v2639_v30  ;;  %9577 = vmatmul.msk.f32.gmra.mxu3 %vm16925_vm2, %v2655_v31  ;;  %v2594_v30 = vsel %vm16921_vm1, %v10915_v28, %v17088_v4  ;;  %v17089_v31 = vld [vmem:[#allocation41_spill] sm:$0xff] }
 0x179   : > { %v2610_v32 = vsel %vm16921_vm1, %v2081_v2, %v17089_v31  ;;  %v2642_v18 = vsel %vm16924_vm3, %v2594_v30, %v17090_v53  ;;  %v17096_v2 = vld [vmem:[#allocation15_spill] sm:$0xff]  ;;  %v10994_v53 = vld [vmem:[%s10108_s10 + $0xa0] sm:$0xff] }
 0x17a   : > { %3462 = vrot.lane.b32.xlu2 %v17085_v8, %s10044_s11  ;;  %3460 = vrot.lane.b32.xlu1 %v17086_v14, %s10044_s11  ;;  %v2658_v50 = vsel %vm16924_vm3, %v2610_v32, %v10825_v16  ;;  %v17093_v16 = vld [vmem:[#allocation14_spill] sm:$0xff]  ;;  %v17099_v8 = vld [vmem:[#allocation29_spill] sm:$0xff] }
 0x17b   : > { %3458 = vrot.lane.b32.xlu0 %v17087_v34, %s10044_s11  ;;  %v2596_v14 = vsel %vm16921_vm1, %v2067_v12, %v17099_v8  ;;  %v17100_v34 = vld [vmem:[#allocation34_spill] sm:$0xff]  ;;  %v3295_v12 = vld [vmem:[%s10108_s10 + $0x1a9] sm:$0xff] }
 0x17c   : > { %v10924_v10 = vpop.permute.xlu1 %2524  ;;  %v10947_v45 = vpop.permute.xlu2 %3396  ;;  %v2644_v31 = vsel %vm16924_vm3, %v2596_v14, %v10681_v11  ;;  %v17102_v11 = vld [vmem:[#allocation52_spill] sm:$0xff] }
 0x17d   : > { %v10931_v54 = vpop.permute.xlu0 %2522 }
 0x17f   : > { %9512 = vmatmul.msk.f32.gmra.mxu0 %vm16925_vm2, %v2642_v18  ;;  %9528 = vmatmul.msk.f32.gmra.mxu2 %vm16925_vm2, %v2658_v50 }
 0x180   : > { %9562 = vmatmul.msk.f32.gmra.mxu1 %vm16925_vm2, %v2640_v22  ;;  %9578 = vmatmul.msk.f32.gmra.mxu3 %vm16925_vm2, %v2656_v35  ;;  %v2595_v22 = vsel %vm16921_vm1, %v2066_v47, %v17094_v1  ;;  %v2611_v35 = vsel %vm16921_vm1, %v2082_v57, %v17095_v61  ;;  %v2084_v47 = vld [vmem:[%s10108_s10 + $0x120] sm:$0xff]  ;;  %v17101_v57 = vld [vmem:[#allocation51_spill] sm:$0xff] }
 0x181   : > { %v2643_v24 = vsel %vm16924_vm3, %v2595_v22, %v10686_v41  ;;  %v2659_v25 = vsel %vm16924_vm3, %v2611_v35, %v10818_v33  ;;  %v17097_v41 = vld [vmem:[#allocation16_spill] sm:$0xff]  ;;  %v17098_v33 = vld [vmem:[#allocation17_spill] sm:$0xff] }
 0x182   : > { %3468 = vrot.lane.b32.xlu2 %v17091_v55, %s10044_s11  ;;  %3466 = vrot.lane.b32.xlu1 %v17092_v21, %s10044_s11  ;;  %v17104_v55 = vld [vmem:[#allocation19_spill] sm:$0xff]  ;;  %v17105_v21 = vld [vmem:[#allocation44_spill] sm:$0xff] }
 0x183   : > { %3464 = vrot.lane.b32.xlu0 %v17093_v16, %s10044_s11 }
 0x184   : > { %v10955_v56 = vpop.permute.xlu1 %2689 }
 0x185   : > { %v10957_v5 = vpop.permute.xlu0 %2687 }
 0x187   : > { %9513 = vmatmul.msk.f32.gmra.mxu0 %vm16925_vm2, %v2643_v24  ;;  %9529 = vmatmul.msk.f32.gmra.mxu2 %vm16925_vm2, %v2659_v25 }
 0x188   : > { %9563 = vmatmul.msk.f32.gmra.mxu1 %vm16925_vm2, %v2641_v7  ;;  %9579 = vmatmul.msk.f32.gmra.mxu3 %vm16925_vm2, %v2657_v51  ;;  %v2612_v7 = vsel %vm16921_vm1, %v2083_v38, %v17100_v34  ;;  %v10979_v51 = vpop.permute.xlu2 %3402  ;;  %v3294_v38 = vld [vmem:[%s10108_s10 + $0x1a1] sm:$0xff] }
 0x189   : > { %v2660_v32 = vsel %vm16924_vm3, %v2612_v7, %v10727_v17  ;;  %v17103_v17 = vld [vmem:[#allocation53_spill] sm:$0xff] }
 0x18a   : > { %3474 = vrot.lane.b32.xlu2 %v17096_v2, %s10044_s11  ;;  %3472 = vrot.lane.b32.xlu1 %v17097_v41, %s10044_s11  ;;  %v3293_v2 = vld [vmem:[%s10108_s10 + $0x199] sm:$0xff]  ;;  %v2069_v41 = vld [vmem:[%s10108_s10 + $0xa8] sm:$0xff] }
 0x18b   : > { %3470 = vrot.lane.b32.xlu0 %v17098_v33, %s10044_s11  ;;  %v17106_v33 = vld [vmem:[#allocation33_spill] sm:$0xff] }
 0x18c   : > { %v10981_v4 = vpop.permute.xlu1 %2701 }
 0x18d   : > { %v10983_v30 = vpop.permute.xlu0 %2699 }
 0x18f   : > { %9514 = vmatmul.msk.f32.gmra.mxu0 %vm16925_vm2, %v2644_v31  ;;  %9530 = vmatmul.msk.f32.gmra.mxu2 %vm16925_vm2, %v2660_v32 }
 0x190   : > { %9564 = vmatmul.msk.f32.gmra.mxu1 %vm16925_vm2, %v2642_v18  ;;  %9580 = vmatmul.msk.f32.gmra.mxu3 %vm16925_vm2, %v2658_v50  ;;  %v2597_v18 = vsel %vm16921_vm1, %v10994_v53, %v17104_v55  ;;  %v2613_v50 = vsel %vm16921_vm1, %v2084_v47, %v17105_v21  ;;  %v11016_v35 = vpop.permute.xlu2 %3408  ;;  %v17108_v55 = vld [vmem:[#allocation20_spill] sm:$0xff]  ;;  %v17112_v21 = vld [vmem:[#allocation35_spill] sm:$0xff] }
 0x191   : > { %v2645_v22 = vsel %vm16924_vm3, %v2597_v18, %v10618_v36  ;;  %v2661_v61 = vsel %vm16924_vm3, %v2613_v50, %v10854_v52  ;;  %v9595_v36 = vld [vmem:[%s16884_s1 + $0x20] sm:$0xff]  ;;  %v2085_v52 = vld [vmem:[%s10108_s10 + $0x128] sm:$0xff]  ;;  %v17111_v18 = vld [vmem:[#allocation32_spill] sm:$0xff] }
 0x192   : > { %3480 = vrot.lane.b32.xlu2 %v17101_v57, %s10044_s11  ;;  %3478 = vrot.lane.b32.xlu1 %v17102_v11, %s10044_s11  ;;  %v2070_v11 = vld [vmem:[%s10108_s10 + $0xb0] sm:$0xff] }
 0x193   : > { %3476 = vrot.lane.b32.xlu0 %v17103_v17, %s10044_s11  ;;  %3989 = vmatpush.msrb.mxu2 %v9595_v36  ;;  %v2086_v17 = vld [vmem:[%s10108_s10 + $0x130] sm:$0xff]  ;;  %v11076_v36 = vld [vmem:[%s10108_s10 + $0xb8] sm:$0xff] }
 0x194   : > { %v11008_v16 = vpop.permute.xlu1 %3394 }
 0x195   : > { %v11010_v1 = vpop.permute.xlu0 %3392 }
 0x197   : > { %9515 = vmatmul.msk.f32.gmra.mxu0 %vm16925_vm2, %v2645_v22  ;;  %9531 = vmatmul.msk.f32.gmra.mxu2 %vm16925_vm2, %v2661_v61 }
 0x198   : > { %9565 = vmatmul.msk.f32.gmra.mxu1 %vm16925_vm2, %v2643_v24  ;;  %9581 = vmatmul.msk.f32.gmra.mxu3 %vm16925_vm2, %v2659_v25  ;;  %v2598_v24 = vsel %vm16921_vm1, %v2069_v41, %v17106_v33  ;;  %v17107_v25 = vld [vmem:[#allocation43_spill] sm:$0xff]  ;;  %v11049_v57 = vpop.permute.xlu2 %3414  ;;  %v2087_v41 = vld [vmem:[%s10108_s10 + $0x138] sm:$0xff]  ;;  %v17115_v33 = vld [vmem:[#allocation26_spill] sm:$0xff] }
 0x199   : > { %v2614_v8 = vsel %vm16921_vm1, %v2085_v52, %v17107_v25  ;;  %v2646_v7 = vsel %vm16924_vm3, %v2598_v24, %v10712_v39  ;;  %v17109_v39 = vld [vmem:[#allocation21_spill] sm:$0xff]  ;;  %v17113_v52 = vld [vmem:[#allocation24_spill] sm:$0xff]  ;;  %v17117_v24 = vld [vmem:[#allocation46_spill] sm:$0xff] }
 0x19a   : > { %3486 = vrot.lane.b32.xlu2 %v3295_v12, %s10044_s11  ;;  %3484 = vrot.lane.b32.xlu1 %v3294_v38, %s10044_s11  ;;  %v2662_v47 = vsel %vm16924_vm3, %v2614_v8, %v10845_v63  ;;  %v17110_v63 = vld [vmem:[#allocation22_spill] sm:$0xff]  ;;  %v2616_v25 = vsel %vm16921_vm1, %v2087_v41, %v17117_v24 }
 0x19b   : > { %3482 = vrot.lane.b32.xlu0 %v3293_v2, %s10044_s11 }
 0x19c   : > { %v11037_v14 = vpop.permute.xlu1 %3400 }
 0x19d   : > { %v11039_v34 = vpop.permute.xlu0 %3398 }
 0x19f   : > { %9516 = vmatmul.msk.f32.gmra.mxu0 %vm16925_vm2, %v2646_v7  ;;  %9532 = vmatmul.msk.f32.gmra.mxu2 %vm16925_vm2, %v2662_v47 }
 0x1a0   : > { %9566 = vmatmul.msk.f32.gmra.mxu1 %vm16925_vm2, %v2644_v31  ;;  %9582 = vmatmul.msk.f32.gmra.mxu3 %vm16925_vm2, %v2660_v32  ;;  %v2599_v31 = vsel %vm16921_vm1, %v2070_v11, %v17111_v18  ;;  %v2615_v32 = vsel %vm16921_vm1, %v2086_v17, %v17112_v21  ;;  %v3302_v18 = vld [vmem:[%s10108_s10 + $0x62] sm:$0xff] }
 0x1a1   : > { %v2647_v38 = vsel %vm16924_vm3, %v2599_v31, %v10707_v44  ;;  %v2663_v2 = vsel %vm16924_vm3, %v2615_v32, %v10754_v49  ;;  %v17114_v44 = vld [vmem:[#allocation25_spill] sm:$0xff]  ;;  %v11083_v49 = vpop.permute.xlu2 %3420  ;;  %v2088_v31 = vld [vmem:[%s10108_s10 + $0x140] sm:$0xff] }
 0x1a2   : > { %3588 = vrot.lane.b32.xlu2 %v17108_v55, %s10045_s12  ;;  %3586 = vrot.lane.b32.xlu1 %v17109_v39, %s10045_s12  ;;  %v2664_v55 = vsel %vm16924_vm3, %v2616_v25, %v10877_v58  ;;  %v3304_v39 = vld [vmem:[%s10108_s10 + $0x72] sm:$0xff] }
 0x1a3   : > { %3584 = vrot.lane.b32.xlu0 %v17110_v63, %s10045_s12  ;;  %v3303_v63 = vld [vmem:[%s10108_s10 + $0x6a] sm:$0xff]  ;;  %v17118_v58 = vld [vmem:[#allocation45_spill] sm:$0xff] }
 0x1a4   : > { %v11063_v50 = vpop.permute.xlu1 %3406  ;;  %v2617_v21 = vsel %vm16921_vm1, %v2088_v31, %v17118_v58  ;;  %v3308_v31 = vld [vmem:[%s10108_s10 + $0x92] sm:$0xff] }
 0x1a5   : > { %v11065_v12 = vpop.permute.xlu0 %3404  ;;  %v2665_v41 = vsel %vm16924_vm3, %v2617_v21, %v10871_v3  ;;  %v2090_v58 = vld [vmem:[%s10108_s10 + $0x150] sm:$0xff] }
 0x1a7   : > { %9517 = vmatmul.msk.f32.gmra.mxu0 %vm16925_vm2, %v2647_v38  ;;  %9533 = vmatmul.msk.f32.gmra.mxu2 %vm16925_vm2, %v2663_v2 }
 0x1a8   : > { %9567 = vmatmul.msk.f32.gmra.mxu1 %vm16925_vm2, %v2645_v22  ;;  %9583 = vmatmul.msk.f32.gmra.mxu3 %vm16925_vm2, %v2661_v61  ;;  %v17116_v22 = vld [vmem:[#allocation23_spill] sm:$0xff] }
 0x1a9   : > { %v2600_v61 = vsel %vm16921_vm1, %v11076_v36, %v17116_v22  ;;  %v3305_v22 = vld [vmem:[%s10108_s10 + $0x7a] sm:$0xff] }
 0x1aa   : > { %3594 = vrot.lane.b32.xlu2 %v17113_v52, %s10045_s12  ;;  %3592 = vrot.lane.b32.xlu1 %v17114_v44, %s10045_s12  ;;  %v2648_v17 = vsel %vm16924_vm3, %v2600_v61, %v10637_v40  ;;  %v11111_v40 = vpop.f32.mrf.mxu0  ;;  %v11123_v52 = vpop.f32.mrf.mxu1  ;;  %v3307_v44 = vld [vmem:[%s10108_s10 + $0x8a] sm:$0xff] }
 0x1ab   : > { %3590 = vrot.lane.b32.xlu0 %v17115_v33, %s10045_s12  ;;  %v3306_v33 = vld [vmem:[%s10108_s10 + $0x82] sm:$0xff] }
 0x1ac   : > { %v11092_v8 = vpop.permute.xlu1 %3412  ;;  %v2089_v61 = vld [vmem:[%s10108_s10 + $0x148] sm:$0xff] }
 0x1ad   : > { %v11094_v11 = vpop.permute.xlu0 %3410 }
 0x1af   : > { %9518 = vmatmul.msk.f32.gmra.mxu0 %vm16925_vm2, %v2648_v17  ;;  %9534 = vmatmul.msk.f32.gmra.mxu2 %vm16925_vm2, %v2664_v55 }
 0x1b0   : > { %9568 = vmatmul.msk.f32.gmra.mxu1 %vm16925_vm2, %v2646_v7  ;;  %9584 = vmatmul.msk.f32.gmra.mxu3 %vm16925_vm2, %v2662_v47  ;;  %v11115_v7 = vpop.permute.xlu2 %3426 }
 0x1b2   : > { %3600 = vrot.lane.b32.xlu2 %v3304_v39, %s10045_s12  ;;  %3598 = vrot.lane.b32.xlu1 %v3303_v63, %s10045_s12  ;;  %v3310_v63 = vld [vmem:[%s10108_s10 + $0xa2] sm:$0xff] }
 0x1b3   : > { %3596 = vrot.lane.b32.xlu0 %v3302_v18, %s10045_s12  ;;  %v3309_v18 = vld [vmem:[%s10108_s10 + $0x9a] sm:$0xff] }
 0x1b4   : > { %v11117_v32 = vpop.permute.xlu1 %3418 }
 0x1b5   : > { %v11119_v47 = vpop.permute.xlu0 %3416 }
 0x1b7   : > { %9519 = vmatmul.msk.f32.gmra.mxu0 %vm16925_vm2, %v10737_v19  ;;  %9535 = vmatmul.msk.f32.gmra.mxu2 %vm16925_vm2, %v2665_v41  ;;  %v17119_v19 = vld [vmem:[#allocation36_spill] sm:$0xff] }
 0x1b8   : > { %9569 = vmatmul.msk.f32.gmra.mxu1 %vm16925_vm2, %v2647_v38  ;;  %9585 = vmatmul.msk.f32.gmra.mxu3 %vm16925_vm2, %v2663_v2  ;;  %v2618_v3 = vsel %vm16921_vm1, %v2089_v61, %v17119_v19  ;;  %v11145_v2 = vpop.f32.mrf.mxu0  ;;  %v11147_v39 = vpop.permute.xlu2 %3432  ;;  %v3311_v61 = vld [vmem:[%s10108_s10 + $0xaa] sm:$0xff] }
 0x1b9   : > { %v2666_v38 = vsel %vm16924_vm3, %v2618_v3, %v10785_v37  ;;  %v11157_v37 = vpop.f32.mrf.mxu1 }
 0x1ba   : > { %3606 = vrot.lane.b32.xlu2 %v3307_v44, %s10045_s12  ;;  %3604 = vrot.lane.b32.xlu1 %v3306_v33, %s10045_s12  ;;  %v3313_v33 = vld [vmem:[%s10108_s10 + $0xba] sm:$0xff] }
 0x1bb   : > { %3602 = vrot.lane.b32.xlu0 %v3305_v22, %s10045_s12  ;;  %v3312_v22 = vld [vmem:[%s10108_s10 + $0xb2] sm:$0xff] }
 0x1bc   : > { %v11139_v24 = vpop.permute.xlu1 %3424 }
 0x1bd   : > { %v11141_v25 = vpop.permute.xlu0 %3422 }
 0x1be   : > { %17120 = vst [vmem:[#allocation38_spill] sm:$0xff] %v11141_v25  ;;  %v3328_v25 = vld [vmem:[%s10108_s10 + $0x132] sm:$0xff] }
 0x1bf   : > { %9520 = vmatmul.msk.f32.gmra.mxu0 %vm16925_vm2, %v10769_v62  ;;  %9536 = vmatmul.msk.f32.gmra.mxu2 %vm16925_vm2, %v2666_v38  ;;  %v17121_v62 = vld [vmem:[#allocation48_spill] sm:$0xff] }
 0x1c0   : > { %9570 = vmatmul.msk.f32.gmra.mxu1 %vm16925_vm2, %v2648_v17  ;;  %9586 = vmatmul.msk.f32.gmra.mxu3 %vm16925_vm2, %v2664_v55  ;;  %v2619_v21 = vsel %vm16921_vm1, %v2090_v58, %v17121_v62  ;;  %v11178_v19 = vpop.f32.mrf.mxu0  ;;  %v11180_v3 = vpop.permute.xlu2 %3438  ;;  %v3316_v62 = vld [vmem:[%s10108_s10 + $0xd2] sm:$0xff] }
 0x1c1   : > { %v2667_v55 = vsel %vm16924_vm3, %v2619_v21, %v10902_v59  ;;  %v17124_v59 = vld [vmem:[#allocation47_spill] sm:$0xff] }
 0x1c2   : > { %3612 = vrot.lane.b32.xlu2 %v3310_v63, %s10045_s12  ;;  %3610 = vrot.lane.b32.xlu1 %v3309_v18, %s10045_s12  ;;  %v2091_v63 = vld [vmem:[%s10108_s10 + $0x158] sm:$0xff]  ;;  %v3315_v21 = vld [vmem:[%s10108_s10 + $0xca] sm:$0xff] }
 0x1c3   : > { %3608 = vrot.lane.b32.xlu0 %v3308_v31, %s10045_s12  ;;  %v2620_v18 = vsel %vm16921_vm1, %v2091_v63, %v17124_v59  ;;  %v17128_v59 = vld [vmem:[#allocation39_spill] sm:$0xff] }
 0x1c4   : > { %v11165_v44 = vpop.permute.xlu1 %3430  ;;  %v2668_v58 = vsel %vm16924_vm3, %v2620_v18, %v10896_v46 }
 0x1c5   : > { %17122 = vst [vmem:[#allocation3_spill] sm:$0xff] %v11165_v44  ;;  %v11167_v17 = vpop.permute.xlu0 %3428 }
 0x1c6   : > { %17123 = vst [vmem:[#allocation4_spill] sm:$0xff] %v11167_v17  ;;  %v2093_v17 = vld [vmem:[%s10108_s10 + $0x168] sm:$0xff] }
 0x1c7   : > { %9521 = vmatmul.msk.f32.gmra.mxu0 %vm16925_vm2, %v10801_v26  ;;  %9537 = vmatmul.msk.f32.gmra.mxu2 %vm16925_vm2, %v2667_v55  ;;  %v11185_v26 = vpop.f32.mrf.mxu1 }
 0x1c8   : > { %9587 = vmatmul.msk.f32.gmra.mxu3 %vm16925_vm2, %v2665_v41  ;;  %v11206_v63 = vpop.f32.mrf.mxu0  ;;  %v11208_v46 = vpop.permute.xlu2 %3444 }
 0x1ca   : > { %3618 = vrot.lane.b32.xlu2 %v3313_v33, %s10045_s12  ;;  %3616 = vrot.lane.b32.xlu1 %v3312_v22, %s10045_s12  ;;  %v3314_v33 = vld [vmem:[%s10108_s10 + $0xc2] sm:$0xff] }
 0x1cb   : > { %3614 = vrot.lane.b32.xlu0 %v3311_v61, %s10045_s12  ;;  %v2092_v22 = vld [vmem:[%s10108_s10 + $0x160] sm:$0xff] }
 0x1cc   : > { %v11190_v41 = vpop.permute.xlu1 %3436 }
 0x1cd   : > { %17125 = vst [vmem:[#allocation5_spill] sm:$0xff] %v11190_v41  ;;  %v11192_v31 = vpop.permute.xlu0 %3434 }
 0x1ce   : > { %17126 = vst [vmem:[#allocation28_spill] sm:$0xff] %v11192_v31 }
 0x1cf   : > { %9538 = vmatmul.msk.f32.gmra.mxu2 %vm16925_vm2, %v2668_v58  ;;  %v11213_v18 = vpop.f32.mrf.mxu1 }
 0x1d0   : > { %9588 = vmatmul.msk.f32.gmra.mxu3 %vm16925_vm2, %v2666_v38  ;;  %v2621_v38 = vsel %vm16921_vm1, %v2092_v22, %v17128_v59 }
 0x1d2   : > { %v11202_v61 = vpop.f32.mrf.mxu2  ;;  %3624 = vrot.lane.b32.xlu2 %v3316_v62, %s10045_s12  ;;  %3622 = vrot.lane.b32.xlu1 %v3315_v21, %s10045_s12  ;;  %v2669_v62 = vsel %vm16924_vm3, %v2621_v38, %v10816_v60  ;;  %v3319_v21 = vld [vmem:[%s10108_s10 + $0xea] sm:$0xff]  ;;  %v17132_v60 = vld [vmem:[#allocation50_spill] sm:$0xff]  ;;  %v11234_v38 = vpop.f32.mrf.mxu0 }
 0x1d3   : > { %17127 = vst [vmem:[#allocation37_spill] sm:$0xff] %v11202_v61  ;;  %3620 = vrot.lane.b32.xlu0 %v3314_v33, %s10045_s12  ;;  %v3318_v61 = vld [vmem:[%s10108_s10 + $0xe2] sm:$0xff]  ;;  %v3317_v33 = vld [vmem:[%s10108_s10 + $0xda] sm:$0xff]  ;;  %v2622_v59 = vsel %vm16921_vm1, %v2093_v17, %v17132_v60  ;;  %v3320_v17 = vld [vmem:[%s10108_s10 + $0xf2] sm:$0xff] }
 0x1d4   : > { %v11215_v31 = vpop.permute.xlu1 %3442 }
 0x1d5   : > { %17129 = vst [vmem:[#allocation6_spill] sm:$0xff] %v11215_v31  ;;  %v11217_v41 = vpop.permute.xlu0 %3440 }
 0x1d6   : > { %17130 = vst [vmem:[#allocation7_spill] sm:$0xff] %v11217_v41  ;;  %v11236_v41 = vpop.permute.xlu2 %3450 }
 0x1d7   : > { %9539 = vmatmul.msk.f32.gmra.mxu2 %vm16925_vm2, %v2669_v62  ;;  %17133 = vst [vmem:[#allocation27_spill] sm:$0xff] %v11236_v41  ;;  %v11244_v44 = vpop.f32.mrf.mxu1 }
 0x1d8   : > { %9589 = vmatmul.msk.f32.gmra.mxu3 %vm16925_vm2, %v2667_v55 }
 0x1da   : > { %v11227_v22 = vpop.f32.mrf.mxu2  ;;  %3630 = vrot.lane.b32.xlu2 %v3319_v21, %s10045_s12  ;;  %3628 = vrot.lane.b32.xlu1 %v3318_v61, %s10045_s12  ;;  %v3322_v61 = vld [vmem:[%s10108_s10 + $0x102] sm:$0xff]  ;;  %v3321_v21 = vld [vmem:[%s10108_s10 + $0xfa] sm:$0xff]  ;;  %v11265_v41 = vpop.f32.mrf.mxu0 }
 0x1db   : > { %17131 = vst [vmem:[#allocation8_spill] sm:$0xff] %v11227_v22  ;;  %3626 = vrot.lane.b32.xlu0 %v3317_v33, %s10045_s12  ;;  %v2670_v22 = vsel %vm16924_vm3, %v2622_v59, %v10931_v54  ;;  %v2094_v33 = vld [vmem:[%s10108_s10 + $0x170] sm:$0xff]  ;;  %v17137_v54 = vld [vmem:[#allocation49_spill] sm:$0xff] }
 0x1dc   : > { %v11238_v55 = vpop.permute.xlu1 %3448  ;;  %v2623_v59 = vsel %vm16921_vm1, %v2094_v33, %v17137_v54  ;;  %v2095_v54 = vld [vmem:[%s10108_s10 + $0x178] sm:$0xff] }
 0x1dd   : > { %17134 = vst [vmem:[#allocation31_spill] sm:$0xff] %v11238_v55  ;;  %v11240_v31 = vpop.permute.xlu0 %3446 }
 0x1de   : > { %17135 = vst [vmem:[#allocation9_spill] sm:$0xff] %v11240_v31 }
 0x1df   : > { %9540 = vmatmul.msk.f32.gmra.mxu2 %vm16925_vm2, %v2670_v22  ;;  %v11274_v33 = vpop.f32.mrf.mxu1 }
 0x1e0   : > { %9590 = vmatmul.msk.f32.gmra.mxu3 %vm16925_vm2, %v2668_v58  ;;  %v2671_v58 = vsel %vm16924_vm3, %v2623_v59, %v10924_v10  ;;  %v17142_v10 = vld [vmem:[#allocation42_spill] sm:$0xff] }
 0x1e1   : > { %v2624_v59 = vsel %vm16921_vm1, %v2095_v54, %v17142_v10 }
 0x1e2   : > { %v11252_v60 = vpop.f32.mrf.mxu2  ;;  %3636 = vrot.lane.b32.xlu2 %v3322_v61, %s10045_s12  ;;  %3634 = vrot.lane.b32.xlu1 %v3321_v21, %s10045_s12  ;;  %v3324_v61 = vld [vmem:[%s10108_s10 + $0x112] sm:$0xff]  ;;  %v11270_v21 = vpop.permute.xlu2 %3456 }
 0x1e3   : > { %17136 = vst [vmem:[#allocation10_spill] sm:$0xff] %v11252_v60  ;;  %3632 = vrot.lane.b32.xlu0 %v3320_v17, %s10045_s12  ;;  %v3325_v60 = vld [vmem:[%s10108_s10 + $0x11a] sm:$0xff]  ;;  %v3323_v17 = vld [vmem:[%s10108_s10 + $0x10a] sm:$0xff] }
 0x1e4   : > { %v11259_v31 = vpop.permute.xlu1 %3454  ;;  %17140 = vst [vmem:[#allocation41_spill] sm:$0xff] %v11270_v21  ;;  %v2672_v21 = vsel %vm16924_vm3, %v2624_v59, %v10852_v42 }
 0x1e5   : > { %17138 = vst [vmem:[#allocation11_spill] sm:$0xff] %v11259_v31  ;;  %v11261_v55 = vpop.permute.xlu0 %3452 }
 0x1e6   : > { %17139 = vst [vmem:[#allocation18_spill] sm:$0xff] %v11261_v55 }
 0x1e7   : > { %9541 = vmatmul.msk.f32.gmra.mxu2 %vm16925_vm2, %v2671_v58  ;;  %v11306_v42 = vpop.f32.mrf.mxu1 }
 0x1e8   : > { %9591 = vmatmul.msk.f32.gmra.mxu3 %vm16925_vm2, %v2669_v62 }
 0x1ea   : > { %v11277_v55 = vpop.f32.mrf.mxu2  ;;  %3642 = vrot.lane.b32.xlu2 %v3325_v60, %s10045_s12  ;;  %3640 = vrot.lane.b32.xlu1 %v3324_v61, %s10045_s12  ;;  %v3326_v60 = vld [vmem:[%s10108_s10 + $0x122] sm:$0xff]  ;;  %v11295_v61 = vpop.f32.mrf.mxu0 }
 0x1eb   : > { %17141 = vst [vmem:[#allocation54_spill] sm:$0xff] %v11277_v55  ;;  %3638 = vrot.lane.b32.xlu0 %v3323_v17, %s10045_s12  ;;  %v3327_v55 = vld [vmem:[%s10108_s10 + $0x12a] sm:$0xff]  ;;  %v11298_v17 = vld [vmem:[%s10108_s10 + $0x180] sm:$0xff]  ;;  %v11300_v54 = vpop.permute.xlu2 %3462 }
 0x1ec   : > { %v11284_v31 = vpop.permute.xlu1 %3460  ;;  %17145 = vst [vmem:[#allocation14_spill] sm:$0xff] %v11298_v17 }
 0x1ed   : > { %17143 = vst [vmem:[#allocation12_spill] sm:$0xff] %v11284_v31  ;;  %v11286_v62 = vpop.permute.xlu0 %3458 }
 0x1ee   : > { %17144 = vst [vmem:[#allocation13_spill] sm:$0xff] %v11286_v62 }
 0x1ef   : > { %9542 = vmatmul.msk.f32.gmra.mxu2 %vm16925_vm2, %v2672_v21 }
 0x1f0   : > { %9592 = vmatmul.msk.f32.gmra.mxu3 %vm16925_vm2, %v2670_v22  ;;  %v2708_v22 = vsel %vm16921_vm1, %v11298_v17, %v10957_v5 }
 0x1f1   : > { %v2711_v31 = vsel %vm16924_vm3, %v2708_v22, %v10983_v30 }
 0x1f2   : > { %v11302_v10 = vpop.f32.mrf.mxu2  ;;  %3648 = vrot.lane.b32.xlu2 %v3328_v25, %s10045_s12  ;;  %3646 = vrot.lane.b32.xlu1 %v3327_v55, %s10045_s12  ;;  %v3331_v25 = vld [vmem:[%s10108_s10 + $0x14a] sm:$0xff] }
 0x1f3   : > { %17146 = vst [vmem:[#allocation30_spill] sm:$0xff] %v11302_v10  ;;  %3644 = vrot.lane.b32.xlu0 %v3326_v60, %s10045_s12  ;;  %v3330_v10 = vld [vmem:[%s10108_s10 + $0x142] sm:$0xff]  ;;  %v3329_v60 = vld [vmem:[%s10108_s10 + $0x13a] sm:$0xff]  ;;  %v11336_v22 = vpop.permute.xlu2 %3468 }
 0x1f4   : > { %v11312_v59 = vpop.permute.xlu1 %3466  ;;  %v11322_v55 = vld [vmem:[%s10108_s10 + $0x188] sm:$0xff]  ;;  %17151 = vst [vmem:[#allocation29_spill] sm:$0xff] %v11336_v22  ;;  %v11409_v22 = vpop.f32.mrf.mxu3 }
 0x1f5   : > { %17147 = vst [vmem:[#allocation40_spill] sm:$0xff] %v11312_v59  ;;  %v11314_v62 = vpop.permute.xlu0 %3464  ;;  %v2709_v30 = vsel %vm16921_vm1, %v11322_v55, %v10955_v56  ;;  %v3333_v56 = vld [vmem:[%s10108_s10 + $0x15a] sm:$0xff] }
 0x1f6   : > { %17148 = vst [vmem:[#allocation15_spill] sm:$0xff] %v11314_v62 }
 0x1f7   : > { %9543 = vmatmul.msk.f32.gmra.mxu2 %vm16925_vm2, %v2711_v31  ;;  %17149 = vst [vmem:[#allocation16_spill] sm:$0xff] %v11322_v55  ;;  %v11333_v31 = vpop.f32.mrf.mxu0  ;;  %v11350_v55 = vld [vmem:[%s10108_s10 + $0x190] sm:$0xff] }
 0x1f8   : > { %9593 = vmatmul.msk.f32.gmra.mxu3 %vm16925_vm2, %v2671_v58  ;;  %v11338_v58 = vpop.f32.mrf.mxu1  ;;  %17154 = vst [vmem:[#allocation52_spill] sm:$0xff] %v11350_v55 }
 0x1fa   : > { %v11326_v5 = vpop.f32.mrf.mxu2  ;;  %3654 = vrot.lane.b32.xlu2 %v3331_v25, %s10045_s12  ;;  %3652 = vrot.lane.b32.xlu1 %v3330_v10, %s10045_s12  ;;  %v2712_v25 = vsel %vm16924_vm3, %v2709_v30, %v10981_v4  ;;  %v3334_v10 = vld [vmem:[%s10108_s10 + $0x162] sm:$0xff]  ;;  %v2710_v4 = vsel %vm16921_vm1, %v11350_v55, %v10882_v23  ;;  %v3336_v23 = vld [vmem:[%s10108_s10 + $0x172] sm:$0xff] }
 0x1fb   : > { %17150 = vst [vmem:[#allocation17_spill] sm:$0xff] %v11326_v5  ;;  %3650 = vrot.lane.b32.xlu0 %v3329_v60, %s10045_s12  ;;  %v3332_v60 = vld [vmem:[%s10108_s10 + $0x152] sm:$0xff] }
 0x1fc   : > { %v11340_v17 = vpop.permute.xlu1 %3472 }
 0x1fd   : > { %17152 = vst [vmem:[#allocation34_spill] sm:$0xff] %v11340_v17  ;;  %v11342_v5 = vpop.permute.xlu0 %3470 }
 0x1fe   : > { %17153 = vst [vmem:[#allocation51_spill] sm:$0xff] %v11342_v5 }
 0x1ff   : > { %9544 = vmatmul.msk.f32.gmra.mxu2 %vm16925_vm2, %v2712_v25  ;;  %v11362_v30 = vpop.f32.mrf.mxu0  ;;  %v11364_v25 = vpop.permute.xlu2 %3474 }
 0x200   : > { %9594 = vmatmul.msk.f32.gmra.mxu3 %vm16925_vm2, %v2672_v21  ;;  %17156 = vst [vmem:[#allocation19_spill] sm:$0xff] %v11364_v25  ;;  %v3342_v25 = vld [vmem:[%s10108_s10 + $0x1a2] sm:$0xff] }
 0x202   : > { %v11354_v62 = vpop.f32.mrf.mxu2  ;;  %3660 = vrot.lane.b32.xlu2 %v3334_v10, %s10045_s12  ;;  %3658 = vrot.lane.b32.xlu1 %v3333_v56, %s10045_s12  ;;  %v11370_v10 = vpop.f32.mrf.mxu1  ;;  %v3337_v56 = vld [vmem:[%s10108_s10 + $0x17a] sm:$0xff] }
 0x203   : > { %17155 = vst [vmem:[#allocation53_spill] sm:$0xff] %v11354_v62  ;;  %3656 = vrot.lane.b32.xlu0 %v3332_v60, %s10045_s12  ;;  %v2713_v62 = vsel %vm16924_vm3, %v2710_v4, %v10912_v27  ;;  %v3335_v60 = vld [vmem:[%s10108_s10 + $0x16a] sm:$0xff] }
 0x204   : > { %v11375_v5 = vpop.permute.xlu1 %3478 }
 0x205   : > { %v11366_v21 = vpop.permute.xlu0 %3476  ;;  %17158 = vst [vmem:[#allocation33_spill] sm:$0xff] %v11375_v5  ;;  %v3338_v5 = vld [vmem:[%s10108_s10 + $0x182] sm:$0xff] }
 0x206   : > { %17157 = vst [vmem:[#allocation44_spill] sm:$0xff] %v11366_v21  ;;  %v3339_v21 = vld [vmem:[%s10108_s10 + $0x18a] sm:$0xff] }
 0x207   : > { %9545 = vmatmul.msk.f32.gmra.mxu2 %vm16925_vm2, %v2713_v62  ;;  %v11385_v4 = vpop.f32.mrf.mxu0  ;;  %v3340_v62 = vld [vmem:[%s10108_s10 + $0x192] sm:$0xff]  ;;  %v11389_v59 = vpop.permute.xlu2 %3480 }
 0x208   : > { %17161 = vst [vmem:[#allocation21_spill] sm:$0xff] %v11389_v59  ;;  %v3343_v59 = vld [vmem:[%s10108_s10 + $0x1aa] sm:$0xff] }
 0x20a   : > { %v11378_v17 = vpop.f32.mrf.mxu2  ;;  %3666 = vrot.lane.b32.xlu2 %v3337_v56, %s10045_s12  ;;  %3664 = vrot.lane.b32.xlu1 %v3336_v23, %s10045_s12  ;;  %v11392_v55 = vpop.f32.mrf.mxu1  ;;  %v3728_v23 = vsel %vm16921_vm1, %v10629_v43, %v11010_v1 }
 0x20b   : > { %17159 = vst [vmem:[#allocation43_spill] sm:$0xff] %v11378_v17  ;;  %3662 = vrot.lane.b32.xlu0 %v3335_v60, %s10045_s12 }
 0x20c   : > { %v11394_v17 = vpop.permute.xlu1 %3484 }
 0x20d   : > { %v11383_v27 = vpop.permute.xlu0 %3482  ;;  %17162 = vst [vmem:[#allocation22_spill] sm:$0xff] %v11394_v17  ;;  %v3341_v17 = vld [vmem:[%s10108_s10 + $0x19a] sm:$0xff] }
 0x20e   : > { %17160 = vst [vmem:[#allocation20_spill] sm:$0xff] %v11383_v27 }
 0x212   : > { %v11396_v56 = vpop.f32.mrf.mxu2  ;;  %3672 = vrot.lane.b32.xlu2 %v3340_v62, %s10045_s12  ;;  %3670 = vrot.lane.b32.xlu1 %v3339_v21, %s10045_s12  ;;  %v11413_v62 = vpop.permute.xlu2 %3486 }
 0x213   : > { %17163 = vst [vmem:[#allocation32_spill] sm:$0xff] %v11396_v56  ;;  %3668 = vrot.lane.b32.xlu0 %v3338_v5, %s10045_s12  ;;  %v11411_v56 = vpop.f32.mrf.mxu0  ;;  %v11420_v43 = vpop.f32.mrf.mxu1  ;;  %v3729_v5 = vsel %vm16921_vm1, %v10650_v6, %v11008_v16 }
 0x214   : > { %17164 = vst [vmem:[#allocation35_spill] sm:$0xff] %v11413_v62  ;;  %v3587_v1 = vpop.permute.xlu1 %3586 }
 0x215   : > { %v3585_v60 = vpop.permute.xlu0 %3584 }
 0x216   : > { %v3776_v27 = vsel %vm16924_vm3, %v3728_v23, %v3585_v60  ;;  %v11429_v60 = vpop.f32.mrf.mxu3 }
 0x217   : > { %9598 = vmatmul.msk.f32.vlgmr.msrb.gmra.mxu2 %vm16925_vm2, %v3776_v27  ;;  %v3777_v27 = vsel %vm16924_vm3, %v3729_v5, %v3587_v1  ;;  %v3731_v5 = vsel %vm16921_vm1, %v10697_v13, %v11039_v34 }
 0x21a   : > { %v11415_v21 = vpop.f32.mrf.mxu2  ;;  %3678 = vrot.lane.b32.xlu2 %v3343_v59, %s10045_s12  ;;  %3676 = vrot.lane.b32.xlu1 %v3342_v25, %s10045_s12  ;;  %v3589_v25 = vpop.permute.xlu2 %3588 }
 0x21b   : > { %17165 = vst [vmem:[#allocation24_spill] sm:$0xff] %v11415_v21  ;;  %3674 = vrot.lane.b32.xlu0 %v3341_v17, %s10045_s12  ;;  %v11431_v59 = vpop.f32.mrf.mxu0  ;;  %v3730_v17 = vsel %vm16921_vm1, %v10671_v9, %v10947_v45  ;;  %v11436_v21 = vpop.f32.mrf.mxu1 }
 0x21c   : > { %v3778_v62 = vsel %vm16924_vm3, %v3730_v17, %v3589_v25  ;;  %v3732_v25 = vsel %vm16921_vm1, %v10718_v15, %v11037_v14 }
 0x21d   : > { %v3591_v16 = vpop.permute.xlu0 %3590 }
 0x21e   : > { %v11442_v1 = vpop.f32.mrf.mxu3 }
 0x21f   : > { %9599 = vmatmul.msk.f32.gmra.mxu2 %vm16925_vm2, %v3777_v27 }
 0x222   : > { %v11427_v23 = vpop.f32.mrf.mxu2 }
 0x223   : > { %17166 = vst [vmem:[#allocation25_spill] sm:$0xff] %v11427_v23  ;;  %v11447_v27 = vpop.f32.mrf.mxu0  ;;  %v3779_v23 = vsel %vm16924_vm3, %v3731_v5, %v3591_v16  ;;  %v11450_v9 = vpop.f32.mrf.mxu1  ;;  %v3733_v5 = vsel %vm16921_vm1, %v10744_v20, %v10979_v51 }
 0x226   : > { %v11458_v17 = vpop.f32.mrf.mxu3 }
 0x227   : > { %9600 = vmatmul.msk.f32.gmra.mxu2 %vm16925_vm2, %v3778_v62  ;;  %v3593_v62 = vpop.permute.xlu1 %3592 }
 0x22a   : > { %v11440_v6 = vpop.f32.mrf.mxu2 }
 0x22b   : > { %17167 = vst [vmem:[#allocation26_spill] sm:$0xff] %v11440_v6  ;;  %v3780_v6 = vsel %vm16924_vm3, %v3732_v25, %v3593_v62  ;;  %v11461_v13 = vpop.f32.mrf.mxu0  ;;  %v11464_v34 = vpop.f32.mrf.mxu1 }
 0x22c   : > { %17169 = vst [vmem:[#allocation46_spill] sm:$0xff] %v11464_v34  ;;  %v3597_v25 = vpop.permute.xlu0 %3596 }
 0x22e   : > { %v11473_v15 = vpop.f32.mrf.mxu3 }
 0x22f   : > { %9601 = vmatmul.msk.f32.gmra.mxu2 %vm16925_vm2, %v3779_v23  ;;  %v3595_v23 = vpop.permute.xlu2 %3594 }
 0x232   : > { %v11453_v45 = vpop.f32.mrf.mxu2 }
 0x233   : > { %17168 = vst [vmem:[#allocation23_spill] sm:$0xff] %v11453_v45  ;;  %v3781_v45 = vsel %vm16924_vm3, %v3733_v5, %v3595_v23  ;;  %v11475_v14 = vpop.f32.mrf.mxu0  ;;  %v3599_v23 = vpop.permute.xlu1 %3598  ;;  %v3735_v5 = vsel %vm16921_vm1, %v10807_v0, %v11063_v50 }
 0x236   : > { %v11488_v51 = vpop.f32.mrf.mxu3 }
 0x237   : > { %9602 = vmatmul.msk.f32.gmra.mxu2 %vm16925_vm2, %v3780_v6  ;;  %v11479_v6 = vpop.f32.mrf.mxu1 }
 0x23a   : > { %v11466_v16 = vpop.f32.mrf.mxu2 }
 0x23b   : > { %17170 = vst [vmem:[#allocation45_spill] sm:$0xff] %v11466_v16  ;;  %v3734_v16 = vsel %vm16921_vm1, %v10775_v48, %v11065_v12  ;;  %v3783_v48 = vsel %vm16924_vm3, %v3735_v5, %v3599_v23  ;;  %v3209_v5 = vld [vmem:[%s10108_s10 + $0x78] sm:$0xff] }
 0x23c   : > { %v3782_v34 = vsel %vm16924_vm3, %v3734_v16, %v3597_v25  ;;  %v3736_v25 = vsel %vm16921_vm1, %v10836_v29, %v11016_v35 }
 0x23e   : > { %v11501_v16 = vpop.f32.mrf.mxu3 }
 0x23f   : > { %9603 = vmatmul.msk.f32.gmra.mxu2 %vm16925_vm2, %v3781_v45  ;;  %v11490_v45 = vpop.f32.mrf.mxu0 }
 0x242   : > { %v11477_v62 = vpop.f32.mrf.mxu2 }
 0x243   : > { %17171 = vst [vmem:[#allocation36_spill] sm:$0xff] %v11477_v62  ;;  %v11495_v62 = vpop.f32.mrf.mxu1 }
 0x244   : > { %17173 = vst [vmem:[#allocation47_spill] sm:$0xff] %v11495_v62 }
 0x246   : > { %v11517_v62 = vpop.f32.mrf.mxu3 }
 0x247   : > { %9604 = vmatmul.msk.f32.gmra.mxu2 %vm16925_vm2, %v3782_v34  ;;  %v3601_v34 = vpop.permute.xlu2 %3600 }
 0x248   : > { %v3784_v0 = vsel %vm16924_vm3, %v3736_v25, %v3601_v34 }
 0x24a   : > { %v11486_v20 = vpop.f32.mrf.mxu2 }
 0x24b   : > { %17172 = vst [vmem:[#allocation48_spill] sm:$0xff] %v11486_v20  ;;  %v11506_v20 = vpop.f32.mrf.mxu0  ;;  %v11509_v50 = vpop.f32.mrf.mxu1 }
 0x24c   : > { %17175 = vst [vmem:[#allocation50_spill] sm:$0xff] %v11509_v50  ;;  %v11531_v50 = vadd.f32 %v11123_v52, %v11111_v40  ;;  %v11546_v40 = vadd.f32 %v11185_v26, %v11178_v19  ;;  %v11551_v52 = vsel %vm16921_vm1, %v10994_v53, %v11083_v49  ;;  %v11566_v19 = vadd.f32 %v11244_v44, %v11234_v38  ;;  %v3216_v26 = vld [vmem:[%s10108_s10 + $0xb0] sm:$0xff]  ;;  %v3219_v38 = vld [vmem:[%s10108_s10 + $0xc8] sm:$0xff] }
 0x24e   : > { %17178 = vst [vmem:[#allocation55_spill] sm:$0xff] %v11566_v19  ;;  %v17194_v19 = vld [vmem:[#allocation37_spill] sm:$0xff] }
 0x24f   : > { %9605 = vmatmul.msk.f32.gmra.mxu2 %vm16925_vm2, %v3783_v48  ;;  %v3603_v48 = vpop.permute.xlu0 %3602 }
 0x252   : > { %v11499_v12 = vpop.f32.mrf.mxu2 }
 0x253   : > { %17174 = vst [vmem:[#allocation39_spill] sm:$0xff] %v11499_v12  ;;  %v3737_v12 = vsel %vm16921_vm1, %v3209_v5, %v11094_v11  ;;  %v11520_v35 = vpop.f32.mrf.mxu0  ;;  %v11523_v34 = vpop.f32.mrf.mxu1  ;;  %v11535_v11 = vadd.f32 %v11157_v37, %v11145_v2  ;;  %v3223_v5 = vld [vmem:[%s10108_s10 + $0xe8] sm:$0xff]  ;;  %v3212_v2 = vld [vmem:[%s10108_s10 + $0x90] sm:$0xff]  ;;  %v3226_v37 = vld [vmem:[%s10108_s10 + $0x100] sm:$0xff] }
 0x254   : > { %v3785_v29 = vsel %vm16924_vm3, %v3737_v12, %v3603_v48  ;;  %v11540_v12 = vsel %vm16921_vm1, %v10915_v28, %v11049_v57  ;;  %v3213_v48 = vld [vmem:[%s10108_s10 + $0x98] sm:$0xff]  ;;  %v11555_v28 = vadd.f32 %v11213_v18, %v11206_v63  ;;  %v11560_v57 = vsel %vm16921_vm1, %v11076_v36, %v11115_v7  ;;  %v3215_v63 = vld [vmem:[%s10108_s10 + $0xa8] sm:$0xff] }
 0x255   : > { %v3229_v36 = vld [vmem:[%s10108_s10 + $0x118] sm:$0xff]  ;;  %v11581_v18 = vadd.f32 %v11274_v33, %v11265_v41  ;;  %v11585_v44 = vsel %vm16921_vm1, %v3223_v5, %v11180_v3  ;;  %v11600_v41 = vadd.f32 %v11306_v42, %v11295_v61  ;;  %v11604_v3 = vsel %vm16921_vm1, %v3226_v37, %v11208_v46  ;;  %v3222_v33 = vld [vmem:[%s10108_s10 + $0xe0] sm:$0xff]  ;;  %v17183_v42 = vld [vmem:[#allocation27_spill] sm:$0xff]  ;;  %v3607_v37 = vpop.permute.xlu2 %3606 }
 0x256   : > { %v11621_v46 = vadd.f32 %v11338_v58, %v11333_v31  ;;  %v3224_v31 = vld [vmem:[%s10108_s10 + $0xf0] sm:$0xff] }
 0x257   : > { %9606 = vmatmul.msk.f32.gmra.mxu2 %vm16925_vm2, %v3784_v0  ;;  %v3220_v0 = vld [vmem:[%s10108_s10 + $0xd0] sm:$0xff]  ;;  %17179 = vst [vmem:[#allocation56_spill] sm:$0xff] %v11581_v18 }
 0x258   : > { %v11570_v53 = vsel %vm16921_vm1, %v3220_v0, %v11147_v39  ;;  %v11589_v39 = vsel %vm16921_vm1, %v3213_v48, %v11117_v32  ;;  %17180 = vst [vmem:[#allocation57_spill] sm:$0xff] %v11600_v41  ;;  %v3232_v32 = vld [vmem:[%s10108_s10 + $0x130] sm:$0xff]  ;;  %v3221_v0 = vld [vmem:[%s10108_s10 + $0xd8] sm:$0xff]  ;;  %v17181_v48 = vld [vmem:[#allocation38_spill] sm:$0xff] }
 0x259   : > { %v11617_v61 = vsel %vm16921_vm1, %v3215_v63, %v17181_v48  ;;  %17182 = vst [vmem:[#allocation38_spill] sm:$0xff] %v11621_v46  ;;  %v3225_v48 = vld [vmem:[%s10108_s10 + $0xf8] sm:$0xff]  ;;  %v11647_v46 = vadd.f32 %v11370_v10, %v11362_v30  ;;  %v17192_v41 = vld [vmem:[#allocation28_spill] sm:$0xff]  ;;  %v11665_v30 = vadd.f32 %v11409_v22, %v17194_v19  ;;  %v3238_v10 = vld [vmem:[%s10108_s10 + $0x160] sm:$0xff] }
 0x25a   : > { %v11512_v23 = vpop.f32.mrf.mxu2  ;;  %v11659_v18 = vsel %vm16921_vm1, %v3221_v0, %v17192_v41  ;;  %v11675_v41 = vadd.f32 %v11392_v55, %v11385_v4  ;;  %v17198_v19 = vld [vmem:[#allocation7_spill] sm:$0xff]  ;;  %v11697_v55 = vadd.f32 %v11420_v43, %v11411_v56  ;;  %v17205_v56 = vld [vmem:[#allocation9_spill] sm:$0xff] }
 0x25b   : > { %17176 = vst [vmem:[#allocation49_spill] sm:$0xff] %v11512_v23  ;;  %v3210_v23 = vld [vmem:[%s10108_s10 + $0x80] sm:$0xff]  ;;  %v11640_v58 = vpop.f32.mrf.mxu0 }
 0x25c   : > { %v3738_v49 = vsel %vm16921_vm1, %v3210_v23, %v11092_v8  ;;  %v3218_v8 = vld [vmem:[%s10108_s10 + $0xc0] sm:$0xff]  ;;  %17195 = vst [vmem:[#allocation28_spill] sm:$0xff] %v11665_v30  ;;  %v3227_v30 = vld [vmem:[%s10108_s10 + $0x108] sm:$0xff] }
 0x25d   : > { %17201 = vst [vmem:[#allocation7_spill] sm:$0xff] %v11697_v55  ;;  %v11714_v43 = vsel %vm16921_vm1, %v3227_v30, %v17205_v56  ;;  %v16919_v30 = vmov 0   ;;  %v17217_v56 = vld [vmem:[#allocation54_spill] sm:$0xff] }
 0x25f   : > { %9607 = vmatmul.msk.f32.gmra.mxu2 %vm16925_vm2, %v3785_v29  ;;  %v3605_v29 = vpop.permute.xlu1 %3604 }
 0x260   : > { %v3786_v23 = vsel %vm16924_vm3, %v3738_v49, %v3605_v29  ;;  %v11625_v29 = vsel %vm16921_vm1, %v3229_v36, %v17183_v42  ;;  %v17185_v49 = vld [vmem:[#allocation3_spill] sm:$0xff] }
 0x261   : > { %17184 = vst [vmem:[#allocation27_spill] sm:$0xff] %v11625_v29 }
 0x262   : > { %v11525_v25 = vpop.f32.mrf.mxu2  ;;  %17187 = vst [vmem:[#allocation3_spill] sm:$0xff] %v11647_v46  ;;  %v11668_v46 = vpop.f32.mrf.mxu1 }
 0x263   : > { %17177 = vst [vmem:[#allocation42_spill] sm:$0xff] %v11525_v25  ;;  %v306_v25 = vlaneseq }
 0x265   : > { %v11577_v7 = vshrl.u32 %v306_v25, 7  ;;  %v11596_v25 = vsel %vm16921_vm1, %v3212_v2, %v11119_v47  ;;  %v11613_v47 = vsel %vm16921_vm1, %v3216_v26, %v11139_v24  ;;  %v11627_v2 = vpop.f32.mrf.mxu3  ;;  %v11631_v24 = vsel %vm16921_vm1, %v3219_v38, %v17185_v49  ;;  %v17186_v26 = vld [vmem:[#allocation4_spill] sm:$0xff]  ;;  %v17188_v38 = vld [vmem:[#allocation41_spill] sm:$0xff] }
 0x266   : > { %v11635_v63 = vsel %vm16921_vm1, %v3218_v8, %v17186_v26  ;;  %v11651_v49 = vsel %vm16921_vm1, %v3232_v32, %v17188_v38  ;;  %v17190_v8 = vld [vmem:[#allocation5_spill] sm:$0xff] }
 0x267   : > { %9608 = vmatmul.msk.f32.gmra.mxu2 %vm16925_vm2, %v3786_v23  ;;  %v358_v5 = vand.u32 65535, %v11577_v7  ;;  %v3235_v23 = vld [vmem:[%s10108_s10 + $0x148] sm:$0xff]  ;;  %v359_v36 = vshrl.u32 %v11577_v7, 16  ;;  %17189 = vst [vmem:[#allocation4_spill] sm:$0xff] %v11651_v49  ;;  %v11655_v26 = vsel %vm16921_vm1, %v3222_v33, %v17190_v8  ;;  %v17197_v8 = vld [vmem:[#allocation6_spill] sm:$0xff]  ;;  %v17199_v49 = vld [vmem:[#allocation8_spill] sm:$0xff] }
 0x268   : > { %17191 = vst [vmem:[#allocation41_spill] sm:$0xff] %v11655_v26  ;;  %v11679_v0 = vsel %vm16921_vm1, %v3235_v23, %v11300_v54  ;;  %v11683_v22 = vsel %vm16921_vm1, %v3225_v48, %v17197_v8  ;;  %v11693_v26 = vadd.f32 %v11429_v60, %v17199_v49  ;;  %v3241_v54 = vld [vmem:[%s10108_s10 + $0x178] sm:$0xff]  ;;  %v3787_v8 = vsel %vm16924_vm3, %v11540_v12, %v3607_v37  ;;  %v17204_v49 = vld [vmem:[#allocation31_spill] sm:$0xff] }
 0x269   : > { %v11643_v42 = vmul.u32 43690, %v358_v5  ;;  %v361_v32 = vmul.u32 43691, %v358_v5  ;;  %v11670_v38 = vmul.u32 43691, %v359_v36  ;;  %17196 = vst [vmem:[#allocation37_spill] sm:$0xff] %v11679_v0  ;;  %v11687_v5 = vsel %vm16921_vm1, %v3224_v31, %v17198_v19  ;;  %v17202_v23 = vld [vmem:[#allocation29_spill] sm:$0xff]  ;;  %v3231_v31 = vld [vmem:[%s10108_s10 + $0x128] sm:$0xff] }
 0x26a   : > { %v11661_v29 = vpop.f32.mrf.mxu2  ;;  %17200 = vst [vmem:[#allocation6_spill] sm:$0xff] %v11693_v26  ;;  %v11703_v48 = vsel %vm16921_vm1, %v3238_v10, %v17202_v23  ;;  %v3230_v26 = vld [vmem:[%s10108_s10 + $0x120] sm:$0xff]  ;;  %v364_v10 = vmul.u32 43690, %v359_v36  ;;  %v11719_v23 = vadd.s32 8, %v11577_v7  ;;  %v11727_v12 = vadd.f32 %v11436_v21, %v11431_v59 }
 0x26b   : > { %17193 = vst [vmem:[#allocation5_spill] sm:$0xff] %v11661_v29  ;;  %v365_v33 = vshll.u32 %v11643_v42, 16  ;;  %v3228_v29 = vld [vmem:[%s10108_s10 + $0x110] sm:$0xff]  ;;  %v367_v4 = vshll.u32 %v11670_v38, 16 }
 0x26c   : > { %17203 = vst [vmem:[#allocation8_spill] sm:$0xff] %v11703_v48  ;;  %v11710_v19 = vsel %vm16921_vm1, %v3228_v29, %v17204_v49  ;;  %v17206_v48 = vld [vmem:[#allocation10_spill] sm:$0xff]  ;;  %v17209_v29 = vld [vmem:[#allocation19_spill] sm:$0xff]  ;;  %v387_v21 = vand.u32 65535, %v11719_v23  ;;  %v388_v59 = vshrl.u32 %v11719_v23, 16 }
 0x26d   : > { %vm369_vm4 = vc.u32 %v361_v32, %v365_v33  ;;  %v371_v60 = vadd.s32 %v365_v33, %v361_v32  ;;  %v11723_v0 = vadd.f32 %v11442_v1, %v17206_v48  ;;  %17208 = vst [vmem:[#allocation31_spill] sm:$0xff] %v11727_v12  ;;  %v11731_v37 = vsel %vm16921_vm1, %v3241_v54, %v17209_v29  ;;  %v17211_v32 = vld [vmem:[#allocation11_spill] sm:$0xff]  ;;  %v3233_v1 = vld [vmem:[%s10108_s10 + $0x138] sm:$0xff]  ;;  %v17215_v54 = vld [vmem:[#allocation18_spill] sm:$0xff] }
 0x26e   : > { %17210 = vst [vmem:[#allocation9_spill] sm:$0xff] %v11731_v37  ;;  %v370_v36 = vsel %vm369_vm4, 1, %v16919_v30  ;;  %v11736_v33 = vsel %vm16921_vm1, %v3231_v31, %v17211_v32  ;;  %v11748_v49 = vsel %vm16921_vm1, %v3230_v26, %v17215_v54  ;;  %v11752_v29 = vadd.f32 %v11458_v17, %v17217_v56  ;;  %v11763_v30 = vpop.f32.mrf.mxu3  ;;  %v3247_v26 = vld [vmem:[%s10108_s10 + $0x1a8] sm:$0xff]  ;;  %v3237_v54 = vld [vmem:[%s10108_s10 + $0x158] sm:$0xff]  ;;  %v11769_v37 = vpop.f32.mrf.mxu0 }
 0x26f   : > { %9609 = vmatmul.msk.f32.gmra.mxu2 %vm16925_vm2, %v3787_v8  ;;  %17207 = vst [vmem:[#allocation29_spill] sm:$0xff] %v11723_v0  ;;  %v3234_v8 = vld [vmem:[%s10108_s10 + $0x140] sm:$0xff]  ;;  %vm11740_vm5 = vc.u32 %v371_v60, %v367_v4  ;;  %v11756_v31 = vadd.f32 %v11450_v9, %v11447_v27  ;;  %v17220_v4 = vld [vmem:[#allocation21_spill] sm:$0xff]  ;;  %v17221_v60 = vld [vmem:[#allocation52_spill] sm:$0xff]  ;;  %v11765_v0 = vpop.permute.xlu2 %3612  ;;  %v3609_v17 = vpop.permute.xlu0 %3608  ;;  %v372_v56 = vadd.s32 %v370_v36, %v364_v10  ;;  %v11773_v27 = vmul.u32 43691, %v388_v59 }
 0x270   : > { %17212 = vst [vmem:[#allocation10_spill] sm:$0xff] %v11736_v33  ;;  %v11761_v32 = vsel %vm16921_vm1, %v17221_v60, %v17220_v4  ;;  %v17223_v9 = vld [vmem:[#allocation12_spill] sm:$0xff]  ;;  %v17225_v60 = vld [vmem:[#allocation13_spill] sm:$0xff]  ;;  %v17230_v36 = vmov 0   ;;  %v17231_v33 = vld [vmem:[#allocation46_spill] sm:$0xff] }
 0x271   : > { %17216 = vst [vmem:[#allocation19_spill] sm:$0xff] %v11748_v49  ;;  %v11771_v49 = vmul.u32 43690, %v387_v21  ;;  %v11777_v4 = vsel %vm16921_vm1, %v3234_v8, %v17223_v9  ;;  %v11794_v55 = vadd.f32 %v17231_v33, %v11461_v13  ;;  %v3236_v8 = vld [vmem:[%s10108_s10 + $0x150] sm:$0xff]  ;;  %v11797_v9 = vpop.f32.mrf.mxu1  ;;  %v3788_v13 = vsel %vm16924_vm3, %v11596_v25, %v3609_v17 }
 0x272   : > { %17218 = vst [vmem:[#allocation11_spill] sm:$0xff] %v11752_v29  ;;  %v390_v29 = vmul.u32 43691, %v387_v21  ;;  %v11787_v10 = vpop.f32.mrf.mxu2  ;;  %v374_v21 = vsel %vm11740_vm5, 1, %v17230_v36  ;;  %v11812_v33 = vadd.s32 16, %v11577_v7 }
 0x273   : > { %17219 = vst [vmem:[#allocation18_spill] sm:$0xff] %v11756_v31  ;;  %v17227_v31 = vld [vmem:[#allocation30_spill] sm:$0xff] }
 0x274   : > { %17222 = vst [vmem:[#allocation54_spill] sm:$0xff] %v11761_v32  ;;  %v11781_v32 = vsel %vm16921_vm1, %v3233_v1, %v17225_v60  ;;  %v11785_v12 = vadd.f32 %v11473_v15, %v17227_v31  ;;  %v394_v1 = vshll.u32 %v11771_v49, 16  ;;  %v396_v60 = vshll.u32 %v11773_v27, 16  ;;  %v17233_v15 = vld [vmem:[#allocation35_spill] sm:$0xff] }
 0x275   : > { %17224 = vst [vmem:[#allocation21_spill] sm:$0xff] %v11777_v4  ;;  %v393_v4 = vmul.u32 43690, %v388_v59  ;;  %v11803_v31 = vsel %vm16921_vm1, %v3247_v26, %v17233_v15  ;;  %v3239_v59 = vld [vmem:[%s10108_s10 + $0x168] sm:$0xff]  ;;  %v416_v17 = vand.u32 65535, %v11812_v33 }
 0x276   : > { %17226 = vst [vmem:[#allocation52_spill] sm:$0xff] %v11781_v32  ;;  %v366_v32 = vshrl.u32 %v11643_v42, 16  ;;  %vm398_vm6 = vc.u32 %v390_v29, %v394_v1  ;;  %v400_v26 = vadd.s32 %v394_v1, %v390_v29  ;;  %v17237_v15 = vld [vmem:[#allocation15_spill] sm:$0xff] }
 0x277   : > { %17228 = vst [vmem:[#allocation12_spill] sm:$0xff] %v11785_v12  ;;  %v3240_v12 = vld [vmem:[%s10108_s10 + $0x170] sm:$0xff]  ;;  %9610 = vmatmul.msk.f32.gmra.mxu2 %vm16925_vm2, %v3788_v13  ;;  %v399_v25 = vsel %vm398_vm6, 1, %v17230_v36  ;;  %v11830_v13 = vadd.f32 %v11479_v6, %v11475_v14  ;;  %v368_v14 = vshrl.u32 %v11670_v38, 16 }
 0x278   : > { %17229 = vst [vmem:[#allocation13_spill] sm:$0xff] %v11787_v10  ;;  %v17235_v10 = vld [vmem:[#allocation40_spill] sm:$0xff]  ;;  %v401_v42 = vadd.s32 %v399_v25, %v393_v4  ;;  %vm402_vm7 = vc.u32 %v400_v26, %v396_v60  ;;  %v419_v4 = vmul.u32 43691, %v416_v17  ;;  %v17245_v60 = vld [vmem:[#allocation53_spill] sm:$0xff]  ;;  %v3158_v26 = vpop.f32.mrf.mxu3  ;;  %v395_v25 = vshrl.u32 %v11771_v49, 16 }
 0x279   : > { %17232 = vst [vmem:[#allocation30_spill] sm:$0xff] %v11794_v55  ;;  %v11807_v48 = vsel %vm16921_vm1, %v3237_v54, %v17235_v10  ;;  %v376_v55 = vadd.s32 %v374_v21, %v372_v56  ;;  %v17239_v54 = vld [vmem:[#allocation17_spill] sm:$0xff]  ;;  %v17241_v56 = vld [vmem:[#allocation34_spill] sm:$0xff]  ;;  %v17243_v21 = vld [vmem:[#allocation51_spill] sm:$0xff]  ;;  %v403_v1 = vsel %vm402_vm7, 1, %v17230_v36 }
 0x27a   : > { %17234 = vst [vmem:[#allocation46_spill] sm:$0xff] %v11803_v31  ;;  %v11820_v31 = vsel %vm16921_vm1, %v3236_v8, %v17237_v15  ;;  %v11824_v10 = vadd.f32 %v11488_v51, %v17239_v54  ;;  %v11834_v29 = vsel %vm16921_vm1, %v3240_v12, %v17241_v56  ;;  %v11838_v8 = vsel %vm16921_vm1, %v3239_v59, %v17243_v21  ;;  %v3611_v54 = vpop.permute.xlu1 %3610 }
 0x27b   : > { %17236 = vst [vmem:[#allocation35_spill] sm:$0xff] %v11807_v48  ;;  %v10047_v51 = vmov 0.0   ;;  %v417_v15 = vshrl.u32 %v11812_v33, 16  ;;  %v377_v6 = vadd.s32 %v376_v55, %v366_v32  ;;  %v420_v12 = vmul.u32 43690, %v416_v17  ;;  %v3619_v55 = vpop.permute.xlu2 %3618  ;;  %v11856_v32 = vpop.f32.mrf.mxu0 }
 0x27c   : > { %17238 = vst [vmem:[#allocation40_spill] sm:$0xff] %v11820_v31  ;;  %v11847_v59 = vadd.f32 %v11501_v16, %v17245_v60  ;;  %v405_v56 = vadd.s32 %v403_v1, %v401_v42  ;;  %v11860_v16 = vadd.s32 24, %v11577_v7  ;;  %v17249_v60 = vld [vmem:[#allocation33_spill] sm:$0xff]  ;;  %v17252_v42 = vld [vmem:[#allocation44_spill] sm:$0xff]  ;;  %v17253_v1 = vld [vmem:[#allocation14_spill] sm:$0xff]  ;;  %v3789_v48 = vsel %vm16924_vm3, %v11589_v39, %v3611_v54 }
 0x27d   : > { %17240 = vst [vmem:[#allocation15_spill] sm:$0xff] %v11824_v10  ;;  %v11850_v21 = vmul.u32 43691, %v417_v15  ;;  %v17247_v10 = vld [vmem:[#allocation47_spill] sm:$0xff]  ;;  %v422_v17 = vmul.u32 43690, %v417_v15  ;;  %v3246_v31 = vld [vmem:[%s10108_s10 + $0x1a0] sm:$0xff]  ;;  %v3245_v15 = vld [vmem:[%s10108_s10 + $0x198] sm:$0xff] }
 0x27e   : > { %17242 = vst [vmem:[#allocation17_spill] sm:$0xff] %v11834_v29  ;;  %v11854_v38 = vadd.f32 %v17247_v10, %v11490_v45  ;;  %v11870_v45 = vsel %vm16921_vm1, %v17253_v1, %v17252_v42  ;;  %v17254_v10 = vld [vmem:[#allocation43_spill] sm:$0xff]  ;;  %v397_v42 = vshrl.u32 %v11773_v27, 16  ;;  %v406_v1 = vadd.s32 %v405_v56, %v395_v25  ;;  %v17259_v27 = vld [vmem:[#allocation20_spill] sm:$0xff] }
 0x27f   : > { %17244 = vst [vmem:[#allocation34_spill] sm:$0xff] %v11838_v8  ;;  %v423_v8 = vshll.u32 %v420_v12, 16  ;;  %v11874_v29 = vadd.f32 %v11517_v62, %v17254_v10  ;;  %9611 = vmatmul.msk.f32.gmra.mxu2 %vm16925_vm2, %v3789_v48  ;;  %v425_v62 = vshll.u32 %v11850_v21, 16  ;;  %v445_v10 = vand.u32 65535, %v11860_v16  ;;  %v17258_v48 = vld [vmem:[#allocation22_spill] sm:$0xff]  ;;  %v17260_v56 = vld [vmem:[#allocation32_spill] sm:$0xff] }
 0x280   : > { %2036 = vst.msk [vmem:[#allocation2] sm:$0xff] %vm16924_vm3, %v10047_v51 }
 0x281   : > { %2037 = vst.msk [vmem:[#allocation2 + $0x8] sm:$0xff] %vm16924_vm3, %v10047_v51  ;;  %vm427_vm8 = vc.u32 %v419_v4, %v423_v8  ;;  %v429_v54 = vadd.s32 %v423_v8, %v419_v4  ;;  %v11905_v8 = vadd.f32 %v11627_v2, %v17260_v56  ;;  %v11914_v2 = vmul.u32 43690, %v445_v10 }
 0x282   : > { %17246 = vst [vmem:[#allocation51_spill] sm:$0xff] %v11847_v59  ;;  %v17250_v59 = vld [vmem:[#allocation16_spill] sm:$0xff]  ;;  %v428_v39 = vsel %vm427_vm8, 1, %v17230_v36 }
 0x283   : > { %17248 = vst [vmem:[#allocation53_spill] sm:$0xff] %v11854_v38  ;;  %v11865_v49 = vsel %vm16921_vm1, %v17250_v59, %v17249_v60  ;;  %v11880_v38 = vpop.f32.mrf.mxu2  ;;  %v3116_v59 = vpop.f32.mrf.mxu1  ;;  %v378_v60 = vadd.s32 %v377_v6, %v368_v14  ;;  %v11896_v14 = vsel %vm16921_vm1, %v3246_v31, %v17258_v48  ;;  %v11900_v6 = vsel %vm16921_vm1, %v3245_v15, %v17259_v27 }
 0x284   : > { %2038 = vst.msk [vmem:[#allocation2 + $0x10] sm:$0xff] %vm16924_vm3, %v10047_v51  ;;  %v430_v25 = vadd.s32 %v428_v39, %v422_v17  ;;  %vm431_vm9 = vc.u32 %v429_v54, %v425_v62  ;;  %v407_v15 = vadd.s32 %v406_v1, %v397_v42  ;;  %v446_v17 = vshrl.u32 %v11860_v16, 16  ;;  %v17261_v39 = vld [vmem:[#allocation24_spill] sm:$0xff] }
 0x285   : > { %17251 = vst [vmem:[#allocation47_spill] sm:$0xff] %v11865_v49  ;;  %v424_v49 = vshrl.u32 %v420_v12, 16  ;;  %v379_v31 = vshrl.u32 %v378_v60, 4  ;;  %v11918_v12 = vadd.f32 %v11763_v30, %v17261_v39  ;;  %v11928_v60 = vadd.s32 32, %v11577_v7  ;;  %v17262_v30 = vld [vmem:[#allocation25_spill] sm:$0xff] }
 0x286   : > { %17255 = vst [vmem:[#allocation33_spill] sm:$0xff] %v11874_v29  ;;  %v426_v42 = vshrl.u32 %v11850_v21, 16  ;;  %v448_v1 = vmul.u32 43691, %v445_v10  ;;  %v11931_v54 = vmul.u32 43691, %v446_v17  ;;  %v11934_v27 = vadd.f32 %v3158_v26, %v17262_v30 }
 0x287   : > { %17256 = vst [vmem:[#allocation16_spill] sm:$0xff] %v11880_v38  ;;  %v17257_v38 = vld [vmem:[#allocation50_spill] sm:$0xff]  ;;  %v380_v21 = vmul.u32 24, %v379_v31  ;;  %v451_v56 = vmul.u32 43690, %v446_v17  ;;  %v452_v26 = vshll.u32 %v11914_v2, 16  ;;  %v475_v31 = vshrl.u32 %v11928_v60, 16 }
 0x288   : > { %2041 = vst.msk [vmem:[#allocation2 + $0x199] sm:$0xff] %vm16924_vm3, %v10047_v51  ;;  %v11892_v29 = vadd.f32 %v17257_v38, %v11506_v20  ;;  %v4427_v4 = vld [vmem:[#allocation2 + $0x1] sm:$0xff]  ;;  %v11909_v20 = vadd.f32 %v11523_v34, %v11520_v35  ;;  %v432_v38 = vsel %vm431_vm9, 1, %v17230_v36  ;;  %v11922_v35 = vadd.f32 %v11668_v46, %v11640_v58  ;;  %v3625_v58 = vpop.permute.xlu2 %3624 }
 0x289   : > { %2042 = vst.msk [vmem:[#allocation2 + $0x1a1] sm:$0xff] %vm16924_vm3, %v10047_v51  ;;  %4571 = vrot.lane.b32.xlu0 %v4427_v4, %s10045_s12  ;;  %v434_v48 = vadd.s32 %v432_v38, %v430_v25  ;;  %v3790_v34 = vsel %vm16924_vm3, %v11551_v52, %v11765_v0  ;;  %v11938_v46 = vadd.f32 %v11797_v9, %v11769_v37  ;;  %v2946_v0 = vpop.f32.mrf.mxu0  ;;  %v408_v25 = vshrl.u32 %v407_v15, 4  ;;  %v17264_v37 = vld [vmem:[#allocation26_spill] sm:$0xff] }
 0x28a   : > { %2043 = vst.msk [vmem:[#allocation2 + $0x1a9] sm:$0xff] %vm16924_vm3, %v10047_v51  ;;  %v11942_v52 = vsel %vm16924_vm3, %v11560_v57, %v3619_v55  ;;  %9612 = vmatmul.msk.f32.gmra.mxu2 %vm16925_vm2, %v3790_v34  ;;  %v474_v4 = vand.u32 65535, %v11928_v60  ;;  %v11953_v57 = vadd.f32 %v3116_v59, %v11856_v32  ;;  %v11959_v15 = vsel %vm16924_vm3, %v11570_v53, %v3625_v58  ;;  %v3615_v59 = vpop.permute.xlu0 %3614 }
 0x28b   : > { %2044 = vst.msk [vmem:[#allocation2 + $0x1b1] sm:$0xff] %vm16924_vm3, %v10047_v51  ;;  %v435_v62 = vadd.s32 %v434_v48, %v424_v49  ;;  %v3617_v49 = vpop.permute.xlu1 %3616  ;;  %v11945_v10 = vpop.f32.mrf.mxu2  ;;  %v4428_v38 = vld [vmem:[#allocation2 + $0x9] sm:$0xff]  ;;  %v454_v48 = vshll.u32 %v11931_v54, 16  ;;  %vm456_vm11 = vc.u32 %v448_v1, %v452_v26  ;;  %v11967_v34 = vsub.s32 %v11577_v7, %v380_v21 }
 0x28c   : > { %2040 = vst.msk [vmem:[#allocation2 + $0x18] sm:$0x1] %vm2039_vm10, %v10047_v51  ;;  %v3161_v51 = vpop.f32.mrf.mxu3  ;;  %v3119_v55 = vpop.f32.mrf.mxu1  ;;  %4573 = vrot.lane.b32.xlu1 %v4428_v38, %s10045_s12  ;;  %v3792_v32 = vsel %vm16924_vm3, %v11613_v47, %v3617_v49  ;;  %v458_v30 = vadd.s32 %v452_v26, %v448_v1  ;;  %v478_v53 = vmul.u32 43690, %v474_v4  ;;  %v11970_v58 = vmul.u32 43691, %v475_v31 }
 0x28d   : > { %17263 = vst [vmem:[#allocation44_spill] sm:$0xff] %v11945_v10  ;;  %v11950_v9 = vadd.f32 %v3161_v51, %v17264_v37  ;;  %v11961_v17 = vadd.f32 %v3119_v55, %v2946_v0  ;;  %v436_v39 = vadd.s32 %v435_v62, %v426_v42  ;;  %v457_v51 = vsel %vm456_vm11, 1, %v17230_v36 }
 0x28e   : > { %v409_v37 = vmul.u32 24, %v408_v25  ;;  %v459_v10 = vadd.s32 %v457_v51, %v451_v56  ;;  %v453_v0 = vshrl.u32 %v11914_v2, 16  ;;  %vm460_vm12 = vc.u32 %v458_v30, %v454_v48 }
 0x28f   : > { %v477_v42 = vmul.u32 43691, %v474_v4  ;;  %v11974_v62 = vadd.s32 40, %v11577_v7  ;;  %v3791_v47 = vsel %vm16924_vm3, %v11617_v61, %v3615_v59  ;;  %v437_v21 = vshrl.u32 %v436_v39, 4 }
 0x290   : > { %v455_v49 = vshrl.u32 %v11931_v54, 16  ;;  %v461_v1 = vsel %vm460_vm12, 1, %v17230_v36  ;;  %v480_v56 = vmul.u32 43690, %v475_v31  ;;  %v481_v26 = vshll.u32 %v478_v53, 16 }
 0x291   : > { %v463_v25 = vadd.s32 %v461_v1, %v459_v10  ;;  %v503_v2 = vand.u32 65535, %v11974_v62  ;;  %vm1747_vm13 = vcmp.ne.s32.totalorder %v11967_v34, 0  ;;  %vm1795_vm14 = vcmp.lt.s32.totalorder %v11967_v34, 0 }
 0x292   : > { %9613 = vmatmul.msk.f32.gmra.mxu2 %vm16925_vm2, %v3791_v47  ;;  %v1891_v4 = vadd.s32 24, %v11967_v34  ;;  %v483_v61 = vshll.u32 %v11970_v58, 16  ;;  %v11987_v55 = vsub.s32 %v11719_v23, %v409_v37  ;;  %vm485_vm15 = vc.u32 %v477_v42, %v481_v26  ;;  %vm11999_vm4 = vmand %vm1795_vm14, %vm1747_vm13 }
 0x293   : > { %v4429_v54 = vld [vmem:[#allocation2 + $0x11] sm:$0xff]  ;;  %v464_v38 = vadd.s32 %v463_v25, %v453_v0  ;;  %v487_v48 = vadd.s32 %v481_v26, %v477_v42  ;;  %v11989_v10 = vpop.f32.mrf.mxu2  ;;  %v438_v31 = vmul.u32 24, %v437_v21  ;;  %v486_v39 = vsel %vm485_vm15, 1, %v17230_v36 }
 0x294   : > { %17265 = vst [vmem:[#allocation14_spill] sm:$0xff] %v11989_v10  ;;  %4575 = vrot.lane.b32.xlu2 %v4429_v54, %s10045_s12  ;;  %v504_v59 = vshrl.u32 %v11974_v62, 16  ;;  %v507_v51 = vmul.u32 43690, %v503_v2  ;;  %v482_v47 = vshrl.u32 %v478_v53, 16  ;;  %v484_v1 = vshrl.u32 %v11970_v58, 16 }
 0x295   : > { %v465_v30 = vadd.s32 %v464_v38, %v455_v49  ;;  %v488_v23 = vadd.s32 %v486_v39, %v480_v56  ;;  %vm489_vm5 = vc.u32 %v487_v48, %v483_v61  ;;  %v506_v0 = vmul.u32 43691, %v503_v2  ;;  %v3631_v39 = vpop.permute.xlu2 %3630 }
 0x296   : > { %v12003_v42 = vmul.u32 43691, %v504_v59  ;;  %v510_v21 = vshll.u32 %v507_v51, 16  ;;  %v490_v49 = vsel %vm489_vm5, 1, %v17230_v36  ;;  %v509_v53 = vmul.u32 43690, %v504_v59 }
 0x297   : > { %v466_v25 = vshrl.u32 %v465_v30, 4  ;;  %v12007_v58 = vadd.s32 48, %v11577_v7  ;;  %v492_v56 = vadd.s32 %v490_v49, %v488_v23  ;;  %v1939_v2 = vsel %vm11999_vm4, %v1891_v4, %v11967_v34  ;;  %v2949_v23 = vpop.f32.mrf.mxu0  ;;  %v3122_v49 = vpop.f32.mrf.mxu1 }
 0x298   : > { %v512_v26 = vshll.u32 %v12003_v42, 16  ;;  %vm514_vm6 = vc.u32 %v506_v0, %v510_v21  ;;  %v516_v54 = vadd.s32 %v510_v21, %v506_v0  ;;  %v12015_v61 = vsub.s32 %v11812_v33, %v438_v31 }
 0x299   : > { %v515_v38 = vsel %vm514_vm6, 1, %v17230_v36  ;;  %v532_v48 = vand.u32 65535, %v12007_v58  ;;  %vm1748_vm7 = vcmp.ne.s32.totalorder %v11987_v55, 0  ;;  %v493_v59 = vadd.s32 %v492_v56, %v482_v47 }
 0x29a   : > { %9614 = vmatmul.msk.f32.gmra.mxu2 %vm16925_vm2, %v3792_v32  ;;  %v517_v30 = vadd.s32 %v515_v38, %v509_v53  ;;  %vm518_vm8 = vc.u32 %v516_v54, %v512_v26  ;;  %v12023_v32 = vld [vmem:[%s16885_s2] ss:$0 sm:$0xff]  ;;  %vm1796_vm9 = vcmp.lt.s32.totalorder %v11987_v55, 0  ;;  %v467_v33 = vmul.u32 24, %v466_v25  ;;  %v3623_v54 = vpop.permute.xlu1 %3622 }
 0x29b   : > { %v519_v34 = vsel %vm518_vm8, 1, %v17230_v36  ;;  %v533_v4 = vshrl.u32 %v12007_v58, 16  ;;  %v3991_v31 = vpop.f32.mrf.mxu2  ;;  %v494_v37 = vadd.s32 %v493_v59, %v484_v1  ;;  %v511_v0 = vshrl.u32 %v507_v51, 16  ;;  %vm12047_vm13 = vmand %vm1796_vm9, %vm1748_vm7 }
 0x29c   : > { %v521_v21 = vadd.s32 %v519_v34, %v517_v30  ;;  %v536_v47 = vmul.u32 43690, %v532_v48  ;;  %v12030_v53 = vsel %vm16924_vm3, %v11585_v44, %v3631_v39  ;;  %v4135_v56 = vadd.f32 %v3991_v31, %v11531_v50 }
 0x29d   : > { %vm1749_vm10 = vcmp.ne.s32.totalorder %v12015_v61, 0  ;;  %vm1797_vm11 = vcmp.lt.s32.totalorder %v12015_v61, 0  ;;  %v12035_v25 = vadd.f32 %v3122_v49, %v2949_v23  ;;  %vm12037_vm12 = vcmp.lt.s32.totalorder %v1939_v2, 16 }
 0x29e   : > { %v17268_v26 = vmov 0  ;;  %v1892_v51 = vadd.s32 24, %v11987_v55  ;;  %v535_v1 = vmul.u32 43691, %v532_v48  ;;  %v4187_v38 = vadd.f32 %v12023_v32, %v4135_v56  ;;  %vm12052_vm14 = vmand %vm1797_vm11, %vm1749_vm10 }
 0x29f   : > { %v17269_v26 = vsel %vm12037_vm12, 4294967295, %v17268_v26  ;;  %v1893_v44 = vadd.s32 24, %v12015_v61  ;;  %v495_v2 = vshrl.u32 %v494_v37, 4  ;;  %v537_v39 = vmul.u32 43691, %v533_v4 }
 0x2a0   : > { %17270 = vst [vmem:[#allocation43_spill] sm:$0xff] %v17269_v26  ;;  %v12057_v48 = vsub.s32 %v11860_v16, %v467_v33  ;;  %v513_v30 = vshrl.u32 %v12003_v42, 16  ;;  %v522_v23 = vadd.s32 %v521_v21, %v511_v0  ;;  %v539_v34 = vshll.u32 %v536_v47, 16  ;;  %v3621_v33 = vpop.permute.xlu0 %3620 }
 0x2a1   : > { %v4235_v31 = vmax.f32 %v4187_v38, 0.0  ;;  %v538_v49 = vmul.u32 43690, %v533_v4  ;;  %v541_v56 = vshll.u32 %v537_v39, 16  ;;  %v12063_v37 = vadd.s32 56, %v11577_v7 }
 0x2a2   : > { %9615 = vmatmul.msk.f32.gmra.mxu2 %vm16925_vm2, %v11942_v52  ;;  %v12067_v10 = vsel %vm16924_vm3, %v11631_v24, %v3623_v54  ;;  %v1940_v16 = vsel %vm12047_vm13, %v1892_v51, %v11987_v55  ;;  %vm543_vm15 = vc.u32 %v535_v1, %v539_v34  ;;  %v545_v42 = vadd.s32 %v539_v34, %v535_v1 }
 0x2a3   : > { %v4283_v0 = vsel %vm12037_vm12, %v4235_v31, 0.0  ;;  %v1941_v52 = vsel %vm12052_vm14, %v1893_v44, %v12015_v61  ;;  %v496_v4 = vmul.u32 24, %v495_v2  ;;  %v544_v21 = vsel %vm543_vm15, 1, %v17230_v36  ;;  %v3994_v24 = vpop.f32.mrf.mxu2 }
 0x2a4   : > { %4331 = vst.msk [vmem:[#allocation2 + $0x19] sm:$0xff] %vm16924_vm3, %v4283_v0  ;;  %vm1750_vm4 = vcmp.ne.s32.totalorder %v12057_v48, 0  ;;  %vm1798_vm5 = vcmp.lt.s32.totalorder %v12057_v48, 0  ;;  %v523_v55 = vadd.s32 %v522_v23, %v513_v30  ;;  %v561_v51 = vand.u32 65535, %v12063_v37 }
 0x2a5   : > { %v4136_v1 = vadd.f32 %v3994_v24, %v11535_v11  ;;  %v540_v54 = vshrl.u32 %v536_v47, 16  ;;  %v546_v38 = vadd.s32 %v544_v21, %v538_v49  ;;  %vm547_vm6 = vc.u32 %v545_v42, %v541_v56  ;;  %vm12091_vm7 = vmand %vm1798_vm5, %vm1750_vm4 }
 0x2a6   : > { %v3794_v61 = vsel %vm16924_vm3, %v11635_v63, %v3621_v33  ;;  %v12086_v50 = vadd.s32 24, %v12057_v48  ;;  %v548_v44 = vsel %vm547_vm6, 1, %v17230_v36  ;;  %v562_v2 = vshrl.u32 %v12063_v37, 16 }
 0x2a7   : > { %v4188_v59 = vadd.f32 %v12023_v32, %v4136_v1  ;;  %v12096_v11 = vsub.s32 %v11928_v60, %v496_v4  ;;  %v542_v47 = vshrl.u32 %v537_v39, 16  ;;  %v550_v23 = vadd.s32 %v548_v44, %v546_v38  ;;  %v3637_v44 = vpop.permute.xlu2 %3636 }
 0x2a8   : > { %vm12098_vm8 = vcmp.lt.s32.totalorder %v1940_v16, 16  ;;  %v17277_v63 = vmov 0  ;;  %vm12102_vm9 = vcmp.lt.s32.totalorder %v1941_v52, 16  ;;  %v17280_v34 = vmov 0 }
 0x2a9   : > { %v17278_v63 = vsel %vm12098_vm8, 4294967295, %v17277_v63  ;;  %v17281_v34 = vsel %vm12102_vm9, 4294967295, %v17280_v34  ;;  %v564_v31 = vmul.u32 43691, %v561_v51  ;;  %v565_v49 = vmul.u32 43690, %v561_v51 }
 0x2aa   : > { %17279 = vst [vmem:[#allocation50_spill] sm:$0xff] %v17278_v63  ;;  %v4236_v56 = vmax.f32 %v4188_v59, 0.0  ;;  %9616 = vmatmul.msk.f32.gmra.mxu2 %vm16925_vm2, %v3794_v61  ;;  %v524_v42 = vshrl.u32 %v523_v55, 4  ;;  %v551_v33 = vadd.s32 %v550_v23, %v540_v54  ;;  %v12107_v0 = vmul.u32 43691, %v562_v2 }
 0x2ab   : > { %17282 = vst [vmem:[#allocation22_spill] sm:$0xff] %v17281_v34  ;;  %v1942_v60 = vsel %vm12091_vm7, %v12086_v50, %v12057_v48  ;;  %v567_v39 = vmul.u32 43690, %v562_v2  ;;  %v568_v16 = vshll.u32 %v565_v49, 16  ;;  %v12114_v52 = vadd.s32 64, %v11577_v7  ;;  %v4430_v21 = vld [vmem:[#allocation2 + $0x19] sm:$0xff]  ;;  %v3997_v55 = vpop.f32.mrf.mxu2 }
 0x2ac   : > { %v4284_v4 = vsel %vm12098_vm8, %v4236_v56, 0.0  ;;  %vm1751_vm10 = vcmp.ne.s32.totalorder %v12096_v11, 0  ;;  %vm1799_vm11 = vcmp.lt.s32.totalorder %v12096_v11, 0  ;;  %v552_v24 = vadd.s32 %v551_v33, %v542_v47  ;;  %4577 = vrot.lane.b32.xlu0 %v4430_v21, %s10045_s12  ;;  %v2952_v33 = vpop.f32.mrf.mxu0 }
 0x2ad   : > { %4332 = vst.msk [vmem:[#allocation2 + $0x21] sm:$0xff] %vm16924_vm3, %v4284_v4  ;;  %v570_v48 = vshll.u32 %v12107_v0, 16  ;;  %vm572_vm13 = vc.u32 %v564_v31, %v568_v16  ;;  %v574_v51 = vadd.s32 %v568_v16, %v564_v31  ;;  %v590_v1 = vand.u32 65535, %v12114_v52  ;;  %vm12136_vm15 = vmand %vm1799_vm11, %vm1751_vm10 }
 0x2ae   : > { %v4137_v54 = vadd.f32 %v3997_v55, %v11546_v40  ;;  %v12126_v38 = vadd.s32 24, %v12096_v11  ;;  %v525_v61 = vmul.u32 24, %v524_v42  ;;  %v573_v50 = vsel %vm572_vm13, 1, %v17230_v36 }
 0x2af   : > { %v569_v2 = vshrl.u32 %v565_v49, 16  ;;  %v575_v59 = vadd.s32 %v573_v50, %v567_v39  ;;  %vm576_vm14 = vc.u32 %v574_v51, %v570_v48  ;;  %v591_v30 = vshrl.u32 %v12114_v52, 16  ;;  %v3125_v48 = vpop.f32.mrf.mxu1 }
 0x2b0   : > { %v4189_v47 = vadd.f32 %v12023_v32, %v4137_v54  ;;  %v553_v23 = vshrl.u32 %v552_v24, 4  ;;  %v577_v31 = vsel %vm576_vm14, 1, %v17230_v36  ;;  %v594_v56 = vmul.u32 43690, %v590_v1 }
 0x2b1   : > { %v579_v49 = vadd.s32 %v577_v31, %v575_v59  ;;  %v593_v42 = vmul.u32 43691, %v590_v1  ;;  %v12140_v39 = vmul.u32 43691, %v591_v30  ;;  %v12143_v16 = vadd.s32 72, %v11577_v7 }
 0x2b2   : > { %v12147_v4 = vsel %vm16924_vm3, %v11604_v3, %v3637_v44  ;;  %v4237_v21 = vmax.f32 %v4189_v47, 0.0  ;;  %9617 = vmatmul.msk.f32.gmra.mxu2 %vm16925_vm2, %v12067_v10  ;;  %v12152_v24 = vsub.s32 %v11974_v62, %v525_v61  ;;  %v597_v55 = vshll.u32 %v594_v56, 16 }
 0x2b3   : > { %v571_v51 = vshrl.u32 %v12107_v0, 16  ;;  %v580_v1 = vadd.s32 %v579_v49, %v569_v2  ;;  %v596_v54 = vmul.u32 43690, %v591_v30  ;;  %v599_v50 = vshll.u32 %v12140_v39, 16  ;;  %v4000_v0 = vpop.f32.mrf.mxu2 }
 0x2b4   : > { %v12156_v59 = vadd.f32 %v3125_v48, %v2952_v33  ;;  %v4285_v3 = vsel %vm12102_vm9, %v4237_v21, 0.0  ;;  %vm12160_vm4 = vcmp.lt.s32.totalorder %v1942_v60, 16  ;;  %v17285_v44 = vmov 0  ;;  %v4431_v10 = vld [vmem:[#allocation2 + $0x21] sm:$0xff]  ;;  %v3627_v33 = vpop.permute.xlu0 %3626 }
 0x2b5   : > { %v17286_v44 = vsel %vm12160_vm4, 4294967295, %v17285_v44  ;;  %v1943_v62 = vsel %vm12136_vm15, %v12126_v38, %v12096_v11  ;;  %4333 = vst.msk [vmem:[#allocation2 + $0x29] sm:$0xff] %vm16924_vm3, %v4285_v3  ;;  %4579 = vrot.lane.b32.xlu1 %v4431_v10, %s10045_s12  ;;  %v554_v61 = vmul.u32 24, %v553_v23  ;;  %vm601_vm5 = vc.u32 %v593_v42, %v597_v55 }
 0x2b6   : > { %17287 = vst [vmem:[#allocation20_spill] sm:$0xff] %v17286_v44  ;;  %v603_v2 = vadd.s32 %v597_v55, %v593_v42  ;;  %v619_v30 = vand.u32 65535, %v12143_v16  ;;  %v4138_v60 = vadd.f32 %v4000_v0, %v11555_v28  ;;  %vm1752_vm6 = vcmp.ne.s32.totalorder %v12152_v24, 0 }
 0x2b7   : > { %vm1800_vm7 = vcmp.lt.s32.totalorder %v12152_v24, 0  ;;  %v602_v47 = vsel %vm601_vm5, 1, %v17230_v36  ;;  %v581_v31 = vadd.s32 %v580_v1, %v571_v51  ;;  %v598_v11 = vshrl.u32 %v594_v56, 16  ;;  %v3629_v51 = vpop.permute.xlu1 %3628 }
 0x2b8   : > { %v604_v38 = vadd.s32 %v602_v47, %v596_v54  ;;  %vm605_vm10 = vc.u32 %v603_v2, %v599_v50  ;;  %v4190_v40 = vadd.f32 %v12023_v32, %v4138_v60  ;;  %v12177_v23 = vadd.s32 24, %v12152_v24  ;;  %vm12193_vm11 = vmand %vm1800_vm7, %vm1752_vm6 }
 0x2b9   : > { %v606_v49 = vsel %vm605_vm10, 1, %v17230_v36  ;;  %v620_v28 = vshrl.u32 %v12143_v16, 16  ;;  %v12182_v42 = vsub.s32 %v12007_v58, %v554_v61  ;;  %v623_v55 = vmul.u32 43690, %v619_v30 }
 0x2ba   : > { %v608_v21 = vadd.s32 %v606_v49, %v604_v38  ;;  %v12185_v48 = vadd.s32 80, %v11577_v7  ;;  %v4238_v56 = vmax.f32 %v4190_v40, 0.0  ;;  %9618 = vmatmul.msk.f32.gmra.mxu2 %vm16925_vm2, %v11959_v15  ;;  %v600_v58 = vshrl.u32 %v12140_v39, 16 }
 0x2bb   : > { %v622_v1 = vmul.u32 43691, %v619_v30  ;;  %v12198_v54 = vmul.u32 43691, %v620_v28  ;;  %v3797_v50 = vsel %vm16924_vm3, %v11659_v18, %v3627_v33  ;;  %v582_v3 = vshrl.u32 %v581_v31, 4  ;;  %v4003_v30 = vpop.f32.mrf.mxu2  ;;  %v17293_v31 = vld [vmem:[#allocation55_spill] sm:$0xff] }
 0x2bc   : > { %v609_v10 = vadd.s32 %v608_v21, %v598_v11  ;;  %v626_v0 = vshll.u32 %v623_v55, 16  ;;  %v4286_v15 = vsel %vm12160_vm4, %v4238_v56, 0.0  ;;  %vm12204_vm13 = vcmp.lt.s32.totalorder %v1943_v62, 16  ;;  %v4432_v2 = vld [vmem:[#allocation2 + $0x29] sm:$0xff] }
 0x2bd   : > { %v17290_v61 = vmov 0  ;;  %v625_v60 = vmul.u32 43690, %v620_v28  ;;  %v628_v39 = vshll.u32 %v12198_v54, 16  ;;  %4334 = vst.msk [vmem:[#allocation2 + $0x31] sm:$0xff] %vm16924_vm3, %v4286_v15  ;;  %4581 = vrot.lane.b32.xlu2 %v4432_v2, %s10045_s12  ;;  %v1944_v18 = vsel %vm12193_vm11, %v12177_v23, %v12152_v24  ;;  %v3643_v24 = vpop.permute.xlu2 %3642 }
 0x2be   : > { %v17291_v61 = vsel %vm12204_vm13, 4294967295, %v17290_v61  ;;  %vm1753_vm14 = vcmp.ne.s32.totalorder %v12182_v42, 0  ;;  %v648_v62 = vand.u32 65535, %v12185_v48  ;;  %v649_v47 = vshrl.u32 %v12185_v48, 16 }
 0x2bf   : > { %17292 = vst [vmem:[#allocation32_spill] sm:$0xff] %v17291_v61  ;;  %v4139_v11 = vadd.f32 %v4003_v30, %v17293_v31  ;;  %v610_v38 = vadd.s32 %v609_v10, %v600_v58  ;;  %vm630_vm15 = vc.u32 %v622_v1, %v626_v0  ;;  %v632_v33 = vadd.s32 %v626_v0, %v622_v1  ;;  %v17294_v31 = vld [vmem:[#allocation27_spill] sm:$0xff] }
 0x2c0   : > { %vm1801_vm5 = vcmp.lt.s32.totalorder %v12182_v42, 0  ;;  %v12221_v40 = vadd.s32 24, %v12182_v42  ;;  %v583_v49 = vmul.u32 24, %v582_v3  ;;  %v631_v28 = vsel %vm630_vm15, 1, %v17230_v36 }
 0x2c1   : > { %v4191_v23 = vadd.f32 %v12023_v32, %v4139_v11  ;;  %v627_v21 = vshrl.u32 %v623_v55, 16  ;;  %v633_v56 = vadd.s32 %v631_v28, %v625_v60  ;;  %vm634_vm6 = vc.u32 %v632_v33, %v628_v39  ;;  %vm12240_vm7 = vmand %vm1801_vm5, %vm1753_vm14  ;;  %v17297_v11 = vld [vmem:[#allocation41_spill] sm:$0xff] }
 0x2c2   : > { %v635_v15 = vsel %vm634_vm6, 1, %v17230_v36  ;;  %v651_v58 = vmul.u32 43691, %v648_v62  ;;  %v652_v10 = vmul.u32 43690, %v648_v62  ;;  %v12226_v1 = vmul.u32 43691, %v649_v47  ;;  %9619 = vmatmul.msk.f32.gmra.mxu2 %vm16925_vm2, %v3797_v50 }
 0x2c3   : > { %v4239_v0 = vmax.f32 %v4191_v23, 0.0  ;;  %v611_v2 = vshrl.u32 %v610_v38, 4  ;;  %v637_v3 = vadd.s32 %v635_v15, %v633_v56  ;;  %v12230_v30 = vadd.s32 88, %v11577_v7 }
 0x2c4   : > { %v12234_v55 = vsel %vm16924_vm3, %v17294_v31, %v3643_v24  ;;  %v12245_v39 = vsub.s32 %v12063_v37, %v583_v49  ;;  %v654_v50 = vmul.u32 43690, %v649_v47  ;;  %v655_v62 = vshll.u32 %v652_v10, 16  ;;  %v4433_v28 = vld [vmem:[#allocation2 + $0x31] sm:$0xff]  ;;  %v4006_v37 = vpop.f32.mrf.mxu2 }
 0x2c5   : > { %v3798_v38 = vsel %vm16924_vm3, %v17297_v11, %v3629_v51  ;;  %v4287_v33 = vsel %vm12204_vm13, %v4239_v0, 0.0  ;;  %v629_v24 = vshrl.u32 %v12198_v54, 16  ;;  %v638_v23 = vadd.s32 %v637_v3, %v627_v21  ;;  %4583 = vrot.lane.b32.xlu0 %v4433_v28, %s10045_s12  ;;  %v17301_v51 = vld [vmem:[#allocation56_spill] sm:$0xff] }
 0x2c6   : > { %4335 = vst.msk [vmem:[#allocation2 + $0x39] sm:$0xff] %vm16924_vm3, %v4287_v33  ;;  %vm12253_vm10 = vcmp.lt.s32.totalorder %v1944_v18, 16  ;;  %v17298_v56 = vmov 0  ;;  %v657_v47 = vshll.u32 %v12226_v1, 16  ;;  %vm659_vm11 = vc.u32 %v651_v58, %v655_v62 }
 0x2c7   : > { %v17299_v56 = vsel %vm12253_vm10, 4294967295, %v17298_v56  ;;  %v677_v49 = vand.u32 65535, %v12230_v30  ;;  %v4140_v15 = vadd.f32 %v4006_v37, %v17301_v51  ;;  %v1945_v54 = vsel %vm12240_vm7, %v12221_v40, %v12182_v42 }
 0x2c8   : > { %17300 = vst [vmem:[#allocation24_spill] sm:$0xff] %v17299_v56  ;;  %v612_v21 = vmul.u32 24, %v611_v2  ;;  %v660_v18 = vsel %vm659_vm11, 1, %v17230_v36  ;;  %vm1754_vm14 = vcmp.ne.s32.totalorder %v12245_v39, 0  ;;  %v661_v0 = vadd.s32 %v655_v62, %v651_v58  ;;  %v3633_v56 = vpop.permute.xlu0 %3632 }
 0x2c9   : > { %v662_v3 = vadd.s32 %v660_v18, %v654_v50  ;;  %v678_v31 = vshrl.u32 %v12230_v30, 16  ;;  %v4192_v11 = vadd.f32 %v12023_v32, %v4140_v15  ;;  %vm1802_vm15 = vcmp.lt.s32.totalorder %v12245_v39, 0 }
 0x2ca   : > { %v639_v33 = vadd.s32 %v638_v23, %v629_v24  ;;  %v656_v28 = vshrl.u32 %v652_v10, 16  ;;  %vm663_vm5 = vc.u32 %v661_v0, %v657_v47  ;;  %v680_v37 = vmul.u32 43691, %v677_v49  ;;  %9620 = vmatmul.msk.f32.gmra.mxu2 %vm16925_vm2, %v3798_v38  ;;  %v17302_v0 = vld [vmem:[#allocation57_spill] sm:$0xff]  ;;  %vm12302_vm1 = vmand %vm1802_vm15, %vm1754_vm14 }
 0x2cb   : > { %v12270_v51 = vmul.u32 43690, %v677_v49  ;;  %v12272_v42 = vmul.u32 43691, %v678_v31  ;;  %v4240_v40 = vmax.f32 %v4192_v11, 0.0  ;;  %v12276_v58 = vsub.s32 %v12114_v52, %v612_v21 }
 0x2cc   : > { %v664_v2 = vsel %vm663_vm5, 1, %v17230_v36  ;;  %v12280_v60 = vadd.s32 96, %v11577_v7  ;;  %v658_v50 = vshrl.u32 %v12226_v1, 16  ;;  %v1898_v38 = vadd.s32 24, %v12245_v39  ;;  %v4009_v15 = vpop.f32.mrf.mxu2 }
 0x2cd   : > { %v666_v10 = vadd.s32 %v664_v2, %v662_v3  ;;  %v684_v62 = vshll.u32 %v12270_v51, 16  ;;  %v686_v24 = vshll.u32 %v12272_v42, 16  ;;  %v4288_v23 = vsel %vm12253_vm10, %v4240_v40, 0.0  ;;  %v4434_v47 = vld [vmem:[#allocation2 + $0x39] sm:$0xff] }
 0x2ce   : > { %v640_v52 = vshrl.u32 %v639_v33, 4  ;;  %v683_v49 = vmul.u32 43690, %v678_v31  ;;  %4336 = vst.msk [vmem:[#allocation2 + $0x41] sm:$0xff] %vm16924_vm3, %v4288_v23  ;;  %4585 = vrot.lane.b32.xlu1 %v4434_v47, %s10045_s12  ;;  %v706_v18 = vand.u32 65535, %v12280_v60  ;;  %v4141_v3 = vadd.f32 %v4009_v15, %v17302_v0 }
 0x2cf   : > { %v667_v21 = vadd.s32 %v666_v10, %v656_v28  ;;  %vm688_vm6 = vc.u32 %v680_v37, %v684_v62  ;;  %v690_v1 = vadd.s32 %v684_v62, %v680_v37  ;;  %vm1755_vm7 = vcmp.ne.s32.totalorder %v12276_v58, 0 }
 0x2d0   : > { %vm1803_vm11 = vcmp.lt.s32.totalorder %v12276_v58, 0  ;;  %v707_v11 = vshrl.u32 %v12280_v60, 16  ;;  %v1899_v31 = vadd.s32 24, %v12276_v58  ;;  %v689_v40 = vsel %vm688_vm6, 1, %v17230_v36 }
 0x2d1   : > { %v668_v33 = vadd.s32 %v667_v21, %v658_v50  ;;  %vm692_vm5 = vc.u32 %v690_v1, %v686_v24  ;;  %v4193_v28 = vadd.f32 %v12023_v32, %v4141_v3  ;;  %v641_v2 = vmul.u32 24, %v640_v52  ;;  %vm12311_vm6 = vmand %vm1803_vm11, %vm1755_vm7 }
 0x2d2   : > { %v691_v10 = vadd.s32 %v689_v40, %v683_v49  ;;  %v693_v62 = vsel %vm692_vm5, 1, %v17230_v36  ;;  %vm12307_vm0 = vcmp.lt.s32.totalorder %v1945_v54, 16  ;;  %v17305_v23 = vmov 0  ;;  %9621 = vmatmul.msk.f32.gmra.mxu2 %vm16925_vm2, %v12030_v53 }
 0x2d3   : > { %v17306_v23 = vsel %vm12307_vm0, 4294967295, %v17305_v23  ;;  %v685_v24 = vshrl.u32 %v12270_v51, 16  ;;  %v709_v47 = vmul.u32 43691, %v706_v18  ;;  %v710_v15 = vmul.u32 43690, %v706_v18  ;;  %v3635_v51 = vpop.permute.xlu1 %3634 }
 0x2d4   : > { %17307 = vst [vmem:[#allocation25_spill] sm:$0xff] %v17306_v23  ;;  %v4241_v21 = vmax.f32 %v4193_v28, 0.0  ;;  %v669_v52 = vshrl.u32 %v668_v33, 4  ;;  %v695_v49 = vadd.s32 %v693_v62, %v691_v10  ;;  %v12318_v1 = vmul.u32 43691, %v707_v11  ;;  %v17310_v62 = vld [vmem:[#allocation38_spill] sm:$0xff] }
 0x2d5   : > { %v1946_v54 = vsel %vm12302_vm1, %v1898_v38, %v12245_v39  ;;  %v712_v0 = vmul.u32 43690, %v707_v11  ;;  %v713_v3 = vshll.u32 %v710_v15, 16  ;;  %v12324_v40 = vadd.s32 104, %v11577_v7  ;;  %v4435_v28 = vld [vmem:[#allocation2 + $0x41] sm:$0xff]  ;;  %v4012_v38 = vpop.f32.mrf.mxu2 }
 0x2d6   : > { %v4289_v18 = vsel %vm12307_vm0, %v4241_v21, 0.0  ;;  %v1947_v53 = vsel %vm12311_vm6, %v1899_v31, %v12276_v58  ;;  %v12332_v33 = vsub.s32 %v12143_v16, %v641_v2  ;;  %v715_v39 = vshll.u32 %v12318_v1, 16  ;;  %4587 = vrot.lane.b32.xlu2 %v4435_v28, %s10045_s12 }
 0x2d7   : > { %4337 = vst.msk [vmem:[#allocation2 + $0x49] sm:$0xff] %vm16924_vm3, %v4289_v18  ;;  %v687_v11 = vshrl.u32 %v12272_v42, 16  ;;  %vm717_vm1 = vc.u32 %v709_v47, %v713_v3  ;;  %v719_v37 = vadd.s32 %v713_v3, %v709_v47  ;;  %v735_v10 = vand.u32 65535, %v12324_v40 }
 0x2d8   : > { %v4142_v21 = vadd.f32 %v4012_v38, %v17310_v62  ;;  %v670_v50 = vmul.u32 24, %v669_v52  ;;  %v696_v58 = vadd.s32 %v695_v49, %v685_v24  ;;  %v718_v16 = vsel %vm717_vm1, 1, %v17230_v36 }
 0x2d9   : > { %v3801_v31 = vsel %vm16924_vm3, %v11683_v22, %v3635_v51  ;;  %v3800_v2 = vsel %vm16924_vm3, %v11687_v5, %v3633_v56  ;;  %vm12345_vm14 = vcmp.lt.s32.totalorder %v1946_v54, 16  ;;  %v17311_v18 = vmov 0 }
 0x2da   : > { %v17312_v18 = vsel %vm12345_vm14, 4294967295, %v17311_v18  ;;  %v720_v42 = vadd.s32 %v718_v16, %v712_v0  ;;  %v4194_v47 = vadd.f32 %v12023_v32, %v4142_v21  ;;  %v714_v3 = vshrl.u32 %v710_v15, 16  ;;  %9622 = vmatmul.msk.f32.gmra.mxu2 %vm16925_vm2, %v3800_v2 }
 0x2db   : > { %17313 = vst [vmem:[#allocation26_spill] sm:$0xff] %v17312_v18  ;;  %vm721_vm15 = vc.u32 %v719_v37, %v715_v39  ;;  %v736_v52 = vshrl.u32 %v12324_v40, 16  ;;  %vm12351_vm7 = vcmp.lt.s32.totalorder %v1947_v53, 16  ;;  %v17314_v24 = vmov 0 }
 0x2dc   : > { %v17315_v24 = vsel %vm12351_vm7, 4294967295, %v17314_v24  ;;  %vm1756_vm11 = vcmp.ne.s32.totalorder %v12332_v33, 0  ;;  %v722_v22 = vsel %vm721_vm15, 1, %v17230_v36  ;;  %v738_v5 = vmul.u32 43691, %v735_v10 }
 0x2dd   : > { %17316 = vst [vmem:[#allocation55_spill] sm:$0xff] %v17315_v24  ;;  %v739_v56 = vmul.u32 43690, %v735_v10  ;;  %v4242_v49 = vmax.f32 %v4194_v47, 0.0  ;;  %v12359_v54 = vsub.s32 %v12185_v48, %v670_v50  ;;  %v697_v15 = vadd.s32 %v696_v58, %v687_v11  ;;  %v4015_v48 = vpop.f32.mrf.mxu2  ;;  %v17317_v50 = vld [vmem:[#allocation3_spill] sm:$0xff] }
 0x2de   : > { %v724_v0 = vadd.s32 %v722_v22, %v720_v42  ;;  %v716_v51 = vshrl.u32 %v12318_v1, 16  ;;  %v740_v28 = vmul.u32 43691, %v736_v52  ;;  %v12363_v39 = vadd.s32 112, %v11577_v7  ;;  %v4436_v37 = vld [vmem:[#allocation2 + $0x49] sm:$0xff] }
 0x2df   : > { %v742_v53 = vshll.u32 %v739_v56, 16  ;;  %v4290_v38 = vsel %vm12345_vm14, %v4242_v49, 0.0  ;;  %vm1804_vm5 = vcmp.lt.s32.totalorder %v12332_v33, 0  ;;  %v741_v62 = vmul.u32 43690, %v736_v52  ;;  %4589 = vrot.lane.b32.xlu0 %v4436_v37, %s10045_s12  ;;  %v4380_v24 = vld [vmem:[#allocation2 + $0x8] sm:$0xff] }
 0x2e0   : > { %v725_v10 = vadd.s32 %v724_v0, %v714_v3  ;;  %4338 = vst.msk [vmem:[#allocation2 + $0x51] sm:$0xff] %vm16924_vm3, %v4290_v38  ;;  %v1900_v1 = vadd.s32 24, %v12332_v33  ;;  %v744_v11 = vshll.u32 %v740_v28, 16  ;;  %v4143_v58 = vadd.f32 %v4015_v48, %v17317_v50  ;;  %vm12381_vm2 = vmand %vm1804_vm5, %vm1756_vm11  ;;  %v3641_v38 = vpop.permute.xlu1 %3640  ;;  %v3639_v50 = vpop.permute.xlu0 %3638 }
 0x2e1   : > { %vm746_vm6 = vc.u32 %v738_v5, %v742_v53  ;;  %v748_v21 = vadd.s32 %v742_v53, %v738_v5  ;;  %vm1757_vm1 = vcmp.ne.s32.totalorder %v12359_v54, 0  ;;  %vm1805_vm15 = vcmp.lt.s32.totalorder %v12359_v54, 0 }
 0x2e2   : > { %v764_v16 = vand.u32 65535, %v12363_v39  ;;  %v698_v2 = vshrl.u32 %v697_v15, 4  ;;  %v726_v42 = vadd.s32 %v725_v10, %v716_v51  ;;  %v747_v47 = vsel %vm746_vm6, 1, %v17230_v36  ;;  %vm12393_vm11 = vmand %vm1805_vm15, %vm1757_vm1 }
 0x2e3   : > { %vm750_vm3 = vc.u32 %v748_v21, %v744_v11  ;;  %v4195_v3 = vadd.f32 %v12023_v32, %v4143_v58  ;;  %v743_v22 = vshrl.u32 %v739_v56, 16  ;;  %v749_v5 = vadd.s32 %v747_v47, %v741_v62 }
 0x2e4   : > { %v751_v49 = vsel %vm750_vm3, 1, %v17230_v36  ;;  %v1901_v15 = vadd.s32 24, %v12359_v54  ;;  %v745_v0 = vshrl.u32 %v740_v28, 16  ;;  %v765_v51 = vshrl.u32 %v12363_v39, 16 }
 0x2e5   : > { %v767_v53 = vmul.u32 43691, %v764_v16  ;;  %v4243_v37 = vmax.f32 %v4195_v3, 0.0  ;;  %vm17320_vm6 = vcmask 97280   ;;  %v753_v56 = vadd.s32 %v751_v49, %v749_v5  ;;  %v4018_v52 = vpop.f32.mrf.mxu2 }
 0x2e6   : > { %9623 = vmatmul.msk.f32.gmra.mxu2 %vm17320_vm6, %v3801_v31  ;;  %v768_v62 = vmul.u32 43690, %v764_v16  ;;  %v12398_v48 = vadd.s32 120, %v11577_v7  ;;  %v1948_v28 = vsel %vm12381_vm2, %v1900_v1, %v12332_v33  ;;  %v699_v11 = vmul.u32 24, %v698_v2 }
 0x2e7   : > { %v727_v21 = vshrl.u32 %v726_v42, 4  ;;  %v12403_v31 = vmul.u32 43691, %v765_v51  ;;  %v4291_v58 = vsel %vm12351_vm7, %v4243_v37, 0.0  ;;  %v4437_v47 = vld [vmem:[#allocation2 + $0x51] sm:$0xff]  ;;  %v754_v3 = vadd.s32 %v753_v56, %v743_v22 }
 0x2e8   : > { %v770_v18 = vmul.u32 43690, %v765_v51  ;;  %v771_v5 = vshll.u32 %v768_v62, 16  ;;  %vm17323_vm3 = vcmask 64512   ;;  %4591 = vrot.lane.b32.xlu1 %v4437_v47, %s10045_s12  ;;  %v1949_v33 = vsel %vm12393_vm11, %v1901_v15, %v12359_v54 }
 0x2e9   : > { %v12409_v16 = vsel %vm17323_vm3, %v11710_v19, %v3641_v38  ;;  %vm17324_vm5 = vmmov %vm17323_vm3  ;;  %v793_v1 = vand.u32 65535, %v12398_v48  ;;  %v794_v2 = vshrl.u32 %v12398_v48, 16  ;;  %v4144_v42 = vadd.f32 %v4018_v52, %v11675_v41 }
 0x2ea   : > { %4339 = vst.msk [vmem:[#allocation2 + $0x59] sm:$0xff] %vm17324_vm5, %v4291_v58  ;;  %v755_v22 = vadd.s32 %v754_v3, %v745_v0  ;;  %v773_v49 = vshll.u32 %v12403_v31, 16  ;;  %vm775_vm2 = vc.u32 %v767_v53, %v771_v5  ;;  %vm17325_vm1 = vmmov %vm17323_vm3  ;;  %vm12422_vm15 = vcmp.lt.s32.totalorder %v1948_v28, 16 }
 0x2eb   : > { %v3803_v19 = vsel %vm17325_vm1, %v11714_v43, %v3639_v50  ;;  %v17326_v51 = vmov 0  ;;  %v728_v38 = vmul.u32 24, %v727_v21  ;;  %v776_v54 = vsel %vm775_vm2, 1, %v17230_v36  ;;  %vm17333_vm2 = vmmov %vm17325_vm1 }
 0x2ec   : > { %v17327_v51 = vsel %vm12422_vm15, 4294967295, %v17326_v51  ;;  %v4196_v15 = vadd.f32 %v12023_v32, %v4144_v42  ;;  %v12429_v37 = vsub.s32 %v12230_v30, %v699_v11  ;;  %v777_v41 = vadd.s32 %v771_v5, %v767_v53 }
 0x2ed   : > { %17328 = vst [vmem:[#allocation27_spill] sm:$0xff] %v17327_v51  ;;  %v778_v0 = vadd.s32 %v776_v54, %v770_v18  ;;  %vm12431_vm6 = vcmp.lt.s32.totalorder %v1949_v33, 16  ;;  %v17329_v10 = vmov 0  ;;  %v796_v56 = vmul.u32 43691, %v793_v1 }
 0x2ee   : > { %v17330_v10 = vsel %vm12431_vm6, 4294967295, %v17329_v10  ;;  %v797_v43 = vmul.u32 43690, %v793_v1  ;;  %v12435_v28 = vmul.u32 43691, %v794_v2  ;;  %v4244_v50 = vmax.f32 %v4196_v15, 0.0  ;;  %v17334_v1 = vld [vmem:[#allocation7_spill] sm:$0xff] }
 0x2ef   : > { %17331 = vst [vmem:[#allocation41_spill] sm:$0xff] %v17330_v10  ;;  %vm17332_vm11 = vcmask 97280   ;;  %v756_v21 = vshrl.u32 %v755_v22, 4  ;;  %v772_v58 = vshrl.u32 %v768_v62, 16  ;;  %vm779_vm3 = vc.u32 %v777_v41, %v773_v49 }
 0x2f0   : > { %9624 = vmatmul.msk.f32.gmra.mxu2 %vm17332_vm11, %v12147_v4  ;;  %v12440_v30 = vsub.s32 %v12280_v60, %v728_v38  ;;  %v780_v18 = vsel %vm779_vm3, 1, %v17230_v36  ;;  %v800_v53 = vshll.u32 %v797_v43, 16  ;;  %v802_v11 = vshll.u32 %v12435_v28, 16  ;;  %v4021_v4 = vpop.f32.mrf.mxu2 }
 0x2f1   : > { %v4292_v47 = vsel %vm12422_vm15, %v4244_v50, 0.0  ;;  %v4438_v3 = vld [vmem:[#allocation2 + $0x59] sm:$0xff]  ;;  %v782_v5 = vadd.s32 %v780_v18, %v778_v0  ;;  %v799_v52 = vmul.u32 43690, %v794_v2  ;;  %v774_v60 = vshrl.u32 %v12403_v31, 16  ;;  %v3647_v0 = vpop.permute.xlu1 %3646 }
 0x2f2   : > { %4340 = vst.msk [vmem:[#allocation2 + $0x61] sm:$0xff] %vm17333_vm2, %v4292_v47  ;;  %4593 = vrot.lane.b32.xlu2 %v4438_v3, %s10045_s12  ;;  %vm804_vm1 = vc.u32 %v796_v56, %v800_v53  ;;  %v806_v62 = vadd.s32 %v800_v53, %v796_v56  ;;  %v12451_v33 = vadd.s32 128, %v11577_v7  ;;  %v4145_v42 = vadd.f32 %v4021_v4, %v17334_v1 }
 0x2f3   : > { %vm1806_vm11 = vcmp.lt.s32.totalorder %v12429_v37, 0  ;;  %v1902_v22 = vadd.s32 24, %v12429_v37  ;;  %v757_v49 = vmul.u32 24, %v756_v21  ;;  %v783_v2 = vadd.s32 %v782_v5, %v772_v58 }
 0x2f4   : > { %v805_v38 = vsel %vm804_vm1, 1, %v17230_v36  ;;  %vm808_vm2 = vc.u32 %v806_v62, %v802_v11  ;;  %v4197_v31 = vadd.f32 %v12023_v32, %v4145_v42  ;;  %v801_v54 = vshrl.u32 %v797_v43, 16  ;;  %v3645_v43 = vpop.permute.xlu0 %3644 }
 0x2f5   : > { %v807_v15 = vadd.s32 %v805_v38, %v799_v52  ;;  %v809_v41 = vsel %vm808_vm2, 1, %v17230_v36  ;;  %vm1807_vm5 = vcmp.lt.s32.totalorder %v12440_v30, 0  ;;  %v784_v56 = vadd.s32 %v783_v2, %v774_v60 }
 0x2f6   : > { %v822_v50 = vand.u32 65535, %v12451_v33  ;;  %v823_v21 = vshrl.u32 %v12451_v33, 16  ;;  %v4245_v18 = vmax.f32 %v4197_v31, 0.0  ;;  %vm17335_vm3 = vcmask 97280  }
 0x2f7   : > { %vm17336_vm1 = vcmp.ne.s32.totalorder %v12429_v37, 0  ;;  %v12473_v58 = vsub.s32 %v12324_v40, %v757_v49  ;;  %v811_v53 = vadd.s32 %v809_v41, %v807_v15  ;;  %v12476_v11 = vadd.s32 136, %v11577_v7  ;;  %v17342_v15 = vld [vmem:[#allocation31_spill] sm:$0xff] }
 0x2f8   : > { %9625 = vmatmul.msk.f32.gmra.mxu2 %vm17335_vm3, %v3803_v19  ;;  %vm12468_vm15 = vmand %vm1806_vm11, %vm17336_vm1  ;;  %v785_v47 = vshrl.u32 %v784_v56, 4  ;;  %v825_v3 = vmul.u32 43691, %v822_v50  ;;  %v826_v5 = vmul.u32 43690, %v822_v50  ;;  %v12478_v52 = vmul.u32 43691, %v823_v21  ;;  %v17339_v19 = vld [vmem:[#allocation10_spill] sm:$0xff]  ;;  %v4024_v49 = vpop.f32.mrf.mxu2 }
 0x2f9   : > { %vm17340_vm3 = vcmask 64512   ;;  %v4293_v60 = vsel %vm12431_vm6, %v4245_v18, 0.0  ;;  %v4439_v62 = vld [vmem:[#allocation2 + $0x61] sm:$0xff]  ;;  %v803_v40 = vshrl.u32 %v12435_v28, 16  ;;  %v812_v1 = vadd.s32 %v811_v53, %v801_v54 }
 0x2fa   : > { %v12482_v4 = vsel %vm17340_vm3, %v17339_v19, %v3647_v0  ;;  %vm17341_vm11 = vmmov %vm17340_vm3  ;;  %v1950_v42 = vsel %vm12468_vm15, %v1902_v22, %v12429_v37  ;;  %4595 = vrot.lane.b32.xlu0 %v4439_v62, %s10045_s12  ;;  %v1903_v2 = vadd.s32 24, %v12440_v30  ;;  %v828_v38 = vmul.u32 43690, %v823_v21 }
 0x2fb   : > { %4341 = vst.msk [vmem:[#allocation2 + $0x69] sm:$0xff] %vm17341_vm11, %v4293_v60  ;;  %v829_v31 = vshll.u32 %v826_v5, 16  ;;  %v4146_v41 = vadd.f32 %v4024_v49, %v17342_v15  ;;  %vm17343_vm2 = vcmp.ne.s32.totalorder %v12440_v30, 0  ;;  %v831_v37 = vshll.u32 %v12478_v52, 16 }
 0x2fc   : > { %vm12498_vm1 = vmand %vm1807_vm5, %vm17343_vm2  ;;  %v851_v22 = vand.u32 65535, %v12476_v11  ;;  %v786_v54 = vmul.u32 24, %v785_v47  ;;  %v852_v56 = vshrl.u32 %v12476_v11, 16  ;;  %vm1808_vm11 = vcmp.lt.s32.totalorder %v12473_v58, 0 }
 0x2fd   : > { %vm833_vm15 = vc.u32 %v825_v3, %v829_v31  ;;  %v835_v0 = vadd.s32 %v829_v31, %v825_v3  ;;  %v4198_v50 = vadd.f32 %v12023_v32, %v4146_v41  ;;  %v813_v21 = vadd.s32 %v812_v1, %v803_v40 }
 0x2fe   : > { %v834_v18 = vsel %vm833_vm15, 1, %v17230_v36  ;;  %vm12509_vm5 = vcmp.lt.s32.totalorder %v1950_v42, 16  ;;  %v17346_v53 = vmov 0  ;;  %v1951_v47 = vsel %vm12498_vm1, %v1903_v2, %v12440_v30 }
 0x2ff   : > { %v17347_v53 = vsel %vm12509_vm5, 4294967295, %v17346_v53  ;;  %v12517_v3 = vadd.s32 24, %v12473_v58  ;;  %v836_v19 = vadd.s32 %v834_v18, %v828_v38  ;;  %v4246_v60 = vmax.f32 %v4198_v50, 0.0  ;;  %v17353_v38 = vld [vmem:[#allocation19_spill] sm:$0xff]  ;;  %v17359_v50 = vld [vmem:[#allocation18_spill] sm:$0xff] }
 0x300   : > { %17348 = vst [vmem:[#allocation56_spill] sm:$0xff] %v17347_v53  ;;  %vm17349_vm2 = vcmask 97280   ;;  %v830_v62 = vshrl.u32 %v826_v5, 16  ;;  %vm837_vm3 = vc.u32 %v835_v0, %v831_v37  ;;  %v855_v40 = vmul.u32 43690, %v851_v22  ;;  %v4027_v28 = vpop.f32.mrf.mxu2 }
 0x301   : > { %9626 = vmatmul.msk.f32.gmra.mxu2 %vm17349_vm2, %v12409_v16  ;;  %vm17350_vm15 = vcmp.ne.s32.totalorder %v12473_v58, 0  ;;  %v12528_v42 = vsub.s32 %v12363_v39, %v786_v54  ;;  %v838_v30 = vsel %vm837_vm3, 1, %v17230_v36  ;;  %v854_v49 = vmul.u32 43691, %v851_v22 }
 0x302   : > { %vm12523_vm6 = vmand %vm1808_vm11, %vm17350_vm15  ;;  %v856_v2 = vmul.u32 43691, %v852_v56  ;;  %vm17354_vm1 = vcmask 64512   ;;  %v4294_v16 = vsel %vm12509_vm5, %v4246_v60, 0.0  ;;  %v4440_v5 = vld [vmem:[#allocation2 + $0x69] sm:$0xff]  ;;  %v814_v15 = vshrl.u32 %v813_v21, 4 }
 0x303   : > { %v12533_v31 = vsel %vm17354_vm1, %v17353_v38, %v3645_v43  ;;  %v840_v41 = vadd.s32 %v838_v30, %v836_v19  ;;  %vm17355_vm11 = vmmov %vm17354_vm1  ;;  %4597 = vrot.lane.b32.xlu1 %v4440_v5, %s10045_s12  ;;  %v832_v39 = vshrl.u32 %v12478_v52, 16  ;;  %v857_v37 = vmul.u32 43690, %v852_v56 }
 0x304   : > { %4342 = vst.msk [vmem:[#allocation2 + $0x71] sm:$0xff] %vm17355_vm11, %v4294_v16  ;;  %v858_v22 = vshll.u32 %v855_v40, 16  ;;  %v12541_v54 = vadd.s32 144, %v11577_v7  ;;  %vm12543_vm3 = vcmp.lt.s32.totalorder %v1951_v47, 16  ;;  %v17356_v0 = vmov 0 }
 0x305   : > { %v17357_v0 = vsel %vm12543_vm3, 4294967295, %v17356_v0  ;;  %v4147_v18 = vadd.f32 %v4027_v28, %v17359_v50  ;;  %v1952_v21 = vsel %vm12523_vm6, %v12517_v3, %v12473_v58  ;;  %v860_v43 = vshll.u32 %v856_v2, 16 }
 0x306   : > { %17358 = vst [vmem:[#allocation57_spill] sm:$0xff] %v17357_v0  ;;  %vm1761_vm2 = vcmp.ne.s32.totalorder %v12528_v42, 0  ;;  %vm1809_vm15 = vcmp.lt.s32.totalorder %v12528_v42, 0  ;;  %v841_v52 = vadd.s32 %v840_v41, %v830_v62  ;;  %vm862_vm1 = vc.u32 %v854_v49, %v858_v22 }
 0x307   : > { %v4199_v56 = vadd.f32 %v12023_v32, %v4147_v18  ;;  %v815_v47 = vmul.u32 24, %v814_v15  ;;  %v863_v19 = vsel %vm862_vm1, 1, %v17230_v36  ;;  %v864_v60 = vadd.s32 %v858_v22, %v854_v49 }
 0x308   : > { %v842_v30 = vadd.s32 %v841_v52, %v832_v39  ;;  %v859_v38 = vshrl.u32 %v855_v40, 16  ;;  %v865_v16 = vadd.s32 %v863_v19, %v857_v37  ;;  %v880_v5 = vand.u32 65535, %v12541_v54  ;;  %v17362_v52 = vld [vmem:[#allocation30_spill] sm:$0xff] }
 0x309   : > { %v4247_v1 = vmax.f32 %v4199_v56, 0.0  ;;  %vm17360_vm6 = vcmask 97280   ;;  %vm866_vm11 = vc.u32 %v864_v60, %v860_v43  ;;  %v881_v58 = vshrl.u32 %v12541_v54, 16 }
 0x30a   : > { %9627 = vmatmul.msk.f32.gmra.mxu2 %vm17360_vm6, %v12234_v55  ;;  %v12561_v3 = vadd.s32 152, %v11577_v7  ;;  %v843_v32 = vshrl.u32 %v842_v30, 4  ;;  %v867_v62 = vsel %vm866_vm11, 1, %v17230_v36  ;;  %v883_v15 = vmul.u32 43691, %v880_v5  ;;  %v4030_v55 = vpop.f32.mrf.mxu2  ;;  %vm12579_vm6 = vmand %vm1809_vm15, %vm1761_vm2 }
 0x30b   : > { %v884_v49 = vmul.u32 43690, %v880_v5  ;;  %v4295_v40 = vsel %vm12543_vm3, %v4247_v1, 0.0  ;;  %v4441_v41 = vld [vmem:[#allocation2 + $0x71] sm:$0xff]  ;;  %v861_v28 = vshrl.u32 %v856_v2, 16  ;;  %v869_v39 = vadd.s32 %v867_v62, %v865_v16  ;;  %v12592_v5 = vld [vmem:[%s16885_s2] ss:$0 sm:$0xff] }
 0x30c   : > { %v12566_v37 = vmul.u32 43691, %v881_v58  ;;  %vm17361_vm1 = vcmask 64512   ;;  %4599 = vrot.lane.b32.xlu2 %v4441_v41, %s10045_s12  ;;  %v1905_v22 = vadd.s32 24, %v12528_v42  ;;  %v12572_v50 = vsub.s32 %v12398_v48, %v815_v47 }
 0x30d   : > { %4343 = vst.msk [vmem:[#allocation2 + $0x79] sm:$0xff] %vm17361_vm1, %v4295_v40  ;;  %v886_v18 = vmul.u32 43690, %v881_v58  ;;  %v887_v43 = vshll.u32 %v884_v49, 16  ;;  %v4148_v56 = vadd.f32 %v4030_v55, %v17362_v52  ;;  %v844_v19 = vmul.u32 24, %v843_v32 }
 0x30e   : > { %v870_v60 = vadd.s32 %v869_v39, %v859_v38  ;;  %v889_v30 = vshll.u32 %v12566_v37, 16  ;;  %vm12584_vm11 = vcmp.lt.s32.totalorder %v1952_v21, 16  ;;  %v17365_v16 = vmov 0  ;;  %v12597_v21 = vpop.permute.xlu2 %3648 }
 0x30f   : > { %v17366_v16 = vsel %vm12584_vm11, 4294967295, %v17365_v16  ;;  %vm891_vm1 = vc.u32 %v883_v15, %v887_v43  ;;  %v893_v48 = vadd.s32 %v887_v43, %v883_v15  ;;  %v909_v47 = vand.u32 65535, %v12561_v3 }
 0x310   : > { %17367 = vst [vmem:[#allocation38_spill] sm:$0xff] %v17366_v16  ;;  %v4200_v1 = vadd.f32 %v12592_v5, %v4148_v56  ;;  %v871_v58 = vadd.s32 %v870_v60, %v861_v28  ;;  %v892_v38 = vsel %vm891_vm1, 1, %v17230_v36  ;;  %v910_v32 = vshrl.u32 %v12561_v3, 16 }
 0x311   : > { %v1953_v62 = vsel %vm12579_vm6, %v1905_v22, %v12528_v42  ;;  %vm1762_vm2 = vcmp.ne.s32.totalorder %v12572_v50, 0  ;;  %vm1810_vm15 = vcmp.lt.s32.totalorder %v12572_v50, 0  ;;  %v894_v15 = vadd.s32 %v892_v38, %v886_v18  ;;  %v4477_v22 = vld [vmem:[#allocation2 + $0x12] sm:$0xff] }
 0x312   : > { %v4248_v40 = vmax.f32 %v4200_v1, 0.0  ;;  %vm17368_vm3 = vcmask 97280   ;;  %v12607_v41 = vsub.s32 %v12451_v33, %v844_v19  ;;  %v888_v28 = vshrl.u32 %v884_v49, 16  ;;  %v4033_v49 = vpop.f32.mrf.mxu2 }
 0x313   : > { %9628 = vmatmul.msk.f32.gmra.mxu2 %vm17368_vm3, %v12533_v31  ;;  %vm895_vm1 = vc.u32 %v893_v48, %v889_v30  ;;  %v912_v55 = vmul.u32 43691, %v909_v47  ;;  %v913_v43 = vmul.u32 43690, %v909_v47  ;;  %v12610_v52 = vmul.u32 43691, %v910_v32 }
 0x314   : > { %v896_v39 = vsel %vm895_vm1, 1, %v17230_v36  ;;  %v4296_v42 = vsel %vm12584_vm11, %v4248_v40, 0.0  ;;  %v4442_v18 = vld [vmem:[#allocation2 + $0x79] sm:$0xff]  ;;  %v12615_v56 = vadd.s32 24, %v12572_v50  ;;  %v872_v31 = vshrl.u32 %v871_v58, 4  ;;  %4767 = vrot.lane.b32.xlu2 %v4477_v22, %s10048_s9  ;;  %vm12628_vm1 = vmand %vm1810_vm15, %vm1762_vm2 }
 0x315   : > { %v898_v2 = vadd.s32 %v896_v39, %v894_v15  ;;  %vm17369_vm3 = vcmask 64512   ;;  %vm12618_vm6 = vcmp.lt.s32.totalorder %v1953_v62, 16  ;;  %v17370_v33 = vmov 0  ;;  %4601 = vrot.lane.b32.xlu0 %v4442_v18, %s10045_s12 }
 0x316   : > { %4344 = vst.msk [vmem:[#allocation2 + $0x81] sm:$0xff] %vm17369_vm3, %v4296_v42  ;;  %v17371_v33 = vsel %vm12618_vm6, 4294967295, %v17370_v33  ;;  %v890_v60 = vshrl.u32 %v12566_v37, 16  ;;  %v916_v30 = vshll.u32 %v913_v43, 16  ;;  %v918_v48 = vshll.u32 %v12610_v52, 16 }
 0x317   : > { %17372 = vst [vmem:[#allocation3_spill] sm:$0xff] %v17371_v33  ;;  %v4149_v47 = vadd.f32 %v4033_v49, %v11830_v13  ;;  %v899_v1 = vadd.s32 %v898_v2, %v888_v28  ;;  %v915_v58 = vmul.u32 43690, %v910_v32  ;;  %v12636_v38 = vadd.s32 160, %v11577_v7 }
 0x318   : > { %vm1811_vm11 = vcmp.lt.s32.totalorder %v12607_v41, 0  ;;  %vm920_vm2 = vc.u32 %v912_v55, %v916_v30  ;;  %v922_v62 = vadd.s32 %v916_v30, %v912_v55  ;;  %v1954_v37 = vsel %vm12628_vm1, %v12615_v56, %v12572_v50  ;;  %v4475_v55 = vld [vmem:[#allocation2 + $0x2] sm:$0xff] }
 0x319   : > { %v4201_v15 = vadd.f32 %v12592_v5, %v4149_v47  ;;  %v1907_v13 = vadd.s32 24, %v12607_v41  ;;  %v873_v40 = vmul.u32 24, %v872_v31  ;;  %v900_v32 = vadd.s32 %v899_v1, %v890_v60  ;;  %v3655_v31 = vpop.permute.xlu2 %3654 }
 0x31a   : > { %v921_v28 = vsel %vm920_vm2, 1, %v17230_v36  ;;  %vm924_vm15 = vc.u32 %v922_v62, %v918_v48  ;;  %v938_v39 = vand.u32 65535, %v12636_v38  ;;  %vm17375_vm3 = vcmask 97280  }
 0x31b   : > { %v4249_v42 = vmax.f32 %v4201_v15, 0.0  ;;  %9629 = vmatmul.msk.f32.gmra.mxu2 %vm17375_vm3, %v12482_v4  ;;  %vm17376_vm5 = vcmp.ne.s32.totalorder %v12607_v41, 0  ;;  %v917_v50 = vshrl.u32 %v913_v43, 16  ;;  %v923_v18 = vadd.s32 %v921_v28, %v915_v58  ;;  %v4036_v43 = vpop.f32.mrf.mxu2  ;;  %v3651_v15 = vpop.permute.xlu0 %3650 }
 0x31c   : > { %vm12652_vm7 = vmand %vm1811_vm11, %vm17376_vm5  ;;  %v925_v56 = vsel %vm924_vm15, 1, %v17230_v36  ;;  %v901_v2 = vshrl.u32 %v900_v32, 4  ;;  %v919_v49 = vshrl.u32 %v12610_v52, 16  ;;  %v939_v19 = vshrl.u32 %v12636_v38, 16  ;;  %v17380_v32 = vld [vmem:[#allocation53_spill] sm:$0xff] }
 0x31d   : > { %v941_v60 = vmul.u32 43691, %v938_v39  ;;  %v4297_v4 = vsel %vm12618_vm6, %v4249_v42, 0.0  ;;  %v4443_v30 = vld [vmem:[#allocation2 + $0x81] sm:$0xff]  ;;  %v927_v48 = vadd.s32 %v925_v56, %v923_v18  ;;  %v12661_v47 = vmul.u32 43690, %v938_v39  ;;  %4763 = vrot.lane.b32.xlu0 %v4475_v55, %s10048_s9  ;;  %v17381_v56 = vld [vmem:[#allocation4_spill] sm:$0xff] }
 0x31e   : > { %v12664_v1 = vadd.s32 168, %v11577_v7  ;;  %vm17379_vm5 = vcmask 64512   ;;  %4603 = vrot.lane.b32.xlu1 %v4443_v30, %s10045_s12  ;;  %v1955_v52 = vsel %vm12652_vm7, %v1907_v13, %v12607_v41  ;;  %v12673_v58 = vsub.s32 %v12476_v11, %v873_v40 }
 0x31f   : > { %4345 = vst.msk [vmem:[#allocation2 + $0x89] sm:$0xff] %vm17379_vm5, %v4297_v4  ;;  %v12675_v62 = vmul.u32 43691, %v939_v19  ;;  %v4150_v28 = vadd.f32 %v4036_v43, %v17380_v32  ;;  %v928_v39 = vadd.s32 %v927_v48, %v917_v50  ;;  %v944_v42 = vmul.u32 43690, %v939_v19  ;;  %vm17382_vm11 = vmmov %vm17379_vm5  ;;  %v17383_v4 = vld [vmem:[#allocation37_spill] sm:$0xff]  ;;  %v17385_v50 = vld [vmem:[#allocation52_spill] sm:$0xff] }
 0x320   : > { %v945_v18 = vshll.u32 %v12661_v47, 16  ;;  %v3808_v55 = vsel %vm17382_vm11, %v17381_v56, %v12597_v21  ;;  %vm17384_vm1 = vmmov %vm17379_vm5  ;;  %v902_v41 = vmul.u32 24, %v901_v2  ;;  %v967_v11 = vand.u32 65535, %v12664_v1 }
 0x321   : > { %v12684_v22 = vsel %vm17384_vm1, %v17383_v4, %v3655_v31  ;;  %v4202_v13 = vadd.f32 %v12592_v5, %v4150_v28  ;;  %v929_v40 = vadd.s32 %v928_v39, %v919_v49  ;;  %v947_v30 = vshll.u32 %v12675_v62, 16  ;;  %vm17386_vm3 = vmmov %vm17384_vm1  ;;  %v4476_v49 = vld [vmem:[#allocation2 + $0xa] sm:$0xff] }
 0x322   : > { %vm949_vm7 = vc.u32 %v941_v60, %v945_v18  ;;  %v3809_v19 = vsel %vm17386_vm3, %v17385_v50, %v3651_v15  ;;  %vm12691_vm2 = vcmp.lt.s32.totalorder %v1954_v37, 16  ;;  %v17387_v48 = vmov 0 }
 0x323   : > { %v17388_v48 = vsel %vm12691_vm2, 4294967295, %v17387_v48  ;;  %vm12695_vm15 = vcmp.lt.s32.totalorder %v1955_v52, 16  ;;  %v17390_v21 = vmov 0  ;;  %v950_v31 = vsel %vm949_vm7, 1, %v17230_v36 }
 0x324   : > { %17389 = vst [vmem:[#allocation7_spill] sm:$0xff] %v17388_v48  ;;  %v17391_v21 = vsel %vm12695_vm15, 4294967295, %v17390_v21  ;;  %v4250_v2 = vmax.f32 %v4202_v13, 0.0  ;;  %vm17393_vm5 = vcmask 97280   ;;  %vm1764_vm11 = vcmp.ne.s32.totalorder %v12673_v58, 0 }
 0x325   : > { %17392 = vst [vmem:[#allocation10_spill] sm:$0xff] %v17391_v21  ;;  %9630 = vmatmul.msk.f32.gmra.mxu2 %vm17393_vm5, %v3808_v55  ;;  %v951_v43 = vadd.s32 %v945_v18, %v941_v60  ;;  %v952_v32 = vadd.s32 %v950_v31, %v944_v42  ;;  %vm1812_vm1 = vcmp.lt.s32.totalorder %v12673_v58, 0  ;;  %v968_v37 = vshrl.u32 %v12664_v1, 16  ;;  %v12709_v55 = vpop.permute.xlu2 %3660  ;;  %v4039_v60 = vpop.f32.mrf.mxu2 }
 0x326   : > { %v970_v15 = vmul.u32 43691, %v967_v11  ;;  %v971_v28 = vmul.u32 43690, %v967_v11  ;;  %v4298_v52 = vsel %vm12691_vm2, %v4250_v2, 0.0  ;;  %v4444_v39 = vld [vmem:[#allocation2 + $0x89] sm:$0xff]  ;;  %v12707_v56 = vsub.s32 %v12541_v54, %v902_v41  ;;  %4765 = vrot.lane.b32.xlu1 %v4476_v49, %s10048_s9  ;;  %v3653_v49 = vpop.permute.xlu1 %3652 }
 0x327   : > { %v930_v4 = vshrl.u32 %v929_v40, 4  ;;  %vm953_vm7 = vc.u32 %v951_v43, %v947_v30  ;;  %4346 = vst.msk [vmem:[#allocation2 + $0x91] sm:$0xff] %vm17386_vm3, %v4298_v52  ;;  %4605 = vrot.lane.b32.xlu2 %v4444_v39, %s10045_s12  ;;  %v946_v42 = vshrl.u32 %v12661_v47, 16  ;;  %v972_v11 = vmul.u32 43691, %v968_v37 }
 0x328   : > { %v954_v18 = vsel %vm953_vm7, 1, %v17230_v36  ;;  %v974_v13 = vshll.u32 %v971_v28, 16  ;;  %v4151_v54 = vadd.f32 %v4039_v60, %v11892_v29  ;;  %v1908_v41 = vadd.s32 24, %v12673_v58  ;;  %vm12724_vm7 = vmand %vm1812_vm1, %vm1764_vm11 }
 0x329   : > { %v956_v40 = vadd.s32 %v954_v18, %v952_v32  ;;  %v973_v30 = vmul.u32 43690, %v968_v37  ;;  %v948_v50 = vshrl.u32 %v12675_v62, 16  ;;  %v976_v31 = vshll.u32 %v972_v11, 16  ;;  %v17397_v18 = vld [vmem:[#allocation21_spill] sm:$0xff] }
 0x32a   : > { %vm978_vm5 = vc.u32 %v970_v15, %v974_v13  ;;  %v980_v2 = vadd.s32 %v974_v13, %v970_v15  ;;  %v4203_v43 = vadd.f32 %v12592_v5, %v4151_v54  ;;  %vm1765_vm3 = vcmp.ne.s32.totalorder %v12707_v56, 0 }
 0x32b   : > { %vm1813_vm2 = vcmp.lt.s32.totalorder %v12707_v56, 0  ;;  %v931_v29 = vmul.u32 24, %v930_v4  ;;  %v957_v62 = vadd.s32 %v956_v40, %v946_v42  ;;  %v975_v32 = vshrl.u32 %v971_v28, 16  ;;  %v4479_v28 = vld [vmem:[#allocation2 + $0x22] sm:$0xff]  ;;  %v4480_v40 = vld [vmem:[#allocation2 + $0x2a] sm:$0xff] }
 0x32c   : > { %v979_v37 = vsel %vm978_vm5, 1, %v17230_v36  ;;  %vm982_vm6 = vc.u32 %v980_v2, %v976_v31  ;;  %v4251_v15 = vmax.f32 %v4203_v43, 0.0  ;;  %vm17396_vm14 = vcmask 97280  }
 0x32d   : > { %9631 = vmatmul.msk.f32.gmra.mxu2 %vm17396_vm14, %v3809_v19  ;;  %v981_v52 = vadd.s32 %v979_v37, %v973_v30  ;;  %v983_v39 = vsel %vm982_vm6, 1, %v17230_v36  ;;  %v12734_v60 = vadd.s32 176, %v11577_v7  ;;  %vm17398_vm11 = vcmask 64512   ;;  %vm12750_vm14 = vmand %vm1813_vm2, %vm1765_vm3 }
 0x32e   : > { %v3810_v13 = vsel %vm17398_vm11, %v17397_v18, %v3653_v49  ;;  %v1956_v4 = vsel %vm12724_vm7, %v1908_v41, %v12673_v58  ;;  %v12742_v42 = vadd.s32 24, %v12707_v56  ;;  %v958_v54 = vadd.s32 %v957_v62, %v948_v50  ;;  %v4445_v30 = vld [vmem:[#allocation2 + $0x91] sm:$0xff]  ;;  %vm17401_vm6 = vmmov %vm17398_vm11  ;;  %v4042_v50 = vpop.f32.mrf.mxu2  ;;  %4771 = vrot.lane.b32.xlu1 %v4479_v28, %s10048_s9 }
 0x32f   : > { %v4299_v19 = vsel %vm12695_vm15, %v4251_v15, 0.0  ;;  %v977_v2 = vshrl.u32 %v972_v11, 16  ;;  %v985_v58 = vadd.s32 %v983_v39, %v981_v52  ;;  %v996_v41 = vand.u32 65535, %v12734_v60  ;;  %4773 = vrot.lane.b32.xlu2 %v4480_v40, %s10048_s9  ;;  %4607 = vrot.lane.b32.xlu0 %v4445_v30, %s10045_s12  ;;  %v12767_v39 = vpop.permute.xlu2 %3666 }
 0x330   : > { %4347 = vst.msk [vmem:[#allocation2 + $0x99] sm:$0xff] %vm17401_vm6, %v4299_v19  ;;  %v12759_v49 = vsub.s32 %v12561_v3, %v931_v29  ;;  %v959_v43 = vshrl.u32 %v958_v54, 4  ;;  %v997_v47 = vshrl.u32 %v12734_v60, 16  ;;  %v12763_v62 = vadd.s32 184, %v11577_v7 }
 0x331   : > { %v4152_v11 = vadd.f32 %v4042_v50, %v11909_v20  ;;  %v986_v37 = vadd.s32 %v985_v58, %v975_v32  ;;  %v999_v15 = vmul.u32 43691, %v996_v41  ;;  %v1000_v52 = vmul.u32 43690, %v996_v41 }
 0x332   : > { %vm12769_vm2 = vcmp.lt.s32.totalorder %v1956_v4, 16  ;;  %v17402_v18 = vmov 0  ;;  %v1957_v3 = vsel %vm12750_vm14, %v12742_v42, %v12707_v56  ;;  %v960_v29 = vmul.u32 24, %v959_v43  ;;  %v3659_v42 = vpop.permute.xlu1 %3658  ;;  %vm17406_vm14 = vmmov %vm17401_vm6 }
 0x333   : > { %v17403_v18 = vsel %vm12769_vm2, 4294967295, %v17402_v18  ;;  %v1001_v28 = vmul.u32 43691, %v997_v47  ;;  %v4204_v20 = vadd.f32 %v12592_v5, %v4152_v11  ;;  %v987_v54 = vadd.s32 %v986_v37, %v977_v2  ;;  %v4483_v11 = vld [vmem:[#allocation2 + $0x42] sm:$0xff] }
 0x334   : > { %17404 = vst [vmem:[#allocation31_spill] sm:$0xff] %v17403_v18  ;;  %v1002_v19 = vmul.u32 43690, %v997_v47  ;;  %v1003_v32 = vshll.u32 %v1000_v52, 16  ;;  %vm1766_vm1 = vcmp.ne.s32.totalorder %v12759_v49, 0  ;;  %v1025_v4 = vand.u32 65535, %v12763_v62 }
 0x335   : > { %v1005_v40 = vshll.u32 %v1001_v28, 16  ;;  %v1026_v30 = vshrl.u32 %v12763_v62, 16  ;;  %v4252_v58 = vmax.f32 %v4204_v20, 0.0  ;;  %vm17405_vm5 = vcmask 97280   ;;  %v4478_v20 = vld [vmem:[#allocation2 + $0x1a] sm:$0xff] }
 0x336   : > { %9632 = vmatmul.msk.f32.gmra.mxu2 %vm17405_vm5, %v3810_v13  ;;  %vm1814_vm7 = vcmp.lt.s32.totalorder %v12759_v49, 0  ;;  %vm1007_vm3 = vc.u32 %v999_v15, %v1003_v32  ;;  %v1009_v56 = vadd.s32 %v1003_v32, %v999_v15  ;;  %v12784_v31 = vadd.s32 24, %v12759_v49  ;;  %v4045_v15 = vpop.f32.mrf.mxu2  ;;  %vm17410_vm5 = vmmov %vm17406_vm14 }
 0x337   : > { %v988_v2 = vshrl.u32 %v987_v54, 4  ;;  %v1008_v41 = vsel %vm1007_vm3, 1, %v17230_v36  ;;  %v1028_v50 = vmul.u32 43691, %v1025_v4  ;;  %v4300_v43 = vsel %vm12769_vm2, %v4252_v58, 0.0  ;;  %v4446_v47 = vld [vmem:[#allocation2 + $0x99] sm:$0xff]  ;;  %4779 = vrot.lane.b32.xlu2 %v4483_v11, %s10048_s9  ;;  %vm12799_vm6 = vmand %vm1814_vm7, %vm1766_vm1  ;;  %4769 = vrot.lane.b32.xlu0 %v4478_v20, %s10048_s9 }
 0x338   : > { %v12790_v37 = vsub.s32 %v12636_v38, %v960_v29  ;;  %v1010_v13 = vadd.s32 %v1008_v41, %v1002_v19  ;;  %vm1011_vm11 = vc.u32 %v1009_v56, %v1005_v40  ;;  %4348 = vst.msk [vmem:[#allocation2 + $0xa1] sm:$0xff] %vm17406_vm14, %v4300_v43  ;;  %4609 = vrot.lane.b32.xlu1 %v4446_v47, %s10045_s12  ;;  %v1004_v38 = vshrl.u32 %v1000_v52, 16  ;;  %v17409_v40 = vld [vmem:[#allocation35_spill] sm:$0xff]  ;;  %v3657_v56 = vpop.permute.xlu0 %3656 }
 0x339   : > { %v1012_v29 = vsel %vm1011_vm11, 1, %v17230_v36  ;;  %v1029_v19 = vmul.u32 43690, %v1025_v4  ;;  %v12804_v32 = vmul.u32 43691, %v1026_v30  ;;  %v12808_v58 = vsel %vm17410_vm5, %v17409_v40, %v3659_v42  ;;  %v12823_v40 = vpop.permute.xlu2 %3672 }
 0x33a   : > { %vm12810_vm3 = vcmp.lt.s32.totalorder %v1957_v3, 16  ;;  %v17411_v41 = vmov 0  ;;  %v4153_v43 = vadd.f32 %v4045_v15, %v11922_v35  ;;  %v1014_v47 = vadd.s32 %v1012_v29, %v1010_v13  ;;  %v4482_v29 = vld [vmem:[#allocation2 + $0x3a] sm:$0xff] }
 0x33b   : > { %v17412_v41 = vsel %vm12810_vm3, 4294967295, %v17411_v41  ;;  %v989_v52 = vmul.u32 24, %v988_v2  ;;  %v1006_v11 = vshrl.u32 %v1001_v28, 16  ;;  %v1031_v18 = vmul.u32 43690, %v1026_v30 }
 0x33c   : > { %17413 = vst [vmem:[#allocation19_spill] sm:$0xff] %v17412_v41  ;;  %v1032_v4 = vshll.u32 %v1029_v19, 16  ;;  %v4205_v21 = vadd.f32 %v12592_v5, %v4153_v43  ;;  %v1958_v42 = vsel %vm12799_vm6, %v12784_v31, %v12759_v49  ;;  %vm1767_vm1 = vcmp.ne.s32.totalorder %v12790_v37, 0 }
 0x33d   : > { %v1034_v3 = vshll.u32 %v12804_v32, 16  ;;  %vm1815_vm7 = vcmp.lt.s32.totalorder %v12790_v37, 0  ;;  %v12827_v35 = vadd.s32 24, %v12790_v37  ;;  %v1015_v28 = vadd.s32 %v1014_v47, %v1004_v38 }
 0x33e   : > { %vm1036_vm11 = vc.u32 %v1028_v50, %v1032_v4  ;;  %v4253_v30 = vmax.f32 %v4205_v21, 0.0  ;;  %vm17414_vm14 = vcmask 97280   ;;  %v1038_v49 = vadd.s32 %v1032_v4, %v1028_v50  ;;  %vm12844_vm6 = vmand %vm1815_vm7, %vm1767_vm1 }
 0x33f   : > { %9633 = vmatmul.msk.f32.gmra.mxu2 %vm17414_vm14, %v12684_v22  ;;  %v1037_v2 = vsel %vm1036_vm11, 1, %v17230_v36  ;;  %v12833_v31 = vadd.s32 192, %v11577_v7  ;;  %v12836_v13 = vsub.s32 %v12664_v1, %v989_v52  ;;  %v1016_v15 = vadd.s32 %v1015_v28, %v1006_v11  ;;  %v4447_v21 = vld [vmem:[#allocation2 + $0xa1] sm:$0xff] }
 0x340   : > { %v1033_v20 = vshrl.u32 %v1029_v19, 16  ;;  %v1039_v54 = vadd.s32 %v1037_v2, %v1031_v18  ;;  %v4301_v38 = vsel %vm12810_vm3, %v4253_v30, 0.0  ;;  %v1035_v50 = vshrl.u32 %v12804_v32, 16  ;;  %v4048_v18 = vpop.f32.mrf.mxu2  ;;  %4777 = vrot.lane.b32.xlu1 %v4482_v29, %s10048_s9  ;;  %4611 = vrot.lane.b32.xlu2 %v4447_v21, %s10045_s12  ;;  %v4481_v19 = vld [vmem:[#allocation2 + $0x32] sm:$0xff]  ;;  %v12870_v29 = vpop.permute.xlu0 %3662 }
 0x341   : > { %vm1040_vm5 = vc.u32 %v1038_v49, %v1034_v3  ;;  %v1054_v1 = vand.u32 65535, %v12833_v31  ;;  %vm17417_vm11 = vcmask 64512   ;;  %v1017_v43 = vshrl.u32 %v1016_v15, 4  ;;  %4775 = vrot.lane.b32.xlu0 %v4481_v19, %s10048_s9  ;;  %v17418_v30 = vld [vmem:[#allocation40_spill] sm:$0xff] }
 0x342   : > { %4349 = vst.msk [vmem:[#allocation2 + $0xa9] sm:$0xff] %vm17417_vm11, %v4301_v38  ;;  %v1041_v47 = vsel %vm1040_vm5, 1, %v17230_v36  ;;  %v1055_v52 = vshrl.u32 %v12833_v31, 16  ;;  %v12856_v11 = vadd.s32 200, %v11577_v7  ;;  %v4154_v32 = vadd.f32 %v4048_v18, %v11938_v46  ;;  %vm17419_vm1 = vmmov %vm17417_vm11 }
 0x343   : > { %v1043_v4 = vadd.s32 %v1041_v47, %v1039_v54  ;;  %v1057_v3 = vmul.u32 43691, %v1054_v1  ;;  %v1058_v28 = vmul.u32 43690, %v1054_v1  ;;  %v3812_v2 = vsel %vm17419_vm1, %v17418_v30, %v3657_v56 }
 0x344   : > { %vm12862_vm7 = vcmp.lt.s32.totalorder %v1958_v42, 16  ;;  %v17420_v49 = vmov 0  ;;  %v1959_v15 = vsel %vm12844_vm6, %v12827_v35, %v12790_v37  ;;  %v1059_v38 = vmul.u32 43691, %v1055_v52  ;;  %v12876_v35 = vpop.permute.xlu2 %3678 }
 0x345   : > { %v17421_v49 = vsel %vm12862_vm7, 4294967295, %v17420_v49  ;;  %v4206_v46 = vadd.f32 %v12592_v5, %v4154_v32  ;;  %v1044_v54 = vadd.s32 %v1043_v4, %v1033_v20  ;;  %v1060_v21 = vmul.u32 43690, %v1055_v52  ;;  %v4485_v32 = vld [vmem:[#allocation2 + $0x52] sm:$0xff]  ;;  %v4486_v4 = vld [vmem:[#allocation2 + $0x5a] sm:$0xff] }
 0x346   : > { %17422 = vst [vmem:[#allocation18_spill] sm:$0xff] %v17421_v49  ;;  %v1061_v1 = vshll.u32 %v1058_v28, 16  ;;  %vm1768_vm14 = vcmp.ne.s32.totalorder %v12836_v13, 0  ;;  %v1018_v56 = vmul.u32 24, %v1017_v43  ;;  %v1063_v42 = vshll.u32 %v1059_v38, 16 }
 0x347   : > { %v1083_v18 = vand.u32 65535, %v12856_v11  ;;  %v4254_v19 = vmax.f32 %v4206_v46, 0.0  ;;  %vm17423_vm5 = vcmask 97280   ;;  %v1045_v47 = vadd.s32 %v1044_v54, %v1035_v50 }
 0x348   : > { %9634 = vmatmul.msk.f32.gmra.mxu2 %vm17423_vm5, %v3812_v2  ;;  %vm1065_vm11 = vc.u32 %v1057_v3, %v1061_v1  ;;  %v1067_v37 = vadd.s32 %v1061_v1, %v1057_v3  ;;  %vm1816_vm6 = vcmp.lt.s32.totalorder %v12836_v13, 0  ;;  %v1062_v22 = vshrl.u32 %v1058_v28, 16  ;;  %v4051_v50 = vpop.f32.mrf.mxu2  ;;  %4783 = vrot.lane.b32.xlu1 %v4485_v32, %s10048_s9  ;;  %v3665_v32 = vpop.permute.xlu1 %3664 }
 0x349   : > { %v1066_v20 = vsel %vm1065_vm11, 1, %v17230_v36  ;;  %v1084_v52 = vshrl.u32 %v12856_v11, 16  ;;  %v4302_v43 = vsel %vm12862_vm7, %v4254_v19, 0.0  ;;  %v4448_v30 = vld [vmem:[#allocation2 + $0xa9] sm:$0xff]  ;;  %v1046_v46 = vshrl.u32 %v1045_v47, 4  ;;  %4785 = vrot.lane.b32.xlu2 %v4486_v4, %s10048_s9  ;;  %vm12894_vm11 = vmand %vm1816_vm6, %vm1768_vm14 }
 0x34a   : > { %v1068_v2 = vadd.s32 %v1066_v20, %v1060_v21  ;;  %vm1069_vm1 = vc.u32 %v1067_v37, %v1063_v42  ;;  %vm17424_vm5 = vcmask 64512   ;;  %v1912_v3 = vadd.s32 24, %v12836_v13  ;;  %4613 = vrot.lane.b32.xlu0 %v4448_v30, %s10045_s12  ;;  %v4484_v21 = vld [vmem:[#allocation2 + $0x4a] sm:$0xff] }
 0x34b   : > { %4350 = vst.msk [vmem:[#allocation2 + $0xb1] sm:$0xff] %vm17424_vm5, %v4302_v43  ;;  %v1070_v28 = vsel %vm1069_vm1, 1, %v17230_v36  ;;  %v1086_v54 = vmul.u32 43691, %v1083_v18  ;;  %v1087_v1 = vmul.u32 43690, %v1083_v18  ;;  %v4155_v19 = vadd.f32 %v4051_v50, %v11953_v57 }
 0x34c   : > { %v12899_v42 = vsub.s32 %v12734_v60, %v1018_v56  ;;  %v1047_v47 = vmul.u32 24, %v1046_v46  ;;  %v1072_v37 = vadd.s32 %v1070_v28, %v1068_v2  ;;  %vm12901_vm1 = vcmp.lt.s32.totalorder %v1959_v15, 16  ;;  %v12912_v46 = vpop.permute.xlu0 %3668 }
 0x34d   : > { %v17427_v20 = vmov 0  ;;  %v1064_v57 = vshrl.u32 %v1059_v38, 16  ;;  %v1088_v18 = vmul.u32 43691, %v1084_v52  ;;  %v1090_v43 = vshll.u32 %v1087_v1, 16 }
 0x34e   : > { %v17428_v20 = vsel %vm12901_vm1, 4294967295, %v17427_v20  ;;  %v4207_v4 = vadd.f32 %v12592_v5, %v4155_v19  ;;  %v12907_v30 = vsub.s32 %v12763_v62, %v1047_v47  ;;  %v1073_v50 = vadd.s32 %v1072_v37, %v1062_v22  ;;  %v12918_v22 = vpop.permute.xlu2 %4575 }
 0x34f   : > { %17429 = vst [vmem:[#allocation30_spill] sm:$0xff] %v17428_v20  ;;  %v1089_v49 = vmul.u32 43690, %v1084_v52  ;;  %v1960_v60 = vsel %vm12894_vm11, %v1912_v3, %v12836_v13  ;;  %v1092_v56 = vshll.u32 %v1088_v18, 16  ;;  %vm1094_vm14 = vc.u32 %v1086_v54, %v1090_v43 }
 0x350   : > { %v1096_v15 = vadd.s32 %v1090_v43, %v1086_v54  ;;  %v4255_v38 = vmax.f32 %v4207_v4, 0.0  ;;  %vm17430_vm6 = vcmask 97280   ;;  %vm1769_vm5 = vcmp.ne.s32.totalorder %v12899_v42, 0  ;;  %v4489_v54 = vld [vmem:[#allocation2 + $0x72] sm:$0xff] }
 0x351   : > { %9635 = vmatmul.msk.f32.gmra.mxu2 %vm17430_vm6, %v12808_v58  ;;  %v1091_v62 = vshrl.u32 %v1087_v1, 16  ;;  %v1074_v52 = vadd.s32 %v1073_v50, %v1064_v57  ;;  %v1095_v2 = vsel %vm1094_vm14, 1, %v17230_v36  ;;  %v12922_v13 = vadd.s32 208, %v11577_v7  ;;  %v4054_v1 = vpop.f32.mrf.mxu2  ;;  %4791 = vrot.lane.b32.xlu2 %v4489_v54, %s10048_s9 }
 0x352   : > { %vm1098_vm11 = vc.u32 %v1096_v15, %v1092_v56  ;;  %v4303_v3 = vsel %vm12901_vm1, %v4255_v38, 0.0  ;;  %v4449_v28 = vld [vmem:[#allocation2 + $0xb1] sm:$0xff]  ;;  %v1097_v58 = vadd.s32 %v1095_v2, %v1089_v49  ;;  %vm17431_vm7 = vcmask 64512   ;;  %4781 = vrot.lane.b32.xlu0 %v4484_v21, %s10048_s9 }
 0x353   : > { %v1099_v19 = vsel %vm1098_vm11, 1, %v17230_v36  ;;  %4351 = vst.msk [vmem:[#allocation2 + $0xb9] sm:$0xff] %vm17431_vm7, %v4303_v3  ;;  %4615 = vrot.lane.b32.xlu1 %v4449_v28, %s10045_s12  ;;  %v1075_v47 = vshrl.u32 %v1074_v52, 4  ;;  %v1112_v37 = vand.u32 65535, %v12922_v13  ;;  %v1113_v57 = vshrl.u32 %v12922_v13, 16  ;;  %v17435_v2 = vld [vmem:[#allocation8_spill] sm:$0xff] }
 0x354   : > { %v4156_v43 = vadd.f32 %v4054_v1, %v11961_v17  ;;  %v1913_v49 = vadd.s32 24, %v12899_v42  ;;  %v1093_v4 = vshrl.u32 %v1088_v18, 16  ;;  %v1101_v50 = vadd.s32 %v1099_v19, %v1097_v58 }
 0x355   : > { %vm17432_vm7 = vcmp.lt.s32.totalorder %v12899_v42, 0  ;;  %v1914_v15 = vadd.s32 24, %v12907_v30  ;;  %v1115_v38 = vmul.u32 43691, %v1112_v37  ;;  %v12946_v52 = vmul.u32 43690, %v1112_v37 }
 0x356   : > { %vm12941_vm11 = vmand %vm17432_vm7, %vm1769_vm5  ;;  %v12948_v17 = vmul.u32 43691, %v1113_v57  ;;  %vm17436_vm14 = vcmask 64512   ;;  %vm12953_vm6 = vcmp.lt.s32.totalorder %v1960_v60, 16  ;;  %v17437_v3 = vmov 0  ;;  %v17444_v60 = vld [vmem:[#allocation17_spill] sm:$0xff] }
 0x357   : > { %v3814_v18 = vsel %vm17436_vm14, %v17435_v2, %v12709_v55  ;;  %v17438_v3 = vsel %vm12953_vm6, 4294967295, %v17437_v3  ;;  %v4208_v28 = vadd.f32 %v12592_v5, %v4156_v43  ;;  %vm17440_vm5 = vcmp.ne.s32.totalorder %v12907_v30, 0  ;;  %v12974_v43 = vpop.permute.xlu1 %3670 }
 0x358   : > { %17439 = vst [vmem:[#allocation53_spill] sm:$0xff] %v17438_v3  ;;  %vm17441_vm7 = vcmp.lt.s32.totalorder %v12907_v30, 0  ;;  %v1102_v58 = vadd.s32 %v1101_v50, %v1091_v62  ;;  %v1076_v19 = vmul.u32 24, %v1075_v47  ;;  %v1118_v1 = vmul.u32 43690, %v1113_v57  ;;  %v17446_v62 = vld [vmem:[#allocation34_spill] sm:$0xff]  ;;  %v12987_v50 = vpop.permute.xlu0 %3674  ;;  %v17464_v3 = vld [vmem:[#allocation9_spill] sm:$0xff] }
 0x359   : > { %vm12962_vm1 = vmand %vm17441_vm7, %vm17440_vm5  ;;  %v1119_v21 = vshll.u32 %v12946_v52, 16  ;;  %v12968_v55 = vadd.s32 216, %v11577_v7  ;;  %v12972_v37 = vsel %vm17436_vm14, %v17444_v60, %v3665_v32  ;;  %v4256_v2 = vmax.f32 %v4208_v28, 0.0 }
 0x35a   : > { %vm17445_vm3 = vcmask 97280   ;;  %v1103_v20 = vadd.s32 %v1102_v58, %v1093_v4  ;;  %v1121_v41 = vshll.u32 %v12948_v17, 16  ;;  %vm17447_vm5 = vmmov %vm17436_vm14  ;;  %v1961_v57 = vsel %vm12941_vm11, %v1913_v49, %v12899_v42  ;;  %v4450_v28 = vld [vmem:[#allocation2 + $0xb9] sm:$0xff]  ;;  %v4057_v42 = vpop.f32.mrf.mxu2 }
 0x35b   : > { %9636 = vmatmul.msk.f32.gmra.mxu2 %vm17445_vm3, %v3814_v18  ;;  %v3815_v47 = vsel %vm17447_vm5, %v17446_v62, %v12870_v29  ;;  %v1962_v32 = vsel %vm12962_vm1, %v1914_v15, %v12907_v30  ;;  %vm1123_vm7 = vc.u32 %v1115_v38, %v1119_v21  ;;  %v4304_v4 = vsel %vm12953_vm6, %v4256_v2, 0.0  ;;  %v4488_v18 = vld [vmem:[#allocation2 + $0x6a] sm:$0xff]  ;;  %v12992_v62 = vpop.permute.xlu2 %4581  ;;  %vm17448_vm3 = vmmov %vm17447_vm5  ;;  %4617 = vrot.lane.b32.xlu2 %v4450_v28, %s10045_s12  ;;  %v4487_v30 = vld [vmem:[#allocation2 + $0x62] sm:$0xff] }
 0x35c   : > { %v1104_v58 = vshrl.u32 %v1103_v20, 4  ;;  %v1124_v60 = vsel %vm1123_vm7, 1, %v17230_v36  ;;  %v1125_v29 = vadd.s32 %v1119_v21, %v1115_v38  ;;  %4352 = vst.msk [vmem:[#allocation2 + $0xc1] sm:$0xff] %vm17448_vm3, %v4304_v4  ;;  %4789 = vrot.lane.b32.xlu1 %v4488_v18, %s10048_s9  ;;  %v12998_v49 = vsub.s32 %v12833_v31, %v1076_v19  ;;  %4787 = vrot.lane.b32.xlu0 %v4487_v30, %s10048_s9 }
 0x35d   : > { %v1126_v56 = vadd.s32 %v1124_v60, %v1118_v1  ;;  %v1141_v15 = vand.u32 65535, %v12968_v55  ;;  %v1142_v20 = vshrl.u32 %v12968_v55, 16  ;;  %v4157_v38 = vadd.f32 %v4057_v42, %v12035_v25 }
 0x35e   : > { %v1105_v54 = vmul.u32 24, %v1104_v58  ;;  %v1120_v21 = vshrl.u32 %v12946_v52, 16  ;;  %vm1127_vm1 = vc.u32 %v1125_v29, %v1121_v41  ;;  %vm13008_vm11 = vcmp.lt.s32.totalorder %v1961_v57, 16 }
 0x35f   : > { %v1128_v2 = vsel %vm1127_vm1, 1, %v17230_v36  ;;  %v1144_v4 = vmul.u32 43691, %v1141_v15  ;;  %v1145_v18 = vmul.u32 43690, %v1141_v15  ;;  %v13006_v28 = vmul.u32 43691, %v1142_v20  ;;  %v13028_v15 = vpop.permute.xlu1 %3676 }
 0x360   : > { %v17449_v31 = vmov 0  ;;  %v4209_v19 = vadd.f32 %v12592_v5, %v4157_v38  ;;  %v13014_v25 = vsub.s32 %v12856_v11, %v1105_v54  ;;  %v1130_v1 = vadd.s32 %v1128_v2, %v1126_v56 }
 0x361   : > { %v17450_v31 = vsel %vm13008_vm11, 4294967295, %v17449_v31  ;;  %vm13016_vm14 = vcmp.lt.s32.totalorder %v1962_v32, 16  ;;  %v17452_v58 = vmov 0  ;;  %v1122_v41 = vshrl.u32 %v12948_v17, 16  ;;  %v4491_v32 = vld [vmem:[#allocation2 + $0x82] sm:$0xff]  ;;  %v13030_v17 = vpop.permute.xlu0 %4571 }
 0x362   : > { %17451 = vst [vmem:[#allocation4_spill] sm:$0xff] %v17450_v31  ;;  %v17453_v58 = vsel %vm13016_vm14, 4294967295, %v17452_v58  ;;  %v1147_v52 = vmul.u32 43690, %v1142_v20  ;;  %v1148_v60 = vshll.u32 %v1145_v18, 16  ;;  %v4257_v57 = vmax.f32 %v4209_v19, 0.0 }
 0x363   : > { %17454 = vst [vmem:[#allocation37_spill] sm:$0xff] %v17453_v58  ;;  %vm17455_vm7 = vcmask 97280   ;;  %v13025_v29 = vadd.s32 24, %v12998_v49  ;;  %v1150_v11 = vshll.u32 %v13006_v28, 16  ;;  %v1131_v42 = vadd.s32 %v1130_v1, %v1120_v21  ;;  %v4451_v38 = vld [vmem:[#allocation2 + $0xc1] sm:$0xff]  ;;  %v13039_v21 = vpop.permute.xlu2 %4587 }
 0x364   : > { %9637 = vmatmul.msk.f32.gmra.mxu2 %vm17455_vm7, %v3815_v47  ;;  %v1149_v30 = vshrl.u32 %v1145_v18, 16  ;;  %vm1152_vm1 = vc.u32 %v1144_v4, %v1148_v60  ;;  %v1154_v56 = vadd.s32 %v1148_v60, %v1144_v4  ;;  %v4305_v20 = vsel %vm13008_vm11, %v4257_v57, 0.0  ;;  %v4492_v47 = vld [vmem:[#allocation2 + $0x8a] sm:$0xff]  ;;  %v4060_v4 = vpop.f32.mrf.mxu2  ;;  %4795 = vrot.lane.b32.xlu1 %v4491_v32, %s10048_s9 }
 0x365   : > { %v1153_v54 = vsel %vm1152_vm1, 1, %v17230_v36  ;;  %v13037_v2 = vadd.s32 224, %v11577_v7  ;;  %4353 = vst.msk [vmem:[#allocation2 + $0xc9] sm:$0xff] %vm17448_vm3, %v4305_v20  ;;  %4797 = vrot.lane.b32.xlu2 %v4492_v47, %s10048_s9  ;;  %v1132_v18 = vadd.s32 %v1131_v42, %v1122_v41  ;;  %v13046_v1 = vadd.s32 232, %v11577_v7  ;;  %4619 = vrot.lane.b32.xlu0 %v4451_v38, %s10045_s12 }
 0x366   : > { %v1155_v19 = vadd.s32 %v1153_v54, %v1147_v52  ;;  %v4158_v60 = vadd.f32 %v4060_v4, %v12156_v59  ;;  %vm1156_vm1 = vc.u32 %v1154_v56, %v1150_v11  ;;  %v1916_v32 = vadd.s32 24, %v13014_v25 }
 0x367   : > { %v1170_v57 = vand.u32 65535, %v13037_v2  ;;  %v1171_v20 = vshrl.u32 %v13037_v2, 16  ;;  %v1133_v31 = vshrl.u32 %v1132_v18, 4  ;;  %v1157_v47 = vsel %vm1156_vm1, 1, %v17230_v36 }
 0x368   : > { %v1199_v41 = vand.u32 65535, %v13046_v1  ;;  %v4210_v52 = vadd.f32 %v12592_v5, %v4158_v60  ;;  %vm17456_vm3 = vcmp.ne.s32.totalorder %v12998_v49, 0  ;;  %vm17457_vm5 = vcmp.lt.s32.totalorder %v12998_v49, 0 }
 0x369   : > { %vm13060_vm7 = vmand %vm17457_vm5, %vm17456_vm3  ;;  %v1151_v11 = vshrl.u32 %v13006_v28, 16  ;;  %v1159_v42 = vadd.s32 %v1157_v47, %v1155_v19  ;;  %v1200_v56 = vshrl.u32 %v13046_v1, 16  ;;  %vm17460_vm11 = vcmp.ne.s32.totalorder %v13014_v25, 0 }
 0x36a   : > { %vm17461_vm1 = vcmp.lt.s32.totalorder %v13014_v25, 0  ;;  %v1134_v54 = vmul.u32 24, %v1133_v31  ;;  %v1173_v4 = vmul.u32 43691, %v1170_v57  ;;  %v13074_v18 = vmul.u32 43690, %v1170_v57 }
 0x36b   : > { %vm13070_vm6 = vmand %vm17461_vm1, %vm17460_vm11  ;;  %v13076_v60 = vmul.u32 43691, %v1171_v20  ;;  %vm17465_vm5 = vcmask 64512   ;;  %v4258_v47 = vmax.f32 %v4210_v52, 0.0  ;;  %vm17467_vm11 = vcmask 97280   ;;  %v4490_v52 = vld [vmem:[#allocation2 + $0x7a] sm:$0xff] }
 0x36c   : > { %v3817_v28 = vsel %vm17465_vm5, %v17464_v3, %v12767_v39  ;;  %vm17466_vm3 = vmmov %vm17465_vm5  ;;  %9638 = vmatmul.msk.f32.gmra.mxu2 %vm17467_vm11, %v12972_v37  ;;  %v1160_v48 = vadd.s32 %v1159_v42, %v1149_v30  ;;  %v1963_v31 = vsel %vm13060_vm7, %v13025_v29, %v12998_v49  ;;  %v1176_v57 = vmul.u32 43690, %v1171_v20  ;;  %v13095_v39 = vpop.permute.xlu1 %4573  ;;  %v4495_v3 = vld [vmem:[#allocation2 + $0xa2] sm:$0xff]  ;;  %v13105_v29 = vpop.permute.xlu2 %4593 }
 0x36d   : > { %v13084_v19 = vsel %vm17466_vm3, %v11870_v45, %v12912_v46  ;;  %v1177_v33 = vshll.u32 %v13074_v18, 16  ;;  %v13093_v16 = vmul.u32 43690, %v1199_v41  ;;  %v4306_v45 = vsel %vm13016_vm14, %v4258_v47, 0.0  ;;  %v4452_v46 = vld [vmem:[#allocation2 + $0xc9] sm:$0xff]  ;;  %vm17468_vm7 = vmmov %vm17466_vm3  ;;  %v4063_v20 = vpop.f32.mrf.mxu2  ;;  %4803 = vrot.lane.b32.xlu2 %v4495_v3, %s10048_s9  ;;  %4793 = vrot.lane.b32.xlu0 %v4490_v52, %s10048_s9 }
 0x36e   : > { %v1964_v37 = vsel %vm13070_vm6, %v1916_v32, %v13014_v25  ;;  %v13103_v30 = vsub.s32 %v12922_v13, %v1134_v54  ;;  %v1161_v49 = vadd.s32 %v1160_v48, %v1151_v11  ;;  %4354 = vst.msk [vmem:[#allocation2 + $0xd1] sm:$0xff] %vm17468_vm7, %v4306_v45  ;;  %4621 = vrot.lane.b32.xlu1 %v4452_v46, %s10045_s12  ;;  %v1179_v59 = vshll.u32 %v13076_v60, 16  ;;  %v17469_v25 = vld [vmem:[#allocation28_spill] sm:$0xff]  ;;  %v13116_v54 = vpop.permute.xlu0 %4577 }
 0x36f   : > { %vm1181_vm1 = vc.u32 %v1173_v4, %v1177_v33  ;;  %v1202_v42 = vmul.u32 43691, %v1199_v41  ;;  %v13111_v38 = vmul.u32 43691, %v1200_v56  ;;  %v4159_v13 = vadd.f32 %v4063_v20, %v17469_v25 }
 0x370   : > { %v1162_v48 = vshrl.u32 %v1161_v49, 4  ;;  %v1182_v32 = vsel %vm1181_vm1, 1, %v17230_v36  ;;  %v1183_v11 = vadd.s32 %v1177_v33, %v1173_v4  ;;  %vm13118_vm6 = vcmp.lt.s32.totalorder %v1963_v31, 16 }
 0x371   : > { %v17470_v47 = vmov 0  ;;  %v1178_v45 = vshrl.u32 %v13074_v18, 16  ;;  %v1184_v46 = vadd.s32 %v1182_v32, %v1176_v57  ;;  %v1206_v41 = vshll.u32 %v13093_v16, 16 }
 0x372   : > { %v17471_v47 = vsel %vm13118_vm6, 4294967295, %v17470_v47  ;;  %v4211_v3 = vadd.f32 %v12592_v5, %v4159_v13  ;;  %v1163_v20 = vmul.u32 24, %v1162_v48  ;;  %v1180_v49 = vshrl.u32 %v13076_v60, 16 }
 0x373   : > { %17472 = vst [vmem:[#allocation52_spill] sm:$0xff] %v17471_v47  ;;  %vm13127_vm3 = vcmp.lt.s32.totalorder %v1964_v37, 16  ;;  %v17473_v33 = vmov 0  ;;  %vm1821_vm11 = vcmp.lt.s32.totalorder %v13103_v30, 0  ;;  %vm1185_vm7 = vc.u32 %v1183_v11, %v1179_v59  ;;  %v4494_v59 = vld [vmem:[#allocation2 + $0x9a] sm:$0xff]  ;;  %v4497_v47 = vld [vmem:[#allocation2 + $0xb2] sm:$0xff] }
 0x374   : > { %v17474_v33 = vsel %vm13127_vm3, 4294967295, %v17473_v33  ;;  %v1205_v4 = vmul.u32 43690, %v1200_v56  ;;  %v1208_v18 = vshll.u32 %v13111_v38, 16  ;;  %v4259_v31 = vmax.f32 %v4211_v3, 0.0  ;;  %v13148_v48 = vpop.permute.xlu2 %4599  ;;  %v13163_v3 = vpop.permute.xlu1 %4579  ;;  %v5004_v11 = vld [vmem:[%s16886_s3] sm:$0xff] }
 0x375   : > { %17475 = vst [vmem:[#allocation21_spill] sm:$0xff] %v17474_v33  ;;  %vm17476_vm1 = vcmask 97280   ;;  %v13135_v5 = vsub.s32 %v12968_v55, %v1163_v20  ;;  %v1186_v57 = vsel %vm1185_vm7, 1, %v17230_v36  ;;  %vm1210_vm5 = vc.u32 %v1202_v42, %v1206_v41  ;;  %v4453_v13 = vld [vmem:[#allocation2 + $0xd1] sm:$0xff]  ;;  %v4066_v32 = vpop.f32.mrf.mxu2  ;;  %v17481_v20 = vld [vmem:[#allocation6_spill] sm:$0xff] }
 0x376   : > { %9639 = vmatmul.msk.f32.gmra.mxu2 %vm17476_vm1, %v3817_v28  ;;  %v1188_v60 = vadd.s32 %v1186_v57, %v1184_v46  ;;  %v1211_v37 = vsel %vm1210_vm5, 1, %v17230_v36  ;;  %v1212_v52 = vadd.s32 %v1206_v41, %v1202_v42  ;;  %v13140_v25 = vadd.s32 240, %v11577_v7  ;;  %4801 = vrot.lane.b32.xlu1 %v4494_v59, %s10048_s9  ;;  %v4493_v42 = vld [vmem:[#allocation2 + $0x92] sm:$0xff] }
 0x377   : > { %v4307_v56 = vsel %vm13118_vm6, %v4259_v31, 0.0  ;;  %v1917_v28 = vadd.s32 24, %v13103_v30  ;;  %v1207_v55 = vshrl.u32 %v13093_v16, 16  ;;  %vm17477_vm7 = vcmask 64512   ;;  %4623 = vrot.lane.b32.xlu2 %v4453_v13, %s10045_s12  ;;  %v5006_v16 = vld [vmem:[%s16886_s3 + $0x10] sm:$0xff]  ;;  %4799 = vrot.lane.b32.xlu0 %v4493_v42, %s10048_s9 }
 0x378   : > { %4355 = vst.msk [vmem:[#allocation2 + $0xd9] sm:$0xff] %vm17477_vm7, %v4307_v56  ;;  %vm17478_vm5 = vcmp.ne.s32.totalorder %v13103_v30, 0  ;;  %v1189_v46 = vadd.s32 %v1188_v60, %v1178_v45  ;;  %v1213_v41 = vadd.s32 %v1211_v37, %v1205_v4  ;;  %vm1214_vm7 = vc.u32 %v1212_v52, %v1208_v18  ;;  %5378 = vmatpush.msrb.mxu0 %v5006_v16  ;;  %v13170_v45 = vpop.permute.xlu0 %4583  ;;  %v5005_v18 = vld [vmem:[%s16886_s3 + $0x8] sm:$0xff]  ;;  %v13180_v52 = vld [vmem:[%s16885_s2] ss:$0 sm:$0xff] }
 0x379   : > { %vm13156_vm6 = vmand %vm1821_vm11, %vm17478_vm5  ;;  %v4160_v31 = vadd.f32 %v4066_v32, %v17481_v20  ;;  %vm1822_vm1 = vcmp.lt.s32.totalorder %v13135_v5, 0  ;;  %v1215_v57 = vsel %vm1214_vm7, 1, %v17230_v36  ;;  %v1228_v56 = vand.u32 65535, %v13140_v25 }
 0x37a   : > { %v1190_v60 = vadd.s32 %v1189_v46, %v1180_v49  ;;  %v1209_v59 = vshrl.u32 %v13111_v38, 16  ;;  %v1217_v4 = vadd.s32 %v1215_v57, %v1213_v41  ;;  %v1229_v37 = vshrl.u32 %v13140_v25, 16  ;;  %5379 = vmatpush.msrb.mxu0 %v5005_v18  ;;  %v17485_v41 = vld [vmem:[#allocation54_spill] sm:$0xff] }
 0x37b   : > { %v4212_v13 = vadd.f32 %v13180_v52, %v4160_v31  ;;  %v1965_v49 = vsel %vm13156_vm6, %v1917_v28, %v13103_v30  ;;  %v13187_v38 = vadd.s32 24, %v13135_v5  ;;  %v1231_v32 = vmul.u32 43691, %v1228_v56  ;;  %v17487_v31 = vld [vmem:[#allocation47_spill] sm:$0xff] }
 0x37c   : > { %vm17482_vm11 = vcmp.ne.s32.totalorder %v13135_v5, 0  ;;  %v1191_v46 = vshrl.u32 %v1190_v60, 4  ;;  %v1218_v16 = vadd.s32 %v1217_v4, %v1207_v55  ;;  %v1232_v30 = vmul.u32 43690, %v1228_v56  ;;  %5380 = vmatpush.msrb.mxu0 %v5004_v11 }
 0x37d   : > { %vm13193_vm5 = vmand %vm1822_vm1, %vm17482_vm11  ;;  %v13200_v28 = vmul.u32 43691, %v1229_v37  ;;  %vm17486_vm6 = vcmask 64512   ;;  %v4260_v18 = vmax.f32 %v4212_v13, 0.0  ;;  %vm17489_vm7 = vcmask 97280  }
 0x37e   : > { %v13205_v20 = vsel %vm17486_vm6, %v17485_v41, %v12823_v40  ;;  %vm17488_vm1 = vmmov %vm17486_vm6  ;;  %9640 = vmatmul.msk.f32.gmra.mxu2 %vm17489_vm7, %v13084_v19  ;;  %v13213_v55 = vadd.s32 248, %v11577_v7  ;;  %vm13215_vm11 = vcmp.lt.s32.totalorder %v1965_v49, 16  ;;  %v17490_v56 = vmov 0  ;;  %4807 = vrot.lane.b32.xlu1 %v4497_v47, %s10048_s9 }
 0x37f   : > { %v3819_v57 = vsel %vm17488_vm1, %v17487_v31, %v12974_v43  ;;  %v17491_v56 = vsel %vm13215_vm11, 4294967295, %v17490_v56  ;;  %v1192_v60 = vmul.u32 24, %v1191_v46  ;;  %v1219_v4 = vadd.s32 %v1218_v16, %v1209_v59  ;;  %v4498_v43 = vld [vmem:[#allocation2 + $0xba] sm:$0xff]  ;;  %vm17493_vm6 = vmmov %vm17488_vm1  ;;  %v4069_v31 = vpop.f32.mrf.mxu2 }
 0x380   : > { %17492 = vst [vmem:[#allocation35_spill] sm:$0xff] %v17491_v56  ;;  %v1235_v40 = vshll.u32 %v1232_v30, 16  ;;  %v4308_v41 = vsel %vm13127_vm3, %v4260_v18, 0.0  ;;  %v4454_v13 = vld [vmem:[#allocation2 + $0xd9] sm:$0xff]  ;;  %v1966_v19 = vsel %vm13193_vm5, %v13187_v38, %v13135_v5  ;;  %v1234_v11 = vmul.u32 43690, %v1229_v37  ;;  %4809 = vrot.lane.b32.xlu2 %v4498_v43, %s10048_s9  ;;  %v13233_v18 = vpop.permute.xlu1 %4585  ;;  %v13241_v43 = vpop.permute.xlu2 %4767 }
 0x381   : > { %v1237_v49 = vshll.u32 %v13200_v28, 16  ;;  %4356 = vst.msk [vmem:[#allocation2 + $0xe1] sm:$0xff] %vm17493_vm6, %v4308_v41  ;;  %v13230_v59 = vsub.s32 %v13037_v2, %v1192_v60  ;;  %v1220_v46 = vshrl.u32 %v1219_v4, 4  ;;  %v1257_v16 = vand.u32 65535, %v13213_v55  ;;  %v17494_v5 = vld [vmem:[#allocation29_spill] sm:$0xff]  ;;  %4625 = vrot.lane.b32.xlu0 %v4454_v13, %s10045_s12  ;;  %v13239_v41 = vpop.permute.xlu0 %4589 }
 0x382   : > { %vm1239_vm1 = vc.u32 %v1231_v32, %v1235_v40  ;;  %v4161_v37 = vadd.f32 %v4069_v31, %v17494_v5  ;;  %v1241_v42 = vadd.s32 %v1235_v40, %v1231_v32  ;;  %v1258_v47 = vshrl.u32 %v13213_v55, 16 }
 0x383   : > { %v1240_v38 = vsel %vm1239_vm1, 1, %v17230_v36  ;;  %vm1775_vm5 = vcmp.ne.s32.totalorder %v13230_v59, 0  ;;  %vm1823_vm7 = vcmp.lt.s32.totalorder %v13230_v59, 0  ;;  %v1221_v2 = vmul.u32 24, %v1220_v46  ;;  %v17498_v46 = vld [vmem:[#allocation46_spill] sm:$0xff] }
 0x384   : > { %v1236_v60 = vshrl.u32 %v1232_v30, 16  ;;  %v4213_v4 = vadd.f32 %v13180_v52, %v4161_v37  ;;  %v1238_v31 = vshrl.u32 %v13200_v28, 16  ;;  %v1242_v13 = vadd.s32 %v1240_v38, %v1234_v11  ;;  %vm13257_vm3 = vmand %vm1823_vm7, %vm1775_vm5 }
 0x385   : > { %vm1243_vm6 = vc.u32 %v1241_v42, %v1237_v49  ;;  %v13248_v32 = vadd.s32 24, %v13230_v59  ;;  %v13251_v40 = vsub.s32 %v13046_v1, %v1221_v2  ;;  %v13254_v33 = vmul.u32 43690, %v1257_v16 }
 0x386   : > { %v1244_v5 = vsel %vm1243_vm6, 1, %v17230_v36  ;;  %v4261_v58 = vmax.f32 %v4213_v4, 0.0  ;;  %vm17495_vm1 = vcmask 97280   ;;  %v1260_v11 = vmul.u32 43691, %v1257_v16 }
 0x387   : > { %9641 = vmatmul.msk.f32.gmra.mxu2 %vm17495_vm1, %v3819_v57  ;;  %v1246_v28 = vadd.s32 %v1244_v5, %v1242_v13  ;;  %v13261_v49 = vmul.u32 43691, %v1258_v47  ;;  %vm17499_vm14 = vcmask 64512   ;;  %vm13278_vm7 = vcmp.lt.s32.totalorder %v1966_v19, 16 }
 0x388   : > { %v13266_v1 = vsel %vm17499_vm14, %v17498_v46, %v12876_v35  ;;  %vm17500_vm6 = vmmov %vm17499_vm14  ;;  %v17502_v38 = vmov 0  ;;  %v4309_v16 = vsel %vm13215_vm11, %v4261_v58, 0.0  ;;  %v4455_v42 = vld [vmem:[#allocation2 + $0xe1] sm:$0xff]  ;;  %v4501_v35 = vld [vmem:[#allocation2 + $0xd2] sm:$0xff]  ;;  %v1263_v4 = vmul.u32 43690, %v1258_v47  ;;  %v13297_v19 = vpop.permute.xlu1 %4591 }
 0x389   : > { %v13271_v37 = vsel %vm17500_vm6, %v11896_v14, %v13028_v15  ;;  %vm17501_vm5 = vmmov %vm17500_vm6  ;;  %v17503_v38 = vsel %vm13278_vm7, 4294967295, %v17502_v38  ;;  %v1247_v2 = vadd.s32 %v1246_v28, %v1236_v60  ;;  %v1264_v13 = vshll.u32 %v13254_v33, 16  ;;  %v4072_v14 = vpop.f32.mrf.mxu2  ;;  %4627 = vrot.lane.b32.xlu1 %v4455_v42, %s10045_s12  ;;  %4815 = vrot.lane.b32.xlu2 %v4501_v35, %s10048_s9  ;;  %v17506_v47 = vld [vmem:[#allocation11_spill] sm:$0xff]  ;;  %v13302_v28 = vpop.permute.xlu0 %4595 }
 0x38a   : > { %v13276_v57 = vsel %vm17501_vm5, %v11900_v6, %v12987_v50  ;;  %17504 = vst [vmem:[#allocation40_spill] sm:$0xff] %v17503_v38  ;;  %vm17505_vm14 = vmmov %vm17501_vm5  ;;  %v4496_v6 = vld [vmem:[#allocation2 + $0xaa] sm:$0xff]  ;;  %v1967_v50 = vsel %vm13257_vm3, %v13248_v32, %v13230_v59  ;;  %vm1776_vm1 = vcmp.ne.s32.totalorder %v13251_v40, 0  ;;  %v1266_v58 = vshll.u32 %v13261_v49, 16  ;;  %v13304_v59 = vpop.permute.xlu2 %4605 }
 0x38b   : > { %4357 = vst.msk [vmem:[#allocation2 + $0xe9] sm:$0xff] %vm17505_vm14, %v4309_v16  ;;  %v13295_v15 = vadd.s32 256, %v11577_v7  ;;  %v4162_v60 = vadd.f32 %v4072_v14, %v17506_v47  ;;  %4805 = vrot.lane.b32.xlu0 %v4496_v6, %s10048_s9  ;;  %vm1824_vm6 = vcmp.lt.s32.totalorder %v13251_v40, 0  ;;  %v1248_v5 = vadd.s32 %v1247_v2, %v1238_v31 }
 0x38c   : > { %vm1268_vm5 = vc.u32 %v1260_v11, %v1264_v13  ;;  %v1270_v30 = vadd.s32 %v1264_v13, %v1260_v11  ;;  %v1265_v14 = vshrl.u32 %v13254_v33, 16  ;;  %vm17507_vm14 = vcmask 97280   ;;  %v4379_v33 = vld [vmem:[#allocation2] sm:$0xff] }
 0x38d   : > { %v1269_v32 = vsel %vm1268_vm5, 1, %v17230_v36  ;;  %v1286_v46 = vand.u32 65535, %v13295_v15  ;;  %v1287_v16 = vshrl.u32 %v13295_v15, 16  ;;  %v4214_v42 = vadd.f32 %v13180_v52, %v4162_v60  ;;  %vm13325_vm5 = vmand %vm1824_vm6, %vm1776_vm1 }
 0x38e   : > { %v1249_v35 = vshrl.u32 %v1248_v5, 4  ;;  %v1271_v6 = vadd.s32 %v1269_v32, %v1263_v4  ;;  %vm1272_vm3 = vc.u32 %v1270_v30, %v1266_v58  ;;  %v13318_v11 = vadd.s32 24, %v13251_v40  ;;  %v4381_v5 = vld [vmem:[#allocation2 + $0x10] sm:$0xff] }
 0x38f   : > { %v1289_v31 = vmul.u32 43691, %v1286_v46  ;;  %v13311_v2 = vmul.u32 43690, %v1286_v46  ;;  %v13313_v47 = vmul.u32 43691, %v1287_v16  ;;  %v4262_v56 = vmax.f32 %v4214_v42, 0.0  ;;  %9642 = vmatmul.msk.f32.gmra.mxu2 %vm17507_vm14, %v13205_v20  ;;  %v4500_v46 = vld [vmem:[#allocation2 + $0xca] sm:$0xff] }
 0x390   : > { %v1250_v13 = vmul.u32 24, %v1249_v35  ;;  %v1273_v60 = vsel %vm1272_vm3, 1, %v17230_v36  ;;  %v1267_v4 = vshrl.u32 %v13261_v49, 16  ;;  %v1292_v0 = vmul.u32 43690, %v1287_v16 }
 0x391   : > { %v1275_v58 = vadd.s32 %v1273_v60, %v1271_v6  ;;  %v1293_v20 = vshll.u32 %v13311_v2, 16  ;;  %v1295_v32 = vshll.u32 %v13313_v47, 16  ;;  %v4310_v30 = vsel %vm13278_vm7, %v4262_v56, 0.0  ;;  %v4075_v49 = vpop.f32.mrf.mxu2  ;;  %4813 = vrot.lane.b32.xlu1 %v4500_v46, %s10048_s9  ;;  %v4499_v6 = vld [vmem:[#allocation2 + $0xc2] sm:$0xff] }
 0x392   : > { %v4456_v42 = vld [vmem:[#allocation2 + $0xe9] sm:$0xff]  ;;  %v13335_v35 = vsub.s32 %v13140_v25, %v1250_v13  ;;  %v13338_v53 = vadd.s32 264, %v11577_v7  ;;  %vm17510_vm1 = vcmask 64512   ;;  %v13346_v13 = vpop.f32.mrf.mxu3  ;;  %vm13354_vm14 = vcmp.lt.s32.totalorder %v1967_v50, 16 }
 0x393   : > { %4358 = vst.msk [vmem:[#allocation2 + $0xf1] sm:$0xff] %vm17510_vm1, %v4310_v30  ;;  %4629 = vrot.lane.b32.xlu2 %v4456_v42, %s10045_s12  ;;  %v1276_v60 = vadd.s32 %v1275_v58, %v1265_v14  ;;  %v9648_v56 = vld [vmem:[%s16886_s3 + $0x28] sm:$0xff]  ;;  %vm1297_vm6 = vc.u32 %v1289_v31, %v1293_v20  ;;  %v1299_v25 = vadd.s32 %v1293_v20, %v1289_v31  ;;  %vm17511_vm3 = vmmov %vm17510_vm1  ;;  %v13352_v30 = vpop.permute.xlu1 %4597  ;;  %v17512_v46 = vmov 0  ;;  %v17515_v42 = vld [vmem:[#allocation12_spill] sm:$0xff]  ;;  %v13364_v58 = vpop.permute.xlu2 %4773 }
 0x394   : > { %v13350_v16 = vsel %vm17511_vm3, %v4381_v5, %v12918_v22  ;;  %v17513_v46 = vsel %vm13354_vm14, 4294967295, %v17512_v46  ;;  %v4163_v14 = vadd.f32 %v4075_v49, %v17515_v42  ;;  %4811 = vrot.lane.b32.xlu0 %v4499_v6, %s10048_s9  ;;  %v1968_v31 = vsel %vm13325_vm5, %v13318_v11, %v13251_v40  ;;  %5208 = vmatpush.msrb.mxu3 %v9648_v56  ;;  %v13366_v22 = vpop.permute.xlu0 %4601  ;;  %v9647_v20 = vld [vmem:[%s16886_s3 + $0x20] sm:$0xff]  ;;  %v9646_v56 = vld [vmem:[%s16886_s3 + $0x18] sm:$0xff] }
 0x395   : > { %17514 = vst [vmem:[#allocation8_spill] sm:$0xff] %v17513_v46  ;;  %v1277_v5 = vadd.s32 %v1276_v60, %v1267_v4  ;;  %v1298_v50 = vsel %vm1297_vm6, 1, %v17230_v36  ;;  %vm1301_vm1 = vc.u32 %v1299_v25, %v1295_v32  ;;  %v1315_v49 = vand.u32 65535, %v13338_v53  ;;  %v17524_v46 = vld [vmem:[#allocation15_spill] sm:$0xff] }
 0x396   : > { %v4215_v6 = vadd.f32 %v13180_v52, %v4163_v14  ;;  %vm1777_vm3 = vcmp.ne.s32.totalorder %v13335_v35, 0  ;;  %v1294_v40 = vshrl.u32 %v13311_v2, 16  ;;  %v1296_v11 = vshrl.u32 %v13313_v47, 16  ;;  %5209 = vmatpush.msrb.mxu3 %v9647_v20  ;;  %v4503_v14 = vld [vmem:[#allocation2 + $0xe2] sm:$0xff] }
 0x397   : > { %vm1825_vm5 = vcmp.lt.s32.totalorder %v13335_v35, 0  ;;  %v1278_v4 = vshrl.u32 %v1277_v5, 4  ;;  %v1300_v32 = vadd.s32 %v1298_v50, %v1292_v0  ;;  %v1302_v60 = vsel %vm1301_vm1, 1, %v17230_v36 }
 0x398   : > { %v4263_v25 = vmax.f32 %v4215_v6, 0.0  ;;  %vm17516_vm6 = vcmask 97280   ;;  %5210 = vmatpush.msrb.mxu3 %v9646_v56  ;;  %v1316_v2 = vshrl.u32 %v13338_v53, 16  ;;  %v1318_v47 = vmul.u32 43691, %v1315_v49 }
 0x399   : > { %9643 = vmatmul.msk.f32.gmra.mxu2 %vm17516_vm6, %v13276_v57  ;;  %v13385_v42 = vmul.u32 43690, %v1315_v49  ;;  %v13388_v5 = vadd.s32 24, %v13335_v35  ;;  %v1279_v0 = vmul.u32 24, %v1278_v4  ;;  %v1304_v50 = vadd.s32 %v1302_v60, %v1300_v32  ;;  %vm13401_vm6 = vmand %vm1825_vm5, %vm1777_vm3  ;;  %4819 = vrot.lane.b32.xlu1 %v4503_v14, %s10048_s9 }
 0x39a   : > { %v13391_v20 = vadd.s32 272, %v11577_v7  ;;  %vm17517_vm1 = vcmask 64512   ;;  %v4311_v57 = vsel %vm13354_vm14, %v4263_v25, 0.0  ;;  %v4504_v56 = vld [vmem:[#allocation2 + $0xea] sm:$0xff]  ;;  %v13405_v4 = vmul.u32 43691, %v1316_v2 }
 0x39b   : > { %v4907_v6 = vsel %vm17517_vm1, %v4379_v33, %v13030_v17  ;;  %v4457_v38 = vld [vmem:[#allocation2 + $0xf1] sm:$0xff]  ;;  %v1322_v32 = vshll.u32 %v13385_v42, 16  ;;  %vm16973_vm7 = vcmask 130048   ;;  %vm17520_vm11 = vmmov %vm17517_vm1  ;;  %v4078_v17 = vpop.f32.mrf.mxu2  ;;  %4821 = vrot.lane.b32.xlu2 %v4504_v56, %s10048_s9  ;;  %vm16969_vm1 = vcmask 195584   ;;  %v13422_v14 = vpop.permute.xlu2 %4779 }
 0x39c   : > { %4359 = vst.msk [vmem:[#allocation2 + $0xf9] sm:$0xff] %vm17520_vm11, %v4311_v57  ;;  %v13412_v33 = vsub.s32 %v13213_v55, %v1279_v0  ;;  %v1305_v60 = vadd.s32 %v1304_v50, %v1294_v40  ;;  %vm13414_vm3 = vcmp.lt.s32.totalorder %v1968_v31, 16  ;;  %v17521_v25 = vmov 0  ;;  %4631 = vrot.lane.b32.xlu0 %v4457_v38, %s10045_s12  ;;  %v13420_v57 = vpop.permute.xlu1 %4603  ;;  %v13430_v50 = vpop.f32.mrf.mxu3 }
 0x39d   : > { %v17522_v25 = vsel %vm13414_vm3, 4294967295, %v17521_v25  ;;  %v4164_v10 = vadd.f32 %v4078_v17, %v17524_v46  ;;  %v1321_v51 = vmul.u32 43690, %v1316_v2  ;;  %vm1326_vm11 = vc.u32 %v1318_v47, %v1322_v32  ;;  %v4764_v46 = vpop.permute.xlu0 %4763 }
 0x39e   : > { %17523 = vst [vmem:[#allocation17_spill] sm:$0xff] %v17522_v25  ;;  %v1969_v55 = vsel %vm13401_vm6, %v13388_v5, %v13335_v35  ;;  %v1306_v40 = vadd.s32 %v1305_v60, %v1296_v11  ;;  %v1324_v31 = vshll.u32 %v13405_v4, 16  ;;  %v1344_v0 = vand.u32 65535, %v13391_v20 }
 0x39f   : > { %v4216_v38 = vadd.f32 %v13180_v52, %v4164_v10  ;;  %vm1778_vm5 = vcmp.ne.s32.totalorder %v13412_v33, 0  ;;  %v1327_v2 = vsel %vm1326_vm11, 1, %v17230_v36  ;;  %v13436_v56 = vadd.s32 280, %v11577_v7 }
 0x3a0   : > { %v4956_v49 = vsel %vm16973_vm7, %v4907_v6, %v4764_v46  ;;  %vm1826_vm6 = vcmp.lt.s32.totalorder %v13412_v33, 0  ;;  %v1307_v35 = vshrl.u32 %v1306_v40, 4  ;;  %v1328_v11 = vadd.s32 %v1322_v32, %v1318_v47 }
 0x3a1   : > { %v4264_v5 = vmax.f32 %v4216_v38, 0.0  ;;  %9697 = vmatmul.msk.f32.vlgmr.msrb.gmra.mxu0 %vm16969_vm1, %v4956_v49  ;;  %vm17525_vm14 = vcmask 97280   ;;  %v1323_v10 = vshrl.u32 %v13385_v42, 16  ;;  %v1329_v17 = vadd.s32 %v1327_v2, %v1321_v51  ;;  %v4502_v38 = vld [vmem:[#allocation2 + $0xda] sm:$0xff] }
 0x3a2   : > { %9644 = vmatmul.msk.f32.gmra.mxu2 %vm17525_vm14, %v13271_v37  ;;  %v1345_v60 = vshrl.u32 %v13391_v20, 16  ;;  %v13446_v23 = vadd.s32 24, %v13412_v33  ;;  %v1308_v6 = vmul.u32 24, %v1307_v35  ;;  %vm1330_vm11 = vc.u32 %v1328_v11, %v1324_v31  ;;  %vm13456_vm14 = vmand %vm1826_vm6, %vm1778_vm5 }
 0x3a3   : > { %v13448_v46 = vmul.u32 43690, %v1344_v0  ;;  %v4312_v47 = vsel %vm13414_vm3, %v4264_v5, 0.0  ;;  %v4458_v32 = vld [vmem:[#allocation2 + $0xf9] sm:$0xff]  ;;  %v1331_v37 = vsel %vm1330_vm11, 1, %v17230_v36  ;;  %v1347_v42 = vmul.u32 43691, %v1344_v0  ;;  %v4081_v31 = vpop.f32.mrf.mxu2 }
 0x3a4   : > { %v13461_v40 = vmul.u32 43691, %v1345_v60  ;;  %vm17528_vm1 = vcmask 64512   ;;  %4633 = vrot.lane.b32.xlu1 %v4458_v32, %s10045_s12  ;;  %v13466_v2 = vsub.s32 %v13295_v15, %v1308_v6  ;;  %v1325_v49 = vshrl.u32 %v13405_v4, 16  ;;  %4817 = vrot.lane.b32.xlu0 %v4502_v38, %s10048_s9  ;;  %v4766_v61 = vpop.permute.xlu1 %4765  ;;  %v13478_v15 = vpop.permute.xlu2 %4611 }
 0x3a5   : > { %4360 = vst.msk [vmem:[#allocation2 + $0x101] sm:$0xff] %vm17528_vm1, %v4312_v47  ;;  %v1333_v35 = vadd.s32 %v1331_v37, %v1329_v17  ;;  %v1351_v11 = vshll.u32 %v13448_v46, 16  ;;  %vm17529_vm5 = vmmov %vm17528_vm1  ;;  %vm13472_vm6 = vcmp.lt.s32.totalorder %v1969_v55, 16  ;;  %v17530_v0 = vmov 0  ;;  %v17533_v47 = vld [vmem:[#allocation51_spill] sm:$0xff]  ;;  %v13491_v51 = vpop.f32.mrf.mxu3 }
 0x3a6   : > { %v4908_v5 = vsel %vm17529_vm5, %v4380_v24, %v13095_v39  ;;  %v17531_v0 = vsel %vm13472_vm6, 4294967295, %v17530_v0  ;;  %v4165_v25 = vadd.f32 %v4081_v31, %v17533_v47  ;;  %v1350_v32 = vmul.u32 43690, %v1345_v60 }
 0x3a7   : > { %17532 = vst [vmem:[#allocation34_spill] sm:$0xff] %v17531_v0  ;;  %v1970_v4 = vsel %vm13456_vm14, %v13446_v23, %v13412_v33  ;;  %v1334_v17 = vadd.s32 %v1333_v35, %v1323_v10  ;;  %v1353_v24 = vshll.u32 %v13461_v40, 16  ;;  %v1373_v39 = vand.u32 65535, %v13436_v56  ;;  %v13541_v0 = vpop.permute.xlu0 %4607 }
 0x3a8   : > { %v4217_v55 = vadd.f32 %v13180_v52, %v4165_v25  ;;  %v4957_v6 = vsel %vm16973_vm7, %v4908_v5, %v4766_v61  ;;  %v1352_v37 = vshrl.u32 %v13448_v46, 16  ;;  %vm1355_vm1 = vc.u32 %v1347_v42, %v1351_v11 }
 0x3a9   : > { %vm1779_vm11 = vcmp.ne.s32.totalorder %v13466_v2, 0  ;;  %v1335_v60 = vadd.s32 %v1334_v17, %v1325_v49  ;;  %v1356_v31 = vsel %vm1355_vm1, 1, %v17230_v36  ;;  %v1357_v38 = vadd.s32 %v1351_v11, %v1347_v42 }
 0x3aa   : > { %v4265_v23 = vmax.f32 %v4217_v55, 0.0  ;;  %vm17534_vm14 = vcmask 195584   ;;  %vm17535_vm5 = vcmask 97280   ;;  %vm1827_vm3 = vcmp.lt.s32.totalorder %v13466_v2, 0 }
 0x3ab   : > { %9698 = vmatmul.msk.f32.gmra.mxu0 %vm17534_vm14, %v4957_v6  ;;  %9645 = vmatmul.msk.f32.gmra.mxu2 %vm17535_vm5, %v13266_v1  ;;  %v1358_v61 = vadd.s32 %v1356_v31, %v1350_v32  ;;  %v1374_v33 = vshrl.u32 %v13436_v56, 16  ;;  %v1336_v25 = vshrl.u32 %v1335_v60, 4  ;;  %vm1359_vm7 = vc.u32 %v1357_v38, %v1353_v24  ;;  %v4084_v47 = vpop.f32.mrf.mxu2  ;;  %v4505_v32 = vld [vmem:[#allocation2 + $0xf2] sm:$0xff] }
 0x3ac   : > { %v1376_v10 = vmul.u32 43691, %v1373_v39  ;;  %v13498_v46 = vmul.u32 43690, %v1373_v39  ;;  %v4313_v42 = vsel %vm13472_vm6, %v4265_v23, 0.0  ;;  %v4506_v49 = vld [vmem:[#allocation2 + $0xfa] sm:$0xff]  ;;  %v1354_v11 = vshrl.u32 %v13461_v40, 16  ;;  %4823 = vrot.lane.b32.xlu0 %v4505_v32, %s10048_s9 }
 0x3ad   : > { %v4459_v35 = vld [vmem:[#allocation2 + $0x101] sm:$0xff]  ;;  %v1360_v5 = vsel %vm1359_vm7, 1, %v17230_v36  ;;  %v13504_v1 = vmul.u32 43691, %v1374_v33  ;;  %vm17536_vm1 = vcmask 64512   ;;  %4825 = vrot.lane.b32.xlu1 %v4506_v49, %s10048_s9  ;;  %v1923_v17 = vadd.s32 24, %v13466_v2  ;;  %v17537_v6 = vld [vmem:[#allocation33_spill] sm:$0xff]  ;;  %vm13517_vm7 = vmand %vm1827_vm3, %vm1779_vm11 }
 0x3ae   : > { %4361 = vst.msk [vmem:[#allocation2 + $0x109] sm:$0xff] %vm17536_vm1, %v4313_v42  ;;  %4635 = vrot.lane.b32.xlu2 %v4459_v35, %s10045_s12  ;;  %v1337_v24 = vmul.u32 24, %v1336_v25  ;;  %v1362_v39 = vadd.s32 %v1360_v5, %v1358_v61  ;;  %v1380_v55 = vshll.u32 %v13498_v46, 16  ;;  %v4166_v40 = vadd.f32 %v4084_v47, %v17537_v6  ;;  %v13525_v61 = vpop.permute.xlu1 %4771  ;;  %v13527_v25 = vpop.permute.xlu2 %4785  ;;  %v17540_v5 = vld [vmem:[#allocation23_spill] sm:$0xff] }
 0x3af   : > { %v1379_v31 = vmul.u32 43690, %v1374_v33  ;;  %v1382_v38 = vshll.u32 %v13504_v1, 16  ;;  %v13523_v23 = vadd.s32 288, %v11577_v7  ;;  %v13534_v47 = vadd.f32 %v13346_v13, %v17540_v5  ;;  %v17541_v33 = vld [vmem:[#allocation45_spill] sm:$0xff] }
 0x3b0   : > { %v13530_v42 = vsub.s32 %v13338_v53, %v1337_v24  ;;  %v1363_v49 = vadd.s32 %v1362_v39, %v1352_v37  ;;  %vm1384_vm14 = vc.u32 %v1376_v10, %v1380_v55  ;;  %v1386_v35 = vadd.s32 %v1380_v55, %v1376_v10  ;;  %v3173_v55 = vpop.f32.mrf.mxu3 }
 0x3b1   : > { %v13538_v32 = vadd.f32 %v13430_v50, %v17541_v33  ;;  %v4218_v6 = vadd.f32 %v13180_v52, %v4166_v40  ;;  %v1385_v44 = vsel %vm1384_vm14, 1, %v17230_v36  ;;  %vm17542_vm3 = vcmask 130048  }
 0x3b2   : > { %v4958_v53 = vsel %vm17542_vm3, %v13350_v16, %v13241_v43  ;;  %vm13547_vm11 = vcmp.lt.s32.totalorder %v1970_v4, 16  ;;  %v17543_v37 = vmov 0  ;;  %v1971_v13 = vsel %vm13517_vm7, %v1923_v17, %v13466_v2 }
 0x3b3   : > { %v17544_v37 = vsel %vm13547_vm11, 4294967295, %v17543_v37  ;;  %v1381_v50 = vshrl.u32 %v13498_v46, 16  ;;  %v4266_v10 = vmax.f32 %v4218_v6, 0.0  ;;  %vm17546_vm5 = vcmask 195584  }
 0x3b4   : > { %17545 = vst [vmem:[#allocation9_spill] sm:$0xff] %v17544_v37  ;;  %9699 = vmatmul.msk.f32.gmra.mxu0 %vm17546_vm5, %v4958_v53  ;;  %v1364_v24 = vadd.s32 %v1363_v49, %v1354_v11  ;;  %v1387_v39 = vadd.s32 %v1385_v44, %v1379_v31  ;;  %vm1388_vm1 = vc.u32 %v1386_v35, %v1382_v38  ;;  %vm1780_vm14 = vcmp.ne.s32.totalorder %v13530_v42, 0  ;;  %v4087_v44 = vpop.f32.mrf.mxu2  ;;  %v4382_v35 = vld [vmem:[#allocation2 + $0x18] sm:$0xff] }
 0x3b5   : > { %v1389_v43 = vsel %vm1388_vm1, 1, %v17230_v36  ;;  %v1402_v16 = vand.u32 65535, %v13523_v23  ;;  %v1403_v4 = vshrl.u32 %v13523_v23, 16  ;;  %v4314_v2 = vsel %vm13547_vm11, %v4266_v10, 0.0  ;;  %v4507_v17 = vld [vmem:[#allocation2 + $0x102] sm:$0xff] }
 0x3b6   : > { %v4460_v46 = vld [vmem:[#allocation2 + $0x109] sm:$0xff]  ;;  %vm1828_vm7 = vcmp.lt.s32.totalorder %v13530_v42, 0  ;;  %v1365_v40 = vshrl.u32 %v1364_v24, 4  ;;  %v1391_v11 = vadd.s32 %v1389_v43, %v1387_v39  ;;  %vm17547_vm3 = vcmask 64512   ;;  %4827 = vrot.lane.b32.xlu2 %v4507_v17, %s10048_s9  ;;  %v13577_v24 = vpop.permute.xlu1 %4609 }
 0x3b7   : > { %4362 = vst.msk [vmem:[#allocation2 + $0x111] sm:$0xff] %vm17547_vm3, %v4314_v2  ;;  %v1383_v60 = vshrl.u32 %v13504_v1, 16  ;;  %v1405_v31 = vmul.u32 43691, %v1402_v16  ;;  %v13566_v38 = vmul.u32 43690, %v1402_v16  ;;  %v13568_v49 = vmul.u32 43691, %v1403_v4  ;;  %4637 = vrot.lane.b32.xlu0 %v4460_v46, %s10045_s12  ;;  %vm17548_vm5 = vmmov %vm17547_vm3  ;;  %v13579_v1 = vpop.permute.xlu2 %4791  ;;  %v4770_v2 = vpop.permute.xlu0 %4769 }
 0x3b8   : > { %v4167_v5 = vadd.f32 %v4087_v44, %v11905_v8  ;;  %v13573_v33 = vadd.s32 24, %v13530_v42  ;;  %v1366_v6 = vmul.u32 24, %v1365_v40  ;;  %v1392_v53 = vadd.s32 %v1391_v11, %v1381_v50  ;;  %vm13585_vm1 = vmand %vm1828_vm7, %vm1780_vm14  ;;  %v3176_v8 = vpop.f32.mrf.mxu3 }
 0x3b9   : > { %v4910_v10 = vsel %vm17548_vm5, %v4382_v35, %v13116_v54  ;;  %v1409_v39 = vshll.u32 %v13566_v38, 16  ;;  %v1411_v43 = vshll.u32 %v13568_v49, 16  ;;  %v13592_v50 = vadd.s32 296, %v11577_v7  ;;  %v17555_v35 = vld [vmem:[#allocation36_spill] sm:$0xff] }
 0x3ba   : > { %vm13594_vm3 = vcmp.lt.s32.totalorder %v1971_v13, 16  ;;  %v17551_v54 = vmov 0  ;;  %v4219_v16 = vadd.f32 %v13180_v52, %v4167_v5  ;;  %v13600_v17 = vsub.s32 %v13391_v20, %v1366_v6  ;;  %v17556_v13 = vld [vmem:[#allocation48_spill] sm:$0xff]  ;;  %v5576_v5 = vld [vmem:[#allocation2 + $0x41] sm:$0xff] }
 0x3bb   : > { %v17552_v54 = vsel %vm13594_vm3, 4294967295, %v17551_v54  ;;  %v1408_v46 = vmul.u32 43690, %v1403_v4  ;;  %vm17554_vm14 = vcmask 130048   ;;  %v1393_v11 = vadd.s32 %v1392_v53, %v1383_v60 }
 0x3bc   : > { %17553 = vst [vmem:[#allocation28_spill] sm:$0xff] %v17552_v54  ;;  %v4959_v40 = vsel %vm17554_vm14, %v4910_v10, %v4770_v2  ;;  %vm1413_vm7 = vc.u32 %v1405_v31, %v1409_v39  ;;  %v1415_v44 = vadd.s32 %v1409_v39, %v1405_v31  ;;  %v13605_v37 = vadd.f32 %v13491_v51, %v17555_v35 }
 0x3bd   : > { %v13608_v34 = vadd.f32 %v3173_v55, %v17556_v13  ;;  %v4267_v63 = vmax.f32 %v4219_v16, 0.0  ;;  %vm17557_vm5 = vcmask 195584   ;;  %v1972_v20 = vsel %vm13585_vm1, %v13573_v33, %v13530_v42  ;;  %v4090_v42 = vpop.f32.mrf.mxu2 }
 0x3be   : > { %9649 = vmatmul.msk.f32.vlgmr.msrb.gmra.mxu3 %vm17557_vm5, %v4959_v40  ;;  %vm17558_vm11 = vmmov %vm17557_vm5  ;;  %v1394_v4 = vshrl.u32 %v1393_v11, 4  ;;  %v1414_v60 = vsel %vm1413_vm7, 1, %v17230_v36  ;;  %vm1417_vm14 = vc.u32 %v1415_v44, %v1411_v43  ;;  %v1431_v51 = vand.u32 65535, %v13592_v50  ;;  %v4461_v31 = vld [vmem:[#allocation2 + $0x111] sm:$0xff]  ;;  %5722 = vrot.lane.b32.xlu2 %v5576_v5, %s10045_s12  ;;  %v4383_v11 = vld [vmem:[#allocation2 + $0x20] sm:$0xff]  ;;  %v13636_v44 = vpop.permute.xlu1 %4777 }
 0x3bf   : > { %9700 = vmatmul.msk.f32.gmra.mxu0 %vm17558_vm11, %v4959_v40  ;;  %v4315_v55 = vsel %vm13594_vm3, %v4267_v63, 0.0  ;;  %v4508_v6 = vld [vmem:[#allocation2 + $0x10a] sm:$0xff]  ;;  %v1410_v53 = vshrl.u32 %v13566_v38, 16  ;;  %v1416_v10 = vadd.s32 %v1414_v60, %v1408_v46  ;;  %v1418_v39 = vsel %vm1417_vm14, 1, %v17230_v36  ;;  %4639 = vrot.lane.b32.xlu1 %v4461_v31, %s10045_s12  ;;  %v13638_v35 = vpop.permute.xlu2 %4617  ;;  %v4776_v31 = vpop.permute.xlu0 %4775 }
 0x3c0   : > { %vm17559_vm11 = vcmask 64512   ;;  %vm1781_vm1 = vcmp.ne.s32.totalorder %v13600_v17, 0  ;;  %vm1829_vm7 = vcmp.lt.s32.totalorder %v13600_v17, 0  ;;  %v1395_v63 = vmul.u32 24, %v1394_v4  ;;  %4829 = vrot.lane.b32.xlu0 %v4508_v6, %s10048_s9  ;;  %v17560_v46 = vld [vmem:[#allocation39_spill] sm:$0xff] }
 0x3c1   : > { %4363 = vst.msk [vmem:[#allocation2 + $0x119] sm:$0xff] %vm17559_vm11, %v4315_v55  ;;  %v1432_v33 = vshrl.u32 %v13592_v50, 16  ;;  %v4168_v38 = vadd.f32 %v4090_v42, %v11918_v12  ;;  %v1412_v43 = vshrl.u32 %v13568_v49, 16  ;;  %v1420_v16 = vadd.s32 %v1418_v39, %v1416_v10  ;;  %v4384_v60 = vld [vmem:[#allocation2 + $0x28] sm:$0xff]  ;;  %vm17561_vm5 = vmmov %vm17559_vm11  ;;  %v4385_v42 = vld [vmem:[#allocation2 + $0x30] sm:$0xff] }
 0x3c2   : > { %v13631_v2 = vmul.u32 43690, %v1431_v51  ;;  %v13634_v40 = vadd.f32 %v3176_v8, %v17560_v46  ;;  %v1925_v13 = vadd.s32 24, %v13600_v17  ;;  %v13644_v12 = vadd.s32 304, %v11577_v7  ;;  %vm13653_vm14 = vmand %vm1829_vm7, %vm1781_vm1 }
 0x3c3   : > { %v13641_v4 = vmul.u32 43691, %v1432_v33  ;;  %v4911_v49 = vsel %vm17561_vm5, %v4383_v11, %v13163_v3  ;;  %v4220_v55 = vadd.f32 %v13180_v52, %v4168_v38  ;;  %v1421_v6 = vadd.s32 %v1420_v16, %v1410_v53  ;;  %vm17564_vm11 = vmmov %vm17561_vm5 }
 0x3c4   : > { %v1434_v10 = vmul.u32 43691, %v1431_v51  ;;  %v4912_v39 = vsel %vm17564_vm11, %v4384_v60, %v12992_v62  ;;  %vm17565_vm3 = vcmask 130048   ;;  %vm13661_vm5 = vcmp.lt.s32.totalorder %v1972_v20, 16  ;;  %vm17569_vm1 = vmmov %vm17564_vm11 }
 0x3c5   : > { %v4960_v3 = vsel %vm17565_vm3, %v4911_v49, %v13525_v61  ;;  %v17566_v8 = vmov 0  ;;  %v13666_v38 = vsub.s32 %v13436_v56, %v1395_v63  ;;  %v4913_v46 = vsel %vm17569_vm1, %v4385_v42, %v13170_v45  ;;  %v5575_v63 = vld [vmem:[#allocation2 + $0x39] sm:$0xff]  ;;  %v4093_v49 = vpop.f32.mrf.mxu2 }
 0x3c6   : > { %v17567_v8 = vsel %vm13661_vm5, 4294967295, %v17566_v8  ;;  %v4268_v11 = vmax.f32 %v4220_v55, 0.0  ;;  %vm17570_vm7 = vcmask 195584   ;;  %v1422_v62 = vadd.s32 %v1421_v6, %v1412_v43 }
 0x3c7   : > { %17568 = vst [vmem:[#allocation6_spill] sm:$0xff] %v17567_v8  ;;  %9650 = vmatmul.msk.f32.gmra.mxu3 %vm17570_vm7, %v4960_v3  ;;  %vm17571_vm6 = vmmov %vm17570_vm7  ;;  %v1438_v51 = vshll.u32 %v13631_v2, 16  ;;  %v1973_v61 = vsel %vm13653_vm14, %v1925_v13, %v13600_v17  ;;  %v1437_v20 = vmul.u32 43690, %v1432_v33  ;;  %v1440_v53 = vshll.u32 %v13641_v4, 16  ;;  %5720 = vrot.lane.b32.xlu1 %v5575_v63, %s10045_s12  ;;  %v5574_v17 = vld [vmem:[#allocation2 + $0x31] sm:$0xff] }
 0x3c8   : > { %9701 = vmatmul.msk.f32.gmra.mxu0 %vm17571_vm6, %v4960_v3  ;;  %v1460_v56 = vand.u32 65535, %v13644_v12  ;;  %v4316_v45 = vsel %vm13661_vm5, %v4268_v11, 0.0  ;;  %v4462_v16 = vld [vmem:[#allocation2 + $0x119] sm:$0xff]  ;;  %v1423_v60 = vshrl.u32 %v1422_v62, 4  ;;  %v13681_v43 = vadd.s32 312, %v11577_v7  ;;  %vm17572_vm6 = vmmov %vm17569_vm1  ;;  %5718 = vrot.lane.b32.xlu0 %v5574_v17, %s10045_s12  ;;  %v13694_v3 = vpop.permute.xlu1 %4783  ;;  %v13696_v11 = vpop.permute.xlu2 %4797 }
 0x3c9   : > { %vm1442_vm3 = vc.u32 %v1434_v10, %v1438_v51  ;;  %4364 = vst.msk [vmem:[#allocation2 + $0x121] sm:$0xff] %vm17572_vm6, %v4316_v45  ;;  %4641 = vrot.lane.b32.xlu2 %v4462_v16, %s10045_s12  ;;  %vm1782_vm14 = vcmp.ne.s32.totalorder %v13666_v38, 0  ;;  %v1444_v13 = vadd.s32 %v1438_v51, %v1434_v10  ;;  %v1461_v55 = vshrl.u32 %v13644_v12, 16  ;;  %v13707_v16 = vpop.permute.xlu0 %4613 }
 0x3ca   : > { %v1443_v33 = vsel %vm1442_vm3, 1, %v17230_v36  ;;  %v4169_v5 = vadd.f32 %v4093_v49, %v11934_v27  ;;  %vm1830_vm11 = vcmp.lt.s32.totalorder %v13666_v38, 0  ;;  %v1424_v6 = vmul.u32 24, %v1423_v60 }
 0x3cb   : > { %v13692_v42 = vmul.u32 43690, %v1460_v56  ;;  %v1445_v62 = vadd.s32 %v1443_v33, %v1437_v20  ;;  %vm1446_vm1 = vc.u32 %v1444_v13, %v1440_v53  ;;  %v1463_v45 = vmul.u32 43691, %v1460_v56  ;;  %vm13712_vm6 = vmand %vm1830_vm11, %vm1782_vm14 }
 0x3cc   : > { %v13698_v63 = vmul.u32 43691, %v1461_v55  ;;  %vm17573_vm7 = vcmask 130048   ;;  %vm13702_vm3 = vcmp.lt.s32.totalorder %v1973_v61, 16  ;;  %v17574_v27 = vmov 0 }
 0x3cd   : > { %v4961_v10 = vsel %vm17573_vm7, %v4912_v39, %v13364_v58  ;;  %v17575_v27 = vsel %vm13702_vm3, 4294967295, %v17574_v27  ;;  %v4221_v51 = vadd.f32 %v13180_v52, %v4169_v5  ;;  %v1926_v60 = vadd.s32 24, %v13666_v38 }
 0x3ce   : > { %17576 = vst [vmem:[#allocation54_spill] sm:$0xff] %v17575_v27  ;;  %v1439_v53 = vshrl.u32 %v13631_v2, 16  ;;  %v1447_v58 = vsel %vm1446_vm1, 1, %v17230_v36  ;;  %v1466_v39 = vmul.u32 43690, %v1461_v55  ;;  %v1467_v61 = vshll.u32 %v13692_v42, 16 }
 0x3cf   : > { %v4962_v56 = vsel %vm17573_vm7, %v4913_v46, %v4776_v31  ;;  %v4269_v49 = vmax.f32 %v4221_v51, 0.0  ;;  %vm17579_vm5 = vcmask 195584   ;;  %v13723_v17 = vsub.s32 %v13523_v23, %v1424_v6  ;;  %v4509_v46 = vld [vmem:[#allocation2 + $0x112] sm:$0xff] }
 0x3d0   : > { %9651 = vmatmul.msk.f32.gmra.mxu3 %vm17579_vm5, %v4961_v10  ;;  %vm17580_vm2 = vmmov %vm17579_vm5  ;;  %v1489_v33 = vand.u32 65535, %v13681_v43  ;;  %v1441_v13 = vshrl.u32 %v13641_v4, 16  ;;  %v1449_v2 = vadd.s32 %v1447_v58, %v1445_v62  ;;  %v1469_v5 = vshll.u32 %v13698_v63, 16  ;;  %v4463_v51 = vld [vmem:[#allocation2 + $0x121] sm:$0xff]  ;;  %v4096_v4 = vpop.f32.mrf.mxu2  ;;  %4831 = vrot.lane.b32.xlu1 %v4509_v46, %s10048_s9 }
 0x3d1   : > { %9702 = vmatmul.msk.f32.gmra.mxu0 %vm17580_vm2, %v4961_v10  ;;  %vm1471_vm14 = vc.u32 %v1463_v45, %v1467_v61  ;;  %v4317_v55 = vsel %vm13702_vm3, %v4269_v49, 0.0  ;;  %v1974_v31 = vsel %vm13712_vm6, %v1926_v60, %v13666_v38  ;;  %v4510_v10 = vld [vmem:[#allocation2 + $0x11a] sm:$0xff]  ;;  %v1473_v6 = vadd.s32 %v1467_v61, %v1463_v45  ;;  %4643 = vrot.lane.b32.xlu0 %v4463_v51, %s10045_s12  ;;  %v13744_v60 = vpop.permute.xlu1 %4615  ;;  %v13746_v61 = vpop.permute.xlu2 %4803 }
 0x3d2   : > { %v1472_v23 = vsel %vm1471_vm14, 1, %v17230_v36  ;;  %vm17581_vm2 = vcmask 64512   ;;  %4833 = vrot.lane.b32.xlu2 %v4510_v10, %s10048_s9  ;;  %v1450_v62 = vadd.s32 %v1449_v2, %v1439_v53  ;;  %v1468_v58 = vshrl.u32 %v13692_v42, 16 }
 0x3d3   : > { %4365 = vst.msk [vmem:[#allocation2 + $0x129] sm:$0xff] %vm17581_vm2, %v4317_v55  ;;  %v1474_v49 = vadd.s32 %v1472_v23, %v1466_v39  ;;  %v1490_v20 = vshrl.u32 %v13681_v43, 16  ;;  %v4170_v38 = vadd.f32 %v4096_v4, %v11950_v9  ;;  %vm1783_vm5 = vcmp.ne.s32.totalorder %v13723_v17, 0  ;;  %v13752_v9 = vpop.permute.xlu0 %4781 }
 0x3d4   : > { %vm1475_vm11 = vc.u32 %v1473_v6, %v1469_v5  ;;  %v13742_v45 = vmul.u32 43690, %v1489_v33  ;;  %v1451_v55 = vadd.s32 %v1450_v62, %v1441_v13  ;;  %v1492_v42 = vmul.u32 43691, %v1489_v33 }
 0x3d5   : > { %v1476_v53 = vsel %vm1475_vm11, 1, %v17230_v36  ;;  %v13749_v39 = vmul.u32 43691, %v1490_v20  ;;  %v4222_v2 = vadd.f32 %v13180_v52, %v4170_v38  ;;  %vm1831_vm1 = vcmp.lt.s32.totalorder %v13723_v17, 0 }
 0x3d6   : > { %v1470_v5 = vshrl.u32 %v13698_v63, 16  ;;  %v1478_v46 = vadd.s32 %v1476_v53, %v1474_v49  ;;  %vm13756_vm6 = vcmp.lt.s32.totalorder %v1974_v31, 16  ;;  %v17582_v10 = vmov 0  ;;  %v3179_v63 = vpop.f32.mrf.mxu3  ;;  %vm13767_vm2 = vmand %vm1831_vm1, %vm1783_vm5 }
 0x3d7   : > { %v17583_v10 = vsel %vm13756_vm6, 4294967295, %v17582_v10  ;;  %v1452_v51 = vshrl.u32 %v1451_v55, 4  ;;  %v1495_v13 = vmul.u32 43690, %v1490_v20  ;;  %v1496_v23 = vshll.u32 %v13742_v45, 16 }
 0x3d8   : > { %17584 = vst [vmem:[#allocation47_spill] sm:$0xff] %v17583_v10  ;;  %v4270_v33 = vmax.f32 %v4222_v2, 0.0  ;;  %vm17585_vm7 = vcmask 195584   ;;  %v1927_v52 = vadd.s32 24, %v13723_v17  ;;  %v1479_v6 = vadd.s32 %v1478_v46, %v1468_v58  ;;  %v5579_v58 = vld [vmem:[#allocation2 + $0x59] sm:$0xff]  ;;  %v4099_v27 = vpop.f32.mrf.mxu2 }
 0x3d9   : > { %9652 = vmatmul.msk.f32.gmra.mxu3 %vm17585_vm7, %v4962_v56  ;;  %vm17586_vm14 = vmmov %vm17585_vm7  ;;  %v1498_v4 = vshll.u32 %v13749_v39, 16  ;;  %v1453_v62 = vmul.u32 24, %v1452_v51  ;;  %vm1500_vm11 = vc.u32 %v1492_v42, %v1496_v23  ;;  %v1502_v49 = vadd.s32 %v1496_v23, %v1492_v42  ;;  %v4386_v23 = vld [vmem:[#allocation2 + $0x38] sm:$0xff] }
 0x3da   : > { %9703 = vmatmul.msk.f32.gmra.mxu0 %vm17586_vm14, %v4962_v56  ;;  %v13772_v20 = vadd.s32 320, %v11577_v7  ;;  %v4318_v56 = vsel %vm13756_vm6, %v4270_v33, 0.0  ;;  %v4464_v38 = vld [vmem:[#allocation2 + $0x129] sm:$0xff]  ;;  %v1480_v53 = vadd.s32 %v1479_v6, %v1470_v5  ;;  %v1497_v2 = vshrl.u32 %v13742_v45, 16  ;;  %5728 = vrot.lane.b32.xlu2 %v5579_v58, %s10045_s12  ;;  %v17595_v58 = vld [vmem:[#allocation49_spill] sm:$0xff] }
 0x3db   : > { %v4511_v55 = vld [vmem:[#allocation2 + $0x122] sm:$0xff]  ;;  %v1501_v46 = vsel %vm1500_vm11, 1, %v17230_v36  ;;  %vm17589_vm5 = vcmask 64512   ;;  %4645 = vrot.lane.b32.xlu1 %v4464_v38, %s10045_s12  ;;  %v13782_v42 = vsub.s32 %v13592_v50, %v1453_v62  ;;  %vm1504_vm1 = vc.u32 %v1502_v49, %v1498_v4  ;;  %v13792_v38 = vpop.permute.xlu1 %4789  ;;  %v13794_v50 = vpop.permute.xlu2 %4623 }
 0x3dc   : > { %4366 = vst.msk [vmem:[#allocation2 + $0x131] sm:$0xff] %vm17589_vm5, %v4318_v56  ;;  %v1503_v51 = vadd.s32 %v1501_v46, %v1495_v13  ;;  %v1975_v5 = vsel %vm13767_vm2, %v1927_v52, %v13723_v17  ;;  %v4171_v45 = vadd.f32 %v4099_v27, %v13534_v47  ;;  %4835 = vrot.lane.b32.xlu0 %v4511_v55, %s10048_s9  ;;  %v1481_v33 = vshrl.u32 %v1480_v53, 4  ;;  %vm17590_vm7 = vmmov %vm17589_vm5  ;;  %v13801_v47 = vld [vmem:[%s16885_s2] ss:$0 sm:$0xff]  ;;  %v13804_v17 = vpop.permute.xlu0 %4787 }
 0x3dd   : > { %v1505_v6 = vsel %vm1504_vm1, 1, %v17230_v36  ;;  %v4914_v56 = vsel %vm17590_vm7, %v4386_v23, %v13233_v18  ;;  %v1499_v13 = vshrl.u32 %v13749_v39, 16  ;;  %v1518_v31 = vand.u32 65535, %v13772_v20  ;;  %v4388_v23 = vld [vmem:[#allocation2 + $0x48] sm:$0xff] }
 0x3de   : > { %v1507_v4 = vadd.s32 %v1505_v6, %v1503_v51  ;;  %v4223_v27 = vadd.f32 %v13801_v47, %v4171_v45  ;;  %vm1784_vm14 = vcmp.ne.s32.totalorder %v13782_v42, 0  ;;  %vm1832_vm2 = vcmp.lt.s32.totalorder %v13782_v42, 0  ;;  %v5578_v6 = vld [vmem:[#allocation2 + $0x51] sm:$0xff] }
 0x3df   : > { %v1482_v18 = vmul.u32 24, %v1481_v33  ;;  %vm17591_vm11 = vcmask 130048   ;;  %vm13810_vm5 = vcmp.lt.s32.totalorder %v1975_v5, 16  ;;  %v17592_v52 = vmov 0 }
 0x3e0   : > { %v4963_v39 = vsel %vm17591_vm11, %v4914_v56, %v13636_v44  ;;  %v17593_v52 = vsel %vm13810_vm5, 4294967295, %v17592_v52  ;;  %v1508_v62 = vadd.s32 %v1507_v4, %v1497_v2  ;;  %v1519_v49 = vshrl.u32 %v13772_v20, 16  ;;  %v4387_v44 = vld [vmem:[#allocation2 + $0x40] sm:$0xff]  ;;  %vm13824_vm11 = vmand %vm1832_vm2, %vm1784_vm14 }
 0x3e1   : > { %17594 = vst [vmem:[#allocation29_spill] sm:$0xff] %v17593_v52  ;;  %v13816_v55 = vadd.f32 %v3179_v63, %v17595_v58  ;;  %v4271_v53 = vmax.f32 %v4223_v27, 0.0  ;;  %vm17596_vm1 = vcmask 195584   ;;  %v1928_v46 = vadd.s32 24, %v13782_v42  ;;  %v3182_v27 = vpop.f32.mrf.mxu3 }
 0x3e2   : > { %9653 = vmatmul.msk.f32.gmra.mxu3 %vm17596_vm1, %v4963_v39  ;;  %vm17597_vm7 = vmmov %vm17596_vm1  ;;  %v13822_v51 = vsub.s32 %v13644_v12, %v1482_v18  ;;  %v1509_v2 = vadd.s32 %v1508_v62, %v1499_v13  ;;  %v1521_v5 = vmul.u32 43691, %v1518_v31  ;;  %v13828_v45 = vmul.u32 43690, %v1518_v31  ;;  %v4102_v13 = vpop.f32.mrf.mxu2  ;;  %v5577_v31 = vld [vmem:[#allocation2 + $0x49] sm:$0xff] }
 0x3e3   : > { %9704 = vmatmul.msk.f32.gmra.mxu0 %vm17597_vm7, %v4963_v39  ;;  %v13830_v63 = vmul.u32 43691, %v1519_v49  ;;  %v4319_v33 = vsel %vm13810_vm5, %v4271_v53, 0.0  ;;  %v4465_v56 = vld [vmem:[#allocation2 + $0x131] sm:$0xff]  ;;  %v1524_v12 = vmul.u32 43690, %v1519_v49  ;;  %v13836_v4 = vadd.s32 328, %v11577_v7  ;;  %5726 = vrot.lane.b32.xlu1 %v5578_v6, %s10045_s12  ;;  %v17601_v49 = vld [vmem:[#allocation42_spill] sm:$0xff] }
 0x3e4   : > { %vm1785_vm1 = vcmp.ne.s32.totalorder %v13822_v51, 0  ;;  %vm17600_vm14 = vcmask 64512   ;;  %4647 = vrot.lane.b32.xlu2 %v4465_v56, %s10045_s12  ;;  %v1510_v18 = vshrl.u32 %v1509_v2, 4  ;;  %v1525_v39 = vshll.u32 %v13828_v45, 16  ;;  %5724 = vrot.lane.b32.xlu0 %v5577_v31, %s10045_s12  ;;  %v13854_v56 = vpop.permute.xlu1 %4795 }
 0x3e5   : > { %4367 = vst.msk [vmem:[#allocation2 + $0x139] sm:$0xff] %vm17600_vm14, %v4319_v33  ;;  %v1527_v62 = vshll.u32 %v13830_v63, 16  ;;  %v13845_v58 = vadd.f32 %v3182_v27, %v17601_v49  ;;  %vm17602_vm7 = vmmov %vm17600_vm14  ;;  %v1976_v33 = vsel %vm13824_vm11, %v1928_v46, %v13782_v42  ;;  %v4172_v6 = vadd.f32 %v4102_v13, %v13538_v32 }
 0x3e6   : > { %v4915_v53 = vsel %vm17602_vm7, %v4387_v44, %v13039_v21  ;;  %v1929_v2 = vadd.s32 24, %v13822_v51  ;;  %v1511_v52 = vmul.u32 24, %v1510_v18  ;;  %vm1529_vm14 = vc.u32 %v1521_v5, %v1525_v39  ;;  %v13860_v44 = vpop.permute.xlu0 %4619 }
 0x3e7   : > { %v1531_v10 = vadd.s32 %v1525_v39, %v1521_v5  ;;  %vm17603_vm2 = vcmask 130048   ;;  %v4224_v21 = vadd.f32 %v13801_v47, %v4172_v6  ;;  %vm17604_vm11 = vcmp.lt.s32.totalorder %v13822_v51, 0 }
 0x3e8   : > { %v4964_v27 = vsel %vm17603_vm2, %v4915_v53, %v13422_v14  ;;  %vm13866_vm7 = vmand %vm17604_vm11, %vm1785_vm1  ;;  %v1530_v42 = vsel %vm1529_vm14, 1, %v17230_v36  ;;  %v1547_v46 = vand.u32 65535, %v13836_v4  ;;  %vm13872_vm5 = vcmp.lt.s32.totalorder %v1976_v33, 16  ;;  %v13876_v14 = vpop.permute.xlu2 %4809  ;;  %v4389_v33 = vld [vmem:[#allocation2 + $0x50] sm:$0xff] }
 0x3e9   : > { %v17607_v5 = vmov 0  ;;  %v1526_v13 = vshrl.u32 %v13828_v45, 16  ;;  %v1532_v31 = vadd.s32 %v1530_v42, %v1524_v12  ;;  %vm1533_vm2 = vc.u32 %v1531_v10, %v1527_v62  ;;  %v4512_v45 = vld [vmem:[#allocation2 + $0x12a] sm:$0xff] }
 0x3ea   : > { %v17608_v5 = vsel %vm13872_vm5, 4294967295, %v17607_v5  ;;  %vm17610_vm1 = vcmask 64512   ;;  %v4272_v39 = vmax.f32 %v4224_v21, 0.0  ;;  %vm17611_vm11 = vcmask 195584  }
 0x3eb   : > { %17609 = vst [vmem:[#allocation46_spill] sm:$0xff] %v17608_v5  ;;  %v4916_v18 = vsel %vm17610_vm1, %v4388_v23, %v13239_v41  ;;  %9654 = vmatmul.msk.f32.gmra.mxu3 %vm17611_vm11, %v4964_v27  ;;  %vm17612_vm14 = vmmov %vm17611_vm11  ;;  %v1534_v49 = vsel %vm1533_vm2, 1, %v17230_v36  ;;  %v1548_v53 = vshrl.u32 %v13836_v4, 16  ;;  %v1977_v6 = vsel %vm13866_vm7, %v1929_v2, %v13822_v51  ;;  %4837 = vrot.lane.b32.xlu1 %v4512_v45, %s10048_s9 }
 0x3ec   : > { %9705 = vmatmul.msk.f32.gmra.mxu0 %vm17612_vm14, %v4964_v27  ;;  %v13889_v10 = vsub.s32 %v13681_v43, %v1511_v52  ;;  %v1528_v41 = vshrl.u32 %v13830_v63, 16  ;;  %v1536_v12 = vadd.s32 %v1534_v49, %v1532_v31  ;;  %v4320_v62 = vsel %vm13872_vm5, %v4272_v39, 0.0  ;;  %v4513_v27 = vld [vmem:[#allocation2 + $0x132] sm:$0xff]  ;;  %vm17613_vm2 = vmmov %vm17610_vm1  ;;  %v4105_v43 = vpop.f32.mrf.mxu2  ;;  %v13917_v39 = vpop.permute.xlu1 %4621 }
 0x3ed   : > { %v4466_v21 = vld [vmem:[#allocation2 + $0x139] sm:$0xff]  ;;  %v1550_v42 = vmul.u32 43691, %v1547_v46  ;;  %v13894_v23 = vmul.u32 43690, %v1547_v46  ;;  %v13896_v8 = vmul.u32 43691, %v1548_v53  ;;  %v13900_v51 = vsel %vm17613_vm2, %v4389_v33, %v13297_v19  ;;  %vm17614_vm7 = vmmov %vm17610_vm1  ;;  %4839 = vrot.lane.b32.xlu2 %v4513_v27, %s10048_s9 }
 0x3ee   : > { %4368 = vst.msk [vmem:[#allocation2 + $0x141] sm:$0xff] %vm17614_vm7, %v4320_v62  ;;  %v1537_v52 = vadd.s32 %v1536_v12, %v1526_v13  ;;  %v13906_v63 = vadd.s32 336, %v11577_v7  ;;  %vm17615_vm1 = vcmask 130048   ;;  %v4173_v32 = vadd.f32 %v4105_v43, %v13605_v37  ;;  %4649 = vrot.lane.b32.xlu0 %v4466_v21, %s10045_s12 }
 0x3ef   : > { %v4965_v2 = vsel %vm17615_vm1, %v4916_v18, %v13752_v9  ;;  %v1553_v19 = vmul.u32 43690, %v1548_v53  ;;  %v1554_v46 = vshll.u32 %v13894_v23, 16  ;;  %vm13913_vm11 = vcmp.lt.s32.totalorder %v1977_v6, 16  ;;  %v13922_v18 = vpop.permute.xlu0 %4793 }
 0x3f0   : > { %v17616_v31 = vmov 0  ;;  %v1538_v13 = vadd.s32 %v1537_v52, %v1528_v41  ;;  %v1556_v49 = vshll.u32 %v13896_v8, 16  ;;  %v1576_v33 = vand.u32 65535, %v13906_v63  ;;  %v13934_v21 = vpop.permute.xlu2 %4815  ;;  %v5582_v52 = vld [vmem:[#allocation2 + $0x71] sm:$0xff] }
 0x3f1   : > { %v17617_v31 = vsel %vm13913_vm11, 4294967295, %v17616_v31  ;;  %v4225_v9 = vadd.f32 %v13801_v47, %v4173_v32  ;;  %vm1786_vm14 = vcmp.ne.s32.totalorder %v13889_v10, 0  ;;  %vm1834_vm2 = vcmp.lt.s32.totalorder %v13889_v10, 0 }
 0x3f2   : > { %17618 = vst [vmem:[#allocation11_spill] sm:$0xff] %v17617_v31  ;;  %vm1558_vm7 = vc.u32 %v1550_v42, %v1554_v46  ;;  %v1930_v37 = vadd.s32 24, %v13889_v10  ;;  %v1539_v53 = vshrl.u32 %v1538_v13, 4  ;;  %v1560_v45 = vadd.s32 %v1554_v46, %v1550_v42  ;;  %vm13936_vm6 = vmand %vm1834_vm2, %vm1786_vm14 }
 0x3f3   : > { %v1559_v6 = vsel %vm1558_vm7, 1, %v17230_v36  ;;  %v4273_v41 = vmax.f32 %v4225_v9, 0.0  ;;  %vm17619_vm1 = vcmask 195584   ;;  %v1577_v62 = vshrl.u32 %v13906_v63, 16 }
 0x3f4   : > { %9655 = vmatmul.msk.f32.gmra.mxu3 %vm17619_vm1, %v4965_v2  ;;  %vm17620_vm5 = vmmov %vm17619_vm1  ;;  %v1561_v12 = vadd.s32 %v1559_v6, %v1553_v19  ;;  %v13932_v27 = vadd.s32 344, %v11577_v7  ;;  %v1540_v32 = vmul.u32 24, %v1539_v53  ;;  %v1555_v42 = vshrl.u32 %v13894_v23, 16  ;;  %v4108_v54 = vpop.f32.mrf.mxu2 }
 0x3f5   : > { %9706 = vmatmul.msk.f32.gmra.mxu0 %vm17620_vm5, %v4965_v2  ;;  %vm1562_vm7 = vc.u32 %v1560_v45, %v1556_v49  ;;  %v13941_v46 = vmul.u32 43690, %v1576_v33  ;;  %v4321_v2 = vsel %vm13913_vm11, %v4273_v41, 0.0  ;;  %v4467_v19 = vld [vmem:[#allocation2 + $0x141] sm:$0xff]  ;;  %v1579_v6 = vmul.u32 43691, %v1576_v33  ;;  %5734 = vrot.lane.b32.xlu2 %v5582_v52, %s10045_s12  ;;  %v13962_v52 = vpop.permute.xlu1 %4801 }
 0x3f6   : > { %v4514_v13 = vld [vmem:[#allocation2 + $0x13a] sm:$0xff]  ;;  %v1563_v9 = vsel %vm1562_vm7, 1, %v17230_v36  ;;  %v13946_v5 = vmul.u32 43691, %v1577_v62  ;;  %vm17623_vm5 = vcmask 64512   ;;  %4651 = vrot.lane.b32.xlu1 %v4467_v19, %s10045_s12  ;;  %v13952_v23 = vsub.s32 %v13772_v20, %v1540_v32 }
 0x3f7   : > { %4369 = vst.msk [vmem:[#allocation2 + $0x149] sm:$0xff] %vm17623_vm5, %v4321_v2  ;;  %v1557_v49 = vshrl.u32 %v13896_v8, 16  ;;  %v1565_v53 = vadd.s32 %v1563_v9, %v1561_v12  ;;  %v1583_v45 = vshll.u32 %v13941_v46, 16  ;;  %v1978_v33 = vsel %vm13936_vm6, %v1930_v37, %v13889_v10  ;;  %4841 = vrot.lane.b32.xlu0 %v4514_v13, %s10048_s9  ;;  %v13968_v43 = vpop.permute.xlu0 %4799  ;;  %v4390_v10 = vld [vmem:[#allocation2 + $0x58] sm:$0xff] }
 0x3f8   : > { %v4174_v41 = vadd.f32 %v4108_v54, %v13608_v34  ;;  %v1582_v2 = vmul.u32 43690, %v1577_v62  ;;  %v1605_v19 = vand.u32 65535, %v13932_v27  ;;  %vm1787_vm14 = vcmp.ne.s32.totalorder %v13952_v23, 0 }
 0x3f9   : > { %vm1835_vm2 = vcmp.lt.s32.totalorder %v13952_v23, 0  ;;  %v1566_v8 = vadd.s32 %v1565_v53, %v1555_v42  ;;  %v1606_v20 = vshrl.u32 %v13932_v27, 16  ;;  %v1931_v34 = vadd.s32 24, %v13952_v23 }
 0x3fa   : > { %v4226_v12 = vadd.f32 %v13801_v47, %v4174_v41  ;;  %v1585_v54 = vshll.u32 %v13946_v5, 16  ;;  %vm1587_vm6 = vc.u32 %v1579_v6, %v1583_v45  ;;  %vm17624_vm1 = vcmask 130048   ;;  %vm13979_vm5 = vmand %vm1835_vm2, %vm1787_vm14 }
 0x3fb   : > { %v4966_v37 = vsel %vm17624_vm1, %v13900_v51, %v13694_v3  ;;  %vm13975_vm7 = vcmp.lt.s32.totalorder %v1978_v33, 16  ;;  %v17625_v62 = vmov 0  ;;  %v1567_v42 = vadd.s32 %v1566_v8, %v1557_v49  ;;  %v5581_v8 = vld [vmem:[#allocation2 + $0x69] sm:$0xff]  ;;  %vm17635_vm14 = vmmov %vm17624_vm1 }
 0x3fc   : > { %v17626_v62 = vsel %vm13975_vm7, 4294967295, %v17625_v62  ;;  %v1588_v13 = vsel %vm1587_vm6, 1, %v17230_v36  ;;  %vm17630_vm11 = vcmask 64512   ;;  %v4274_v53 = vmax.f32 %v4226_v12, 0.0 }
 0x3fd   : > { %17627 = vst [vmem:[#allocation12_spill] sm:$0xff] %v17626_v62  ;;  %v4918_v9 = vsel %vm17630_vm11, %v4390_v10, %v13105_v29  ;;  %vm17631_vm3 = vcmask 195584   ;;  %v1589_v3 = vadd.s32 %v1583_v45, %v1579_v6  ;;  %v1590_v51 = vadd.s32 %v1588_v13, %v1582_v2  ;;  %v13999_v6 = vpop.permute.xlu2 %4629  ;;  %v4111_v45 = vpop.f32.mrf.mxu2  ;;  %v5580_v2 = vld [vmem:[#allocation2 + $0x61] sm:$0xff] }
 0x3fe   : > { %9656 = vmatmul.msk.f32.gmra.mxu3 %vm17631_vm3, %v4966_v37  ;;  %vm17632_vm15 = vmmov %vm17631_vm3  ;;  %v1568_v33 = vshrl.u32 %v1567_v42, 4  ;;  %v1608_v41 = vmul.u32 43691, %v1605_v19  ;;  %v13988_v31 = vmul.u32 43690, %v1605_v19  ;;  %v13990_v26 = vmul.u32 43691, %v1606_v20  ;;  %v4468_v12 = vld [vmem:[#allocation2 + $0x149] sm:$0xff]  ;;  %17634 = vst [vmem:[#allocation15_spill] sm:$0xff] %v13999_v6  ;;  %5732 = vrot.lane.b32.xlu1 %v5581_v8, %s10045_s12  ;;  %v14012_v13 = vpop.permute.xlu1 %4807 }
 0x3ff   : > { %9707 = vmatmul.msk.f32.gmra.mxu0 %vm17632_vm15, %v4966_v37  ;;  %v4322_v49 = vsel %vm13975_vm7, %v4274_v53, 0.0  ;;  %v1979_v29 = vsel %vm13979_vm5, %v1931_v34, %v13952_v23  ;;  %v1584_v10 = vshrl.u32 %v13941_v46, 16  ;;  %vm1591_vm15 = vc.u32 %v1589_v3, %v1585_v54  ;;  %vm17633_vm3 = vmmov %vm17630_vm11  ;;  %4653 = vrot.lane.b32.xlu2 %v4468_v12, %s10045_s12 }
 0x400   : > { %4370 = vst.msk [vmem:[#allocation2 + $0x151] sm:$0xff] %vm17633_vm3, %v4322_v49  ;;  %v1569_v19 = vmul.u32 24, %v1568_v33  ;;  %v1592_v37 = vsel %vm1591_vm15, 1, %v17230_v36  ;;  %v1612_v23 = vshll.u32 %v13988_v31, 16  ;;  %v14006_v34 = vadd.s32 352, %v11577_v7  ;;  %5730 = vrot.lane.b32.xlu0 %v5580_v2, %s10045_s12 }
 0x401   : > { %v4175_v46 = vadd.f32 %v4111_v45, %v13634_v40  ;;  %v1586_v54 = vshrl.u32 %v13946_v5, 16  ;;  %v1594_v32 = vadd.s32 %v1592_v37, %v1590_v51  ;;  %v1614_v42 = vshll.u32 %v13990_v26, 16  ;;  %v14022_v5 = vpop.permute.xlu0 %4625 }
 0x402   : > { %v1570_v53 = vsub.s32 %v13836_v4, %v1569_v19  ;;  %v1611_v3 = vmul.u32 43690, %v1606_v20  ;;  %vm1616_vm11 = vc.u32 %v1608_v41, %v1612_v23  ;;  %v1618_v33 = vadd.s32 %v1612_v23, %v1608_v41  ;;  %v4391_v41 = vld [vmem:[#allocation2 + $0x60] sm:$0xff] }
 0x403   : > { %v4967_v49 = vsel %vm17635_vm14, %v4918_v9, %v13527_v25  ;;  %vm14017_vm2 = vcmp.lt.s32.totalorder %v1979_v29, 16  ;;  %v17636_v8 = vmov 0  ;;  %v4227_v40 = vadd.f32 %v13801_v47, %v4175_v46  ;;  %v4515_v46 = vld [vmem:[#allocation2 + $0x142] sm:$0xff] }
 0x404   : > { %v17637_v8 = vsel %vm14017_vm2, 4294967295, %v17636_v8  ;;  %v1595_v51 = vadd.s32 %v1594_v32, %v1584_v10  ;;  %vm1788_vm6 = vcmp.ne.s32.totalorder %v1570_v53, 0  ;;  %vm1836_vm1 = vcmp.lt.s32.totalorder %v1570_v53, 0 }
 0x405   : > { %17638 = vst [vmem:[#allocation51_spill] sm:$0xff] %v17637_v8  ;;  %v1932_v12 = vadd.s32 24, %v1570_v53  ;;  %v1634_v4 = vand.u32 65535, %v14006_v34  ;;  %v4275_v20 = vmax.f32 %v4227_v40, 0.0  ;;  %vm17639_vm5 = vcmask 195584   ;;  %vm14028_vm14 = vmand %vm1836_vm1, %vm1788_vm6 }
 0x406   : > { %9657 = vmatmul.msk.f32.gmra.mxu3 %vm17639_vm5, %v4967_v49  ;;  %vm17640_vm15 = vmmov %vm17639_vm5  ;;  %v1596_v25 = vadd.s32 %v1595_v51, %v1586_v54  ;;  %v1617_v9 = vsel %vm1616_vm11, 1, %v17230_v36  ;;  %vm1620_vm3 = vc.u32 %v1618_v33, %v1614_v42  ;;  %v1613_v10 = vshrl.u32 %v13988_v31, 16  ;;  %v4114_v31 = vpop.f32.mrf.mxu2  ;;  %4843 = vrot.lane.b32.xlu1 %v4515_v46, %s10048_s9 }
 0x407   : > { %9708 = vmatmul.msk.f32.gmra.mxu0 %vm17640_vm15, %v4967_v49  ;;  %v1619_v45 = vadd.s32 %v1617_v9, %v1611_v3  ;;  %v1621_v2 = vsel %vm1620_vm3, 1, %v17230_v36  ;;  %v1635_v19 = vshrl.u32 %v14006_v34, 16  ;;  %vm17643_vm5 = vcmask 64512   ;;  %v4516_v54 = vld [vmem:[#allocation2 + $0x14a] sm:$0xff] }
 0x408   : > { %v4919_v37 = vsel %vm17643_vm5, %v4391_v41, %v13302_v28  ;;  %v4323_v23 = vsel %vm14017_vm2, %v4275_v20, 0.0  ;;  %v14039_v32 = vld [vmem:[#allocation2 + $0x151] sm:$0xff]  ;;  %v1597_v42 = vshrl.u32 %v1596_v25, 4  ;;  %v1615_v33 = vshrl.u32 %v13990_v26, 16  ;;  %v4392_v49 = vld [vmem:[#allocation2 + $0x68] sm:$0xff]  ;;  %vm17644_vm11 = vmmov %vm17643_vm5  ;;  %4845 = vrot.lane.b32.xlu2 %v4516_v54, %s10048_s9 }
 0x409   : > { %4371 = vst.msk [vmem:[#allocation2 + $0x159] sm:$0xff] %vm17644_vm11, %v4323_v23  ;;  %v1623_v3 = vadd.s32 %v1621_v2, %v1619_v45  ;;  %v1637_v28 = vmul.u32 43691, %v1634_v4  ;;  %v14045_v40 = vmul.u32 43690, %v1634_v4  ;;  %v14047_v51 = vmul.u32 43691, %v1635_v19  ;;  %v9747_v20 = vld [vmem:[%s16886_s3 + $0x40] sm:$0xff]  ;;  %vm17645_vm6 = vmmov %vm17643_vm5  ;;  %4655 = vrot.lane.b32.xlu0 %v14039_v32, %s10045_s12  ;;  %v14059_v4 = vpop.permute.xlu2 %4821  ;;  %v14061_v45 = vpop.permute.xlu1 %4627 }
 0x40a   : > { %v4920_v26 = vsel %vm17645_vm6, %v4392_v49, %v13352_v30  ;;  %v1980_v25 = vsel %vm14028_vm14, %v1932_v12, %v1570_v53  ;;  %v4176_v9 = vadd.f32 %v4114_v31, %v13816_v55  ;;  %v1598_v41 = vmul.u32 24, %v1597_v42  ;;  %6311 = vmatpush.msrb.mxu1 %v9747_v20  ;;  %17646 = vst [vmem:[#allocation33_spill] sm:$0xff] %v14059_v4  ;;  %v14071_v12 = vpop.permute.xlu0 %4805 }
 0x40b   : > { %v1624_v2 = vadd.s32 %v1623_v3, %v1613_v10  ;;  %v1641_v23 = vshll.u32 %v14045_v40, 16  ;;  %v1643_v46 = vshll.u32 %v14047_v51, 16  ;;  %v14066_v30 = vadd.s32 360, %v11577_v7 }
 0x40c   : > { %vm17647_vm1 = vcmask 130048   ;;  %v4228_v53 = vadd.f32 %v13801_v47, %v4176_v9  ;;  %v1599_v29 = vsub.s32 %v13906_v63, %v1598_v41  ;;  %v1640_v54 = vmul.u32 43690, %v1635_v19 }
 0x40d   : > { %v4968_v55 = vsel %vm17647_vm1, %v4919_v37, %v13804_v17  ;;  %vm14074_vm15 = vcmp.lt.s32.totalorder %v1980_v25, 16  ;;  %v17648_v42 = vmov 0  ;;  %v1625_v10 = vadd.s32 %v1624_v2, %v1615_v33  ;;  %v3185_v37 = vpop.f32.mrf.mxu3  ;;  %v5585_v25 = vld [vmem:[#allocation2 + $0x89] sm:$0xff] }
 0x40e   : > { %v17649_v42 = vsel %vm14074_vm15, 4294967295, %v17648_v42  ;;  %vm1645_vm3 = vc.u32 %v1637_v28, %v1641_v23  ;;  %v1647_v49 = vadd.s32 %v1641_v23, %v1637_v28  ;;  %v4276_v31 = vmax.f32 %v4228_v53, 0.0 }
 0x40f   : > { %17650 = vst [vmem:[#allocation23_spill] sm:$0xff] %v17649_v42  ;;  %vm17651_vm14 = vcmask 195584   ;;  %vm1789_vm11 = vcmp.ne.s32.totalorder %v1599_v29, 0  ;;  %vm1837_vm6 = vcmp.lt.s32.totalorder %v1599_v29, 0  ;;  %v1933_v17 = vadd.s32 24, %v1599_v29 }
 0x410   : > { %9658 = vmatmul.msk.f32.gmra.mxu3 %vm17651_vm14, %v4968_v55  ;;  %vm17652_vm5 = vmmov %vm17651_vm14  ;;  %v1626_v63 = vshrl.u32 %v1625_v10, 4  ;;  %v1646_v19 = vsel %vm1645_vm3, 1, %v17230_v36  ;;  %vm1649_vm2 = vc.u32 %v1647_v49, %v1643_v46  ;;  %v1663_v33 = vand.u32 65535, %v14066_v30  ;;  %v14088_v20 = vld [vmem:[#allocation2 + $0x159] sm:$0xff]  ;;  %v4117_v46 = vpop.f32.mrf.mxu2  ;;  %5740 = vrot.lane.b32.xlu2 %v5585_v25, %s10045_s12 }
 0x411   : > { %9709 = vmatmul.msk.f32.gmra.mxu0 %vm17652_vm5, %v4968_v55  ;;  %vm14080_vm1 = vmand %vm1837_vm6, %vm1789_vm11  ;;  %v4324_v28 = vsel %vm14074_vm15, %v4276_v31, 0.0  ;;  %v4517_v9 = vld [vmem:[#allocation2 + $0x152] sm:$0xff]  ;;  %v1642_v41 = vshrl.u32 %v14045_v40, 16  ;;  %v1648_v2 = vadd.s32 %v1646_v19, %v1640_v54  ;;  %v1650_v23 = vsel %vm1649_vm2, 1, %v17230_v36  ;;  %4657 = vrot.lane.b32.xlu1 %v14088_v20, %s10045_s12  ;;  %v14109_v3 = vpop.permute.xlu2 %4635 }
 0x412   : > { %vm17655_vm14 = vcmask 64512   ;;  %v1981_v55 = vsel %vm14080_vm1, %v1933_v17, %v1599_v29  ;;  %v1627_v53 = vmul.u32 24, %v1626_v63  ;;  %v1664_v10 = vshrl.u32 %v14066_v30, 16  ;;  %4847 = vrot.lane.b32.xlu0 %v4517_v9, %s10048_s9  ;;  %17657 = vst [vmem:[#allocation45_spill] sm:$0xff] %v14109_v3  ;;  %v14119_v25 = vpop.permute.xlu0 %4811 }
 0x413   : > { %4372 = vst.msk [vmem:[#allocation2 + $0x161] sm:$0xff] %vm17655_vm14, %v4324_v28  ;;  %v14100_v49 = vadd.s32 368, %v11577_v7  ;;  %v4177_v40 = vadd.f32 %v4117_v46, %v13845_v58  ;;  %v1644_v54 = vshrl.u32 %v14047_v51, 16  ;;  %v1652_v31 = vadd.s32 %v1650_v23, %v1648_v2  ;;  %v14121_v2 = vpop.permute.xlu1 %4813 }
 0x414   : > { %v14105_v29 = vmul.u32 43690, %v1663_v33  ;;  %vm17656_vm2 = vcmask 130048   ;;  %v1628_v63 = vsub.s32 %v13932_v27, %v1627_v53  ;;  %v14112_v19 = vmul.u32 43691, %v1664_v10 }
 0x415   : > { %v4969_v17 = vsel %vm17656_vm2, %v4920_v26, %v13792_v38  ;;  %vm14114_vm3 = vcmp.lt.s32.totalorder %v1981_v55, 16  ;;  %v17658_v28 = vmov 0  ;;  %v4229_v58 = vadd.f32 %v13801_v47, %v4177_v40  ;;  %v4393_v26 = vld [vmem:[#allocation2 + $0x70] sm:$0xff] }
 0x416   : > { %v17659_v28 = vsel %vm14114_vm3, 4294967295, %v17658_v28  ;;  %v1653_v51 = vadd.s32 %v1652_v31, %v1642_v41  ;;  %v1666_v9 = vmul.u32 43691, %v1663_v33  ;;  %vm1790_vm5 = vcmp.ne.s32.totalorder %v1628_v63, 0  ;;  %v17663_v41 = vld [vmem:[#allocation5_spill] sm:$0xff] }
 0x417   : > { %17660 = vst [vmem:[#allocation36_spill] sm:$0xff] %v17659_v28  ;;  %vm1838_vm11 = vcmp.lt.s32.totalorder %v1628_v63, 0  ;;  %v1692_v38 = vand.u32 65535, %v14100_v49  ;;  %v1693_v27 = vshrl.u32 %v14100_v49, 16  ;;  %v4277_v23 = vmax.f32 %v4229_v58, 0.0 }
 0x418   : > { %vm17661_vm6 = vcmask 195584   ;;  %v1934_v55 = vadd.s32 24, %v1628_v63  ;;  %v1654_v46 = vadd.s32 %v1653_v51, %v1644_v54  ;;  %v1670_v53 = vshll.u32 %v14105_v29, 16  ;;  %vm14131_vm2 = vmand %vm1838_vm11, %vm1790_vm5 }
 0x419   : > { %9659 = vmatmul.msk.f32.gmra.mxu3 %vm17661_vm6, %v4969_v17  ;;  %vm17662_vm1 = vmmov %vm17661_vm6  ;;  %v3186_v33 = vadd.f32 %v3185_v37, %v17663_v41  ;;  %v4921_v40 = vsel %vm17655_vm14, %v4393_v26, %v13148_v48  ;;  %v1669_v42 = vmul.u32 43690, %v1664_v10  ;;  %v1672_v58 = vshll.u32 %v14112_v19, 16  ;;  %v3188_v37 = vpop.f32.mrf.mxu3  ;;  %v4120_v48 = vpop.f32.mrf.mxu2  ;;  %v5583_v10 = vld [vmem:[#allocation2 + $0x79] sm:$0xff] }
 0x41a   : > { %9710 = vmatmul.msk.f32.gmra.mxu0 %vm17662_vm1, %v4969_v17  ;;  %v4325_v8 = vsel %vm14114_vm3, %v4277_v23, 0.0  ;;  %v5584_v17 = vld [vmem:[#allocation2 + $0x81] sm:$0xff]  ;;  %v1655_v54 = vshrl.u32 %v1654_v46, 4  ;;  %vm1674_vm6 = vc.u32 %v1666_v9, %v1670_v53  ;;  %v1695_v51 = vmul.u32 43691, %v1692_v38  ;;  %vm17667_vm1 = vmmov %vm17655_vm14  ;;  %5736 = vrot.lane.b32.xlu0 %v5583_v10, %s10045_s12  ;;  %v14154_v4 = vpop.permute.xlu2 %4827 }
 0x41b   : > { %v14138_v62 = vld [vmem:[#allocation2 + $0x161] sm:$0xff]  ;;  %4373 = vst.msk [vmem:[#allocation2 + $0x169] sm:$0xff] %vm17667_vm1, %v4325_v8  ;;  %5738 = vrot.lane.b32.xlu1 %v5584_v17, %s10045_s12  ;;  %v1675_v26 = vsel %vm1674_vm6, 1, %v17230_v36  ;;  %v1676_v41 = vadd.s32 %v1670_v53, %v1666_v9  ;;  %v14145_v23 = vmul.u32 43690, %v1692_v38  ;;  %v14147_v28 = vmul.u32 43691, %v1693_v27  ;;  %v14159_v53 = vpop.permute.xlu0 %4631 }
 0x41c   : > { %17666 = vst [vmem:[#allocation48_spill] sm:$0xff] %v14138_v62  ;;  %4659 = vrot.lane.b32.xlu2 %v14138_v62, %s10045_s12  ;;  %vm17668_vm5 = vcmask 130048   ;;  %v1982_v8 = vsel %vm14131_vm2, %v1934_v55, %v1628_v63  ;;  %v4178_v3 = vadd.f32 %v4120_v48, %v3186_v33  ;;  %v1656_v17 = vmul.u32 24, %v1655_v54  ;;  %v17676_v48 = vld [vmem:[#allocation13_spill] sm:$0xff] }
 0x41d   : > { %v4970_v46 = vsel %vm17668_vm5, %v4921_v40, %v13579_v1  ;;  %v1671_v62 = vshrl.u32 %v14105_v29, 16  ;;  %v1677_v6 = vadd.s32 %v1675_v26, %v1669_v42  ;;  %vm1678_vm11 = vc.u32 %v1676_v41, %v1672_v58  ;;  %v4518_v41 = vld [vmem:[#allocation2 + $0x15a] sm:$0xff] }
 0x41e   : > { %v1699_v9 = vshll.u32 %v14145_v23, 16  ;;  %v4230_v38 = vadd.f32 %v13801_v47, %v4178_v3  ;;  %v1657_v1 = vsub.s32 %v14006_v34, %v1656_v17  ;;  %v1673_v63 = vshrl.u32 %v14112_v19, 16  ;;  %v14171_v3 = vpop.permute.xlu1 %4819 }
 0x41f   : > { %v1698_v55 = vmul.u32 43690, %v1693_v27  ;;  %vm14163_vm14 = vcmp.lt.s32.totalorder %v1982_v8, 16  ;;  %v17669_v33 = vmov 0  ;;  %v1679_v40 = vsel %vm1678_vm11, 1, %v17230_v36 }
 0x420   : > { %v17670_v33 = vsel %vm14163_vm14, 4294967295, %v17669_v33  ;;  %v1701_v42 = vshll.u32 %v14147_v28, 16  ;;  %vm1703_vm2 = vc.u32 %v1695_v51, %v1699_v9  ;;  %v4278_v29 = vmax.f32 %v4230_v38, 0.0 }
 0x421   : > { %17671 = vst [vmem:[#allocation39_spill] sm:$0xff] %v17670_v33  ;;  %vm17672_vm6 = vcmask 195584   ;;  %vm1791_vm5 = vcmp.ne.s32.totalorder %v1657_v1, 0  ;;  %vm1839_vm3 = vcmp.lt.s32.totalorder %v1657_v1, 0  ;;  %v1935_v34 = vadd.s32 24, %v1657_v1  ;;  %v4123_v38 = vpop.f32.mrf.mxu2 }
 0x422   : > { %9660 = vmatmul.msk.f32.gmra.mxu3 %vm17672_vm6, %v4970_v46  ;;  %vm17673_vm1 = vmmov %vm17672_vm6  ;;  %v1681_v27 = vadd.s32 %v1679_v40, %v1677_v6  ;;  %v1704_v31 = vsel %vm1703_vm2, 1, %v17230_v36  ;;  %v1705_v58 = vadd.s32 %v1699_v9, %v1695_v51  ;;  %v14179_v54 = vadd.s32 376, %v11577_v7  ;;  %v14184_v8 = vld [vmem:[#allocation2 + $0x169] sm:$0xff] }
 0x423   : > { %9711 = vmatmul.msk.f32.gmra.mxu0 %vm17673_vm1, %v4970_v46  ;;  %vm14173_vm15 = vmand %vm1839_vm3, %vm1791_vm5  ;;  %v3189_v10 = vadd.f32 %v3188_v37, %v17676_v48  ;;  %v4326_v26 = vsel %vm14163_vm14, %v4278_v29, 0.0  ;;  %v4519_v46 = vld [vmem:[#allocation2 + $0x162] sm:$0xff]  ;;  %v1706_v17 = vadd.s32 %v1704_v31, %v1698_v55  ;;  %vm17677_vm3 = vcmask 64512   ;;  %4849 = vrot.lane.b32.xlu1 %v4518_v41, %s10048_s9  ;;  %v3191_v29 = vpop.f32.mrf.mxu3  ;;  %v4394_v31 = vld [vmem:[#allocation2 + $0x78] sm:$0xff]  ;;  %v14197_v48 = vpop.permute.xlu2 %5722 }
 0x424   : > { %4374 = vst.msk [vmem:[#allocation2 + $0x171] sm:$0xff] %vm17677_vm3, %v4326_v26  ;;  %4851 = vrot.lane.b32.xlu2 %v4519_v46, %s10048_s9  ;;  %v1682_v6 = vadd.s32 %v1681_v27, %v1671_v62  ;;  %v1700_v7 = vshrl.u32 %v14145_v23, 16  ;;  %vm1707_vm11 = vc.u32 %v1705_v58, %v1701_v42  ;;  %v1721_v51 = vand.u32 65535, %v14179_v54  ;;  %4661 = vrot.lane.b32.xlu0 %v14184_v8, %s10045_s12  ;;  %v14205_v19 = vpop.permute.xlu0 %4817  ;;  %vm17683_vm5 = vmmov %vm17673_vm1 }
 0x425   : > { %v1983_v37 = vsel %vm14173_vm15, %v1935_v34, %v1657_v1  ;;  %v4179_v9 = vadd.f32 %v4123_v38, %v3189_v10  ;;  %v1708_v55 = vsel %vm1707_vm11, 1, %v17230_v36  ;;  %v1722_v40 = vshrl.u32 %v14179_v54, 16  ;;  %vm17678_vm15 = vmmov %vm17677_vm3 }
 0x426   : > { %v1683_v62 = vadd.s32 %v1682_v6, %v1673_v63  ;;  %v1702_v23 = vshrl.u32 %v14147_v28, 16  ;;  %v1710_v42 = vadd.s32 %v1708_v55, %v1706_v17  ;;  %v14200_v27 = vmul.u32 43690, %v1721_v51  ;;  %vm17685_vm11 = vmmov %vm17678_vm15 }
 0x427   : > { %v4922_v1 = vsel %vm17678_vm15, %v4394_v31, %v13366_v22  ;;  %v4231_v34 = vadd.f32 %v13801_v47, %v4179_v9  ;;  %v1724_v58 = vmul.u32 43691, %v1721_v51  ;;  %v14207_v10 = vmul.u32 43691, %v1722_v40  ;;  %v17684_v9 = vld [vmem:[#allocation16_spill] sm:$0xff] }
 0x428   : > { %vm17679_vm2 = vcmask 130048   ;;  %vm14211_vm6 = vcmp.lt.s32.totalorder %v1983_v37, 16  ;;  %v17680_v63 = vmov 0  ;;  %v1684_v28 = vshrl.u32 %v1683_v62, 4 }
 0x429   : > { %v4971_v26 = vsel %vm17679_vm2, %v4922_v1, %v13922_v18  ;;  %v17681_v63 = vsel %vm14211_vm6, 4294967295, %v17680_v63  ;;  %v1711_v41 = vadd.s32 %v1710_v42, %v1700_v7  ;;  %v4279_v46 = vmax.f32 %v4231_v34, 0.0  ;;  %v5588_v7 = vld [vmem:[#allocation2 + $0xa1] sm:$0xff]  ;;  %v4126_v1 = vpop.f32.mrf.mxu2 }
 0x42a   : > { %17682 = vst [vmem:[#allocation49_spill] sm:$0xff] %v17681_v63  ;;  %9661 = vmatmul.msk.f32.gmra.mxu3 %vm17673_vm1, %v4971_v26  ;;  %v1727_v22 = vmul.u32 43690, %v1722_v40  ;;  %v1728_v17 = vshll.u32 %v14200_v27, 16  ;;  %v1730_v38 = vshll.u32 %v14207_v10, 16  ;;  %v1685_v6 = vmul.u32 24, %v1684_v28  ;;  %v14225_v40 = vpop.permute.xlu1 %4633 }
 0x42b   : > { %9712 = vmatmul.msk.f32.gmra.mxu0 %vm17683_vm5, %v4971_v26  ;;  %v1712_v51 = vadd.s32 %v1711_v41, %v1702_v23  ;;  %v3192_v18 = vadd.f32 %v3191_v29, %v17684_v9  ;;  %v4327_v37 = vsel %vm14211_vm6, %v4279_v46, 0.0  ;;  %v14222_v55 = vld [vmem:[#allocation2 + $0x171] sm:$0xff]  ;;  %v14233_v41 = vpop.f32.mrf.mxu0  ;;  %vm17686_vm5 = vmmov %vm17685_vm11  ;;  %v3194_v9 = vpop.f32.mrf.mxu3 }
 0x42c   : > { %v4520_v31 = vld [vmem:[#allocation2 + $0x16a] sm:$0xff]  ;;  %vm1732_vm3 = vc.u32 %v1724_v58, %v1728_v17  ;;  %v1734_v62 = vadd.s32 %v1728_v17, %v1724_v58  ;;  %4375 = vst.msk [vmem:[#allocation2 + $0x179] sm:$0xff] %vm17685_vm11, %v4327_v37  ;;  %v1686_v42 = vsub.s32 %v14066_v30, %v1685_v6  ;;  %4663 = vrot.lane.b32.xlu1 %v14222_v55, %s10045_s12  ;;  %v4395_v58 = vld [vmem:[#allocation2 + $0x80] sm:$0xff]  ;;  %v14238_v6 = vpop.permute.xlu2 %4641 }
 0x42d   : > { %5746 = vrot.lane.b32.xlu2 %v5588_v7, %s10045_s12  ;;  %v1713_v29 = vshrl.u32 %v1712_v51, 4  ;;  %v1733_v23 = vsel %vm1732_vm3, 1, %v17230_v36  ;;  %v4180_v34 = vadd.f32 %v4126_v1, %v3192_v18  ;;  %4853 = vrot.lane.b32.xlu0 %v4520_v31, %s10048_s9  ;;  %v4923_v46 = vsel %vm17686_vm5, %v4395_v58, %v13420_v57  ;;  %v14240_v51 = vpop.permute.xlu0 %4823  ;;  %v17693_v1 = vld [vmem:[#allocation44_spill] sm:$0xff] }
 0x42e   : > { %v1735_v26 = vadd.s32 %v1733_v23, %v1727_v22  ;;  %vm1736_vm15 = vc.u32 %v1734_v62, %v1730_v38  ;;  %vm1792_vm2 = vcmp.ne.s32.totalorder %v1686_v42, 0  ;;  %vm1840_vm1 = vcmp.lt.s32.totalorder %v1686_v42, 0 }
 0x42f   : > { %v1936_v28 = vadd.s32 24, %v1686_v42  ;;  %v1714_v30 = vmul.u32 24, %v1713_v29  ;;  %vm1888_vm11 = vmand %vm1840_vm1, %vm1792_vm2  ;;  %v4232_v17 = vadd.f32 %v13801_v47, %v4180_v34  ;;  %v1729_v22 = vshrl.u32 %v14200_v27, 16  ;;  %v5587_v29 = vld [vmem:[#allocation2 + $0x99] sm:$0xff] }
 0x430   : > { %v1737_v38 = vsel %vm1736_vm15, 1, %v17230_v36  ;;  %vm17687_vm3 = vcmask 130048   ;;  %v17688_v57 = vmov 0  ;;  %vm17691_vm2 = vcmask 195584  }
 0x431   : > { %v4972_v18 = vsel %vm17687_vm3, %v4923_v46, %v13854_v56  ;;  %v1984_v37 = vsel %vm1888_vm11, %v1936_v28, %v1686_v42  ;;  %v1715_v7 = vsub.s32 %v14100_v49, %v1714_v30  ;;  %v4280_v31 = vmax.f32 %v4232_v17, 0.0  ;;  %vm17692_vm1 = vmmov %vm17691_vm2  ;;  %v4396_v46 = vld [vmem:[#allocation2 + $0x88] sm:$0xff] }
 0x432   : > { %vm14247_vm6 = vcmp.lt.s32.totalorder %v1984_v37, 16  ;;  %9662 = vmatmul.msk.f32.gmra.mxu3 %vm17691_vm2, %v4972_v18  ;;  %v1731_v27 = vshrl.u32 %v14207_v10, 16  ;;  %v1739_v62 = vadd.s32 %v1737_v38, %v1735_v26  ;;  %v3195_v56 = vadd.f32 %v3194_v9, %v17693_v1  ;;  %v4129_v10 = vpop.f32.mrf.mxu2  ;;  %v5586_v26 = vld [vmem:[#allocation2 + $0x91] sm:$0xff]  ;;  %v14270_v17 = vpop.permute.xlu1 %4825  ;;  %v17704_v1 = vld [vmem:[#allocation14_spill] sm:$0xff] }
 0x433   : > { %v17689_v57 = vsel %vm14247_vm6, 4294967295, %v17688_v57  ;;  %9713 = vmatmul.msk.f32.gmra.mxu0 %vm17692_vm1, %v4972_v18  ;;  %vm1793_vm15 = vcmp.ne.s32.totalorder %v1715_v7, 0  ;;  %vm1841_vm5 = vcmp.lt.s32.totalorder %v1715_v7, 0  ;;  %v1937_v36 = vadd.s32 24, %v1715_v7  ;;  %v14261_v23 = vld [vmem:[#allocation2 + $0x179] sm:$0xff] }
 0x434   : > { %17690 = vst [vmem:[#allocation42_spill] sm:$0xff] %v17689_v57  ;;  %v4328_v49 = vsel %vm14247_vm6, %v4280_v31, 0.0  ;;  %vm14257_vm11 = vmand %vm1841_vm5, %vm1793_vm15  ;;  %v1740_v34 = vadd.s32 %v1739_v62, %v1729_v22  ;;  %vm17696_vm3 = vcmask 64512   ;;  %5744 = vrot.lane.b32.xlu1 %v5587_v29, %s10045_s12  ;;  %v4181_v28 = vadd.f32 %v4129_v10, %v3195_v56  ;;  %v14272_v22 = vpop.f32.mrf.mxu0  ;;  %v14277_v18 = vpop.permute.xlu2 %4833  ;;  %v4521_v29 = vld [vmem:[#allocation2 + $0x172] sm:$0xff] }
 0x435   : > { %4376 = vst.msk [vmem:[#allocation2 + $0x181] sm:$0xff] %vm17696_vm3, %v4328_v49  ;;  %4665 = vrot.lane.b32.xlu2 %v14261_v23, %s10045_s12  ;;  %v1985_v58 = vsel %vm14257_vm11, %v1937_v36, %v1715_v7  ;;  %5742 = vrot.lane.b32.xlu0 %v5586_v26, %s10045_s12  ;;  %vm17697_vm2 = vmmov %vm17696_vm3  ;;  %v14279_v37 = vpop.permute.xlu0 %4637  ;;  %vm17698_vm1 = vcmask 130048   ;;  %vm17702_vm5 = vcmask 195584   ;;  %v3197_v36 = vpop.f32.mrf.mxu3 }
 0x436   : > { %v1741_v30 = vadd.s32 %v1740_v34, %v1731_v27  ;;  %v4924_v38 = vsel %vm17697_vm2, %v4396_v46, %v13304_v59  ;;  %v4233_v9 = vadd.f32 %v13801_v47, %v4181_v28  ;;  %vm14283_vm15 = vcmp.lt.s32.totalorder %v1985_v58, 16  ;;  %vm17703_vm11 = vmmov %vm17702_vm5  ;;  %v4397_v28 = vld [vmem:[#allocation2 + $0x90] sm:$0xff] }
 0x437   : > { %v4973_v7 = vsel %vm17698_vm1, %v4924_v38, %v13696_v11  ;;  %v17699_v27 = vmov 0  ;;  %v3198_v56 = vadd.f32 %v3197_v36, %v17704_v1  ;;  %vm17705_vm3 = vmmov %vm17697_vm2  ;;  %v5591_v1 = vld [vmem:[#allocation2 + $0xb9] sm:$0xff] }
 0x438   : > { %v1742_v31 = vshrl.u32 %v1741_v30, 4  ;;  %v17700_v27 = vsel %vm14283_vm15, 4294967295, %v17699_v27  ;;  %v4281_v62 = vmax.f32 %v4233_v9, 0.0 }
 0x439   : > { %17701 = vst [vmem:[#allocation5_spill] sm:$0xff] %v17700_v27  ;;  %v5595_v27 = vld [vmem:[#allocation2 + $0xd9] sm:$0xff] }
 0x43a   : > { %9663 = vmatmul.msk.f32.gmra.mxu3 %vm17702_vm5, %v4973_v7  ;;  %v1743_v59 = vmul.u32 24, %v1742_v31  ;;  %v4329_v49 = vsel %vm14283_vm15, %v4281_v62, 0.0  ;;  %v4132_v10 = vpop.f32.mrf.mxu2  ;;  %v14302_v30 = vpop.permute.xlu1 %4639 }
 0x43b   : > { %9714 = vmatmul.msk.f32.gmra.mxu0 %vm17703_vm11, %v4973_v7  ;;  %4377 = vst.msk [vmem:[#allocation2 + $0x189] sm:$0xff] %vm17705_vm3, %v4329_v49  ;;  %v4182_v58 = vadd.f32 %v4132_v10, %v3198_v56  ;;  %vm17706_vm11 = vmmov %vm17705_vm3  ;;  %vm17707_vm3 = vcmask 130048  }
 0x43c   : > { %v1744_v42 = vsub.s32 %v14179_v54, %v1743_v59  ;;  %v4522_v11 = vld [vmem:[#allocation2 + $0x17a] sm:$0xff]  ;;  %4855 = vrot.lane.b32.xlu1 %v4521_v29, %s10048_s9  ;;  %v14300_v54 = vpop.f32.mrf.mxu0  ;;  %v4925_v46 = vsel %vm17706_vm11, %v4397_v28, %v13541_v0  ;;  %v14307_v31 = vpop.permute.xlu2 %5728  ;;  %v17708_v59 = vmov 0  ;;  %v5590_v28 = vld [vmem:[#allocation2 + $0xb1] sm:$0xff] }
 0x43d   : > { %v14293_v34 = vld [vmem:[#allocation2 + $0x181] sm:$0xff]  ;;  %4857 = vrot.lane.b32.xlu2 %v4522_v11, %s10048_s9  ;;  %v4234_v9 = vadd.f32 %v13801_v47, %v4182_v58  ;;  %v14309_v7 = vpop.permute.xlu0 %4829  ;;  %v4974_v62 = vsel %vm17707_vm3, %v4925_v46, %v13968_v43  ;;  %v4398_v43 = vld [vmem:[#allocation2 + $0x98] sm:$0xff] }
 0x43e   : > { %vm1794_vm2 = vcmp.ne.s32.totalorder %v1744_v42, 0  ;;  %vm1842_vm1 = vcmp.lt.s32.totalorder %v1744_v42, 0  ;;  %v1938_v26 = vadd.s32 24, %v1744_v42  ;;  %5019 = vrot.lane.b32.xlu0 %v14293_v34, %s10045_s12  ;;  %v9746_v58 = vld [vmem:[%s16886_s3 + $0x38] sm:$0xff] }
 0x43f   : > { %vm1890_vm5 = vmand %vm1842_vm1, %vm1794_vm2  ;;  %v4282_v36 = vmax.f32 %v4234_v9, 0.0  ;;  %vm17711_vm2 = vcmask 195584   ;;  %6312 = vmatpush.msrb.mxu1 %v9746_v58  ;;  %v4399_v9 = vld [vmem:[#allocation2 + $0xa0] sm:$0xff] }
 0x440   : > { %v1986_v38 = vsel %vm1890_vm5, %v1938_v26, %v1744_v42  ;;  %vm17712_vm1 = vmmov %vm17711_vm2 }
 0x441   : > { %vm14313_vm15 = vcmp.lt.s32.totalorder %v1986_v38, 16  ;;  %vm17713_vm5 = vmmov %vm17706_vm11  ;;  %v5589_v38 = vld [vmem:[#allocation2 + $0xa9] sm:$0xff] }
 0x442   : > { %v17709_v59 = vsel %vm14313_vm15, 4294967295, %v17708_v59  ;;  %9664 = vmatmul.msk.f32.gmra.mxu3 %vm17711_vm2, %v4974_v62  ;;  %v4330_v0 = vsel %vm14313_vm15, %v4282_v36, 0.0  ;;  %v14321_v47 = vld [vmem:[#allocation2 + $0x189] sm:$0xff]  ;;  %v14333_v42 = vpop.permute.xlu1 %5720  ;;  %vm17714_vm11 = vmmov %vm17713_vm5 }
 0x443   : > { %17710 = vst [vmem:[#allocation13_spill] sm:$0xff] %v17709_v59  ;;  %9715 = vmatmul.msk.f32.gmra.mxu0 %vm17712_vm1, %v4974_v62  ;;  %v14323_v56 = vld [vmem:[#allocation2 + $0x182] sm:$0xff]  ;;  %v4926_v29 = vsel %vm17714_vm11, %v4398_v43, %v13577_v24  ;;  %vm17715_vm2 = vmmov %vm17712_vm1  ;;  %v5212_v24 = vpop.f32.mrf.mxu3 }
 0x444   : > { %4378 = vst.msk [vmem:[#allocation2 + $0x191] sm:$0xff] %vm17713_vm5, %v4330_v0  ;;  %5021 = vrot.lane.b32.xlu1 %v14321_v47, %s10045_s12  ;;  %v14331_v49 = vpop.f32.mrf.mxu0  ;;  %v14337_v11 = vpop.permute.xlu2 %4647  ;;  %v4975_v26 = vsel %vm17707_vm3, %v4926_v29, %v13962_v52  ;;  %v14354_v52 = vadd.f32 %v14233_v41, %v5212_v24  ;;  %v4927_v0 = vsel %vm17713_vm5, %v4399_v9, %v13478_v15  ;;  %vm17717_vm11 = vmmov %vm17707_vm3  ;;  %v5592_v15 = vld [vmem:[#allocation2 + $0xc1] sm:$0xff] }
 0x445   : > { %5752 = vrot.lane.b32.xlu2 %v5591_v1, %s10045_s12  ;;  %v14339_v10 = vpop.permute.xlu0 %5718  ;;  %v4976_v29 = vsel %vm17717_vm11, %v4927_v0, %v13746_v61  ;;  %vm17718_vm3 = vmmov %vm17712_vm1  ;;  %v4400_v61 = vld [vmem:[#allocation2 + $0xa8] sm:$0xff] }
 0x446   : > { %5031 = vrot.lane.b32.xlu0 %v14323_v56, %s10048_s9  ;;  %17716 = vst [vmem:[#allocation16_spill] sm:$0xff] %v14354_v52 }
 0x44a   : > { %9665 = vmatmul.msk.f32.gmra.mxu3 %vm17715_vm2, %v4975_v26  ;;  %v14359_v36 = vpop.permute.xlu1 %4831  ;;  %vm17719_vm2 = vmmov %vm17712_vm1 }
 0x44b   : > { %9716 = vmatmul.msk.f32.gmra.mxu0 %vm17712_vm1, %v4975_v26  ;;  %v14348_v46 = vld [vmem:[#allocation2 + $0x191] sm:$0xff]  ;;  %v5215_v58 = vpop.f32.mrf.mxu3  ;;  %vm17721_vm1 = vmmov %vm17713_vm5 }
 0x44c   : > { %5750 = vrot.lane.b32.xlu1 %v5590_v28, %s10045_s12  ;;  %v14357_v62 = vpop.f32.mrf.mxu0  ;;  %v14363_v1 = vpop.permute.xlu2 %4839  ;;  %v14371_v41 = vld [vmem:[#allocation2 + $0x18a] sm:$0xff]  ;;  %v14373_v26 = vld [vmem:[#allocation2 + $0x192] sm:$0xff]  ;;  %v14380_v28 = vadd.f32 %v14272_v22, %v5215_v58  ;;  %v4928_v9 = vsel %vm17721_vm1, %v4400_v61, %v13707_v16  ;;  %vm17722_vm5 = vmmov %vm17717_vm11 }
 0x44d   : > { %5023 = vrot.lane.b32.xlu2 %v14348_v46, %s10045_s12  ;;  %v14365_v43 = vpop.permute.xlu0 %4643  ;;  %v4977_v59 = vsel %vm17722_vm5, %v4928_v9, %v14071_v12  ;;  %vm17723_vm11 = vmmov %vm17719_vm2  ;;  %v5593_v22 = vld [vmem:[#allocation2 + $0xc9] sm:$0xff]  ;;  %v5594_v58 = vld [vmem:[#allocation2 + $0xd1] sm:$0xff] }
 0x44e   : > { %5748 = vrot.lane.b32.xlu0 %v5589_v38, %s10045_s12  ;;  %17720 = vst [vmem:[#allocation44_spill] sm:$0xff] %v14380_v28  ;;  %v4401_v61 = vld [vmem:[#allocation2 + $0xb0] sm:$0xff] }
 0x452   : > { %9666 = vmatmul.msk.f32.gmra.mxu3 %vm17718_vm3, %v4976_v29  ;;  %v14385_v38 = vpop.permute.xlu1 %4645  ;;  %vm17724_vm3 = vmmov %vm17719_vm2 }
 0x453   : > { %9717 = vmatmul.msk.f32.gmra.mxu0 %vm17719_vm2, %v4976_v29  ;;  %vm17726_vm2 = vmmov %vm17721_vm1 }
 0x454   : > { %5033 = vrot.lane.b32.xlu1 %v14371_v41, %s10048_s9  ;;  %v14383_v24 = vpop.f32.mrf.mxu0  ;;  %v14389_v0 = vpop.permute.xlu2 %5734  ;;  %vm17727_vm1 = vmmov %vm17722_vm5 }
 0x455   : > { %5035 = vrot.lane.b32.xlu2 %v14373_v26, %s10048_s9  ;;  %v14391_v29 = vpop.permute.xlu0 %4835  ;;  %vm17728_vm5 = vmmov %vm17724_vm3 }
 0x456   : > { %5754 = vrot.lane.b32.xlu0 %v5592_v15, %s10045_s12  ;;  %v5218_v15 = vpop.f32.mrf.mxu3 }
 0x457   : > { %v14400_v16 = vadd.f32 %v14300_v54, %v5218_v15  ;;  %v5597_v54 = vld [vmem:[#allocation2 + $0xe9] sm:$0xff]  ;;  %v5598_v15 = vld [vmem:[#allocation2 + $0xf1] sm:$0xff] }
 0x459   : > { %17725 = vst [vmem:[#allocation14_spill] sm:$0xff] %v14400_v16 }
 0x45a   : > { %9667 = vmatmul.msk.f32.gmra.mxu3 %vm17723_vm11, %v4977_v59  ;;  %v14405_v12 = vpop.permute.xlu1 %5726  ;;  %vm17729_vm11 = vmmov %vm17724_vm3 }
 0x45b   : > { %9718 = vmatmul.msk.f32.gmra.mxu0 %vm17724_vm3, %v4977_v59  ;;  %v4929_v59 = vsel %vm17726_vm2, %v4401_v61, %v13744_v60  ;;  %v4402_v61 = vld [vmem:[#allocation2 + $0xb8] sm:$0xff]  ;;  %vm17731_vm3 = vmmov %vm17726_vm2 }
 0x45c   : > { %5756 = vrot.lane.b32.xlu1 %v5593_v22, %s10045_s12  ;;  %v14403_v57 = vpop.f32.mrf.mxu0  ;;  %v14409_v9 = vpop.permute.xlu2 %4653  ;;  %v4978_v22 = vsel %vm17727_vm1, %v4929_v59, %v14012_v13  ;;  %v4930_v59 = vsel %vm17731_vm3, %v4402_v61, %v13638_v35  ;;  %vm17732_vm2 = vmmov %vm17727_vm1  ;;  %v4403_v61 = vld [vmem:[#allocation2 + $0xc0] sm:$0xff] }
 0x45d   : > { %5758 = vrot.lane.b32.xlu2 %v5594_v58, %s10045_s12  ;;  %v14411_v63 = vpop.permute.xlu0 %5724  ;;  %vm17733_vm1 = vmmov %vm17728_vm5 }
 0x45e   : > { %5760 = vrot.lane.b32.xlu0 %v5595_v27, %s10045_s12  ;;  %v5596_v27 = vld [vmem:[#allocation2 + $0xe1] sm:$0xff]  ;;  %v5221_v58 = vpop.f32.mrf.mxu3 }
 0x45f   : > { %v14420_v60 = vadd.f32 %v14331_v49, %v5221_v58  ;;  %v5599_v49 = vld [vmem:[#allocation2 + $0xf9] sm:$0xff] }
 0x461   : > { %17730 = vst [vmem:[#allocation58_spill] sm:$0xff] %v14420_v60 }
 0x462   : > { %9668 = vmatmul.msk.f32.gmra.mxu3 %vm17728_vm5, %v4978_v22  ;;  %v14425_v13 = vpop.permute.xlu1 %4837  ;;  %vm17734_vm5 = vmmov %vm17733_vm1 }
 0x463   : > { %9719 = vmatmul.msk.f32.gmra.mxu0 %vm17729_vm11, %v4978_v22  ;;  %vm17736_vm11 = vmmov %vm17731_vm3 }
 0x464   : > { %5762 = vrot.lane.b32.xlu1 %v5596_v27, %s10045_s12  ;;  %v14423_v33 = vpop.f32.mrf.mxu0  ;;  %v14429_v22 = vpop.permute.xlu2 %4845  ;;  %v4979_v27 = vsel %vm17732_vm2, %v4930_v59, %v13876_v14  ;;  %v4931_v59 = vsel %vm17736_vm11, %v4403_v61, %v13860_v44  ;;  %vm17738_vm3 = vmmov %vm17732_vm2  ;;  %v4404_v61 = vld [vmem:[#allocation2 + $0xc8] sm:$0xff] }
 0x465   : > { %5764 = vrot.lane.b32.xlu2 %v5597_v54, %s10045_s12  ;;  %v14431_v16 = vpop.permute.xlu0 %4649  ;;  %v5600_v54 = vld [vmem:[#allocation2 + $0x101] sm:$0xff]  ;;  %vm17739_vm2 = vmmov %vm17733_vm1 }
 0x466   : > { %5766 = vrot.lane.b32.xlu0 %v5598_v15, %s10045_s12  ;;  %v5224_v58 = vpop.f32.mrf.mxu3  ;;  %v5601_v15 = vld [vmem:[#allocation2 + $0x109] sm:$0xff] }
 0x467   : > { %v14440_v35 = vadd.f32 %v14357_v62, %v5224_v58  ;;  %v5602_v62 = vld [vmem:[#allocation2 + $0x111] sm:$0xff] }
 0x469   : > { %17735 = vst [vmem:[#allocation59_spill] sm:$0xff] %v14440_v35 }
 0x46a   : > { %9669 = vmatmul.msk.f32.gmra.mxu3 %vm17733_vm1, %v4979_v27  ;;  %v14445_v14 = vpop.permute.xlu1 %4651 }
 0x46b   : > { %9720 = vmatmul.msk.f32.gmra.mxu0 %vm17734_vm5, %v4979_v27  ;;  %vm17741_vm5 = vmmov %vm17736_vm11 }
 0x46c   : > { %5768 = vrot.lane.b32.xlu1 %v5599_v49, %s10045_s12  ;;  %v14443_v60 = vpop.f32.mrf.mxu0  ;;  %v14449_v27 = vpop.permute.xlu2 %5740  ;;  %v4980_v49 = vsel %vm17738_vm3, %v4931_v59, %v14119_v25  ;;  %v4932_v25 = vsel %vm17741_vm5, %v4404_v61, %v13917_v39  ;;  %vm17742_vm11 = vmmov %vm17738_vm3  ;;  %v5623_v39 = vld [vmem:[#allocation2 + $0x3a] sm:$0xff] }
 0x46d   : > { %5770 = vrot.lane.b32.xlu2 %v5600_v54, %s10045_s12  ;;  %17737 = vst [vmem:[#allocation60_spill] sm:$0xff] %v14449_v27  ;;  %v14451_v28 = vpop.permute.xlu0 %4841  ;;  %v5603_v54 = vld [vmem:[#allocation2 + $0x119] sm:$0xff]  ;;  %vm17743_vm3 = vmmov %vm17733_vm1 }
 0x46e   : > { %5772 = vrot.lane.b32.xlu0 %v5601_v15, %s10045_s12  ;;  %v5227_v58 = vpop.f32.mrf.mxu3  ;;  %v5622_v15 = vld [vmem:[#allocation2 + $0x32] sm:$0xff] }
 0x46f   : > { %v14460_v44 = vadd.f32 %v14383_v24, %v5227_v58  ;;  %v5604_v24 = vld [vmem:[#allocation2 + $0x121] sm:$0xff]  ;;  %v5605_v58 = vld [vmem:[#allocation2 + $0x129] sm:$0xff] }
 0x471   : > { %17740 = vst [vmem:[#allocation61_spill] sm:$0xff] %v14460_v44  ;;  %v4405_v44 = vld [vmem:[#allocation2 + $0xd0] sm:$0xff] }
 0x472   : > { %9670 = vmatmul.msk.f32.gmra.mxu3 %vm17739_vm2, %v4980_v49  ;;  %v14463_v35 = vpop.permute.xlu1 %5732  ;;  %vm17744_vm2 = vmmov %vm17733_vm1 }
 0x473   : > { %9721 = vmatmul.msk.f32.gmra.mxu0 %vm17733_vm1, %v4980_v49  ;;  %vm17746_vm1 = vmmov %vm17741_vm5 }
 0x474   : > { %5774 = vrot.lane.b32.xlu1 %v5602_v62, %s10045_s12  ;;  %v4981_v62 = vsel %vm17742_vm11, %v4932_v25, %v14121_v2  ;;  %v4933_v25 = vsel %vm17746_vm1, %v4405_v44, %v13794_v50  ;;  %vm17747_vm5 = vmmov %vm17742_vm11  ;;  %v5607_v50 = vld [vmem:[#allocation2 + $0x139] sm:$0xff] }
 0x475   : > { %5776 = vrot.lane.b32.xlu2 %v5603_v54, %s10045_s12  ;;  %v14469_v49 = vpop.permute.xlu0 %5730  ;;  %v5409_v54 = vpop.f32.mrf.mxu0  ;;  %vm17748_vm11 = vmmov %vm17744_vm2 }
 0x476   : > { %5910 = vrot.lane.b32.xlu0 %v5622_v15, %s10048_s9  ;;  %v14467_v59 = vpop.permute.xlu2 %4659 }
 0x477   : > { %v5230_v15 = vpop.f32.mrf.mxu3 }
 0x478   : > { %v14478_v61 = vadd.f32 %v14403_v57, %v5230_v15  ;;  %v5624_v15 = vld [vmem:[#allocation2 + $0x42] sm:$0xff] }
 0x47a   : > { %9671 = vmatmul.msk.f32.gmra.mxu3 %vm17743_vm3, %v4981_v62  ;;  %17745 = vst [vmem:[#allocation62_spill] sm:$0xff] %v14478_v61  ;;  %v14481_v2 = vpop.permute.xlu1 %4843  ;;  %vm17749_vm3 = vmmov %vm17744_vm2  ;;  %v4406_v61 = vld [vmem:[#allocation2 + $0xd8] sm:$0xff] }
 0x47b   : > { %9722 = vmatmul.msk.f32.gmra.mxu0 %vm17744_vm2, %v4981_v62  ;;  %vm17751_vm2 = vmmov %vm17746_vm1 }
 0x47c   : > { %5778 = vrot.lane.b32.xlu1 %v5604_v24, %s10045_s12  ;;  %v4982_v24 = vsel %vm17747_vm5, %v4933_v25, %v13934_v21  ;;  %v4934_v25 = vsel %vm17751_vm2, %v4406_v61, %v14022_v5  ;;  %vm17753_vm1 = vmmov %vm17747_vm5  ;;  %v5609_v61 = vld [vmem:[#allocation2 + $0x149] sm:$0xff] }
 0x47d   : > { %5780 = vrot.lane.b32.xlu2 %v5605_v58, %s10045_s12  ;;  %v14487_v52 = vpop.permute.xlu0 %4655  ;;  %v5412_v57 = vpop.f32.mrf.mxu0  ;;  %v5606_v58 = vld [vmem:[#allocation2 + $0x131] sm:$0xff]  ;;  %vm17754_vm5 = vmmov %vm17749_vm3 }
 0x47e   : > { %5912 = vrot.lane.b32.xlu0 %v5623_v39, %s10048_s9  ;;  %v14485_v62 = vpop.permute.xlu2 %4851 }
 0x481   : > { %v5233_v39 = vpop.f32.mrf.mxu3 }
 0x482   : > { %9672 = vmatmul.msk.f32.gmra.mxu3 %vm17748_vm11, %v4982_v24  ;;  %v14496_v44 = vadd.f32 %v14423_v33, %v5233_v39  ;;  %vm17755_vm11 = vmmov %vm17749_vm3  ;;  %v9745_v33 = vld [vmem:[%s16886_s3 + $0x30] sm:$0xff] }
 0x483   : > { %9723 = vmatmul.msk.f32.gmra.mxu0 %vm17749_vm3, %v4982_v24  ;;  %v14499_v21 = vpop.permute.xlu1 %4657  ;;  %6313 = vmatpush.msrb.mxu1 %v9745_v33  ;;  %v5625_v39 = vld [vmem:[#allocation2 + $0x4a] sm:$0xff]  ;;  %vm17758_vm3 = vmmov %vm17751_vm2 }
 0x484   : > { %5782 = vrot.lane.b32.xlu1 %v5606_v58, %s10045_s12  ;;  %17750 = vst [vmem:[#allocation63_spill] sm:$0xff] %v14496_v44  ;;  %v4983_v58 = vsel %vm17753_vm1, %v4934_v25, %v14205_v19  ;;  %v4407_v25 = vld [vmem:[#allocation2 + $0xe0] sm:$0xff]  ;;  %vm17759_vm2 = vmmov %vm17753_vm1 }
 0x485   : > { %5914 = vrot.lane.b32.xlu2 %v5624_v15, %s10048_s9  ;;  %v14505_v27 = vpop.permute.xlu0 %4847  ;;  %v5608_v15 = vld [vmem:[#allocation2 + $0x141] sm:$0xff]  ;;  %v4935_v33 = vsel %vm17758_vm3, %v4407_v25, %v14061_v45  ;;  %vm17760_vm1 = vmmov %vm17754_vm5 }
 0x486   : > { %5784 = vrot.lane.b32.xlu0 %v5607_v50, %s10045_s12  ;;  %v5415_v50 = vpop.f32.mrf.mxu0  ;;  %v4408_v45 = vld [vmem:[#allocation2 + $0xe8] sm:$0xff] }
 0x487   : > { %v14503_v24 = vpop.permute.xlu2 %5746 }
 0x488   : > { %17752 = vst [vmem:[#allocation64_spill] sm:$0xff] %v14503_v24 }
 0x489   : > { %v5236_v5 = vpop.f32.mrf.mxu3 }
 0x48a   : > { %9673 = vmatmul.msk.f32.gmra.mxu3 %vm17754_vm5, %v4983_v58  ;;  %v14517_v19 = vadd.f32 %v14443_v60, %v5236_v5  ;;  %vm17761_vm5 = vmmov %vm17760_vm1  ;;  %v5626_v60 = vld [vmem:[#allocation2 + $0x52] sm:$0xff] }
 0x48b   : > { %9724 = vmatmul.msk.f32.gmra.mxu0 %vm17755_vm11, %v4983_v58  ;;  %vm17764_vm11 = vmmov %vm17758_vm3 }
 0x48c   : > { %5786 = vrot.lane.b32.xlu1 %v5608_v15, %s10045_s12  ;;  %17756 = vst [vmem:[#allocation65_spill] sm:$0xff] %v14517_v19  ;;  %v4984_v15 = vsel %vm17759_vm2, %v4935_v33, %v14171_v3  ;;  %v17763_v3 = vld [vmem:[#allocation15_spill] sm:$0xff]  ;;  %vm17766_vm3 = vmmov %vm17759_vm2 }
 0x48d   : > { %5916 = vrot.lane.b32.xlu2 %v5625_v39, %s10048_s9  ;;  %v14520_v58 = vpop.permute.xlu1 %5738  ;;  %v14526_v24 = vpop.permute.xlu0 %5736  ;;  %v4936_v33 = vsel %vm17764_vm11, %v4408_v45, %v17763_v3  ;;  %vm17767_vm2 = vmmov %vm17760_vm1  ;;  %v4409_v45 = vld [vmem:[#allocation2 + $0xf0] sm:$0xff] }
 0x48e   : > { %5788 = vrot.lane.b32.xlu0 %v5609_v61, %s10045_s12  ;;  %17757 = vst [vmem:[#allocation66_spill] sm:$0xff] %v14520_v58  ;;  %v5418_v61 = vpop.f32.mrf.mxu0  ;;  %v17765_v58 = vld [vmem:[#allocation33_spill] sm:$0xff] }
 0x48f   : > { %v14524_v44 = vpop.permute.xlu2 %4665 }
 0x492   : > { %9674 = vmatmul.msk.f32.gmra.mxu3 %vm17760_vm1, %v4984_v15 }
 0x493   : > { %9725 = vmatmul.msk.f32.gmra.mxu0 %vm17761_vm5, %v4984_v15  ;;  %v5239_v39 = vpop.f32.mrf.mxu3  ;;  %vm17769_vm5 = vmmov %vm17764_vm11 }
 0x494   : > { %5790 = vrot.lane.b32.xlu1 %v14039_v32, %s10045_s12  ;;  %v14535_v5 = vadd.f32 %v5409_v54, %v5239_v39  ;;  %v4985_v32 = vsel %vm17766_vm3, %v4936_v33, %v17765_v58  ;;  %v5627_v54 = vld [vmem:[#allocation2 + $0x5a] sm:$0xff]  ;;  %v4937_v58 = vsel %vm17769_vm5, %v4409_v45, %v14159_v53  ;;  %vm17770_vm11 = vmmov %vm17766_vm3 }
 0x495   : > { %5918 = vrot.lane.b32.xlu2 %v5626_v60, %s10048_s9  ;;  %v14539_v25 = vpop.permute.xlu1 %4849  ;;  %v17768_v60 = vld [vmem:[#allocation48_spill] sm:$0xff]  ;;  %vm17771_vm3 = vmmov %vm17760_vm1 }
 0x496   : > { %17762 = vst [vmem:[#allocation67_spill] sm:$0xff] %v14535_v5  ;;  %5792 = vrot.lane.b32.xlu0 %v14088_v20, %s10045_s12  ;;  %v14545_v19 = vpop.permute.xlu0 %4661 }
 0x497   : > { %v14543_v15 = vpop.permute.xlu2 %4857  ;;  %v5421_v5 = vpop.f32.mrf.mxu0 }
 0x49a   : > { %9675 = vmatmul.msk.f32.gmra.mxu3 %vm17767_vm2, %v4985_v32  ;;  %vm17772_vm2 = vmmov %vm17760_vm1 }
 0x49b   : > { %9726 = vmatmul.msk.f32.gmra.mxu0 %vm17760_vm1, %v4985_v32  ;;  %vm17774_vm1 = vmmov %vm17769_vm5 }
 0x49c   : > { %v5242_v20 = vpop.f32.mrf.mxu3  ;;  %5920 = vrot.lane.b32.xlu1 %v5627_v54, %s10048_s9  ;;  %v4986_v54 = vsel %vm17770_vm11, %v4937_v58, %v14240_v51  ;;  %vm17775_vm5 = vmmov %vm17770_vm11 }
 0x49d   : > { %5794 = vrot.lane.b32.xlu2 %v17768_v60, %s10045_s12  ;;  %v14554_v39 = vadd.f32 %v5412_v57, %v5242_v20  ;;  %v5628_v57 = vld [vmem:[#allocation2 + $0x62] sm:$0xff]  ;;  %v4410_v20 = vld [vmem:[#allocation2 + $0xf8] sm:$0xff]  ;;  %vm17776_vm11 = vmmov %vm17772_vm2 }
 0x49e   : > { %5796 = vrot.lane.b32.xlu0 %v14184_v8, %s10045_s12  ;;  %v14558_v3 = vpop.permute.xlu1 %4663  ;;  %v4938_v51 = vsel %vm17774_vm1, %v4410_v20, %v14225_v40  ;;  %v5630_v40 = vld [vmem:[#allocation2 + $0x72] sm:$0xff] }
 0x49f   : > { %v14562_v33 = vpop.permute.xlu2 %5752  ;;  %v14564_v32 = vpop.permute.xlu0 %4853  ;;  %v4987_v58 = vsel %vm17775_vm5, %v4938_v51, %v14270_v17  ;;  %v4411_v17 = vld [vmem:[#allocation2 + $0x100] sm:$0xff]  ;;  %v17779_v20 = vld [vmem:[#allocation45_spill] sm:$0xff] }
 0x4a2   : > { %9676 = vmatmul.msk.f32.gmra.mxu3 %vm17771_vm3, %v4986_v54  ;;  %vm17777_vm3 = vmmov %vm17772_vm2 }
 0x4a3   : > { %9727 = vmatmul.msk.f32.gmra.mxu0 %vm17772_vm2, %v4986_v54  ;;  %vm17780_vm2 = vmmov %vm17774_vm1 }
 0x4a4   : > { %5922 = vrot.lane.b32.xlu1 %v5628_v57, %s10048_s9  ;;  %v4939_v51 = vsel %vm17780_vm2, %v4411_v17, %v17779_v20  ;;  %vm17781_vm1 = vmmov %vm17775_vm5 }
 0x4a5   : > { %v5245_v8 = vpop.f32.mrf.mxu3  ;;  %5798 = vrot.lane.b32.xlu2 %v14222_v55, %s10045_s12  ;;  %v5424_v55 = vpop.f32.mrf.mxu0  ;;  %vm17782_vm5 = vmmov %vm17777_vm3 }
 0x4a6   : > { %v14573_v53 = vadd.f32 %v5415_v50, %v5245_v8  ;;  %5800 = vrot.lane.b32.xlu0 %v14261_v23, %s10045_s12  ;;  %v14577_v60 = vpop.permute.xlu1 %5744  ;;  %v5629_v50 = vld [vmem:[#allocation2 + $0x6a] sm:$0xff] }
 0x4a7   : > { %v14581_v45 = vpop.permute.xlu0 %5742  ;;  %v14585_v54 = vpop.permute.xlu2 %5023 }
 0x4a8   : > { %17773 = vst [vmem:[#allocation15_spill] sm:$0xff] %v14573_v53  ;;  %v4988_v53 = vsel %vm17781_vm1, %v4939_v51, %v14154_v4  ;;  %v14614_v4 = vld [vmem:[#allocation2 + $0x108] sm:$0xff] }
 0x4a9   : > { %17785 = vst [vmem:[#allocation45_spill] sm:$0xff] %v14614_v4 }
 0x4aa   : > { %9677 = vmatmul.msk.f32.gmra.mxu3 %vm17776_vm11, %v4987_v58  ;;  %vm17783_vm11 = vmmov %vm17777_vm3 }
 0x4ab   : > { %9728 = vmatmul.msk.f32.gmra.mxu0 %vm17777_vm3, %v4987_v58  ;;  %vm17786_vm3 = vmmov %vm17780_vm2 }
 0x4ac   : > { %5924 = vrot.lane.b32.xlu1 %v5629_v50, %s10048_s9  ;;  %vm17787_vm2 = vmmov %vm17781_vm1 }
 0x4ad   : > { %v5248_v23 = vpop.f32.mrf.mxu3  ;;  %5802 = vrot.lane.b32.xlu2 %v14293_v34, %s10045_s12  ;;  %vm17788_vm1 = vmmov %vm17782_vm5 }
 0x4ae   : > { %v14592_v57 = vadd.f32 %v5418_v61, %v5248_v23  ;;  %5926 = vrot.lane.b32.xlu0 %v5630_v40, %s10048_s9  ;;  %v14595_v8 = vpop.permute.xlu1 %4855  ;;  %v5427_v61 = vpop.f32.mrf.mxu0  ;;  %v5631_v23 = vld [vmem:[#allocation2 + $0x7a] sm:$0xff] }
 0x4af   : > { %v14605_v34 = vpop.permute.xlu2 %5035 }
 0x4b0   : > { %17778 = vst [vmem:[#allocation33_spill] sm:$0xff] %v14592_v57  ;;  %v14599_v58 = vpop.permute.xlu0 %5019 }
 0x4b2   : > { %9678 = vmatmul.msk.f32.gmra.mxu3 %vm17782_vm5, %v4988_v53  ;;  %vm17789_vm5 = vmmov %vm17788_vm1 }
 0x4b3   : > { %9729 = vmatmul.msk.f32.gmra.mxu0 %vm17783_vm11, %v4988_v53  ;;  %v4940_v53 = vsel %vm17786_vm3, %v14614_v4, %v14279_v37  ;;  %vm17792_vm11 = vmmov %vm17786_vm3 }
 0x4b4   : > { %5804 = vrot.lane.b32.xlu1 %v14321_v47, %s10045_s12  ;;  %v4989_v47 = vsel %vm17787_vm2, %v4940_v53, %v14309_v7  ;;  %vm17793_vm3 = vmmov %vm17787_vm2 }
 0x4b5   : > { %v5251_v50 = vpop.f32.mrf.mxu3  ;;  %5806 = vrot.lane.b32.xlu2 %v14348_v46, %s10045_s12  ;;  %v5619_v46 = vld [vmem:[#allocation2 + $0x199] sm:$0xff]  ;;  %vm17794_vm2 = vmmov %vm17788_vm1 }
 0x4b6   : > { %v14611_v40 = vadd.f32 %v5421_v5, %v5251_v50  ;;  %5928 = vrot.lane.b32.xlu0 %v5631_v23, %s10048_s9  ;;  %v14616_v17 = vpop.permute.xlu1 %5021  ;;  %v5620_v5 = vld [vmem:[#allocation2 + $0x1a1] sm:$0xff]  ;;  %v5430_v7 = vpop.f32.mrf.mxu0 }
 0x4b7   : > { %v14627_v51 = vpop.permute.xlu2 %5758  ;;  %v5632_v23 = vld [vmem:[#allocation2 + $0x82] sm:$0xff] }
 0x4b8   : > { %17784 = vst [vmem:[#allocation48_spill] sm:$0xff] %v14611_v40  ;;  %v14621_v20 = vpop.permute.xlu0 %5031  ;;  %v14634_v40 = vld [vmem:[#allocation2 + $0x110] sm:$0xff] }
 0x4b9   : > { %17791 = vst [vmem:[#allocation69_spill] sm:$0xff] %v14634_v40 }
 0x4ba   : > { %9679 = vmatmul.msk.f32.gmra.mxu3 %vm17788_vm1, %v4989_v47 }
 0x4bb   : > { %9730 = vmatmul.msk.f32.gmra.mxu0 %vm17789_vm5, %v4989_v47  ;;  %v4941_v47 = vsel %vm17792_vm11, %v14634_v40, %v14302_v30  ;;  %v14652_v30 = vld [vmem:[#allocation2 + $0x118] sm:$0xff]  ;;  %vm17797_vm5 = vmmov %vm17792_vm11 }
 0x4bc   : > { %5808 = vrot.lane.b32.xlu1 %v5619_v46, %s10045_s12  ;;  %v4990_v46 = vsel %vm17793_vm3, %v4941_v47, %v14359_v36  ;;  %17796 = vst [vmem:[#allocation71_spill] sm:$0xff] %v14652_v30  ;;  %v4942_v47 = vsel %vm17797_vm5, %v14652_v30, %v14238_v6  ;;  %vm17798_vm11 = vmmov %vm17793_vm3  ;;  %v14672_v6 = vld [vmem:[#allocation2 + $0x120] sm:$0xff] }
 0x4bd   : > { %v5254_v50 = vpop.f32.mrf.mxu3  ;;  %5810 = vrot.lane.b32.xlu2 %v5620_v5, %s10045_s12  ;;  %v5633_v5 = vld [vmem:[#allocation2 + $0x8a] sm:$0xff]  ;;  %vm17799_vm3 = vmmov %vm17788_vm1  ;;  %17802 = vst [vmem:[#allocation73_spill] sm:$0xff] %v14672_v6 }
 0x4be   : > { %v14631_v37 = vadd.f32 %v5424_v55, %v5254_v50  ;;  %5930 = vrot.lane.b32.xlu0 %v5632_v23, %s10048_s9  ;;  %v14636_v53 = vpop.permute.xlu1 %5750  ;;  %v5621_v55 = vld [vmem:[#allocation2 + $0x1a9] sm:$0xff]  ;;  %v5634_v23 = vld [vmem:[#allocation2 + $0x92] sm:$0xff] }
 0x4bf   : > { %v14654_v40 = vpop.permute.xlu2 %5764 }
 0x4c0   : > { %17790 = vst [vmem:[#allocation68_spill] sm:$0xff] %v14631_v37  ;;  %v14641_v57 = vpop.permute.xlu0 %5748 }
 0x4c2   : > { %9680 = vmatmul.msk.f32.gmra.mxu3 %vm17794_vm2, %v4990_v46  ;;  %vm17800_vm2 = vmmov %vm17788_vm1 }
 0x4c3   : > { %9731 = vmatmul.msk.f32.gmra.mxu0 %vm17788_vm1, %v4990_v46  ;;  %vm17803_vm1 = vmmov %vm17797_vm5 }
 0x4c4   : > { %5812 = vrot.lane.b32.xlu1 %v5621_v55, %s10045_s12  ;;  %v4991_v55 = vsel %vm17798_vm11, %v4942_v47, %v14277_v18  ;;  %v4943_v47 = vsel %vm17803_vm1, %v14672_v6, %v14365_v43  ;;  %vm17804_vm5 = vmmov %vm17798_vm11  ;;  %v5640_v43 = vld [vmem:[#allocation2 + $0xc2] sm:$0xff] }
 0x4c5   : > { %v5257_v50 = vpop.f32.mrf.mxu3  ;;  %5932 = vrot.lane.b32.xlu2 %v5633_v5, %s10048_s9  ;;  %v5433_v5 = vpop.f32.mrf.mxu0  ;;  %vm17805_vm11 = vmmov %vm17800_vm2 }
 0x4c6   : > { %v14649_v37 = vadd.f32 %v5427_v61, %v5257_v50  ;;  %5934 = vrot.lane.b32.xlu0 %v5634_v23, %s10048_s9  ;;  %v14656_v36 = vpop.permute.xlu1 %5033  ;;  %v5635_v61 = vld [vmem:[#allocation2 + $0x9a] sm:$0xff]  ;;  %v5636_v50 = vld [vmem:[#allocation2 + $0xa2] sm:$0xff] }
 0x4c7   : > { %v14683_v30 = vpop.permute.xlu2 %5770 }
 0x4c8   : > { %17795 = vst [vmem:[#allocation70_spill] sm:$0xff] %v14649_v37  ;;  %v14661_v46 = vpop.permute.xlu0 %5754  ;;  %v5637_v37 = vld [vmem:[#allocation2 + $0xaa] sm:$0xff] }
 0x4ca   : > { %9681 = vmatmul.msk.f32.gmra.mxu3 %vm17799_vm3, %v4991_v55  ;;  %vm17806_vm3 = vmmov %vm17800_vm2 }
 0x4cb   : > { %9732 = vmatmul.msk.f32.gmra.mxu0 %vm17800_vm2, %v4991_v55  ;;  %vm17809_vm2 = vmmov %vm17803_vm1 }
 0x4cc   : > { %5936 = vrot.lane.b32.xlu1 %v5635_v61, %s10048_s9  ;;  %v4992_v61 = vsel %vm17804_vm5, %v4943_v47, %v14391_v29  ;;  %v14692_v29 = vld [vmem:[#allocation2 + $0x128] sm:$0xff]  ;;  %vm17810_vm1 = vmmov %vm17804_vm5 }
 0x4cd   : > { %v5260_v23 = vpop.f32.mrf.mxu3  ;;  %5938 = vrot.lane.b32.xlu2 %v5636_v50, %s10048_s9  ;;  %v5639_v50 = vld [vmem:[#allocation2 + $0xba] sm:$0xff]  ;;  %17808 = vst [vmem:[#allocation75_spill] sm:$0xff] %v14692_v29  ;;  %vm17811_vm5 = vmmov %vm17806_vm3 }
 0x4ce   : > { %v14669_v4 = vadd.f32 %v5430_v7, %v5260_v23  ;;  %5940 = vrot.lane.b32.xlu0 %v5637_v37, %s10048_s9  ;;  %v14674_v18 = vpop.permute.xlu1 %5756  ;;  %v5436_v37 = vpop.f32.mrf.mxu0  ;;  %v5638_v7 = vld [vmem:[#allocation2 + $0xb2] sm:$0xff] }
 0x4d0   : > { %17801 = vst [vmem:[#allocation72_spill] sm:$0xff] %v14669_v4  ;;  %v14679_v55 = vpop.permute.xlu0 %5760 }
 0x4d2   : > { %9682 = vmatmul.msk.f32.gmra.mxu3 %vm17805_vm11, %v4992_v61  ;;  %vm17812_vm11 = vmmov %vm17806_vm3 }
 0x4d3   : > { %9733 = vmatmul.msk.f32.gmra.mxu0 %vm17806_vm3, %v4992_v61  ;;  %v4944_v61 = vsel %vm17809_vm2, %v14692_v29, %v14385_v38  ;;  %v5643_v38 = vld [vmem:[#allocation2 + $0xda] sm:$0xff]  ;;  %vm17816_vm3 = vmmov %vm17809_vm2 }
 0x4d4   : > { %5942 = vrot.lane.b32.xlu1 %v5638_v7, %s10048_s9  ;;  %v4993_v7 = vsel %vm17810_vm1, %v4944_v61, %v14425_v13  ;;  %v14712_v13 = vld [vmem:[#allocation2 + $0x130] sm:$0xff]  ;;  %vm17818_vm2 = vmmov %vm17810_vm1 }
 0x4d5   : > { %v5263_v23 = vpop.f32.mrf.mxu3  ;;  %5944 = vrot.lane.b32.xlu2 %v5639_v50, %s10048_s9  ;;  %v5641_v50 = vld [vmem:[#allocation2 + $0xca] sm:$0xff]  ;;  %17815 = vst [vmem:[#allocation78_spill] sm:$0xff] %v14712_v13  ;;  %vm17819_vm1 = vmmov %vm17811_vm5 }
 0x4d6   : > { %v14689_v4 = vadd.f32 %v5433_v5, %v5263_v23  ;;  %5946 = vrot.lane.b32.xlu0 %v5640_v43, %s10048_s9  ;;  %v14694_v47 = vpop.permute.xlu1 %5762  ;;  %v14705_v5 = vpop.permute.xlu2 %5776  ;;  %v5642_v23 = vld [vmem:[#allocation2 + $0xd2] sm:$0xff] }
 0x4d7   : > { %17813 = vst [vmem:[#allocation76_spill] sm:$0xff] %v14705_v5  ;;  %v5439_v43 = vpop.f32.mrf.mxu0 }
 0x4d8   : > { %17807 = vst [vmem:[#allocation74_spill] sm:$0xff] %v14689_v4  ;;  %v14699_v6 = vpop.permute.xlu0 %5766 }
 0x4da   : > { %9683 = vmatmul.msk.f32.gmra.mxu3 %vm17811_vm5, %v4993_v7  ;;  %vm17820_vm5 = vmmov %vm17819_vm1 }
 0x4db   : > { %9734 = vmatmul.msk.f32.gmra.mxu0 %vm17812_vm11, %v4993_v7  ;;  %v4945_v7 = vsel %vm17816_vm3, %v14712_v13, %v14337_v11  ;;  %v5526_v13 = vld [vmem:[#allocation2 + $0x30] sm:$0xff]  ;;  %vm17823_vm11 = vmmov %vm17816_vm3 }
 0x4dc   : > { %5948 = vrot.lane.b32.xlu1 %v5641_v50, %s10048_s9  ;;  %v4994_v50 = vsel %vm17818_vm2, %v4945_v7, %v14363_v1  ;;  %v14732_v1 = vld [vmem:[#allocation2 + $0x138] sm:$0xff]  ;;  %vm17825_vm15 = vmmov %vm17820_vm5 }
 0x4dd   : > { %v5266_v4 = vpop.f32.mrf.mxu3  ;;  %5950 = vrot.lane.b32.xlu2 %v5642_v23, %s10048_s9  ;;  %vm17826_vm6 = vmmov %vm17820_vm5 }
 0x4de   : > { %v14709_v29 = vadd.f32 %v5436_v37, %v5266_v4  ;;  %5952 = vrot.lane.b32.xlu0 %v5643_v38, %s10048_s9  ;;  %v14714_v61 = vpop.permute.xlu1 %5768  ;;  %v5644_v4 = vld [vmem:[#allocation2 + $0xe2] sm:$0xff]  ;;  %v5645_v37 = vld [vmem:[#allocation2 + $0xea] sm:$0xff]  ;;  %v14725_v23 = vpop.permute.xlu2 %5780 }
 0x4df   : > { %17821 = vst [vmem:[#allocation80_spill] sm:$0xff] %v14725_v23  ;;  %v5442_v7 = vpop.f32.mrf.mxu0 }
 0x4e0   : > { %17814 = vst [vmem:[#allocation77_spill] sm:$0xff] %v14709_v29  ;;  %v14719_v5 = vpop.permute.xlu0 %5772  ;;  %v5646_v29 = vld [vmem:[#allocation2 + $0xf2] sm:$0xff] }
 0x4e1   : > { %17817 = vst [vmem:[#allocation79_spill] sm:$0xff] %v14719_v5 }
 0x4e2   : > { %9684 = vmatmul.msk.f32.gmra.mxu3 %vm17819_vm1, %v4994_v50  ;;  %vm17824_vm1 = vmmov %vm17818_vm2 }
 0x4e3   : > { %9735 = vmatmul.msk.f32.gmra.mxu0 %vm17820_vm5, %v4994_v50  ;;  %v6054_v50 = vsel %vm17823_vm11, %v5526_v13, %v14339_v10  ;;  %v5649_v10 = vld [vmem:[#allocation2 + $0x10a] sm:$0xff]  ;;  %v14752_v13 = vld [vmem:[#allocation2 + $0x140] sm:$0xff]  ;;  %vm17829_vm11 = vmmov %vm17824_vm1 }
 0x4e4   : > { %5954 = vrot.lane.b32.xlu1 %v5644_v4, %s10048_s9  ;;  %v4946_v4 = vsel %vm17816_vm3, %v14732_v1, %v14431_v16 }
 0x4e5   : > { %v5269_v38 = vpop.f32.mrf.mxu3  ;;  %5956 = vrot.lane.b32.xlu2 %v5645_v37, %s10048_s9 }
 0x4e6   : > { %v14729_v11 = vadd.f32 %v5439_v43, %v5269_v38  ;;  %5958 = vrot.lane.b32.xlu0 %v5646_v29, %s10048_s9  ;;  %v14734_v5 = vpop.permute.xlu1 %5774  ;;  %v4995_v43 = vsel %vm17818_vm2, %v4946_v4, %v14451_v28  ;;  %v5647_v29 = vld [vmem:[#allocation2 + $0xfa] sm:$0xff]  ;;  %v5648_v38 = vld [vmem:[#allocation2 + $0x102] sm:$0xff]  ;;  %vm17831_vm2 = vmmov %vm17820_vm5 }
 0x4e7   : > { %v5527_v28 = vld [vmem:[#allocation2 + $0x38] sm:$0xff] }
 0x4e8   : > { %17822 = vst [vmem:[#allocation81_spill] sm:$0xff] %v14729_v11  ;;  %v5911_v23 = vpop.permute.xlu0 %5910 }
 0x4e9   : > { %v6102_v37 = vsel %vm17824_vm1, %v6054_v50, %v5911_v23  ;;  %v5915_v23 = vpop.permute.xlu2 %5914 }
 0x4ea   : > { %9685 = vmatmul.msk.f32.gmra.mxu3 %vm17820_vm5, %v4995_v43  ;;  %9748 = vmatmul.msk.f32.vlgmr.msrb.gmra.mxu1 %vm17826_vm6, %v6102_v37  ;;  %vm17827_vm6 = vmmov %vm17816_vm3 }
 0x4eb   : > { %9736 = vmatmul.msk.f32.gmra.mxu0 %vm17825_vm15, %v4995_v43  ;;  %v6055_v4 = vsel %vm17827_vm6, %v5527_v28, %v14333_v42  ;;  %vm17828_vm15 = vmmov %vm17816_vm3 }
 0x4ec   : > { %5960 = vrot.lane.b32.xlu1 %v5647_v29, %s10048_s9  ;;  %v4947_v43 = vsel %vm17828_vm15, %v14752_v13, %v14445_v14  ;;  %vm17830_vm3 = vmmov %vm17824_vm1  ;;  %v5652_v14 = vld [vmem:[#allocation2 + $0x122] sm:$0xff] }
 0x4ed   : > { %v5272_v11 = vpop.f32.mrf.mxu3  ;;  %5962 = vrot.lane.b32.xlu2 %v5648_v38, %s10048_s9  ;;  %vm17832_vm1 = vmmov %vm17831_vm2  ;;  %v5650_v38 = vld [vmem:[#allocation2 + $0x112] sm:$0xff] }
 0x4ee   : > { %v14749_v16 = vadd.f32 %v5442_v7, %v5272_v11  ;;  %5964 = vrot.lane.b32.xlu0 %v5649_v10, %s10048_s9  ;;  %v14754_v50 = vpop.permute.xlu1 %5778  ;;  %v4996_v11 = vsel %vm17829_vm11, %v4947_v43, %v14481_v2  ;;  %v5445_v7 = vpop.f32.mrf.mxu0  ;;  %vm17833_vm5 = vmmov %vm17832_vm1  ;;  %v5651_v10 = vld [vmem:[#allocation2 + $0x11a] sm:$0xff]  ;;  %v14772_v2 = vld [vmem:[#allocation2 + $0x148] sm:$0xff] }
 0x4ef   : > { %v5528_v43 = vld [vmem:[#allocation2 + $0x40] sm:$0xff]  ;;  %vm17835_vm15 = vmmov %vm17827_vm6 }
 0x4f0   : > { %v5913_v37 = vpop.permute.xlu0 %5912  ;;  %vm17836_vm11 = vmmov %vm17830_vm3 }
 0x4f1   : > { %v6103_v29 = vsel %vm17830_vm3, %v6055_v4, %v5913_v37  ;;  %v4948_v37 = vsel %vm17827_vm6, %v14772_v2, %v14409_v9  ;;  %v5654_v9 = vld [vmem:[#allocation2 + $0x132] sm:$0xff] }
 0x4f2   : > { %9686 = vmatmul.msk.f32.gmra.mxu3 %vm17831_vm2, %v4996_v11  ;;  %9749 = vmatmul.msk.f32.gmra.mxu1 %vm17833_vm5, %v6103_v29  ;;  %v6056_v29 = vsel %vm17835_vm15, %v5528_v43, %v14197_v48  ;;  %vm17837_vm2 = vmmov %vm17832_vm1  ;;  %v5655_v48 = vld [vmem:[#allocation2 + $0x13a] sm:$0xff] }
 0x4f3   : > { %9737 = vmatmul.msk.f32.gmra.mxu0 %vm17832_vm1, %v4996_v11  ;;  %vm17838_vm5 = vmmov %vm17832_vm1 }
 0x4f4   : > { %5966 = vrot.lane.b32.xlu1 %v5650_v38, %s10048_s9  ;;  %v5917_v38 = vpop.permute.xlu2 %5916  ;;  %vm17840_vm15 = vmmov %vm17827_vm6 }
 0x4f5   : > { %v5275_v42 = vpop.f32.mrf.mxu3  ;;  %5968 = vrot.lane.b32.xlu2 %v5651_v10, %s10048_s9  ;;  %v6104_v10 = vsel %vm17830_vm3, %v6056_v29, %v5915_v23 }
 0x4f6   : > { %v14769_v28 = vadd.f32 %v5445_v7, %v5275_v42  ;;  %5970 = vrot.lane.b32.xlu0 %v5652_v14, %s10048_s9  ;;  %v14774_v4 = vpop.permute.xlu1 %5782  ;;  %v4997_v7 = vsel %vm17836_vm11, %v4948_v37, %v14429_v22  ;;  %v5448_v42 = vpop.f32.mrf.mxu0  ;;  %v5653_v14 = vld [vmem:[#allocation2 + $0x12a] sm:$0xff]  ;;  %vm17841_vm11 = vmmov %vm17830_vm3 }
 0x4f7   : > { %v14794_v22 = vld [vmem:[#allocation2 + $0x150] sm:$0xff]  ;;  %v5529_v37 = vld [vmem:[#allocation2 + $0x48] sm:$0xff] }
 0x4f8   : > { %17834 = vst [vmem:[#allocation82_spill] sm:$0xff] %v14769_v28  ;;  %v14779_v11 = vpop.permute.xlu0 %5784  ;;  %v4949_v29 = vsel %vm17827_vm6, %v14794_v22, %v14487_v52 }
 0x4fa   : > { %9687 = vmatmul.msk.f32.gmra.mxu3 %vm17837_vm2, %v4997_v7  ;;  %9750 = vmatmul.msk.f32.gmra.mxu1 %vm17838_vm5, %v6104_v10  ;;  %v6057_v10 = vsel %vm17840_vm15, %v5529_v37, %v14411_v63  ;;  %vm17842_vm2 = vmmov %vm17832_vm1  ;;  %v5658_v63 = vld [vmem:[#allocation2 + $0x152] sm:$0xff] }
 0x4fb   : > { %9738 = vmatmul.msk.f32.gmra.mxu0 %vm17832_vm1, %v4997_v7  ;;  %vm17843_vm5 = vmmov %vm17832_vm1 }
 0x4fc   : > { %5972 = vrot.lane.b32.xlu1 %v5653_v14, %s10048_s9  ;;  %v5919_v14 = vpop.permute.xlu2 %5918  ;;  %vm17844_vm15 = vmmov %vm17827_vm6 }
 0x4fd   : > { %v5278_v28 = vpop.f32.mrf.mxu3  ;;  %5974 = vrot.lane.b32.xlu2 %v5654_v9, %s10048_s9  ;;  %v5656_v9 = vld [vmem:[#allocation2 + $0x142] sm:$0xff] }
 0x4fe   : > { %v14791_v43 = vadd.f32 %v5448_v42, %v5278_v28  ;;  %5976 = vrot.lane.b32.xlu0 %v5655_v48, %s10048_s9  ;;  %v14796_v23 = vpop.permute.xlu1 %5786  ;;  %v4998_v28 = vsel %vm17841_vm11, %v4949_v29, %v14505_v27  ;;  %v6105_v42 = vsel %vm17830_vm3, %v6057_v10, %v5917_v38  ;;  %v5657_v48 = vld [vmem:[#allocation2 + $0x14a] sm:$0xff]  ;;  %v5451_v52 = vpop.f32.mrf.mxu0  ;;  %v14816_v27 = vld [vmem:[#allocation2 + $0x158] sm:$0xff]  ;;  %vm17845_vm11 = vmmov %vm17830_vm3 }
 0x4ff   : > { %v5530_v29 = vld [vmem:[#allocation2 + $0x50] sm:$0xff]  ;;  %v4950_v10 = vsel %vm17827_vm6, %v14816_v27, %v14499_v21  ;;  %v5531_v21 = vld [vmem:[#allocation2 + $0x58] sm:$0xff] }
 0x500   : > { %17839 = vst [vmem:[#allocation83_spill] sm:$0xff] %v14791_v43  ;;  %v14801_v7 = vpop.permute.xlu0 %5788 }
 0x502   : > { %9688 = vmatmul.msk.f32.gmra.mxu3 %vm17842_vm2, %v4998_v28  ;;  %9751 = vmatmul.msk.f32.gmra.mxu1 %vm17843_vm5, %v6105_v42  ;;  %v6058_v42 = vsel %vm17844_vm15, %v5530_v29, %v14405_v12  ;;  %vm17846_vm2 = vmmov %vm17832_vm1  ;;  %v5661_v12 = vld [vmem:[#allocation2 + $0x16a] sm:$0xff] }
 0x503   : > { %9739 = vmatmul.msk.f32.gmra.mxu0 %vm17832_vm1, %v4998_v28  ;;  %vm17847_vm5 = vmmov %vm17832_vm1 }
 0x504   : > { %5978 = vrot.lane.b32.xlu1 %v5656_v9, %s10048_s9  ;;  %v6106_v9 = vsel %vm17830_vm3, %v6058_v42, %v5919_v14  ;;  %v14840_v14 = vld [vmem:[#allocation2 + $0x160] sm:$0xff]  ;;  %vm17848_vm15 = vmmov %vm17827_vm6 }
 0x505   : > { %v5281_v43 = vpop.f32.mrf.mxu3  ;;  %5980 = vrot.lane.b32.xlu2 %v5657_v48, %s10048_s9  ;;  %v5659_v48 = vld [vmem:[#allocation2 + $0x15a] sm:$0xff] }
 0x506   : > { %v14813_v37 = vadd.f32 %v5451_v52, %v5281_v43  ;;  %5982 = vrot.lane.b32.xlu0 %v5658_v63, %s10048_s9  ;;  %v14818_v38 = vpop.permute.xlu1 %5790  ;;  %v4999_v43 = vsel %vm17845_vm11, %v4950_v10, %v14539_v25  ;;  %v5660_v52 = vld [vmem:[#allocation2 + $0x162] sm:$0xff]  ;;  %v14833_v63 = vpop.permute.xlu2 %5794  ;;  %v6059_v25 = vsel %vm17827_vm6, %v5531_v21, %v14307_v31  ;;  %v4951_v10 = vsel %vm17848_vm15, %v14840_v14, %v14467_v59  ;;  %vm17849_vm11 = vmmov %vm17830_vm3  ;;  %v5662_v31 = vld [vmem:[#allocation2 + $0x172] sm:$0xff] }
 0x507   : > { %v5532_v59 = vld [vmem:[#allocation2 + $0x60] sm:$0xff]  ;;  %vm17852_vm15 = vmmov %vm17827_vm6 }
 0x508   : > { %v14823_v28 = vpop.permute.xlu0 %5792 }
 0x50a   : > { %9689 = vmatmul.msk.f32.gmra.mxu3 %vm17846_vm2, %v4999_v43  ;;  %9752 = vmatmul.msk.f32.gmra.mxu1 %vm17847_vm5, %v6106_v9  ;;  %v5000_v9 = vsel %vm17830_vm3, %v4951_v10, %v14485_v62  ;;  %vm17850_vm2 = vmmov %vm17832_vm1  ;;  %v14859_v62 = vld [vmem:[#allocation2 + $0x168] sm:$0xff] }
 0x50b   : > { %9740 = vmatmul.msk.f32.gmra.mxu0 %vm17832_vm1, %v4999_v43  ;;  %vm17851_vm5 = vmmov %vm17832_vm1 }
 0x50c   : > { %5984 = vrot.lane.b32.xlu1 %v5659_v48, %s10048_s9  ;;  %v5663_v48 = vld [vmem:[#allocation2 + $0x17a] sm:$0xff] }
 0x50d   : > { %5986 = vrot.lane.b32.xlu2 %v5660_v52, %s10048_s9  ;;  %v6060_v52 = vsel %vm17827_vm6, %v5532_v59, %v14469_v49  ;;  %v5533_v49 = vld [vmem:[#allocation2 + $0x68] sm:$0xff] }
 0x50e   : > { %5988 = vrot.lane.b32.xlu0 %v5661_v12, %s10048_s9  ;;  %v5921_v29 = vpop.permute.xlu1 %5920  ;;  %v14861_v12 = vpop.permute.xlu2 %5798 }
 0x50f   : > { %v6107_v42 = vsel %vm17849_vm11, %v6059_v25, %v5921_v29  ;;  %v4952_v25 = vsel %vm17852_vm15, %v14859_v62, %v14545_v19  ;;  %vm17853_vm11 = vmmov %vm17830_vm3  ;;  %v6061_v19 = vsel %vm17827_vm6, %v5533_v49, %v14463_v35  ;;  %v5669_v35 = vld [vmem:[#allocation2 + $0x1aa] sm:$0xff] }
 0x510   : > { %v14846_v43 = vpop.permute.xlu0 %5796  ;;  %v5001_v10 = vsel %vm17830_vm3, %v4952_v25, %v14564_v32  ;;  %v14881_v32 = vld [vmem:[#allocation2 + $0x170] sm:$0xff]  ;;  %vm17856_vm15 = vmmov %vm17827_vm6 }
 0x512   : > { %9690 = vmatmul.msk.f32.gmra.mxu3 %vm17850_vm2, %v5000_v9  ;;  %9753 = vmatmul.msk.f32.gmra.mxu1 %vm17851_vm5, %v6107_v42  ;;  %vm17854_vm2 = vmmov %vm17832_vm1 }
 0x513   : > { %9741 = vmatmul.msk.f32.gmra.mxu0 %vm17832_vm1, %v5000_v9  ;;  %vm17855_vm5 = vmmov %vm17832_vm1 }
 0x514   : > { %5990 = vrot.lane.b32.xlu1 %v5662_v31, %s10048_s9  ;;  %v4953_v31 = vsel %vm17856_vm15, %v14881_v32, %v14558_v3  ;;  %v14896_v3 = vld [vmem:[#allocation2 + $0x178] sm:$0xff]  ;;  %vm17860_vm15 = vmmov %vm17827_vm6 }
 0x515   : > { %5992 = vrot.lane.b32.xlu2 %v5663_v48, %s10048_s9 }
 0x516   : > { %5994 = vrot.lane.b32.xlu0 %v14323_v56, %s10048_s9  ;;  %v5923_v21 = vpop.permute.xlu1 %5922  ;;  %v5667_v56 = vld [vmem:[#allocation2 + $0x19a] sm:$0xff]  ;;  %v14889_v59 = vpop.permute.xlu2 %5802 }
 0x517   : > { %v6108_v29 = vsel %vm17853_vm11, %v6060_v52, %v5923_v21  ;;  %vm17857_vm11 = vmmov %vm17830_vm3  ;;  %v5534_v21 = vld [vmem:[#allocation2 + $0x70] sm:$0xff] }
 0x518   : > { %v14869_v42 = vpop.permute.xlu0 %5800  ;;  %v6062_v25 = vsel %vm17860_vm15, %v5534_v21, %v14389_v0  ;;  %vm17864_vm15 = vmmov %vm17827_vm6 }
 0x51a   : > { %9691 = vmatmul.msk.f32.gmra.mxu3 %vm17854_vm2, %v5001_v10  ;;  %9754 = vmatmul.msk.f32.gmra.mxu1 %vm17855_vm5, %v6108_v29  ;;  %vm17858_vm2 = vmmov %vm17832_vm1 }
 0x51b   : > { %9742 = vmatmul.msk.f32.gmra.mxu0 %vm17832_vm1, %v5001_v10  ;;  %vm17859_vm5 = vmmov %vm17832_vm1 }
 0x51c   : > { %5996 = vrot.lane.b32.xlu1 %v14371_v41, %s10048_s9  ;;  %v5002_v41 = vsel %vm17830_vm3, %v4953_v31, %v14595_v8  ;;  %v4954_v8 = vsel %vm17827_vm6, %v14896_v3, %v14524_v44  ;;  %v5535_v44 = vld [vmem:[#allocation2 + $0x78] sm:$0xff] }
 0x51d   : > { %5998 = vrot.lane.b32.xlu2 %v14373_v26, %s10048_s9  ;;  %v5668_v26 = vld [vmem:[#allocation2 + $0x1a2] sm:$0xff] }
 0x51e   : > { %6000 = vrot.lane.b32.xlu0 %v5667_v56, %s10048_s9  ;;  %v5925_v9 = vpop.permute.xlu1 %5924  ;;  %v14908_v56 = vpop.permute.xlu2 %5806 }
 0x51f   : > { %v6109_v48 = vsel %vm17857_vm11, %v6061_v19, %v5925_v9  ;;  %vm17861_vm11 = vmmov %vm17830_vm3  ;;  %v14911_v19 = vld [vmem:[#allocation2 + $0x180] sm:$0xff] }
 0x520   : > { %v5927_v52 = vpop.permute.xlu0 %5926  ;;  %v5003_v29 = vsel %vm17861_vm11, %v4954_v8, %v14543_v15  ;;  %v5040_v0 = vsel %vm17827_vm6, %v14911_v19, %v14599_v58  ;;  %v6063_v15 = vsel %vm17864_vm15, %v5535_v44, %v14526_v24  ;;  %vm17865_vm11 = vmmov %vm17830_vm3  ;;  %v5536_v58 = vld [vmem:[#allocation2 + $0x80] sm:$0xff]  ;;  %v17875_v44 = vld [vmem:[#allocation60_spill] sm:$0xff] }
 0x521   : > { %v6110_v10 = vsel %vm17830_vm3, %v6062_v25, %v5927_v52  ;;  %v5043_v9 = vsel %vm17865_vm11, %v5040_v0, %v14621_v20  ;;  %v17868_v52 = vld [vmem:[#allocation66_spill] sm:$0xff]  ;;  %vm17870_vm15 = vmmov %vm17830_vm3 }
 0x522   : > { %9692 = vmatmul.msk.f32.gmra.mxu3 %vm17858_vm2, %v5002_v41  ;;  %9755 = vmatmul.msk.f32.gmra.mxu1 %vm17859_vm5, %v6109_v48  ;;  %vm17862_vm2 = vmmov %vm17832_vm1 }
 0x523   : > { %9743 = vmatmul.msk.f32.gmra.mxu0 %vm17832_vm1, %v5002_v41  ;;  %vm17863_vm5 = vmmov %vm17832_vm1 }
 0x524   : > { %6002 = vrot.lane.b32.xlu1 %v5668_v26, %s10048_s9  ;;  %v14927_v26 = vld [vmem:[#allocation2 + $0x188] sm:$0xff]  ;;  %vm17871_vm11 = vmmov %vm17830_vm3 }
 0x525   : > { %6004 = vrot.lane.b32.xlu2 %v5669_v35, %s10048_s9 }
 0x526   : > { %v14920_v31 = vpop.permute.xlu1 %5804  ;;  %v14925_v41 = vpop.permute.xlu2 %5810 }
 0x528   : > { %v5929_v49 = vpop.permute.xlu0 %5928 }
 0x529   : > { %v6111_v48 = vsel %vm17830_vm3, %v6063_v15, %v5929_v49  ;;  %vm17872_vm3 = vmmov %vm17832_vm1  ;;  %v5537_v49 = vld [vmem:[#allocation2 + $0x88] sm:$0xff] }
 0x52a   : > { %9693 = vmatmul.msk.f32.gmra.mxu3 %vm17862_vm2, %v5003_v29  ;;  %9756 = vmatmul.msk.f32.gmra.mxu1 %vm17863_vm5, %v6110_v10  ;;  %vm17866_vm2 = vmmov %vm17832_vm1 }
 0x52b   : > { %9744 = vmatmul.msk.f32.gmra.mxu0 %vm17832_vm1, %v5003_v29  ;;  %vm17867_vm5 = vmmov %vm17827_vm6  ;;  %v14941_v29 = vld [vmem:[#allocation2 + $0x190] sm:$0xff] }
 0x52c   : > { %v5041_v24 = vsel %vm17867_vm5, %v14927_v26, %v14616_v17  ;;  %vm17869_vm6 = vmmov %vm17867_vm5 }
 0x52d   : > { %v6064_v20 = vsel %vm17869_vm6, %v5536_v58, %v17868_v52  ;;  %v5044_v21 = vsel %vm17870_vm15, %v5041_v24, %v14656_v36  ;;  %vm17877_vm6 = vmmov %vm17871_vm11  ;;  %v5539_v52 = vld [vmem:[#allocation2 + $0x98] sm:$0xff] }
 0x52e   : > { %v14938_v25 = vpop.permute.xlu1 %5808  ;;  %v5933_v10 = vpop.permute.xlu2 %5932  ;;  %vm17878_vm15 = vmmov %vm17877_vm6 }
 0x530   : > { %v5931_v35 = vpop.permute.xlu0 %5930 }
 0x531   : > { %v6112_v8 = vsel %vm17871_vm11, %v6064_v20, %v5931_v35  ;;  %v5538_v35 = vld [vmem:[#allocation2 + $0x90] sm:$0xff] }
 0x532   : > { %9694 = vmatmul.msk.f32.gmra.mxu3 %vm17866_vm2, %v5043_v9  ;;  %9757 = vmatmul.msk.f32.gmra.mxu1 %vm17832_vm1, %v6111_v48  ;;  %vm17873_vm2 = vmmov %vm17832_vm1 }
 0x533   : > { %vm17874_vm1 = vmmov %vm17867_vm5 }
 0x534   : > { %v5042_v17 = vsel %vm17874_vm1, %v14941_v29, %v14585_v54  ;;  %vm17876_vm5 = vmmov %vm17874_vm1 }
 0x535   : > { %v6065_v0 = vsel %vm17876_vm5, %v5537_v49, %v17875_v44  ;;  %v5045_v36 = vsel %vm17877_vm6, %v5042_v17, %v14605_v34  ;;  %vm17879_vm11 = vmmov %vm17873_vm2  ;;  %v6751_v34 = vld [vmem:[#allocation2 + $0x1] sm:$0xff]  ;;  %v6752_v49 = vld [vmem:[#allocation2 + $0x9] sm:$0xff] }
 0x536   : > { %v6113_v15 = vsel %vm17878_vm15, %v6065_v0, %v5933_v10  ;;  %v14953_v9 = vpop.permute.xlu1 %5812  ;;  %6895 = vrot.lane.b32.xlu0 %v6751_v34, %s10045_s12  ;;  %v5540_v10 = vld [vmem:[#allocation2 + $0xa0] sm:$0xff]  ;;  %6897 = vrot.lane.b32.xlu1 %v6752_v49, %s10045_s12  ;;  %v17892_v34 = vld [vmem:[#allocation16_spill] sm:$0xff] }
 0x538   : > { %v5935_v48 = vpop.permute.xlu0 %5934 }
 0x53a   : > { %9695 = vmatmul.msk.f32.gmra.mxu3 %vm17872_vm3, %v5044_v21  ;;  %9758 = vmatmul.msk.f32.gmra.mxu1 %vm17873_vm2, %v6112_v8  ;;  %vm17880_vm3 = vmmov %vm17873_vm2  ;;  %v5939_v8 = vpop.permute.xlu2 %5938 }
 0x53b   : > { %vm17881_vm2 = vmmov %vm17874_vm1 }
 0x53c   : > { %v6066_v58 = vsel %vm17881_vm2, %v5538_v35, %v14581_v45  ;;  %vm17882_vm1 = vmmov %vm17877_vm6  ;;  %v17887_v45 = vld [vmem:[#allocation64_spill] sm:$0xff] }
 0x53d   : > { %v6114_v54 = vsel %vm17882_vm1, %v6066_v58, %v5935_v48  ;;  %vm17883_vm14 = vmmov %vm17880_vm3  ;;  %v14977_v58 = vld [vmem:[%s16887_s4] ss:$0 sm:$0xff] }
 0x53e   : > { %v5937_v24 = vpop.permute.xlu1 %5936  ;;  %vm17884_vm5 = vmmov %vm17881_vm2 }
 0x53f   : > { %v6067_v20 = vsel %vm17884_vm5, %v5539_v52, %v14577_v60  ;;  %vm17885_vm6 = vmmov %vm17882_vm1  ;;  %v5541_v60 = vld [vmem:[#allocation2 + $0xa8] sm:$0xff] }
 0x540   : > { %v6115_v21 = vsel %vm17885_vm6, %v6067_v20, %v5937_v24  ;;  %vm17886_vm15 = vmmov %vm17880_vm3  ;;  %v5941_v0 = vpop.permute.xlu0 %5940 }
 0x541   : > { %vm17890_vm5 = vmmov %vm17880_vm3 }
 0x542   : > { %9696 = vmatmul.msk.f32.gmra.mxu3 %vm17879_vm11, %v5045_v36  ;;  %9759 = vmatmul.msk.f32.gmra.mxu1 %vm17880_vm3, %v6113_v15  ;;  %vm17888_vm11 = vmmov %vm17881_vm2  ;;  %v6753_v36 = vld [vmem:[#allocation2 + $0x11] sm:$0xff]  ;;  %v6069_v15 = vsel %vm17881_vm2, %v5541_v60, %v14641_v57 }
 0x543   : > { %v6068_v17 = vsel %vm17888_vm11, %v5540_v10, %v17887_v45  ;;  %6899 = vrot.lane.b32.xlu2 %v6753_v36, %s10045_s12  ;;  %v6117_v48 = vsel %vm17882_vm1, %v6069_v15, %v5941_v0  ;;  %vm17891_vm6 = vmmov %vm17881_vm2  ;;  %v5945_v10 = vpop.permute.xlu2 %5944  ;;  %v17898_v0 = vld [vmem:[#allocation44_spill] sm:$0xff] }
 0x544   : > { %vm17894_vm11 = vmmov %vm17880_vm3 }
 0x546   : > { %v5943_v35 = vpop.permute.xlu1 %5942 }
 0x54a   : > { %9760 = vmatmul.msk.f32.gmra.mxu1 %vm17883_vm14, %v6114_v54  ;;  %vm17889_vm14 = vmmov %vm17882_vm1  ;;  %v5542_v54 = vld [vmem:[#allocation2 + $0xb0] sm:$0xff] }
 0x54b   : > { %v6116_v44 = vsel %vm17889_vm14, %v6068_v17, %v5939_v8  ;;  %v6070_v52 = vsel %vm17891_vm6, %v5542_v54, %v14636_v53  ;;  %v5543_v17 = vld [vmem:[#allocation2 + $0xb8] sm:$0xff]  ;;  %vm17896_vm14 = vmmov %vm17881_vm2 }
 0x552   : > { %9761 = vmatmul.msk.f32.gmra.mxu1 %vm17886_vm15, %v6115_v21  ;;  %vm17893_vm15 = vmmov %vm17882_vm1 }
 0x553   : > { %v6118_v57 = vsel %vm17893_vm15, %v6070_v52, %v5943_v35  ;;  %v5947_v35 = vpop.permute.xlu0 %5946 }
 0x55a   : > { %9762 = vmatmul.msk.f32.gmra.mxu1 %vm17880_vm3, %v6116_v44  ;;  %vm17897_vm3 = vmmov %vm17881_vm2 }
 0x55b   : > { %v6071_v53 = vsel %vm17897_vm3, %v5543_v17, %v14562_v33  ;;  %vm17899_vm2 = vmmov %vm17882_vm1  ;;  %v5953_v17 = vpop.permute.xlu0 %5952 }
 0x55c   : > { %v6119_v36 = vsel %vm17899_vm2, %v6071_v53, %v5945_v10  ;;  %vm17900_vm1 = vmmov %vm17890_vm5 }
 0x55d   : > { %vm17905_vm6 = vmmov %vm17899_vm2 }
 0x55e   : > { %vm17906_vm15 = vmmov %vm17900_vm1 }
 0x562   : > { %9763 = vmatmul.msk.f32.gmra.mxu1 %vm17890_vm5, %v6117_v48  ;;  %vm17903_vm5 = vmmov %vm17897_vm3 }
 0x567   : > { %v6315_v24 = vpop.f32.mrf.mxu1 }
 0x568   : > { %v6459_v20 = vadd.f32 %v6315_v24, %v17892_v34  ;;  %v5544_v34 = vld [vmem:[#allocation2 + $0xc0] sm:$0xff] }
 0x569   : > { %v6072_v33 = vsel %vm17903_vm5, %v5544_v34, %v14661_v46 }
 0x56a   : > { %v6511_v21 = vadd.f32 %v14977_v58, %v6459_v20  ;;  %9764 = vmatmul.msk.f32.gmra.mxu1 %vm17894_vm11, %v6118_v57  ;;  %v17904_v57 = vld [vmem:[#allocation14_spill] sm:$0xff]  ;;  %vm17909_vm11 = vmmov %vm17897_vm3 }
 0x56c   : > { %v6559_v8 = vmax.f32 %v6511_v21, 0.0 }
 0x56e   : > { %v6607_v45 = vsel %vm12037_vm12, %v6559_v8, 0.0  ;;  %vm17902_vm12 = vmmov %vm17897_vm3  ;;  %v6120_v8 = vsel %vm17905_vm6, %v6072_v33, %v5947_v35  ;;  %v5546_v33 = vld [vmem:[#allocation2 + $0xd0] sm:$0xff] }
 0x56f   : > { %6655 = vst.msk [vmem:[#allocation2 + $0x19] sm:$0xff] %vm17896_vm14, %v6607_v45  ;;  %v6318_v44 = vpop.f32.mrf.mxu1  ;;  %v5949_v45 = vpop.permute.xlu1 %5948  ;;  %vm17911_vm14 = vmmov %vm17899_vm2 }
 0x570   : > { %v6460_v60 = vadd.f32 %v6318_v44, %v17898_v0  ;;  %v5545_v0 = vld [vmem:[#allocation2 + $0xc8] sm:$0xff]  ;;  %vm17915_vm2 = vmmov %vm17903_vm5 }
 0x571   : > { %v6073_v46 = vsel %vm17909_vm11, %v5545_v0, %v14674_v18  ;;  %v6074_v18 = vsel %vm17915_vm2, %v5546_v33, %v14627_v51  ;;  %v5548_v33 = vld [vmem:[#allocation2 + $0xe0] sm:$0xff] }
 0x572   : > { %v6512_v15 = vadd.f32 %v14977_v58, %v6460_v60  ;;  %9765 = vmatmul.msk.f32.gmra.mxu1 %vm17900_vm1, %v6119_v36  ;;  %v17910_v36 = vld [vmem:[#allocation58_spill] sm:$0xff] }
 0x574   : > { %v6560_v48 = vmax.f32 %v6512_v15, 0.0 }
 0x576   : > { %v6608_v24 = vsel %vm12098_vm8, %v6560_v48, 0.0  ;;  %v6754_v52 = vld [vmem:[#allocation2 + $0x19] sm:$0xff]  ;;  %vm17908_vm8 = vmmov %vm17897_vm3  ;;  %v6121_v48 = vsel %vm17911_vm14, %v6073_v46, %v5949_v45 }
 0x577   : > { %6656 = vst.msk [vmem:[#allocation2 + $0x21] sm:$0xff] %vm17902_vm12, %v6608_v24  ;;  %v6321_v20 = vpop.f32.mrf.mxu1  ;;  %6901 = vrot.lane.b32.xlu0 %v6754_v52, %s10045_s12  ;;  %vm17912_vm3 = vmmov %vm17900_vm1  ;;  %v5951_v24 = vpop.permute.xlu2 %5950 }
 0x578   : > { %v6461_v21 = vadd.f32 %v6321_v20, %v17904_v57  ;;  %vm17917_vm1 = vmmov %vm17905_vm6 }
 0x579   : > { %vm17918_vm12 = vmmov %vm17912_vm3 }
 0x57a   : > { %v6513_v10 = vadd.f32 %v14977_v58, %v6461_v21  ;;  %9766 = vmatmul.msk.f32.gmra.mxu1 %vm17906_vm15, %v6120_v8  ;;  %v17916_v21 = vld [vmem:[#allocation59_spill] sm:$0xff]  ;;  %vm17923_vm6 = vmmov %vm17917_vm1 }
 0x57b   : > { %vm17924_vm15 = vmmov %vm17912_vm3 }
 0x57c   : > { %v6561_v49 = vmax.f32 %v6513_v10, 0.0  ;;  %v6122_v10 = vsel %vm17917_vm1, %v6074_v18, %v5951_v24  ;;  %v5955_v24 = vpop.permute.xlu1 %5954  ;;  %v17928_v18 = vld [vmem:[#allocation62_spill] sm:$0xff]  ;;  %vm17929_vm11 = vmmov %vm17917_vm1 }
 0x57d   : > { %vm17930_vm14 = vmmov %vm17912_vm3 }
 0x57e   : > { %v6609_v44 = vsel %vm12102_vm9, %v6561_v49, 0.0  ;;  %v6755_v53 = vld [vmem:[#allocation2 + $0x21] sm:$0xff]  ;;  %vm17914_vm9 = vmmov %vm17903_vm5 }
 0x57f   : > { %6657 = vst.msk [vmem:[#allocation2 + $0x29] sm:$0xff] %vm17908_vm8, %v6609_v44  ;;  %v6324_v60 = vpop.f32.mrf.mxu1  ;;  %6903 = vrot.lane.b32.xlu1 %v6755_v53, %s10045_s12  ;;  %vm17921_vm5 = vmmov %vm17915_vm2 }
 0x580   : > { %v6462_v15 = vadd.f32 %v6324_v60, %v17910_v36  ;;  %v5547_v60 = vld [vmem:[#allocation2 + $0xd8] sm:$0xff]  ;;  %vm17927_vm8 = vmmov %vm17915_vm2 }
 0x581   : > { %v6075_v51 = vsel %vm17921_vm5, %v5547_v60, %v14679_v55  ;;  %v17922_v36 = vld [vmem:[#allocation61_spill] sm:$0xff]  ;;  %v6076_v55 = vsel %vm17927_vm8, %v5548_v33, %v14694_v47 }
 0x582   : > { %v6514_v35 = vadd.f32 %v14977_v58, %v6462_v15  ;;  %9767 = vmatmul.msk.f32.gmra.mxu1 %vm17912_vm3, %v6121_v48  ;;  %v6123_v48 = vsel %vm17923_vm6, %v6075_v51, %v5953_v17  ;;  %vm17933_vm3 = vmmov %vm17915_vm2  ;;  %v17941_v33 = vld [vmem:[#allocation65_spill] sm:$0xff] }
 0x583   : > { %v5551_v17 = vld [vmem:[#allocation2 + $0xf8] sm:$0xff] }
 0x584   : > { %v6562_v54 = vmax.f32 %v6514_v35, 0.0 }
 0x586   : > { %v6610_v34 = vsel %vm12160_vm4, %v6562_v54, 0.0  ;;  %v6756_v20 = vld [vmem:[#allocation2 + $0x29] sm:$0xff]  ;;  %vm17920_vm4 = vmmov %vm17915_vm2 }
 0x587   : > { %6658 = vst.msk [vmem:[#allocation2 + $0x31] sm:$0xff] %vm17914_vm9, %v6610_v34  ;;  %v6327_v57 = vpop.f32.mrf.mxu1  ;;  %6905 = vrot.lane.b32.xlu2 %v6756_v20, %s10045_s12  ;;  %vm17935_vm9 = vmmov %vm17917_vm1 }
 0x588   : > { %v6463_v8 = vadd.f32 %v6327_v57, %v17916_v21  ;;  %vm17939_vm1 = vmmov %vm17933_vm3 }
 0x58a   : > { %v6515_v49 = vadd.f32 %v14977_v58, %v6463_v8  ;;  %9768 = vmatmul.msk.f32.gmra.mxu1 %vm17918_vm12, %v6122_v10  ;;  %v6124_v8 = vsel %vm17929_vm11, %v6076_v55, %v5955_v24 }
 0x58c   : > { %v6563_v45 = vmax.f32 %v6515_v49, 0.0 }
 0x58e   : > { %v6611_v53 = vsel %vm12204_vm13, %v6563_v45, 0.0  ;;  %v6757_v0 = vld [vmem:[#allocation2 + $0x31] sm:$0xff]  ;;  %vm17926_vm13 = vmmov %vm17915_vm2  ;;  %v5957_v45 = vpop.permute.xlu2 %5956 }
 0x58f   : > { %6659 = vst.msk [vmem:[#allocation2 + $0x39] sm:$0xff] %vm17920_vm4, %v6611_v53  ;;  %v6330_v46 = vpop.f32.mrf.mxu1  ;;  %6907 = vrot.lane.b32.xlu0 %v6757_v0, %s10045_s12  ;;  %v5549_v0 = vld [vmem:[#allocation2 + $0xe8] sm:$0xff]  ;;  %vm17942_vm4 = vmmov %vm17923_vm6 }
 0x590   : > { %v6464_v15 = vadd.f32 %v6330_v46, %v17922_v36  ;;  %v6077_v47 = vsel %vm17933_vm3, %v5549_v0, %v14654_v40  ;;  %v17934_v46 = vld [vmem:[#allocation63_spill] sm:$0xff]  ;;  %vm17949_vm8 = vmmov %vm17942_vm4 }
 0x591   : > { %v6125_v36 = vsel %vm17935_vm9, %v6077_v47, %v5957_v45  ;;  %vm17954_vm3 = vmmov %vm17939_vm1 }
 0x592   : > { %v6516_v35 = vadd.f32 %v14977_v58, %v6464_v15  ;;  %9769 = vmatmul.msk.f32.gmra.mxu1 %vm17924_vm15, %v6123_v48  ;;  %vm17946_vm15 = vmmov %vm17939_vm1 }
 0x593   : > { %vm17955_vm9 = vmmov %vm17942_vm4 }
 0x594   : > { %v6564_v54 = vmax.f32 %v6516_v35, 0.0  ;;  %v5959_v35 = vpop.permute.xlu0 %5958 }
 0x596   : > { %v6612_v34 = vsel %vm12253_vm10, %v6564_v54, 0.0  ;;  %v6758_v20 = vld [vmem:[#allocation2 + $0x39] sm:$0xff]  ;;  %vm17932_vm10 = vmmov %vm17915_vm2 }
 0x597   : > { %6660 = vst.msk [vmem:[#allocation2 + $0x41] sm:$0xff] %vm17926_vm13, %v6612_v34  ;;  %v6333_v57 = vpop.f32.mrf.mxu1  ;;  %6909 = vrot.lane.b32.xlu1 %v6758_v20, %s10045_s12  ;;  %vm17936_vm2 = vmmov %vm17918_vm12  ;;  %v17937_v54 = vld [vmem:[#allocation26_spill] sm:$0xff]  ;;  %v5550_v34 = vld [vmem:[#allocation2 + $0xf0] sm:$0xff] }
 0x598   : > { %v6465_v21 = vadd.f32 %v6333_v57, %v17928_v18  ;;  %vm17940_vm12 = vmmov %vm17939_vm1 }
 0x599   : > { %v6078_v40 = vsel %vm17940_vm12, %v5550_v34, %v14699_v6  ;;  %vm17943_vm5 = vmmov %vm17936_vm2 }
 0x59a   : > { %v6517_v10 = vadd.f32 %v14977_v58, %v6465_v21  ;;  %9770 = vmatmul.msk.f32.gmra.mxu1 %vm17930_vm14, %v6124_v8  ;;  %v6126_v55 = vsel %vm17942_vm4, %v6078_v40, %v5959_v35  ;;  %v5961_v8 = vpop.permute.xlu1 %5960  ;;  %vm17947_vm13 = vmmov %vm17939_vm1  ;;  %v5552_v35 = vld [vmem:[#allocation2 + $0x100] sm:$0xff] }
 0x59b   : > { %v6079_v6 = vsel %vm17947_vm13, %v5551_v17, %v14714_v61  ;;  %vm17950_vm11 = vmmov %vm17936_vm2  ;;  %v6080_v61 = vsel %vm17954_vm3, %v5552_v35, %v14683_v30  ;;  %v17958_v30 = vld [vmem:[#allocation79_spill] sm:$0xff] }
 0x59c   : > { %v6565_v49 = vmax.f32 %v6517_v10, 0.0  ;;  %v17944_v10 = vld [vmem:[#allocation55_spill] sm:$0xff]  ;;  %v5965_v40 = vpop.permute.xlu0 %5964  ;;  %vm17960_vm12 = vmmov %vm17939_vm1 }
 0x59d   : > { %vm17945_vm6 = vnez %v17944_v10  ;;  %vm17967_vm13 = vmmov %vm17939_vm1 }
 0x59e   : > { %v6613_v44 = vsel %vm12307_vm0, %v6565_v49, 0.0  ;;  %v6759_v53 = vld [vmem:[#allocation2 + $0x41] sm:$0xff]  ;;  %vm17938_vm0 = vnez %v17937_v54  ;;  %vm17976_vm3 = vmmov %vm17939_vm1 }
 0x59f   : > { %6661 = vst.msk [vmem:[#allocation2 + $0x49] sm:$0xff] %vm17932_vm10, %v6613_v44  ;;  %v6336_v60 = vpop.f32.mrf.mxu1  ;;  %6911 = vrot.lane.b32.xlu2 %v6759_v53, %s10045_s12  ;;  %v17948_v53 = vld [vmem:[#allocation67_spill] sm:$0xff]  ;;  %vm17953_vm10 = vmmov %vm17939_vm1 }
 0x5a0   : > { %v6466_v51 = vadd.f32 %v6336_v60, %v17934_v46  ;;  %v6127_v60 = vsel %vm17949_vm8, %v6079_v6, %v5961_v8  ;;  %v17961_v8 = vld [vmem:[#allocation15_spill] sm:$0xff]  ;;  %v17963_v6 = vld [vmem:[#allocation56_spill] sm:$0xff]  ;;  %vm17969_vm8 = vmmov %vm17942_vm4 }
 0x5a2   : > { %v6518_v15 = vadd.f32 %v14977_v58, %v6466_v51  ;;  %9771 = vmatmul.msk.f32.gmra.mxu1 %vm17936_vm2, %v6125_v36  ;;  %v5963_v51 = vpop.permute.xlu2 %5962  ;;  %v17951_v36 = vld [vmem:[#allocation27_spill] sm:$0xff] }
 0x5a3   : > { %vm17952_vm14 = vnez %v17951_v36 }
 0x5a4   : > { %v6566_v48 = vmax.f32 %v6518_v15, 0.0 }
 0x5a6   : > { %v6614_v24 = vsel %vm17938_vm0, %v6566_v48, 0.0  ;;  %v6760_v52 = vld [vmem:[#allocation2 + $0x49] sm:$0xff] }
 0x5a7   : > { %6662 = vst.msk [vmem:[#allocation2 + $0x51] sm:$0xff] %vm17939_vm1, %v6614_v24  ;;  %v6339_v20 = vpop.f32.mrf.mxu1  ;;  %6913 = vrot.lane.b32.xlu0 %v6760_v52, %s10045_s12  ;;  %v6128_v52 = vsel %vm17955_vm9, %v6080_v61, %v5963_v51  ;;  %v17966_v51 = vld [vmem:[#allocation69_spill] sm:$0xff]  ;;  %vm17978_vm9 = vmmov %vm17942_vm4 }
 0x5a8   : > { %v6467_v57 = vadd.f32 %v6339_v20, %v17941_v33  ;;  %v17956_v33 = vld [vmem:[#allocation41_spill] sm:$0xff]  ;;  %v6082_v36 = vsel %vm17967_vm13, %v17966_v51, %v14734_v5  ;;  %v9897_v5 = vld [vmem:[%s16888_s5 + $0x40] sm:$0xff]  ;;  %vm17989_vm13 = vmmov %vm17939_vm1 }
 0x5a9   : > { %vm17957_vm0 = vnez %v17956_v33  ;;  %v17974_v33 = vld [vmem:[#allocation76_spill] sm:$0xff]  ;;  %8633 = vmatpush.msra.mxu0 %v9897_v5 }
 0x5aa   : > { %v6519_v18 = vadd.f32 %v14977_v58, %v6467_v57  ;;  %9772 = vmatmul.msk.f32.gmra.mxu1 %vm17943_vm5, %v6126_v55  ;;  %vm17962_vm5 = vmmov %vm17936_vm2 }
 0x5ac   : > { %v6567_v21 = vmax.f32 %v6519_v18, 0.0 }
 0x5ae   : > { %v6615_v49 = vsel %vm17945_vm6, %v6567_v21, 0.0  ;;  %v6761_v45 = vld [vmem:[#allocation2 + $0x51] sm:$0xff]  ;;  %vm17964_vm6 = vnez %v17963_v6  ;;  %v8929_v6 = vld [vmem:[%s16890_s7] sm:$0xf] }
 0x5af   : > { %6663 = vst.msk [vmem:[#allocation2 + $0x59] sm:$0xff] %vm17946_vm15, %v6615_v49  ;;  %v6342_v44 = vpop.f32.mrf.mxu1  ;;  %6915 = vrot.lane.b32.xlu1 %v6761_v45, %s10045_s12  ;;  %v17959_v21 = vld [vmem:[#allocation45_spill] sm:$0xff]  ;;  %vm17965_vm15 = vmmov %vm17939_vm1 }
 0x5b0   : > { %v6468_v0 = vadd.f32 %v6342_v44, %v17948_v53  ;;  %v5967_v44 = vpop.permute.xlu1 %5966 }
 0x5b1   : > { %v6130_v35 = vsel %vm17969_vm8, %v6082_v36, %v5967_v44 }
 0x5b2   : > { %v6520_v47 = vadd.f32 %v14977_v58, %v6468_v0  ;;  %9773 = vmatmul.msk.f32.gmra.mxu1 %vm17950_vm11, %v6127_v60  ;;  %vm17970_vm11 = vmmov %vm17936_vm2 }
 0x5b4   : > { %v6568_v46 = vmax.f32 %v6520_v47, 0.0  ;;  %v9798_v47 = vld [vmem:[%s16888_s5 + $0x28] sm:$0xff] }
 0x5b5   : > { %7530 = vmatpush.msra.mxu2 %v9798_v47 }
 0x5b6   : > { %v6616_v15 = vsel %vm17952_vm14, %v6568_v46, 0.0  ;;  %v6762_v48 = vld [vmem:[#allocation2 + $0x59] sm:$0xff]  ;;  %v7329_v46 = vld [vmem:[%s16888_s5 + $0x10] sm:$0xff] }
 0x5b7   : > { %6664 = vst.msk [vmem:[#allocation2 + $0x61] sm:$0xff] %vm17953_vm10, %v6616_v15  ;;  %v6345_v54 = vpop.f32.mrf.mxu1  ;;  %6917 = vrot.lane.b32.xlu2 %v6762_v48, %s10045_s12  ;;  %v17968_v15 = vld [vmem:[#allocation33_spill] sm:$0xff]  ;;  %7700 = vmatpush.msra.mxu3 %v7329_v46  ;;  %vm17973_vm10 = vmmov %vm17939_vm1 }
 0x5b8   : > { %v6469_v24 = vadd.f32 %v6345_v54, %v14554_v39  ;;  %v6081_v39 = vsel %vm17960_vm12, %v17959_v21, %v17958_v30  ;;  %vm17982_vm12 = vmmov %vm17939_vm1 }
 0x5b9   : > { %v6129_v49 = vsel %vm17942_vm4, %v6081_v39, %v5965_v40  ;;  %vm17984_vm4 = vcmask 1043456  }
 0x5ba   : > { %v6521_v34 = vadd.f32 %v14977_v58, %v6469_v24  ;;  %9774 = vmatmul.msk.f32.gmra.mxu1 %vm17936_vm2, %v6128_v52  ;;  %v5969_v24 = vpop.permute.xlu2 %5968  ;;  %v17971_v52 = vld [vmem:[#allocation57_spill] sm:$0xff] }
 0x5bb   : > { %vm17972_vm14 = vnez %v17971_v52  ;;  %9946 = vmatpush.msk.msra.mxu1 %vm17984_vm4, %v8929_v6 }
 0x5bc   : > { %v6569_v20 = vmax.f32 %v6521_v34, 0.0 }
 0x5be   : > { %v6617_v57 = vsel %vm17957_vm0, %v6569_v20, 0.0  ;;  %v6763_v55 = vld [vmem:[#allocation2 + $0x61] sm:$0xff] }
 0x5bf   : > { %6665 = vst.msk [vmem:[#allocation2 + $0x69] sm:$0xff] %vm17939_vm1, %v6617_v57  ;;  %v6348_v18 = vpop.f32.mrf.mxu1  ;;  %6919 = vrot.lane.b32.xlu0 %v6763_v55, %s10045_s12  ;;  %v17975_v57 = vld [vmem:[#allocation71_spill] sm:$0xff] }
 0x5c0   : > { %v6470_v10 = vadd.f32 %v6348_v18, %v17961_v8  ;;  %v6083_v55 = vsel %vm17976_vm3, %v17975_v57, %v17974_v33  ;;  %v17977_v18 = vld [vmem:[#allocation48_spill] sm:$0xff]  ;;  %vm17998_vm3 = vmmov %vm17939_vm1 }
 0x5c1   : > { %v6131_v21 = vsel %vm17978_vm9, %v6083_v55, %v5969_v24  ;;  %v17991_v24 = vld [vmem:[#allocation75_spill] sm:$0xff]  ;;  %vm18000_vm9 = vmmov %vm17939_vm1 }
 0x5c2   : > { %v6522_v45 = vadd.f32 %v14977_v58, %v6470_v10  ;;  %9775 = vmatmul.msk.f32.gmra.mxu1 %vm17962_vm5, %v6129_v49  ;;  %v5971_v10 = vpop.permute.xlu0 %5970  ;;  %v17979_v49 = vld [vmem:[#allocation38_spill] sm:$0xff]  ;;  %vm17985_vm5 = vmmov %vm17969_vm8  ;;  %v5975_v57 = vpop.permute.xlu2 %5974  ;;  %v17996_v55 = vld [vmem:[#allocation7_spill] sm:$0xff] }
 0x5c3   : > { %vm17980_vm0 = vnez %v17979_v49  ;;  %vm17992_vm8 = vmmov %vm17939_vm1 }
 0x5c4   : > { %v6570_v17 = vmax.f32 %v6522_v45, 0.0  ;;  %vm18007_vm4 = vmmov %vm17998_vm3 }
 0x5c6   : > { %v6618_v53 = vsel %vm17964_vm6, %v6570_v17, 0.0  ;;  %v6764_v0 = vld [vmem:[#allocation2 + $0x69] sm:$0xff]  ;;  %vm17986_vm6 = vmmov %vm17936_vm2 }
 0x5c7   : > { %6666 = vst.msk [vmem:[#allocation2 + $0x71] sm:$0xff] %vm17965_vm15, %v6618_v53  ;;  %v6351_v60 = vpop.f32.mrf.mxu1  ;;  %6921 = vrot.lane.b32.xlu1 %v6764_v0, %s10045_s12  ;;  %v17981_v53 = vld [vmem:[#allocation73_spill] sm:$0xff] }
 0x5c8   : > { %v6471_v48 = vadd.f32 %v6351_v60, %v17968_v15  ;;  %v6084_v0 = vsel %vm17982_vm12, %v17981_v53, %v14754_v50  ;;  %v17983_v60 = vld [vmem:[#allocation68_spill] sm:$0xff]  ;;  %v5973_v15 = vpop.permute.xlu1 %5972  ;;  %v18004_v53 = vld [vmem:[#allocation10_spill] sm:$0xff]  ;;  %vm18006_vm12 = vmmov %vm17998_vm3 }
 0x5c9   : > { %v6132_v46 = vsel %vm17985_vm5, %v6084_v0, %v5971_v10  ;;  %v17990_v50 = vld [vmem:[#allocation80_spill] sm:$0xff] }
 0x5ca   : > { %v6523_v54 = vadd.f32 %v14977_v58, %v6471_v48  ;;  %9776 = vmatmul.msk.f32.gmra.mxu1 %vm17970_vm11, %v6130_v35  ;;  %v17987_v48 = vld [vmem:[#allocation3_spill] sm:$0xff]  ;;  %v6085_v52 = vsel %vm17992_vm8, %v17991_v24, %v17990_v50  ;;  %vm17994_vm11 = vmmov %vm17985_vm5  ;;  %v18001_v10 = vld [vmem:[#allocation72_spill] sm:$0xff]  ;;  %v5977_v6 = vpop.permute.xlu0 %5976 }
 0x5cb   : > { %vm17988_vm15 = vnez %v17987_v48  ;;  %v15174_v48 = vpop.f32.mrf.mxu3  ;;  %v18011_v50 = vld [vmem:[#allocation31_spill] sm:$0xff]  ;;  %vm18014_vm8 = vmmov %vm17998_vm3 }
 0x5cc   : > { %v6571_v61 = vmax.f32 %v6523_v54, 0.0 }
 0x5ce   : > { %v6619_v34 = vsel %vm17972_vm14, %v6571_v61, 0.0  ;;  %v6765_v20 = vld [vmem:[#allocation2 + $0x71] sm:$0xff]  ;;  %vm17995_vm14 = vmmov %vm17936_vm2 }
 0x5cf   : > { %6667 = vst.msk [vmem:[#allocation2 + $0x79] sm:$0xff] %vm17973_vm10, %v6619_v34  ;;  %v6354_v40 = vpop.f32.mrf.mxu1  ;;  %6923 = vrot.lane.b32.xlu2 %v6765_v20, %s10045_s12  ;;  %v17993_v34 = vld [vmem:[#allocation70_spill] sm:$0xff]  ;;  %vm17997_vm10 = vnez %v17996_v55  ;;  %v5981_v55 = vpop.permute.xlu2 %5980 }
 0x5d0   : > { %v6472_v30 = vadd.f32 %v6354_v40, %v17977_v18  ;;  %v6133_v40 = vsel %vm17994_vm11, %v6085_v52, %v5973_v15 }
 0x5d2   : > { %v6524_v39 = vadd.f32 %v14977_v58, %v6472_v30  ;;  %9777 = vmatmul.msk.f32.gmra.mxu1 %vm17936_vm2, %v6131_v21  ;;  %vm18002_vm2 = vmmov %vm17985_vm5 }
 0x5d3   : > { %vm18009_vm5 = vmmov %vm18002_vm2 }
 0x5d4   : > { %v6572_v8 = vmax.f32 %v6524_v39, 0.0  ;;  %v17999_v39 = vld [vmem:[#allocation78_spill] sm:$0xff]  ;;  %vm18016_vm11 = vmmov %vm18002_vm2 }
 0x5d6   : > { %v6620_v45 = vsel %vm17980_vm0, %v6572_v8, 0.0  ;;  %v6766_v17 = vld [vmem:[#allocation2 + $0x79] sm:$0xff]  ;;  %v6086_v8 = vsel %vm18000_vm9, %v17999_v39, %v14774_v4  ;;  %vm18003_vm0 = vmmov %vm17986_vm6  ;;  %v6087_v4 = vsel %vm18007_vm4, %v14732_v1, %v14779_v11  ;;  %v6088_v11 = vsel %vm18014_vm8, %v14752_v13, %v14796_v23 }
 0x5d7   : > { %6668 = vst.msk [vmem:[#allocation2 + $0x81] sm:$0xff] %vm17939_vm1, %v6620_v45  ;;  %v6357_v44 = vpop.f32.mrf.mxu1  ;;  %6925 = vrot.lane.b32.xlu0 %v6766_v17, %s10045_s12  ;;  %v6134_v45 = vsel %vm18002_vm2, %v6086_v8, %v5975_v57  ;;  %vm18005_vm1 = vnez %v18004_v53  ;;  %v15189_v57 = vpop.f32.mrf.mxu3  ;;  %vm18020_vm9 = vmmov %vm17998_vm3  ;;  %v18021_v8 = vld [vmem:[#allocation81_spill] sm:$0xff] }
 0x5d8   : > { %v6473_v47 = vadd.f32 %v6357_v44, %v17983_v60  ;;  %v6089_v23 = vsel %vm18020_vm9, %v14772_v2, %v14801_v7  ;;  %vm18025_vm4 = vmmov %vm17998_vm3 }
 0x5d9   : > { %v6090_v2 = vsel %vm18025_vm4, %v14794_v22, %v14818_v38  ;;  %vm18031_vm8 = vmmov %vm17998_vm3  ;;  %v18032_v38 = vld [vmem:[#allocation82_spill] sm:$0xff] }
 0x5da   : > { %v6525_v51 = vadd.f32 %v14977_v58, %v6473_v47  ;;  %9778 = vmatmul.msk.f32.gmra.mxu1 %vm17986_vm6, %v6132_v46  ;;  %v18008_v46 = vld [vmem:[#allocation74_spill] sm:$0xff]  ;;  %vm18010_vm6 = vmmov %vm18003_vm0 }
 0x5db   : > { %vm18037_vm9 = vmmov %vm17998_vm3 }
 0x5dc   : > { %v6573_v36 = vmax.f32 %v6525_v51, 0.0  ;;  %vm18042_vm4 = vmmov %vm17998_vm3 }
 0x5de   : > { %v6621_v35 = vsel %vm17988_vm15, %v6573_v36, 0.0  ;;  %v6767_v54 = vld [vmem:[#allocation2 + $0x81] sm:$0xff]  ;;  %v6135_v36 = vsel %vm18009_vm5, %v6087_v4, %v5977_v6  ;;  %vm18012_vm15 = vnez %v18011_v50  ;;  %vm18026_vm5 = vmmov %vm18002_vm2 }
 0x5df   : > { %6669 = vst.msk [vmem:[#allocation2 + $0x89] sm:$0xff] %vm17989_vm13, %v6621_v35  ;;  %v6360_v61 = vpop.f32.mrf.mxu1  ;;  %6927 = vrot.lane.b32.xlu1 %v6767_v54, %s10045_s12  ;;  %v15176_v54 = vpop.f32.mrf.mxu0  ;;  %vm18013_vm13 = vmmov %vm17998_vm3  ;;  %v18022_v6 = vld [vmem:[#allocation18_spill] sm:$0xff] }
 0x5e0   : > { %v6474_v20 = vadd.f32 %v6360_v61, %v17993_v34  ;;  %v5979_v61 = vpop.permute.xlu1 %5978  ;;  %v18015_v34 = vld [vmem:[#allocation77_spill] sm:$0xff]  ;;  %v15211_v7 = vpop.f32.mrf.mxu3 }
 0x5e2   : > { %v6526_v5 = vadd.f32 %v14977_v58, %v6474_v20  ;;  %9779 = vmatmul.msk.f32.gmra.mxu1 %vm17995_vm14, %v6133_v40  ;;  %v6136_v40 = vsel %vm18016_vm11, %v6088_v11, %v5979_v61  ;;  %vm18017_vm14 = vmmov %vm18003_vm0 }
 0x5e3   : > { %vm18033_vm11 = vmmov %vm18002_vm2 }
 0x5e4   : > { %v6574_v33 = vmax.f32 %v6526_v5, 0.0 }
 0x5e6   : > { %v6622_v18 = vsel %vm17997_vm10, %v6574_v33, 0.0  ;;  %v6768_v30 = vld [vmem:[#allocation2 + $0x89] sm:$0xff] }
 0x5e7   : > { %6670 = vst.msk [vmem:[#allocation2 + $0x91] sm:$0xff] %vm17998_vm3, %v6622_v18  ;;  %v6363_v21 = vpop.f32.mrf.mxu1  ;;  %6929 = vrot.lane.b32.xlu2 %v6768_v30, %s10045_s12  ;;  %v18018_v18 = vld [vmem:[#allocation19_spill] sm:$0xff]  ;;  %v15195_v13 = vpop.f32.mrf.mxu0 }
 0x5e8   : > { %v6475_v49 = vadd.f32 %v6363_v21, %v18001_v10  ;;  %vm18019_vm10 = vnez %v18018_v18  ;;  %v18038_v18 = vld [vmem:[#allocation83_spill] sm:$0xff] }
 0x5ea   : > { %v6527_v17 = vadd.f32 %v14977_v58, %v6475_v49  ;;  %9780 = vmatmul.msk.f32.gmra.mxu1 %vm18003_vm0, %v6134_v45  ;;  %v6137_v49 = vsel %vm18002_vm2, %v6089_v23, %v5981_v55 }
 0x5ec   : > { %v6575_v44 = vmax.f32 %v6527_v17, 0.0 }
 0x5ee   : > { %v6623_v0 = vsel %vm18005_vm1, %v6575_v44, 0.0  ;;  %v6769_v60 = vld [vmem:[#allocation2 + $0x91] sm:$0xff]  ;;  %v5983_v44 = vpop.permute.xlu0 %5982  ;;  %vm18023_vm1 = vnez %v18022_v6 }
 0x5ef   : > { %6671 = vst.msk [vmem:[#allocation2 + $0x99] sm:$0xff] %vm18006_vm12, %v6623_v0  ;;  %v6366_v47 = vpop.f32.mrf.mxu1  ;;  %6931 = vrot.lane.b32.xlu0 %v6769_v60, %s10045_s12  ;;  %vm18024_vm12 = vmmov %vm17998_vm3  ;;  %v6138_v4 = vsel %vm18026_vm5, %v6090_v2, %v5983_v44  ;;  %v5455_v2 = vadd.f32 %v15176_v54, %v15174_v48 }
 0x5f0   : > { %v6476_v51 = vadd.f32 %v6366_v47, %v18008_v46  ;;  %v15215_v46 = vpop.f32.mrf.mxu0  ;;  %vm18043_vm5 = vmmov %vm18002_vm2 }
 0x5f2   : > { %v6528_v15 = vadd.f32 %v14977_v58, %v6476_v51  ;;  %9781 = vmatmul.msk.f32.gmra.mxu1 %vm18010_vm6, %v6135_v36  ;;  %vm18027_vm6 = vmmov %vm18003_vm0 }
 0x5f4   : > { %v6576_v35 = vmax.f32 %v6528_v15, 0.0  ;;  %v5985_v15 = vpop.permute.xlu1 %5984 }
 0x5f6   : > { %v6624_v24 = vsel %vm18012_vm15, %v6576_v35, 0.0  ;;  %v6770_v52 = vld [vmem:[#allocation2 + $0x99] sm:$0xff] }
 0x5f7   : > { %6672 = vst.msk [vmem:[#allocation2 + $0xa1] sm:$0xff] %vm18013_vm13, %v6624_v24  ;;  %v6369_v1 = vpop.f32.mrf.mxu1  ;;  %6933 = vrot.lane.b32.xlu1 %v6770_v52, %s10045_s12  ;;  %v18028_v35 = vld [vmem:[#allocation30_spill] sm:$0xff]  ;;  %vm18030_vm13 = vmmov %vm17998_vm3 }
 0x5f8   : > { %v6477_v20 = vadd.f32 %v6369_v1, %v18015_v34  ;;  %vm18029_vm15 = vnez %v18028_v35  ;;  %v15228_v1 = vpop.f32.mrf.mxu3  ;;  %v15232_v34 = vpop.f32.mrf.mxu0 }
 0x5fa   : > { %v6529_v5 = vadd.f32 %v14977_v58, %v6477_v20  ;;  %9782 = vmatmul.msk.f32.gmra.mxu1 %vm18017_vm14, %v6136_v40  ;;  %vm18034_vm14 = vmmov %vm18003_vm0  ;;  %v5987_v40 = vpop.permute.xlu2 %5986 }
 0x5fc   : > { %v6577_v33 = vmax.f32 %v6529_v5, 0.0  ;;  %v18035_v5 = vld [vmem:[#allocation53_spill] sm:$0xff] }
 0x5fe   : > { %v6625_v30 = vsel %vm18019_vm10, %v6577_v33, 0.0  ;;  %v6771_v21 = vld [vmem:[#allocation2 + $0xa1] sm:$0xff]  ;;  %vm18036_vm10 = vnez %v18035_v5  ;;  %v5461_v5 = vadd.f32 %v15215_v46, %v15211_v7 }
 0x5ff   : > { %6673 = vst.msk [vmem:[#allocation2 + $0xa9] sm:$0xff] %vm17998_vm3, %v6625_v30  ;;  %v6372_v39 = vpop.f32.mrf.mxu1  ;;  %6935 = vrot.lane.b32.xlu2 %v6771_v21, %s10045_s12 }
 0x600   : > { %v6478_v10 = vadd.f32 %v6372_v39, %v18021_v8  ;;  %v15245_v23 = vpop.f32.mrf.mxu3 }
 0x602   : > { %v6530_v45 = vadd.f32 %v14977_v58, %v6478_v10  ;;  %9783 = vmatmul.msk.f32.gmra.mxu1 %vm18003_vm0, %v6137_v49  ;;  %v15247_v10 = vpop.f32.mrf.mxu0  ;;  %v5989_v49 = vpop.permute.xlu0 %5988 }
 0x604   : > { %v6578_v17 = vmax.f32 %v6530_v45, 0.0  ;;  %v18039_v45 = vld [vmem:[#allocation4_spill] sm:$0xff] }
 0x606   : > { %v6626_v53 = vsel %vm18023_vm1, %v6578_v17, 0.0  ;;  %v6772_v0 = vld [vmem:[#allocation2 + $0xa9] sm:$0xff]  ;;  %vm18040_vm1 = vnez %v18039_v45 }
 0x607   : > { %6674 = vst.msk [vmem:[#allocation2 + $0xb1] sm:$0xff] %vm18024_vm12, %v6626_v53  ;;  %v6375_v60 = vpop.f32.mrf.mxu1  ;;  %6937 = vrot.lane.b32.xlu0 %v6772_v0, %s10045_s12  ;;  %vm18041_vm12 = vmmov %vm17998_vm3  ;;  %v18060_v45 = vld [vmem:[#allocation35_spill] sm:$0xff] }
 0x608   : > { %v6479_v47 = vadd.f32 %v6375_v60, %v14749_v16  ;;  %v6091_v16 = vsel %vm18031_vm8, %v14816_v27, %v14823_v28  ;;  %v6092_v28 = vsel %vm18037_vm9, %v14840_v14, %v14833_v63  ;;  %v6093_v14 = vsel %vm18042_vm4, %v14859_v62, %v14846_v43  ;;  %vm18048_vm8 = vmmov %vm17998_vm3 }
 0x609   : > { %v6139_v52 = vsel %vm18033_vm11, %v6091_v16, %v5985_v15  ;;  %v6140_v21 = vsel %vm18002_vm2, %v6092_v28, %v5987_v40  ;;  %v6141_v53 = vsel %vm18043_vm5, %v6093_v14, %v5989_v49  ;;  %v6094_v43 = vsel %vm18048_vm8, %v14881_v32, %v14861_v12  ;;  %vm18049_vm11 = vmmov %vm18002_vm2  ;;  %v18051_v16 = vld [vmem:[#allocation52_spill] sm:$0xff] }
 0x60a   : > { %v6531_v51 = vadd.f32 %v14977_v58, %v6479_v47  ;;  %9784 = vmatmul.msk.f32.gmra.mxu1 %vm18027_vm6, %v6138_v4  ;;  %vm18044_vm6 = vmmov %vm18003_vm0  ;;  %v15262_v47 = vpop.f32.mrf.mxu3  ;;  %v5991_v4 = vpop.permute.xlu1 %5990 }
 0x60b   : > { %v15271_v62 = vpop.f32.mrf.mxu0  ;;  %v6142_v48 = vsel %vm18049_vm11, %v6094_v43, %v5991_v4  ;;  %vm18053_vm9 = vmmov %vm17998_vm3 }
 0x60c   : > { %v6579_v36 = vmax.f32 %v6531_v51, 0.0  ;;  %v18045_v51 = vld [vmem:[#allocation37_spill] sm:$0xff]  ;;  %v6095_v32 = vsel %vm18053_vm9, %v14896_v3, %v14869_v42  ;;  %vm18057_vm4 = vmmov %vm17998_vm3 }
 0x60d   : > { %v6096_v28 = vsel %vm18057_vm4, %v14911_v19, %v14889_v59  ;;  %vm18058_vm5 = vmmov %vm18002_vm2 }
 0x60e   : > { %v6627_v61 = vsel %vm18029_vm15, %v6579_v36, 0.0  ;;  %v6773_v50 = vld [vmem:[#allocation2 + $0xb1] sm:$0xff]  ;;  %vm18046_vm15 = vnez %v18045_v51  ;;  %vm18063_vm8 = vmmov %vm17998_vm3  ;;  %v9797_v51 = vld [vmem:[%s16888_s5 + $0x20] sm:$0xff] }
 0x60f   : > { %6675 = vst.msk [vmem:[#allocation2 + $0xb9] sm:$0xff] %vm18030_vm13, %v6627_v61  ;;  %v6378_v22 = vpop.f32.mrf.mxu1  ;;  %6939 = vrot.lane.b32.xlu1 %v6773_v50, %s10045_s12  ;;  %vm18047_vm13 = vmmov %vm17998_vm3  ;;  %v5458_v50 = vadd.f32 %v15195_v13, %v15189_v57  ;;  %7531 = vmatpush.msra.mxu2 %v9797_v51  ;;  %v18087_v51 = vld [vmem:[#allocation28_spill] sm:$0xff] }
 0x610   : > { %v6480_v24 = vadd.f32 %v6378_v22, %v18032_v38  ;;  %v5993_v22 = vpop.permute.xlu2 %5992  ;;  %vm18064_vm11 = vmmov %vm18002_vm2 }
 0x611   : > { %vm18068_vm9 = vmmov %vm17998_vm3 }
 0x612   : > { %v6532_v11 = vadd.f32 %v14977_v58, %v6480_v24  ;;  %9785 = vmatmul.msk.f32.gmra.mxu1 %vm18034_vm14, %v6139_v52  ;;  %vm18050_vm14 = vmmov %vm18003_vm0  ;;  %v15285_v52 = vpop.f32.mrf.mxu3  ;;  %v5997_v49 = vpop.permute.xlu1 %5996 }
 0x613   : > { %v15288_v57 = vpop.f32.mrf.mxu0  ;;  %vm18072_vm4 = vmmov %vm17998_vm3 }
 0x614   : > { %v6580_v20 = vmax.f32 %v6532_v11, 0.0 }
 0x616   : > { %v6628_v33 = vsel %vm18036_vm10, %v6580_v20, 0.0  ;;  %v6774_v55 = vld [vmem:[#allocation2 + $0xb9] sm:$0xff]  ;;  %vm18052_vm10 = vnez %v18051_v16  ;;  %v6143_v20 = vsel %vm18002_vm2, %v6095_v32, %v5993_v22 }
 0x617   : > { %6676 = vst.msk [vmem:[#allocation2 + $0xc1] sm:$0xff] %vm17998_vm3, %v6628_v33  ;;  %v6381_v27 = vpop.f32.mrf.mxu1  ;;  %6941 = vrot.lane.b32.xlu2 %v6774_v55, %s10045_s12  ;;  %v5995_v33 = vpop.permute.xlu0 %5994  ;;  %v18054_v55 = vld [vmem:[#allocation21_spill] sm:$0xff] }
 0x618   : > { %v6481_v30 = vadd.f32 %v6381_v27, %v18038_v18  ;;  %v9896_v16 = vld [vmem:[%s16888_s5 + $0x38] sm:$0xff] }
 0x619   : > { %8634 = vmatpush.msra.mxu0 %v9896_v16 }
 0x61a   : > { %v6533_v39 = vadd.f32 %v14977_v58, %v6481_v30  ;;  %9786 = vmatmul.msk.f32.gmra.mxu1 %vm18003_vm0, %v6140_v21  ;;  %v6144_v30 = vsel %vm18058_vm5, %v6096_v28, %v5995_v33  ;;  %v15302_v21 = vpop.f32.mrf.mxu3  ;;  %vm18073_vm5 = vmmov %vm18002_vm2 }
 0x61b   : > { %v15306_v46 = vpop.f32.mrf.mxu0 }
 0x61c   : > { %v6581_v8 = vmax.f32 %v6533_v39, 0.0 }
 0x61e   : > { %v6629_v17 = vsel %vm18040_vm1, %v6581_v8, 0.0  ;;  %v6775_v44 = vld [vmem:[#allocation2 + $0xc1] sm:$0xff]  ;;  %vm18055_vm1 = vnez %v18054_v55  ;;  %v5464_v8 = vadd.f32 %v15232_v34, %v15228_v1 }
 0x61f   : > { %6677 = vst.msk [vmem:[#allocation2 + $0xc9] sm:$0xff] %vm18041_vm12, %v6629_v17  ;;  %v6384_v63 = vpop.f32.mrf.mxu1  ;;  %6943 = vrot.lane.b32.xlu0 %v6775_v44, %s10045_s12  ;;  %vm18056_vm12 = vmmov %vm17998_vm3  ;;  %v6097_v44 = vsel %vm18063_vm8, %v14927_v26, %v14920_v31 }
 0x620   : > { %v6482_v6 = vadd.f32 %v6384_v63, %v14813_v37  ;;  %v6145_v14 = vsel %vm18064_vm11, %v6097_v44, %v5997_v49  ;;  %vm18078_vm8 = vmmov %vm17998_vm3 }
 0x621   : > { %vm18079_vm11 = vmmov %vm18002_vm2 }
 0x622   : > { %v6534_v0 = vadd.f32 %v14977_v58, %v6482_v6  ;;  %9787 = vmatmul.msk.f32.gmra.mxu1 %vm18044_vm6, %v6141_v53  ;;  %vm18059_vm6 = vmmov %vm18003_vm0  ;;  %v15320_v1 = vpop.f32.mrf.mxu3  ;;  %v5467_v53 = vadd.f32 %v15247_v10, %v15245_v23  ;;  %v7328_v23 = vld [vmem:[%s16888_s5 + $0x8] sm:$0xff]  ;;  %v6098_v10 = vsel %vm18068_vm9, %v14941_v29, %v14908_v56  ;;  %v5571_v56 = vld [vmem:[#allocation2 + $0x198] sm:$0xff] }
 0x623   : > { %7701 = vmatpush.msra.mxu3 %v7328_v23  ;;  %vm18083_vm9 = vmmov %vm17998_vm3 }
 0x624   : > { %v6582_v60 = vmax.f32 %v6534_v0, 0.0  ;;  %v15324_v0 = vpop.f32.mrf.mxu0 }
 0x626   : > { %v6630_v36 = vsel %vm18046_vm15, %v6582_v60, 0.0  ;;  %v6776_v15 = vld [vmem:[#allocation2 + $0xc9] sm:$0xff]  ;;  %vm18061_vm15 = vnez %v18060_v45  ;;  %v5999_v60 = vpop.permute.xlu2 %5998 }
 0x627   : > { %6678 = vst.msk [vmem:[#allocation2 + $0xd1] sm:$0xff] %vm18047_vm13, %v6630_v36  ;;  %v6387_v37 = vpop.f32.mrf.mxu1  ;;  %6945 = vrot.lane.b32.xlu1 %v6776_v15, %s10045_s12  ;;  %vm18062_vm13 = vmmov %vm17998_vm3  ;;  %v6146_v15 = vsel %vm18002_vm2, %v6098_v10, %v5999_v60 }
 0x628   : > { %v6483_v35 = vadd.f32 %v6387_v37, %v5455_v2  ;;  %v18066_v2 = vld [vmem:[#allocation40_spill] sm:$0xff] }
 0x62a   : > { %v6535_v54 = vadd.f32 %v14977_v58, %v6483_v35  ;;  %9788 = vmatmul.msk.f32.gmra.mxu1 %vm18050_vm14, %v6142_v48  ;;  %vm18065_vm14 = vmmov %vm18003_vm0  ;;  %v5470_v35 = vadd.f32 %v15271_v62, %v15262_v47  ;;  %v5311_v48 = vpop.f32.mrf.mxu3 }
 0x62c   : > { %v6583_v61 = vmax.f32 %v6535_v54, 0.0  ;;  %v6001_v54 = vpop.permute.xlu0 %6000  ;;  %v5481_v47 = vpop.f32.mrf.mxu0 }
 0x62e   : > { %v6631_v38 = vsel %vm18052_vm10, %v6583_v61, 0.0  ;;  %v6777_v24 = vld [vmem:[#allocation2 + $0xd1] sm:$0xff]  ;;  %vm18067_vm10 = vnez %v18066_v2 }
 0x62f   : > { %6679 = vst.msk [vmem:[#allocation2 + $0xd9] sm:$0xff] %vm17998_vm3, %v6631_v38  ;;  %v6390_v12 = vpop.f32.mrf.mxu1  ;;  %6947 = vrot.lane.b32.xlu2 %v6777_v24, %s10045_s12  ;;  %v18069_v61 = vld [vmem:[#allocation8_spill] sm:$0xff]  ;;  %v6099_v38 = vsel %vm18072_vm4, %v5571_v56, %v14938_v25  ;;  %vm18088_vm4 = vnez %v18087_v51  ;;  %v15422_v51 = vld [vmem:[%s16887_s4] ss:$0 sm:$0xff] }
 0x630   : > { %v6484_v11 = vadd.f32 %v6390_v12, %v5458_v50  ;;  %v6147_v24 = vsel %vm18073_vm5, %v6099_v38, %v6001_v54  ;;  %vm18089_vm5 = vmmov %vm17998_vm3  ;;  %v18093_v38 = vld [vmem:[#allocation54_spill] sm:$0xff] }
 0x632   : > { %v6536_v13 = vadd.f32 %v14977_v58, %v6484_v11  ;;  %9789 = vmatmul.msk.f32.gmra.mxu1 %vm18003_vm0, %v6143_v20  ;;  %v5572_v11 = vld [vmem:[#allocation2 + $0x1a0] sm:$0xff]  ;;  %v5473_v20 = vadd.f32 %v15288_v57, %v15285_v52 }
 0x633   : > { %v6100_v55 = vsel %vm18078_vm8, %v5572_v11, %v14925_v41  ;;  %vm18095_vm8 = vmmov %vm17998_vm3 }
 0x634   : > { %v6584_v40 = vmax.f32 %v6536_v13, 0.0  ;;  %v6003_v13 = vpop.permute.xlu1 %6002  ;;  %v5484_v28 = vpop.f32.mrf.mxu0 }
 0x636   : > { %v6632_v27 = vsel %vm18055_vm1, %v6584_v40, 0.0  ;;  %v6778_v42 = vld [vmem:[#allocation2 + $0xd9] sm:$0xff]  ;;  %vm18070_vm1 = vnez %v18069_v61 }
 0x637   : > { %6680 = vst.msk [vmem:[#allocation2 + $0xe1] sm:$0xff] %vm18056_vm12, %v6632_v27  ;;  %v6393_v3 = vpop.f32.mrf.mxu1  ;;  %6949 = vrot.lane.b32.xlu0 %v6778_v42, %s10045_s12  ;;  %vm18071_vm12 = vmmov %vm17998_vm3  ;;  %v18075_v40 = vld [vmem:[#allocation17_spill] sm:$0xff]  ;;  %v5314_v27 = vpop.f32.mrf.mxu3 }
 0x638   : > { %v6485_v18 = vadd.f32 %v6393_v3, %v5461_v5  ;;  %v6148_v3 = vsel %vm18079_vm11, %v6100_v55, %v6003_v13 }
 0x63a   : > { %v6537_v7 = vadd.f32 %v14977_v58, %v6485_v18  ;;  %9790 = vmatmul.msk.f32.gmra.mxu1 %vm18059_vm6, %v6144_v30  ;;  %vm18074_vm6 = vmmov %vm18003_vm0  ;;  %v5573_v18 = vld [vmem:[#allocation2 + $0x1a8] sm:$0xff]  ;;  %v5476_v30 = vadd.f32 %v15306_v46, %v15302_v21 }
 0x63b   : > { %v6101_v45 = vsel %vm18083_vm9, %v5573_v18, %v14953_v9  ;;  %v18099_v18 = vld [vmem:[#allocation29_spill] sm:$0xff] }
 0x63c   : > { %v6585_v39 = vmax.f32 %v6537_v7, 0.0  ;;  %v6005_v7 = vpop.permute.xlu2 %6004  ;;  %v5487_v21 = vpop.f32.mrf.mxu0 }
 0x63e   : > { %v6633_v17 = vsel %vm18061_vm15, %v6585_v39, 0.0  ;;  %v6779_v59 = vld [vmem:[#allocation2 + $0xe1] sm:$0xff]  ;;  %vm18076_vm15 = vnez %v18075_v40 }
 0x63f   : > { %6681 = vst.msk [vmem:[#allocation2 + $0xe9] sm:$0xff] %vm18062_vm13, %v6633_v17  ;;  %v6396_v19 = vpop.f32.mrf.mxu1  ;;  %6951 = vrot.lane.b32.xlu1 %v6779_v59, %s10045_s12  ;;  %vm18077_vm13 = vmmov %vm17998_vm3  ;;  %v18081_v39 = vld [vmem:[#allocation34_spill] sm:$0xff]  ;;  %v6149_v59 = vsel %vm18002_vm2, %v6101_v45, %v6005_v7 }
 0x640   : > { %v6486_v63 = vadd.f32 %v6396_v19, %v5464_v8  ;;  %v5317_v19 = vpop.f32.mrf.mxu3  ;;  %vm18103_vm2 = vmmov %vm17998_vm3 }
 0x641   : > { %v5488_v16 = vadd.f32 %v5487_v21, %v5317_v19  ;;  %v18101_v19 = vld [vmem:[#allocation46_spill] sm:$0xff] }
 0x642   : > { %v6538_v6 = vadd.f32 %v14977_v58, %v6486_v63  ;;  %9791 = vmatmul.msk.f32.gmra.mxu1 %vm18065_vm14, %v6145_v14  ;;  %vm18080_vm14 = vmmov %vm18003_vm0  ;;  %v5479_v63 = vadd.f32 %v15324_v0, %v15320_v1  ;;  %v18084_v14 = vld [vmem:[#allocation9_spill] sm:$0xff]  ;;  %vm18102_vm9 = vnez %v18101_v19  ;;  %v15453_v19 = vpop.permute.xlu1 %6897 }
 0x644   : > { %v6586_v34 = vmax.f32 %v6538_v6, 0.0 }
 0x646   : > { %v6634_v4 = vsel %vm18067_vm10, %v6586_v34, 0.0  ;;  %v6780_v31 = vld [vmem:[#allocation2 + $0xe9] sm:$0xff]  ;;  %vm18082_vm10 = vnez %v18081_v39 }
 0x647   : > { %6682 = vst.msk [vmem:[#allocation2 + $0xf1] sm:$0xff] %vm17998_vm3, %v6634_v4  ;;  %v6399_v26 = vpop.f32.mrf.mxu1  ;;  %6953 = vrot.lane.b32.xlu2 %v6780_v31, %s10045_s12  ;;  %v5490_v31 = vpop.f32.mrf.mxu0 }
 0x648   : > { %v6487_v36 = vadd.f32 %v6399_v26, %v5467_v53  ;;  %v5320_v2 = vpop.f32.mrf.mxu3  ;;  %v5482_v26 = vadd.f32 %v5481_v47, %v5311_v48 }
 0x649   : > { %v5491_v40 = vadd.f32 %v5490_v31, %v5320_v2 }
 0x64a   : > { %v6539_v37 = vadd.f32 %v14977_v58, %v6487_v36  ;;  %9792 = vmatmul.msk.f32.gmra.mxu1 %vm18003_vm0, %v6146_v15 }
 0x64c   : > { %v6587_v43 = vmax.f32 %v6539_v37, 0.0  ;;  %v5485_v37 = vadd.f32 %v5484_v28, %v5314_v27 }
 0x64e   : > { %v6635_v50 = vsel %vm18070_vm1, %v6587_v43, 0.0  ;;  %v6781_v22 = vld [vmem:[#allocation2 + $0xf1] sm:$0xff]  ;;  %vm18085_vm1 = vnez %v18084_v14 }
 0x64f   : > { %6683 = vst.msk [vmem:[#allocation2 + $0xf9] sm:$0xff] %vm18071_vm12, %v6635_v50  ;;  %v6402_v29 = vpop.f32.mrf.mxu1  ;;  %6955 = vrot.lane.b32.xlu0 %v6781_v22, %s10045_s12  ;;  %vm18086_vm12 = vmmov %vm17998_vm3  ;;  %v5493_v50 = vpop.f32.mrf.mxu0 }
 0x650   : > { %v6488_v62 = vadd.f32 %v6402_v29, %v5470_v35  ;;  %v5323_v43 = vpop.f32.mrf.mxu3  ;;  %v18090_v35 = vld [vmem:[#allocation6_spill] sm:$0xff] }
 0x652   : > { %v6540_v12 = vadd.f32 %v14977_v58, %v6488_v62  ;;  %9793 = vmatmul.msk.f32.gmra.mxu1 %vm18074_vm6, %v6147_v24  ;;  %vm18091_vm6 = vnez %v18090_v35 }
 0x654   : > { %v6588_v32 = vmax.f32 %v6540_v12, 0.0 }
 0x656   : > { %v6636_v5 = vsel %vm18076_vm15, %v6588_v32, 0.0  ;;  %v6782_v33 = vld [vmem:[#allocation2 + $0xf9] sm:$0xff]  ;;  %vm18092_vm15 = vmmov %vm17998_vm3 }
 0x657   : > { %6684 = vst.msk [vmem:[#allocation2 + $0x101] sm:$0xff] %vm18077_vm13, %v6636_v5  ;;  %v6405_v25 = vpop.f32.mrf.mxu1  ;;  %6957 = vrot.lane.b32.xlu1 %v6782_v33, %s10045_s12  ;;  %vm18094_vm13 = vnez %v18093_v38  ;;  %v5496_v11 = vpop.f32.mrf.mxu0  ;;  %v18096_v5 = vld [vmem:[#allocation47_spill] sm:$0xff] }
 0x658   : > { %v6489_v42 = vadd.f32 %v6405_v25, %v5473_v20  ;;  %v5326_v12 = vpop.f32.mrf.mxu3  ;;  %vm18097_vm11 = vnez %v18096_v5 }
 0x65a   : > { %v6541_v52 = vadd.f32 %v14977_v58, %v6489_v42  ;;  %9794 = vmatmul.msk.f32.gmra.mxu1 %vm18080_vm14, %v6148_v3  ;;  %vm18098_vm14 = vmmov %vm17998_vm3 }
 0x65c   : > { %v6589_v57 = vmax.f32 %v6541_v52, 0.0 }
 0x65e   : > { %v6637_v8 = vsel %vm18082_vm10, %v6589_v57, 0.0  ;;  %v6783_v49 = vld [vmem:[#allocation2 + $0x101] sm:$0xff]  ;;  %v5494_v57 = vadd.f32 %v5493_v50, %v5323_v43  ;;  %vm18100_vm10 = vnez %v18099_v18 }
 0x65f   : > { %6685 = vst.msk [vmem:[#allocation2 + $0x109] sm:$0xff] %vm17998_vm3, %v6637_v8  ;;  %v6408_v41 = vpop.f32.mrf.mxu1  ;;  %6959 = vrot.lane.b32.xlu2 %v6783_v49, %s10045_s12  ;;  %v5499_v28 = vpop.f32.mrf.mxu0  ;;  %v18109_v50 = vld [vmem:[#allocation51_spill] sm:$0xff] }
 0x660   : > { %v6490_v17 = vadd.f32 %v6408_v41, %v5476_v30  ;;  %v5329_v42 = vpop.f32.mrf.mxu3 }
 0x662   : > { %v6542_v44 = vadd.f32 %v14977_v58, %v6490_v17  ;;  %9795 = vmatmul.msk.f32.gmra.mxu1 %vm18003_vm0, %v6149_v59  ;;  %v5497_v59 = vadd.f32 %v5496_v11, %v5326_v12 }
 0x664   : > { %v6590_v46 = vmax.f32 %v6542_v44, 0.0 }
 0x666   : > { %v6638_v6 = vsel %vm18085_vm1, %v6590_v46, 0.0  ;;  %v6784_v34 = vld [vmem:[#allocation2 + $0x109] sm:$0xff]  ;;  %vm18106_vm1 = vmmov %vm18103_vm2 }
 0x667   : > { %6686 = vst.msk [vmem:[#allocation2 + $0x111] sm:$0xff] %vm18086_vm12, %v6638_v6  ;;  %v6411_v9 = vpop.f32.mrf.mxu1  ;;  %6961 = vrot.lane.b32.xlu0 %v6784_v34, %s10045_s12  ;;  %v5502_v17 = vpop.f32.mrf.mxu0  ;;  %v5500_v34 = vadd.f32 %v5499_v28, %v5329_v42  ;;  %vm18108_vm12 = vmmov %vm18106_vm1 }
 0x668   : > { %v6491_v53 = vadd.f32 %v6411_v9, %v5479_v63  ;;  %v5332_v41 = vpop.f32.mrf.mxu3 }
 0x66a   : > { %v6543_v60 = vadd.f32 %v14977_v58, %v6491_v53  ;;  %v18104_v53 = vld [vmem:[#allocation11_spill] sm:$0xff] }
 0x66b   : > { %vm18105_vm0 = vnez %v18104_v53  ;;  %v9895_v53 = vld [vmem:[%s16888_s5 + $0x30] sm:$0xff] }
 0x66c   : > { %v6591_v4 = vmax.f32 %v6543_v60, 0.0  ;;  %8635 = vmatpush.msra.mxu0 %v9895_v53  ;;  %v7897_v53 = vld [vmem:[#allocation2 + $0x39] sm:$0xff] }
 0x66e   : > { %v6639_v23 = vsel %vm18088_vm4, %v6591_v4, 0.0  ;;  %v6785_v1 = vld [vmem:[#allocation2 + $0x111] sm:$0xff]  ;;  %vm18110_vm4 = vnez %v18109_v50 }
 0x66f   : > { %6687 = vst.msk [vmem:[#allocation2 + $0x119] sm:$0xff] %vm18089_vm5, %v6639_v23  ;;  %v6414_v0 = vpop.f32.mrf.mxu1  ;;  %6963 = vrot.lane.b32.xlu1 %v6785_v1, %s10045_s12  ;;  %v5505_v31 = vpop.f32.mrf.mxu0  ;;  %v5503_v1 = vadd.f32 %v5502_v17, %v5332_v41  ;;  %vm18111_vm5 = vmmov %vm18106_vm1 }
 0x670   : > { %v6492_v10 = vadd.f32 %v6414_v0, %v5482_v26  ;;  %v5335_v9 = vpop.f32.mrf.mxu3 }
 0x672   : > { %v6544_v36 = vadd.f32 %v14977_v58, %v6492_v10 }
 0x674   : > { %v6592_v15 = vmax.f32 %v6544_v36, 0.0 }
 0x676   : > { %v6640_v54 = vsel %vm18091_vm6, %v6592_v15, 0.0  ;;  %v6786_v61 = vld [vmem:[#allocation2 + $0x119] sm:$0xff]  ;;  %vm18114_vm6 = vmmov %vm18106_vm1 }
 0x677   : > { %6688 = vst.msk [vmem:[#allocation2 + $0x121] sm:$0xff] %vm18092_vm15, %v6640_v54  ;;  %v6417_v48 = vpop.f32.mrf.mxu1  ;;  %6965 = vrot.lane.b32.xlu2 %v6786_v61, %s10045_s12  ;;  %v5508_v35 = vpop.f32.mrf.mxu0 }
 0x678   : > { %v6493_v22 = vadd.f32 %v6417_v48, %v5485_v37  ;;  %v5338_v37 = vpop.f32.mrf.mxu3  ;;  %v5506_v48 = vadd.f32 %v5505_v31, %v5335_v9  ;;  %v18121_v31 = vld [vmem:[#allocation49_spill] sm:$0xff] }
 0x679   : > { %v5509_v12 = vadd.f32 %v5508_v35, %v5338_v37 }
 0x67a   : > { %v6545_v56 = vadd.f32 %v14977_v58, %v6493_v22 }
 0x67c   : > { %v6593_v29 = vmax.f32 %v6545_v56, 0.0 }
 0x67e   : > { %v6641_v47 = vsel %vm18094_vm13, %v6593_v29, 0.0  ;;  %v6787_v62 = vld [vmem:[#allocation2 + $0x121] sm:$0xff]  ;;  %vm18117_vm13 = vmmov %vm18106_vm1 }
 0x67f   : > { %6689 = vst.msk [vmem:[#allocation2 + $0x129] sm:$0xff] %vm18095_vm8, %v6641_v47  ;;  %v6420_v24 = vpop.f32.mrf.mxu1  ;;  %6967 = vrot.lane.b32.xlu0 %v6787_v62, %s10045_s12  ;;  %v5511_v62 = vpop.f32.mrf.mxu0 }
 0x680   : > { %v6494_v32 = vadd.f32 %v6420_v24, %v5488_v16  ;;  %v5341_v38 = vpop.f32.mrf.mxu3 }
 0x681   : > { %v5512_v42 = vadd.f32 %v5511_v62, %v5341_v38 }
 0x682   : > { %v6546_v20 = vadd.f32 %v14977_v58, %v6494_v32  ;;  %v18112_v32 = vld [vmem:[#allocation23_spill] sm:$0xff] }
 0x684   : > { %v6594_v13 = vmax.f32 %v6546_v20, 0.0 }
 0x686   : > { %v6642_v33 = vsel %vm18097_vm11, %v6594_v13, 0.0  ;;  %v6788_v25 = vld [vmem:[#allocation2 + $0x129] sm:$0xff]  ;;  %vm18120_vm11 = vmmov %vm18106_vm1 }
 0x687   : > { %6690 = vst.msk [vmem:[#allocation2 + $0x131] sm:$0xff] %vm18098_vm14, %v6642_v33  ;;  %v6423_v55 = vpop.f32.mrf.mxu1  ;;  %6969 = vrot.lane.b32.xlu1 %v6788_v25, %s10045_s12  ;;  %vm18122_vm14 = vnez %v18121_v31 }
 0x688   : > { %v6495_v27 = vadd.f32 %v6423_v55, %v5491_v40  ;;  %v15439_v40 = vpop.permute.xlu2 %6899  ;;  %v5344_v25 = vpop.f32.mrf.mxu3 }
 0x68a   : > { %v6547_v3 = vadd.f32 %v14977_v58, %v6495_v27  ;;  %v5514_v27 = vpop.f32.mrf.mxu0 }
 0x68c   : > { %v6595_v52 = vmax.f32 %v6547_v3, 0.0  ;;  %v18115_v3 = vld [vmem:[#allocation36_spill] sm:$0xff] }
 0x68d   : > { %vm18116_vm15 = vnez %v18115_v3 }
 0x68e   : > { %v6643_v30 = vsel %vm18100_vm10, %v6595_v52, 0.0  ;;  %v6789_v7 = vld [vmem:[#allocation2 + $0x131] sm:$0xff]  ;;  %vm18123_vm10 = vmmov %vm18106_vm1 }
 0x68f   : > { %6691 = vst.msk [vmem:[#allocation2 + $0x139] sm:$0xff] %vm17998_vm3, %v6643_v30  ;;  %v6426_v39 = vpop.f32.mrf.mxu1  ;;  %6971 = vrot.lane.b32.xlu2 %v6789_v7, %s10045_s12 }
 0x690   : > { %v6496_v8 = vadd.f32 %v6426_v39, %v5494_v57  ;;  %v15444_v57 = vpop.permute.xlu0 %6895  ;;  %v15448_v7 = vpop.permute.xlu2 %6905 }
 0x691   : > { %v5347_v41 = vpop.f32.mrf.mxu3 }
 0x692   : > { %v6548_v49 = vadd.f32 %v14977_v58, %v6496_v8 }
 0x694   : > { %v6596_v45 = vmax.f32 %v6548_v49, 0.0  ;;  %v5515_v49 = vadd.f32 %v5514_v27, %v5344_v25  ;;  %v6803_v25 = vld [vmem:[#allocation2 + $0x22] sm:$0xff]  ;;  %v6801_v27 = vld [vmem:[#allocation2 + $0x12] sm:$0xff] }
 0x696   : > { %v6644_v44 = vsel %vm18102_vm9, %v6596_v45, 0.0  ;;  %v6790_v21 = vld [vmem:[#allocation2 + $0x139] sm:$0xff]  ;;  %v18118_v45 = vld [vmem:[#allocation39_spill] sm:$0xff]  ;;  %vm18126_vm9 = vmmov %vm18106_vm1 }
 0x697   : > { %6692 = vst.msk [vmem:[#allocation2 + $0x141] sm:$0xff] %vm18103_vm2, %v6644_v44  ;;  %v6429_v46 = vpop.f32.mrf.mxu1  ;;  %6973 = vrot.lane.b32.xlu0 %v6790_v21, %s10045_s12  ;;  %vm18119_vm8 = vnez %v18118_v45  ;;  %v9796_v21 = vld [vmem:[%s16888_s5 + $0x18] sm:$0xff]  ;;  %v6804_v45 = vld [vmem:[#allocation2 + $0x2a] sm:$0xff] }
 0x698   : > { %v6497_v63 = vadd.f32 %v6429_v46, %v5497_v59  ;;  %v7327_v46 = vld [vmem:[%s16888_s5] sm:$0xff]  ;;  %7532 = vmatpush.msra.mxu2 %v9796_v21  ;;  %v6809_v21 = vld [vmem:[#allocation2 + $0x52] sm:$0xff] }
 0x699   : > { %7702 = vmatpush.msra.mxu3 %v7327_v46  ;;  %v6807_v46 = vld [vmem:[#allocation2 + $0x42] sm:$0xff] }
 0x69a   : > { %v6549_v14 = vadd.f32 %v14977_v58, %v6497_v63 }
 0x69c   : > { %v6597_v6 = vmax.f32 %v6549_v14, 0.0  ;;  %v5517_v14 = vpop.f32.mrf.mxu0 }
 0x69e   : > { %v6645_v60 = vsel %vm18105_vm0, %v6597_v6, 0.0  ;;  %v6791_v2 = vld [vmem:[#allocation2 + $0x141] sm:$0xff]  ;;  %v15463_v6 = vpop.permute.xlu0 %6901  ;;  %vm18129_vm0 = vmmov %vm18106_vm1 }
 0x69f   : > { %6693 = vst.msk [vmem:[#allocation2 + $0x149] sm:$0xff] %vm18106_vm1, %v6645_v60  ;;  %v6432_v4 = vpop.f32.mrf.mxu1  ;;  %6975 = vrot.lane.b32.xlu1 %v6791_v2, %s10045_s12  ;;  %v6799_v2 = vld [vmem:[#allocation2 + $0x2] sm:$0xff] }
 0x6a0   : > { %v6498_v26 = vadd.f32 %v6432_v4, %v5500_v34  ;;  %v15465_v34 = vpop.permute.xlu2 %6911  ;;  %v5518_v4 = vadd.f32 %v5517_v14, %v5347_v41  ;;  %v6806_v41 = vld [vmem:[#allocation2 + $0x3a] sm:$0xff] }
 0x6a2   : > { %v6550_v58 = vadd.f32 %v15422_v51, %v6498_v26 }
 0x6a4   : > { %v6598_v23 = vmax.f32 %v6550_v58, 0.0 }
 0x6a6   : > { %v6646_v10 = vsel %vm13975_vm7, %v6598_v23, 0.0  ;;  %v6792_v36 = vld [vmem:[#allocation2 + $0x149] sm:$0xff]  ;;  %vm18113_vm7 = vnez %v18112_v32 }
 0x6a7   : > { %6694 = vst.msk [vmem:[#allocation2 + $0x151] sm:$0xff] %vm18108_vm12, %v6646_v10  ;;  %v6435_v15 = vpop.f32.mrf.mxu1  ;;  %6977 = vrot.lane.b32.xlu2 %v6792_v36, %s10045_s12  ;;  %v15476_v10 = vpop.permute.xlu1 %6903  ;;  %vm18132_vm12 = vmmov %vm18129_vm0 }
 0x6a8   : > { %v6499_v43 = vadd.f32 %v6435_v15, %v5503_v1  ;;  %v5350_v1 = vpop.f32.mrf.mxu3  ;;  %v15478_v36 = vpop.permute.xlu0 %6907 }
 0x6a9   : > { %v15480_v15 = vpop.permute.xlu2 %6917 }
 0x6aa   : > { %v6551_v54 = vadd.f32 %v15422_v51, %v6499_v43  ;;  %v5520_v43 = vpop.f32.mrf.mxu0 }
 0x6ac   : > { %v6599_v61 = vmax.f32 %v6551_v54, 0.0  ;;  %v6800_v54 = vld [vmem:[#allocation2 + $0xa] sm:$0xff] }
 0x6ae   : > { %v6647_v22 = vsel %vm18110_vm4, %v6599_v61, 0.0  ;;  %v6793_v56 = vld [vmem:[#allocation2 + $0x151] sm:$0xff]  ;;  %v5521_v61 = vadd.f32 %v5520_v43, %v5350_v1  ;;  %vm18133_vm4 = vmmov %vm18129_vm0 }
 0x6af   : > { %6695 = vst.msk [vmem:[#allocation2 + $0x159] sm:$0xff] %vm18111_vm5, %v6647_v22  ;;  %v6438_v29 = vpop.f32.mrf.mxu1  ;;  %6979 = vrot.lane.b32.xlu0 %v6793_v56, %s10045_s12  ;;  %v6802_v22 = vld [vmem:[#allocation2 + $0x1a] sm:$0xff]  ;;  %v15489_v38 = vpop.permute.xlu1 %6909  ;;  %vm18134_vm5 = vcmask 130048  }
 0x6b0   : > { %v6500_v16 = vadd.f32 %v6438_v29, %v5506_v48  ;;  %v18124_v48 = vld [vmem:[#allocation42_spill] sm:$0xff] }
 0x6b1   : > { %vm18125_vm3 = vnez %v18124_v48  ;;  %v15493_v62 = vpop.permute.xlu2 %6923  ;;  %v7899_v48 = vld [vmem:[#allocation2 + $0x49] sm:$0xff] }
 0x6b2   : > { %v6552_v47 = vadd.f32 %v15422_v51, %v6500_v16 }
 0x6b4   : > { %v6600_v24 = vmax.f32 %v6552_v47, 0.0  ;;  %v15491_v47 = vpop.permute.xlu0 %6913 }
 0x6b6   : > { %v6648_v11 = vsel %vm18113_vm7, %v6600_v24, 0.0  ;;  %v6794_v20 = vld [vmem:[#allocation2 + $0x159] sm:$0xff]  ;;  %vm18135_vm7 = vcmask 195584  }
 0x6b7   : > { %6696 = vst.msk [vmem:[#allocation2 + $0x161] sm:$0xff] %vm18114_vm6, %v6648_v11  ;;  %v6441_v13 = vpop.f32.mrf.mxu1  ;;  %6981 = vrot.lane.b32.xlu1 %v6794_v20, %s10045_s12  ;;  %v5523_v11 = vpop.f32.mrf.mxu0  ;;  %vm18136_vm6 = vmmov %vm18129_vm0 }
 0x6b8   : > { %v6501_v5 = vadd.f32 %v6441_v13, %v5509_v12  ;;  %v5353_v12 = vpop.f32.mrf.mxu3  ;;  %v18127_v13 = vld [vmem:[#allocation5_spill] sm:$0xff]  ;;  %v15502_v3 = vpop.permute.xlu1 %6915 }
 0x6b9   : > { %v5524_v20 = vadd.f32 %v5523_v11, %v5353_v12  ;;  %vm18128_vm2 = vnez %v18127_v13  ;;  %v6815_v11 = vld [vmem:[#allocation2 + $0x82] sm:$0xff]  ;;  %v7901_v13 = vld [vmem:[#allocation2 + $0x59] sm:$0xff] }
 0x6ba   : > { %v6553_v33 = vadd.f32 %v15422_v51, %v6501_v5 }
 0x6bc   : > { %v6601_v55 = vmax.f32 %v6553_v33, 0.0  ;;  %v6805_v33 = vld [vmem:[#allocation2 + $0x32] sm:$0xff] }
 0x6be   : > { %v6649_v28 = vsel %vm18116_vm15, %v6601_v55, 0.0  ;;  %v6795_v52 = vld [vmem:[#allocation2 + $0x161] sm:$0xff]  ;;  %vm18137_vm15 = vmmov %vm18129_vm0 }
 0x6bf   : > { %6697 = vst.msk [vmem:[#allocation2 + $0x169] sm:$0xff] %vm18117_vm13, %v6649_v28  ;;  %v6444_v18 = vpop.f32.mrf.mxu1  ;;  %6983 = vrot.lane.b32.xlu2 %v6795_v52, %s10045_s12  ;;  %v15504_v28 = vpop.permute.xlu0 %6919  ;;  %vm18138_vm13 = vmmov %vm18134_vm5 }
 0x6c0   : > { %v6502_v30 = vadd.f32 %v6444_v18, %v5512_v42  ;;  %v15506_v52 = vpop.permute.xlu2 %6929 }
 0x6c2   : > { %v6554_v39 = vadd.f32 %v15422_v51, %v6502_v30 }
 0x6c4   : > { %v6602_v8 = vmax.f32 %v6554_v39, 0.0  ;;  %v18130_v39 = vld [vmem:[#allocation13_spill] sm:$0xff] }
 0x6c5   : > { %vm18131_vm1 = vnez %v18130_v39  ;;  %v7904_v39 = vld [vmem:[#allocation2 + $0x71] sm:$0xff] }
 0x6c6   : > { %v6650_v17 = vsel %vm18119_vm8, %v6602_v8, 0.0  ;;  %v6796_v59 = vld [vmem:[#allocation2 + $0x169] sm:$0xff]  ;;  %vm18139_vm8 = vmmov %vm18134_vm5 }
 0x6c7   : > { %6698 = vst.msk [vmem:[#allocation2 + $0x171] sm:$0xff] %vm18120_vm11, %v6650_v17  ;;  %v6447_v44 = vpop.f32.mrf.mxu1  ;;  %6985 = vrot.lane.b32.xlu0 %v6796_v59, %s10045_s12  ;;  %v15515_v17 = vpop.permute.xlu1 %6921  ;;  %vm18140_vm11 = vmmov %vm18135_vm7 }
 0x6c8   : > { %v6503_v63 = vadd.f32 %v6447_v44, %v5515_v49  ;;  %v6808_v49 = vld [vmem:[#allocation2 + $0x4a] sm:$0xff]  ;;  %v15517_v59 = vpop.permute.xlu0 %6925 }
 0x6c9   : > { %v7896_v44 = vld [vmem:[#allocation2 + $0x31] sm:$0xff] }
 0x6ca   : > { %v6555_v9 = vadd.f32 %v15422_v51, %v6503_v63 }
 0x6cc   : > { %v6603_v60 = vmax.f32 %v6555_v9, 0.0 }
 0x6ce   : > { %v6651_v26 = vsel %vm18122_vm14, %v6603_v60, 0.0  ;;  %v6797_v58 = vld [vmem:[#allocation2 + $0x171] sm:$0xff]  ;;  %v6810_v60 = vld [vmem:[#allocation2 + $0x5a] sm:$0xff]  ;;  %vm18141_vm14 = vmmov %vm18135_vm7 }
 0x6cf   : > { %6699 = vst.msk [vmem:[#allocation2 + $0x179] sm:$0xff] %vm18123_vm10, %v6651_v26  ;;  %v6450_v23 = vpop.f32.mrf.mxu1  ;;  %7087 = vrot.lane.b32.xlu0 %v6799_v2, %s10048_s9  ;;  %6987 = vrot.lane.b32.xlu1 %v6797_v58, %s10045_s12  ;;  %v15524_v63 = vpop.permute.xlu1 %6927  ;;  %v7898_v26 = vld [vmem:[#allocation2 + $0x41] sm:$0xff]  ;;  %vm18142_vm10 = vcmask 31744  }
 0x6d0   : > { %v6504_v0 = vadd.f32 %v6450_v23, %v5518_v4  ;;  %v15526_v14 = vpop.permute.xlu0 %6931  ;;  %v6811_v58 = vld [vmem:[#allocation2 + $0x62] sm:$0xff] }
 0x6d2   : > { %v6556_v37 = vadd.f32 %v15422_v51, %v6504_v0 }
 0x6d4   : > { %v6604_v35 = vmax.f32 %v6556_v37, 0.0  ;;  %v6812_v37 = vld [vmem:[#allocation2 + $0x6a] sm:$0xff] }
 0x6d6   : > { %v6652_v50 = vsel %vm18125_vm3, %v6604_v35, 0.0  ;;  %v6798_v56 = vld [vmem:[#allocation2 + $0x179] sm:$0xff]  ;;  %vm18143_vm3 = vmmov %vm18129_vm0 }
 0x6d7   : > { %6700 = vst.msk [vmem:[#allocation2 + $0x181] sm:$0xff] %vm18126_vm9, %v6652_v50  ;;  %v6453_v29 = vpop.f32.mrf.mxu1  ;;  %7093 = vrot.lane.b32.xlu0 %v6802_v22, %s10048_s9  ;;  %7089 = vrot.lane.b32.xlu1 %v6800_v54, %s10048_s9  ;;  %v15533_v2 = vpop.permute.xlu1 %6933  ;;  %vm18144_vm9 = vmmov %vm18129_vm0 }
 0x6d8   : > { %v6505_v16 = vadd.f32 %v6453_v29, %v5521_v61  ;;  %6989 = vrot.lane.b32.xlu2 %v6798_v56, %s10045_s12  ;;  %v15535_v4 = vpop.permute.xlu0 %6937  ;;  %v6813_v61 = vld [vmem:[#allocation2 + $0x72] sm:$0xff]  ;;  %v6814_v29 = vld [vmem:[#allocation2 + $0x7a] sm:$0xff] }
 0x6da   : > { %v6557_v24 = vadd.f32 %v15422_v51, %v6505_v16  ;;  %v7900_v16 = vld [vmem:[#allocation2 + $0x51] sm:$0xff] }
 0x6dc   : > { %v6605_v32 = vmax.f32 %v6557_v24, 0.0 }
 0x6de   : > { %v6653_v5 = vsel %vm18128_vm2, %v6605_v32, 0.0  ;;  %vm18145_vm2 = vmmov %vm18134_vm5 }
 0x6df   : > { %6701 = vst.msk [vmem:[#allocation2 + $0x189] sm:$0xff] %vm18129_vm0, %v6653_v5  ;;  %v6456_v55 = vpop.f32.mrf.mxu1  ;;  %7099 = vrot.lane.b32.xlu0 %v6805_v33, %s10048_s9  ;;  %7095 = vrot.lane.b32.xlu1 %v6803_v25, %s10048_s9  ;;  %v15542_v23 = vpop.permute.xlu1 %6939  ;;  %vm18146_vm0 = vmmov %vm18145_vm2 }
 0x6e0   : > { %v6506_v42 = vadd.f32 %v6456_v55, %v5524_v20  ;;  %7091 = vrot.lane.b32.xlu2 %v6801_v27, %s10048_s9  ;;  %v15544_v1 = vpop.permute.xlu0 %6943  ;;  %v7902_v20 = vld [vmem:[#allocation2 + $0x61] sm:$0xff]  ;;  %v6816_v55 = vld [vmem:[#allocation2 + $0x8a] sm:$0xff] }
 0x6e1   : > { %v7903_v27 = vld [vmem:[#allocation2 + $0x69] sm:$0xff] }
 0x6e2   : > { %v6558_v18 = vadd.f32 %v15422_v51, %v6506_v42  ;;  %v15519_v51 = vpop.permute.xlu2 %6935 }
 0x6e4   : > { %v6606_v30 = vmax.f32 %v6558_v18, 0.0 }
 0x6e6   : > { %v6654_v8 = vsel %vm18131_vm1, %v6606_v30, 0.0  ;;  %vm18147_vm1 = vmmov %vm18135_vm7 }
 0x6e7   : > { %6702 = vst.msk [vmem:[#allocation2 + $0x191] sm:$0xff] %vm18132_vm12, %v6654_v8  ;;  %7105 = vrot.lane.b32.xlu0 %v6808_v49, %s10048_s9  ;;  %7101 = vrot.lane.b32.xlu1 %v6806_v41, %s10048_s9  ;;  %v15551_v43 = vpop.permute.xlu1 %6945  ;;  %v10023_v8 = vld [vmem:[#allocation2 + $0x79] sm:$0xff]  ;;  %vm18148_vm12 = vmmov %vm18147_vm1 }
 0x6e8   : > { %7097 = vrot.lane.b32.xlu2 %v6804_v45, %s10048_s9  ;;  %v15553_v35 = vpop.permute.xlu0 %6949 }
 0x6ea   : > { %v15528_v9 = vpop.permute.xlu2 %6941 }
 0x6ef   : > { %8040 = vrot.lane.b32.xlu0 %v7896_v44, %s10045_s12  ;;  %7107 = vrot.lane.b32.xlu1 %v6809_v21, %s10048_s9  ;;  %v15560_v50 = vpop.permute.xlu1 %6951  ;;  %v10024_v44 = vld [vmem:[#allocation2 + $0x81] sm:$0xff] }
 0x6f0   : > { %7103 = vrot.lane.b32.xlu2 %v6807_v46, %s10048_s9  ;;  %v15562_v22 = vpop.permute.xlu0 %6955 }
 0x6f2   : > { %v15537_v31 = vpop.permute.xlu2 %6947 }
 0x6f7   : > { %8042 = vrot.lane.b32.xlu0 %v7897_v53, %s10045_s12  ;;  %8232 = vrot.lane.b32.xlu1 %v6805_v33, %s10048_s9  ;;  %v15569_v24 = vpop.permute.xlu1 %6957 }
 0x6f8   : > { %7109 = vrot.lane.b32.xlu2 %v6810_v60, %s10048_s9  ;;  %v15571_v12 = vpop.permute.xlu0 %6961 }
 0x6fa   : > { %v15546_v0 = vpop.permute.xlu2 %6953 }
 0x6ff   : > { %8044 = vrot.lane.b32.xlu0 %v7898_v26, %s10045_s12  ;;  %8234 = vrot.lane.b32.xlu1 %v6806_v41, %s10048_s9  ;;  %v15578_v5 = vpop.permute.xlu1 %6963  ;;  %v10025_v26 = vld [vmem:[#allocation2 + $0x89] sm:$0xff] }
 0x700   : > { %7111 = vrot.lane.b32.xlu2 %v6811_v58, %s10048_s9  ;;  %v15580_v33 = vpop.permute.xlu0 %6967 }
 0x702   : > { %v15555_v54 = vpop.permute.xlu2 %6959 }
 0x707   : > { %8238 = vrot.lane.b32.xlu0 %v6808_v49, %s10048_s9  ;;  %8236 = vrot.lane.b32.xlu1 %v6807_v46, %s10048_s9  ;;  %v15587_v42 = vpop.permute.xlu1 %6969 }
 0x708   : > { %7113 = vrot.lane.b32.xlu2 %v6812_v37, %s10048_s9 }
 0x709   : > { %v15589_v18 = vpop.permute.xlu0 %6973 }
 0x70a   : > { %v15564_v56 = vpop.permute.xlu2 %6965 }
 0x70f   : > { %8240 = vrot.lane.b32.xlu0 %v6809_v21, %s10048_s9  ;;  %7115 = vrot.lane.b32.xlu1 %v6813_v61, %s10048_s9 }
 0x710   : > { %8046 = vrot.lane.b32.xlu2 %v7899_v48, %s10045_s12 }
 0x711   : > { %v15596_v49 = vpop.permute.xlu1 %6975 }
 0x712   : > { %v15573_v32 = vpop.permute.xlu2 %6971 }
 0x717   : > { %8242 = vrot.lane.b32.xlu0 %v6810_v60, %s10048_s9  ;;  %7117 = vrot.lane.b32.xlu1 %v6814_v29, %s10048_s9  ;;  %v6703_v60 = vld [vmem:[#allocation2] sm:$0xff] }
 0x718   : > { %8048 = vrot.lane.b32.xlu2 %v7900_v16, %s10045_s12 }
 0x71a   : > { %v15582_v25 = vpop.permute.xlu2 %6977 }
 0x71f   : > { %7119 = vrot.lane.b32.xlu0 %v6815_v11, %s10048_s9  ;;  %8052 = vrot.lane.b32.xlu1 %v7902_v20, %s10045_s12  ;;  %v6704_v20 = vld [vmem:[#allocation2 + $0x8] sm:$0xff] }
 0x720   : > { %8050 = vrot.lane.b32.xlu2 %v7901_v13, %s10045_s12  ;;  %v6706_v13 = vld [vmem:[#allocation2 + $0x18] sm:$0xff] }
 0x721   : > { %v15598_v41 = vpop.permute.xlu0 %6979 }
 0x722   : > { %v15591_v30 = vpop.permute.xlu2 %6983 }
 0x727   : > { %7121 = vrot.lane.b32.xlu0 %v6816_v55, %s10048_s9  ;;  %8054 = vrot.lane.b32.xlu1 %v7903_v27, %s10045_s12  ;;  %v7234_v27 = vsel %vm18137_vm15, %v6706_v13, %v15463_v6  ;;  %v6707_v6 = vld [vmem:[#allocation2 + $0x20] sm:$0xff]  ;;  %vm18153_vm15 = vmmov %vm18147_vm1 }
 0x728   : > { %8244 = vrot.lane.b32.xlu2 %v6811_v58, %s10048_s9  ;;  %v6817_v58 = vld [vmem:[#allocation2 + $0x92] sm:$0xff] }
 0x729   : > { %v15605_v21 = vpop.permute.xlu1 %6981 }
 0x72f   : > { %8058 = vrot.lane.b32.xlu0 %v10023_v8, %s10045_s12  ;;  %8056 = vrot.lane.b32.xlu1 %v7904_v39, %s10045_s12 }
 0x730   : > { %8246 = vrot.lane.b32.xlu2 %v6812_v37, %s10048_s9  ;;  %v7231_v37 = vsel %vm18133_vm4, %v6703_v60, %v15444_v57  ;;  %v7232_v57 = vsel %vm18136_vm6, %v6704_v20, %v15453_v19  ;;  %v6819_v19 = vld [vmem:[#allocation2 + $0xa2] sm:$0xff]  ;;  %vm18149_vm4 = vmmov %vm18142_vm10 }
 0x731   : > { %vm18152_vm6 = vmmov %vm18147_vm1 }
 0x732   : > { %v15600_v45 = vpop.permute.xlu2 %6989 }
 0x737   : > { %8060 = vrot.lane.b32.xlu0 %v10024_v44, %s10045_s12  ;;  %8250 = vrot.lane.b32.xlu1 %v6814_v29, %s10048_s9 }
 0x738   : > { %8248 = vrot.lane.b32.xlu2 %v6813_v61, %s10048_s9 }
 0x739   : > { %v15607_v46 = vpop.permute.xlu0 %6985 }
 0x73a   : > { %v7092_v53 = vpop.permute.xlu2 %7091 }
 0x73f   : > { %8062 = vrot.lane.b32.xlu0 %v10025_v26, %s10045_s12  ;;  %8252 = vrot.lane.b32.xlu1 %v6815_v11, %s10048_s9  ;;  %v6818_v11 = vld [vmem:[#allocation2 + $0x9a] sm:$0xff] }
 0x740   : > { %7123 = vrot.lane.b32.xlu2 %v6817_v58, %s10048_s9 }
 0x741   : > { %v7088_v48 = vpop.permute.xlu0 %7087  ;;  %v15614_v29 = vpop.permute.xlu1 %6987 }
 0x742   : > { %v7279_v61 = vsel %vm18134_vm5, %v7231_v37, %v7088_v48  ;;  %v7098_v16 = vpop.permute.xlu2 %7097  ;;  %v10026_v37 = vld [vmem:[#allocation2 + $0x91] sm:$0xff]  ;;  %vm18150_vm5 = vmmov %vm18143_vm3 }
 0x743   : > { %9847 = vmatmul.msk.f32.vlgmr.msra.gmra.mxu3 %vm18135_vm7, %v7279_v61  ;;  %v7235_v61 = vsel %vm18144_vm9, %v6707_v6, %v15476_v10  ;;  %v6708_v10 = vld [vmem:[#allocation2 + $0x28] sm:$0xff]  ;;  %vm18151_vm7 = vmmov %vm18146_vm0 }
 0x744   : > { %vm18160_vm9 = vmmov %vm18150_vm5 }
 0x747   : > { %8256 = vrot.lane.b32.xlu0 %v6817_v58, %s10048_s9  ;;  %8254 = vrot.lane.b32.xlu1 %v6816_v55, %s10048_s9  ;;  %v8881_v55 = vld [vmem:[%s10108_s10 + $0x19] sm:$0xff]  ;;  %v6705_v58 = vld [vmem:[#allocation2 + $0x10] sm:$0xff] }
 0x748   : > { %7125 = vrot.lane.b32.xlu2 %v6818_v11, %s10048_s9  ;;  %9947 = vmatmul.msk.f32.vlgmr.msra.gmra.mxu1 %vm18142_vm10, %v8881_v55  ;;  %v7233_v48 = vsel %vm18143_vm3, %v6705_v58, %v15439_v40  ;;  %v6820_v40 = vld [vmem:[#allocation2 + $0xaa] sm:$0xff]  ;;  %vm18158_vm10 = vmmov %vm18147_vm1 }
 0x749   : > { %v7094_v39 = vpop.permute.xlu0 %7093  ;;  %v7090_v8 = vpop.permute.xlu1 %7089 }
 0x74a   : > { %v7282_v44 = vsel %vm18138_vm13, %v7234_v27, %v7094_v39  ;;  %v7280_v60 = vsel %vm18139_vm8, %v7232_v57, %v7090_v8  ;;  %v15627_v26 = vpop.permute.xlu2 %7103  ;;  %v7281_v57 = vsel %vm18145_vm2, %v7233_v48, %v7092_v53  ;;  %v10027_v8 = vld [vmem:[#allocation2 + $0x99] sm:$0xff]  ;;  %v7236_v53 = vsel %vm18150_vm5, %v6708_v10, %v15448_v7  ;;  %vm18154_vm13 = vmmov %vm18149_vm4  ;;  %v10028_v48 = vld [vmem:[#allocation2 + $0xa9] sm:$0xff] }
 0x74b   : > { %9799 = vmatmul.msk.f32.vlgmr.msra.gmra.mxu2 %vm18140_vm11, %v7282_v44  ;;  %9848 = vmatmul.msk.f32.gmra.mxu3 %vm18141_vm14, %v7280_v60  ;;  %v7284_v58 = vsel %vm18151_vm7, %v7236_v53, %v7098_v16  ;;  %v6709_v7 = vld [vmem:[#allocation2 + $0x30] sm:$0xff]  ;;  %vm18155_vm8 = vmmov %vm18143_vm3 }
 0x74c   : > { %v7237_v16 = vsel %vm18155_vm8, %v6709_v7, %v15478_v36  ;;  %vm18156_vm11 = vmmov %vm18146_vm0  ;;  %v8884_v10 = vld [vmem:[%s10108_s10 + $0x31] sm:$0xff] }
 0x74d   : > { %vm18157_vm14 = vmmov %vm18147_vm1  ;;  %v10030_v53 = vld [vmem:[#allocation2 + $0xb1] sm:$0xff] }
 0x74e   : > { %vm18159_vm3 = vmmov %vm18149_vm4  ;;  %v6710_v36 = vld [vmem:[#allocation2 + $0x38] sm:$0xff] }
 0x74f   : > { %8258 = vrot.lane.b32.xlu0 %v6818_v11, %s10048_s9  ;;  %7127 = vrot.lane.b32.xlu1 %v6819_v19, %s10048_s9  ;;  %v8882_v11 = vld [vmem:[%s10108_s10 + $0x21] sm:$0xff]  ;;  %vm18161_vm2 = vmmov %vm18150_vm5 }
 0x750   : > { %8064 = vrot.lane.b32.xlu2 %v10026_v37, %s10045_s12  ;;  %9948 = vmatmul.msk.f32.gmra.mxu1 %vm18149_vm4, %v8882_v11  ;;  %v6821_v37 = vld [vmem:[#allocation2 + $0xb2] sm:$0xff]  ;;  %vm18164_vm4 = vmmov %vm18152_vm6 }
 0x751   : > { %v7100_v20 = vpop.permute.xlu0 %7099  ;;  %v7096_v13 = vpop.permute.xlu1 %7095  ;;  %vm18165_vm5 = vmmov %vm18164_vm4 }
 0x752   : > { %v7283_v27 = vsel %vm18146_vm0, %v7235_v61, %v7096_v13  ;;  %v15642_v39 = vpop.permute.xlu2 %7109  ;;  %v10029_v61 = vld [vmem:[#allocation2 + $0xa1] sm:$0xff]  ;;  %vm18166_vm7 = vmmov %vm18159_vm3 }
 0x753   : > { %9800 = vmatmul.msk.f32.gmra.mxu2 %vm18147_vm1, %v7283_v27  ;;  %9849 = vmatmul.msk.f32.gmra.mxu3 %vm18148_vm12, %v7281_v57  ;;  %vm18162_vm1 = vmmov %vm18146_vm0 }
 0x754   : > { %vm18163_vm12 = vmmov %vm18152_vm6 }
 0x755   : > { %vm18170_vm8 = vmmov %vm18146_vm0 }
 0x757   : > { %8260 = vrot.lane.b32.xlu0 %v6819_v19, %s10048_s9  ;;  %7129 = vrot.lane.b32.xlu1 %v6820_v40, %s10048_s9  ;;  %v8883_v19 = vld [vmem:[%s10108_s10 + $0x29] sm:$0xff] }
 0x758   : > { %8066 = vrot.lane.b32.xlu2 %v10027_v8, %s10045_s12  ;;  %9949 = vmatmul.msk.f32.gmra.mxu1 %vm18154_vm13, %v8883_v19  ;;  %v6822_v8 = vld [vmem:[#allocation2 + $0xba] sm:$0xff]  ;;  %vm18169_vm13 = vmmov %vm18146_vm0 }
 0x759   : > { %v15653_v60 = vpop.permute.xlu0 %7105  ;;  %v7102_v55 = vpop.permute.xlu1 %7101 }
 0x75a   : > { %v15656_v6 = vpop.permute.xlu2 %7111 }
 0x75b   : > { %9801 = vmatmul.msk.f32.gmra.mxu2 %vm18152_vm6, %v7284_v58  ;;  %9850 = vmatmul.msk.f32.gmra.mxu3 %vm18153_vm15, %v7282_v44  ;;  %v7285_v44 = vsel %vm18156_vm11, %v7237_v16, %v7100_v20  ;;  %v7238_v20 = vsel %vm18160_vm9, %v6710_v36, %v15489_v38  ;;  %v10032_v38 = vld [vmem:[#allocation2 + $0xb9] sm:$0xff]  ;;  %vm18167_vm6 = vmmov %vm18161_vm2 }
 0x75c   : > { %vm18168_vm15 = vmmov %vm18161_vm2 }
 0x75d   : > { %vm18171_vm11 = vmmov %vm18164_vm4 }
 0x75e   : > { %vm18174_vm9 = vmmov %vm18161_vm2 }
 0x75f   : > { %7131 = vrot.lane.b32.xlu0 %v6821_v37, %s10048_s9  ;;  %8070 = vrot.lane.b32.xlu1 %v10028_v48, %s10045_s12 }
 0x760   : > { %8068 = vrot.lane.b32.xlu2 %v10029_v61, %s10045_s12  ;;  %9950 = vmatmul.msk.f32.gmra.mxu1 %vm18159_vm3, %v8884_v10  ;;  %v7286_v61 = vsel %vm18146_vm0, %v7238_v20, %v7102_v55  ;;  %v6711_v55 = vld [vmem:[#allocation2 + $0x40] sm:$0xff] }
 0x761   : > { %v8041_v13 = vpop.permute.xlu0 %8040  ;;  %v15667_v57 = vpop.permute.xlu1 %7107 }
 0x762   : > { %v15670_v11 = vpop.permute.xlu2 %7113  ;;  %v8376_v19 = vsel %vm18161_vm2, %v6709_v7, %v8041_v13  ;;  %v7239_v7 = vsel %vm18167_vm6, %v6711_v55, %v15465_v34  ;;  %v7962_v34 = vld [vmem:[#allocation2 + $0xc2] sm:$0xff]  ;;  %vm18179_vm6 = vmmov %vm18161_vm2 }
 0x763   : > { %9802 = vmatmul.msk.f32.gmra.mxu2 %vm18157_vm14, %v7285_v44  ;;  %9851 = vmatmul.msk.f32.gmra.mxu3 %vm18158_vm10, %v7283_v27  ;;  %vm18172_vm14 = vmmov %vm18164_vm4 }
 0x764   : > { %vm18173_vm10 = vmmov %vm18164_vm4 }
 0x767   : > { %7133 = vrot.lane.b32.xlu0 %v6822_v8, %s10048_s9  ;;  %8072 = vrot.lane.b32.xlu1 %v10030_v53, %s10045_s12  ;;  %v8885_v53 = vld [vmem:[%s10108_s10 + $0x39] sm:$0xff] }
 0x768   : > { %8262 = vrot.lane.b32.xlu2 %v6820_v40, %s10048_s9  ;;  %9951 = vmatmul.msk.f32.gmra.mxu1 %vm18166_vm7, %v8885_v53  ;;  %v10031_v40 = vld [vmem:[#allocation2 + $0xc1] sm:$0xff]  ;;  %v10033_v53 = vld [vmem:[#allocation2 + $0xc9] sm:$0xff]  ;;  %vm18178_vm7 = vmmov %vm18159_vm3 }
 0x769   : > { %v8043_v48 = vpop.permute.xlu0 %8042  ;;  %v8233_v27 = vpop.permute.xlu1 %8232 }
 0x76a   : > { %v8424_v16 = vsel %vm18162_vm1, %v8376_v19, %v8233_v27  ;;  %v8047_v10 = vpop.permute.xlu2 %8046  ;;  %v7287_v19 = vsel %vm18169_vm13, %v7239_v7, %v15627_v26  ;;  %v6712_v26 = vld [vmem:[#allocation2 + $0x48] sm:$0xff]  ;;  %vm18175_vm1 = vmmov %vm18146_vm0 }
 0x76b   : > { %9803 = vmatmul.msk.f32.gmra.mxu2 %vm18163_vm12, %v7286_v61  ;;  %9852 = vmatmul.msk.f32.gmra.mxu3 %vm18164_vm4, %v7284_v58  ;;  %v8377_v58 = vsel %vm18168_vm15, %v6710_v36, %v8043_v48  ;;  %v7850_v36 = vld [vmem:[#allocation2 + $0x40] sm:$0xff]  ;;  %v7240_v48 = vsel %vm18174_vm9, %v6712_v26, %v15491_v47  ;;  %vm18176_vm12 = vmmov %vm18164_vm4  ;;  %v7963_v47 = vld [vmem:[#allocation2 + $0xca] sm:$0xff] }
 0x76c   : > { %9898 = vmatmul.msk.f32.vlgmr.msra.gmra.mxu0 %vm18165_vm5, %v8424_v16  ;;  %v7288_v55 = vsel %vm18146_vm0, %v7240_v48, %v15653_v60  ;;  %vm18177_vm5 = vmmov %vm18164_vm4  ;;  %v6713_v60 = vld [vmem:[#allocation2 + $0x50] sm:$0xff] }
 0x76d   : > { %vm18180_vm15 = vmmov %vm18146_vm0 }
 0x76e   : > { %vm18181_vm13 = vmmov %vm18161_vm2 }
 0x76f   : > { %8076 = vrot.lane.b32.xlu0 %v10031_v40, %s10045_s12  ;;  %8074 = vrot.lane.b32.xlu1 %v10032_v38, %s10045_s12  ;;  %vm18186_vm9 = vmmov %vm18161_vm2 }
 0x770   : > { %8264 = vrot.lane.b32.xlu2 %v6821_v37, %s10048_s9  ;;  %v8886_v37 = vld [vmem:[%s10108_s10 + $0x41] sm:$0xff] }
 0x771   : > { %v8045_v13 = vpop.permute.xlu0 %8044  ;;  %v8235_v20 = vpop.permute.xlu1 %8234  ;;  %9952 = vmatmul.msk.f32.gmra.mxu1 %vm18159_vm3, %v8886_v37 }
 0x772   : > { %v8425_v27 = vsel %vm18170_vm8, %v8377_v58, %v8235_v20  ;;  %v8049_v16 = vpop.permute.xlu2 %8048  ;;  %v7241_v20 = vsel %vm18179_vm6, %v6713_v60, %v15502_v3  ;;  %vm18182_vm8 = vmmov %vm18146_vm0  ;;  %v7965_v3 = vld [vmem:[#allocation2 + $0xda] sm:$0xff] }
 0x773   : > { %9804 = vmatmul.msk.f32.gmra.mxu2 %vm18171_vm11, %v7287_v19  ;;  %9853 = vmatmul.msk.f32.gmra.mxu3 %vm18172_vm14, %v7285_v44  ;;  %v8378_v44 = vsel %vm18161_vm2, %v7850_v36, %v8045_v13  ;;  %v10034_v13 = vld [vmem:[#allocation2 + $0xd1] sm:$0xff]  ;;  %v7289_v37 = vsel %vm18180_vm15, %v7241_v20, %v15667_v57  ;;  %vm18183_vm11 = vmmov %vm18164_vm4 }
 0x774   : > { %9899 = vmatmul.msk.f32.gmra.mxu0 %vm18173_vm10, %v8425_v27  ;;  %vm18184_vm14 = vmmov %vm18164_vm4  ;;  %v6714_v57 = vld [vmem:[#allocation2 + $0x58] sm:$0xff] }
 0x775   : > { %vm18185_vm10 = vmmov %vm18164_vm4 }
 0x776   : > { %vm18187_vm2 = vmmov %vm18146_vm0 }
 0x777   : > { %8078 = vrot.lane.b32.xlu0 %v10033_v53, %s10045_s12  ;;  %8268 = vrot.lane.b32.xlu1 %v7962_v34, %s10048_s9  ;;  %v8379_v53 = vsel %vm18181_vm13, %v6712_v26, %v8047_v10  ;;  %v7242_v10 = vsel %vm18186_vm9, %v6714_v57, %v15480_v15  ;;  %vm18188_vm0 = vmmov %vm18179_vm6  ;;  %v15749_v15 = vld [vmem:[#allocation2 + $0xe2] sm:$0xff] }
 0x778   : > { %8266 = vrot.lane.b32.xlu2 %v6822_v8, %s10048_s9  ;;  %v8887_v8 = vld [vmem:[%s10108_s10 + $0x49] sm:$0xff]  ;;  %vm18192_vm6 = vmmov %vm18188_vm0  ;;  %v7854_v57 = vld [vmem:[#allocation2 + $0x60] sm:$0xff] }
 0x779   : > { %v8239_v40 = vpop.permute.xlu0 %8238  ;;  %v8237_v38 = vpop.permute.xlu1 %8236  ;;  %9953 = vmatmul.msk.f32.gmra.mxu1 %vm18178_vm7, %v8887_v8  ;;  %vm18191_vm7 = vmmov %vm18159_vm3 }
 0x77a   : > { %v8426_v7 = vsel %vm18175_vm1, %v8378_v44, %v8237_v38  ;;  %v8051_v58 = vpop.permute.xlu2 %8050  ;;  %v8427_v48 = vsel %vm18182_vm8, %v8379_v53, %v8239_v40  ;;  %v7964_v44 = vld [vmem:[#allocation2 + $0xd2] sm:$0xff]  ;;  %v7290_v40 = vsel %vm18187_vm2, %v7242_v10, %v15642_v39  ;;  %v8380_v38 = vsel %vm18188_vm0, %v6713_v60, %v8049_v16  ;;  %v6715_v16 = vld [vmem:[#allocation2 + $0x60] sm:$0xff]  ;;  %vm18193_vm15 = vmmov %vm18175_vm1 }
 0x77b   : > { %9805 = vmatmul.msk.f32.gmra.mxu2 %vm18176_vm12, %v7288_v55  ;;  %9854 = vmatmul.msk.f32.gmra.mxu3 %vm18164_vm4, %v7286_v61  ;;  %vm18189_vm12 = vmmov %vm18164_vm4  ;;  %v7917_v39 = vld [vmem:[#allocation2 + $0xd9] sm:$0xff] }
 0x77c   : > { %9900 = vmatmul.msk.f32.gmra.mxu0 %vm18177_vm5, %v8426_v7  ;;  %vm18190_vm5 = vmmov %vm18164_vm4 }
 0x77d   : > { %vm18194_vm13 = vmmov %vm18188_vm0 }
 0x77e   : > { %vm18195_vm8 = vmmov %vm18175_vm1 }
 0x77f   : > { %8080 = vrot.lane.b32.xlu0 %v10034_v13, %s10045_s12  ;;  %8270 = vrot.lane.b32.xlu1 %v7963_v47, %s10048_s9  ;;  %v7853_v13 = vld [vmem:[#allocation2 + $0x58] sm:$0xff]  ;;  %vm18199_vm9 = vmmov %vm18188_vm0 }
 0x780   : > { %7135 = vrot.lane.b32.xlu2 %v7962_v34, %s10048_s9  ;;  %v8888_v34 = vld [vmem:[%s10108_s10 + $0x51] sm:$0xff]  ;;  %v8381_v53 = vsel %vm18194_vm13, %v7853_v13, %v8051_v58  ;;  %v6716_v58 = vld [vmem:[#allocation2 + $0x68] sm:$0xff]  ;;  %vm18200_vm2 = vmmov %vm18188_vm0 }
 0x781   : > { %v8241_v27 = vpop.permute.xlu0 %8240  ;;  %v15722_v61 = vpop.permute.xlu1 %7115  ;;  %9954 = vmatmul.msk.f32.gmra.mxu1 %vm18159_vm3, %v8888_v34  ;;  %vm18201_vm0 = vmmov %vm18175_vm1  ;;  %v6717_v13 = vld [vmem:[#allocation2 + $0x70] sm:$0xff] }
 0x782   : > { %v8245_v36 = vpop.permute.xlu2 %8244  ;;  %v8428_v8 = vsel %vm18175_vm1, %v8380_v38, %v8241_v27  ;;  %vm18202_vm1 = vmmov %vm18164_vm4 }
 0x783   : > { %9806 = vmatmul.msk.f32.gmra.mxu2 %vm18183_vm11, %v7289_v37  ;;  %9855 = vmatmul.msk.f32.gmra.mxu3 %vm18184_vm14, %v7287_v19  ;;  %vm18196_vm11 = vmmov %vm18164_vm4 }
 0x784   : > { %9901 = vmatmul.msk.f32.gmra.mxu0 %vm18185_vm10, %v8427_v48  ;;  %vm18197_vm14 = vmmov %vm18164_vm4 }
 0x785   : > { %vm18198_vm10 = vmmov %vm18164_vm4 }
 0x786   : > { %vm18209_vm13 = vmmov %vm18201_vm0 }
 0x787   : > { %8274 = vrot.lane.b32.xlu0 %v7965_v3, %s10048_s9  ;;  %8272 = vrot.lane.b32.xlu1 %v7964_v44, %s10048_s9 }
 0x788   : > { %7137 = vrot.lane.b32.xlu2 %v7963_v47, %s10048_s9  ;;  %v8889_v47 = vld [vmem:[%s10108_s10 + $0x59] sm:$0xff] }
 0x789   : > { %v8243_v26 = vpop.permute.xlu0 %8242  ;;  %v15738_v19 = vpop.permute.xlu1 %7117  ;;  %9955 = vmatmul.msk.f32.gmra.mxu1 %vm18191_vm7, %v8889_v47  ;;  %vm18206_vm7 = vmmov %vm18159_vm3 }
 0x78a   : > { %v8247_v7 = vpop.permute.xlu2 %8246  ;;  %v8429_v34 = vsel %vm18195_vm8, %v8381_v53, %v8243_v26  ;;  %vm18210_vm8 = vmmov %vm18202_vm1 }
 0x78b   : > { %9807 = vmatmul.msk.f32.gmra.mxu2 %vm18189_vm12, %v7290_v40  ;;  %9856 = vmatmul.msk.f32.gmra.mxu3 %vm18164_vm4, %v7288_v55  ;;  %v7243_v55 = vsel %vm18192_vm6, %v6715_v16, %v15504_v28  ;;  %v7967_v28 = vld [vmem:[#allocation2 + $0xea] sm:$0xff]  ;;  %vm18203_vm12 = vmmov %vm18202_vm1 }
 0x78c   : > { %9902 = vmatmul.msk.f32.gmra.mxu0 %vm18190_vm5, %v8428_v8  ;;  %v7291_v27 = vsel %vm18193_vm15, %v7243_v55, %v15656_v6  ;;  %v7918_v6 = vld [vmem:[#allocation2 + $0xe1] sm:$0xff]  ;;  %vm18204_vm4 = vmmov %vm18201_vm0  ;;  %v7920_v16 = vld [vmem:[#allocation2 + $0xf1] sm:$0xff] }
 0x78d   : > { %vm18205_vm5 = vmmov %vm18202_vm1  ;;  %v7855_v55 = vld [vmem:[#allocation2 + $0x68] sm:$0xff] }
 0x78e   : > { %vm18207_vm6 = vmmov %vm18200_vm2 }
 0x78f   : > { %8276 = vrot.lane.b32.xlu0 %v15749_v15, %s10048_s9  ;;  %7139 = vrot.lane.b32.xlu1 %v7964_v44, %s10048_s9  ;;  %v8890_v44 = vld [vmem:[%s10108_s10 + $0x61] sm:$0xff]  ;;  %vm18208_vm15 = vmmov %vm18200_vm2 }
 0x790   : > { %8082 = vrot.lane.b32.xlu2 %v7917_v39, %s10045_s12  ;;  %v8891_v39 = vld [vmem:[%s10108_s10 + $0x69] sm:$0xff] }
 0x791   : > { %v15757_v60 = vpop.permute.xlu0 %7119  ;;  %v8053_v20 = vpop.permute.xlu1 %8052  ;;  %9956 = vmatmul.msk.f32.gmra.mxu1 %vm18159_vm3, %v8890_v44  ;;  %vm18214_vm3 = vmmov %vm18200_vm2 }
 0x792   : > { %v8249_v48 = vpop.permute.xlu2 %8248  ;;  %v8382_v10 = vsel %vm18199_vm9, %v7854_v57, %v8053_v20  ;;  %vm18215_vm9 = vmmov %vm18206_vm7 }
 0x793   : > { %9808 = vmatmul.msk.f32.gmra.mxu2 %vm18196_vm11, %v7291_v27  ;;  %9857 = vmatmul.msk.f32.gmra.mxu3 %vm18197_vm14, %v7289_v37  ;;  %v7244_v37 = vsel %vm18200_vm2, %v6716_v58, %v15515_v17  ;;  %v7968_v17 = vld [vmem:[#allocation2 + $0xf2] sm:$0xff]  ;;  %vm18211_vm11 = vmmov %vm18202_vm1 }
 0x794   : > { %9903 = vmatmul.msk.f32.gmra.mxu0 %vm18198_vm10, %v8429_v34  ;;  %v7292_v8 = vsel %vm18201_vm0, %v7244_v37, %v15670_v11  ;;  %v7919_v11 = vld [vmem:[#allocation2 + $0xe9] sm:$0xff]  ;;  %vm18212_vm14 = vmmov %vm18201_vm0  ;;  %v7921_v58 = vld [vmem:[#allocation2 + $0xf9] sm:$0xff] }
 0x795   : > { %vm18213_vm10 = vmmov %vm18202_vm1  ;;  %v7856_v37 = vld [vmem:[#allocation2 + $0x70] sm:$0xff] }
 0x797   : > { %8278 = vrot.lane.b32.xlu0 %v7967_v28, %s10048_s9  ;;  %7141 = vrot.lane.b32.xlu1 %v7965_v3, %s10048_s9  ;;  %v8430_v3 = vsel %vm18204_vm4, %v8382_v10, %v8245_v36  ;;  %v7245_v36 = vsel %vm18208_vm15, %v6717_v13, %v15493_v62  ;;  %v8892_v10 = vld [vmem:[%s10108_s10 + $0x71] sm:$0xff]  ;;  %vm18217_vm4 = vmmov %vm18201_vm0 }
 0x798   : > { %8084 = vrot.lane.b32.xlu2 %v7918_v6, %s10045_s12  ;;  %v7293_v34 = vsel %vm18209_vm13, %v7245_v36, %v15722_v61  ;;  %v7969_v6 = vld [vmem:[#allocation2 + $0xfa] sm:$0xff]  ;;  %vm18220_vm15 = vmmov %vm18201_vm0 }
 0x799   : > { %v15774_v26 = vpop.permute.xlu0 %7121  ;;  %v8055_v38 = vpop.permute.xlu1 %8054  ;;  %9957 = vmatmul.msk.f32.gmra.mxu1 %vm18206_vm7, %v8891_v39  ;;  %v6718_v62 = vld [vmem:[#allocation2 + $0x78] sm:$0xff]  ;;  %vm18221_vm13 = vmmov %vm18200_vm2 }
 0x79a   : > { %v15778_v47 = vpop.permute.xlu2 %7123  ;;  %v8383_v20 = vsel %vm18207_vm6, %v7855_v55, %v8055_v38  ;;  %v7922_v55 = vld [vmem:[#allocation2 + $0x101] sm:$0xff]  ;;  %vm18219_vm6 = vmmov %vm18200_vm2 }
 0x79b   : > { %9809 = vmatmul.msk.f32.gmra.mxu2 %vm18202_vm1, %v7292_v8  ;;  %9858 = vmatmul.msk.f32.gmra.mxu3 %vm18203_vm12, %v7290_v40  ;;  %v8431_v57 = vsel %vm18212_vm14, %v8383_v20, %v8247_v7  ;;  %v7246_v7 = vsel %vm18200_vm2, %v6718_v62, %v15517_v59  ;;  %vm18216_vm12 = vmmov %vm18202_vm1  ;;  %v8893_v59 = vld [vmem:[%s10108_s10 + $0x79] sm:$0xff] }
 0x79c   : > { %9904 = vmatmul.msk.f32.gmra.mxu0 %vm18205_vm5, %v8430_v3  ;;  %v7294_v3 = vsel %vm18201_vm0, %v7246_v7, %v15738_v19  ;;  %vm18218_vm5 = vmmov %vm18202_vm1  ;;  %v6719_v19 = vld [vmem:[#allocation2 + $0x80] sm:$0xff] }
 0x79d   : > { %vm18224_vm14 = vmmov %vm18202_vm1 }
 0x79f   : > { %8280 = vrot.lane.b32.xlu0 %v7968_v17, %s10048_s9  ;;  %8088 = vrot.lane.b32.xlu1 %v7920_v16, %s10045_s12 }
 0x7a0   : > { %8086 = vrot.lane.b32.xlu2 %v7919_v11, %s10045_s12 }
 0x7a1   : > { %v8059_v40 = vpop.permute.xlu0 %8058  ;;  %v8057_v53 = vpop.permute.xlu1 %8056  ;;  %9958 = vmatmul.msk.f32.gmra.mxu1 %vm18215_vm9, %v8892_v10  ;;  %vm18227_vm9 = vmmov %vm18200_vm2 }
 0x7a2   : > { %v15794_v44 = vpop.permute.xlu2 %7125  ;;  %v8384_v61 = vsel %vm18214_vm3, %v7856_v37, %v8057_v53  ;;  %vm18226_vm3 = vmmov %vm18206_vm7 }
 0x7a3   : > { %9810 = vmatmul.msk.f32.gmra.mxu2 %vm18210_vm8, %v7293_v34  ;;  %9859 = vmatmul.msk.f32.gmra.mxu3 %vm18211_vm11, %v7291_v27  ;;  %v8432_v16 = vsel %vm18217_vm4, %v8384_v61, %v8249_v48  ;;  %v7247_v48 = vsel %vm18219_vm6, %v6719_v19, %v15524_v63  ;;  %vm18222_vm8 = vmmov %vm18201_vm0  ;;  %v7923_v63 = vld [vmem:[#allocation2 + $0x109] sm:$0xff] }
 0x7a4   : > { %9905 = vmatmul.msk.f32.gmra.mxu0 %vm18213_vm10, %v8431_v57  ;;  %v7295_v20 = vsel %vm18220_vm15, %v7247_v48, %v15757_v60  ;;  %vm18223_vm11 = vmmov %vm18202_vm1  ;;  %v8894_v60 = vld [vmem:[%s10108_s10 + $0x81] sm:$0xff] }
 0x7a5   : > { %vm18225_vm10 = vmmov %vm18202_vm1 }
 0x7a6   : > { %vm18228_vm2 = vmmov %vm18201_vm0 }
 0x7a7   : > { %8282 = vrot.lane.b32.xlu0 %v7969_v6, %s10048_s9  ;;  %8090 = vrot.lane.b32.xlu1 %v7921_v58, %s10045_s12  ;;  %v7858_v58 = vld [vmem:[#allocation2 + $0x80] sm:$0xff]  ;;  %vm18229_vm0 = vmmov %vm18219_vm6 }
 0x7a8   : > { %7143 = vrot.lane.b32.xlu2 %v15749_v15, %s10048_s9  ;;  %v15817_v15 = vld [vmem:[#allocation2 + $0x102] sm:$0xff]  ;;  %vm18232_vm4 = vmmov %vm18218_vm5 }
 0x7a9   : > { %v8061_v27 = vpop.permute.xlu0 %8060  ;;  %v8251_v38 = vpop.permute.xlu1 %8250  ;;  %9959 = vmatmul.msk.f32.gmra.mxu1 %vm18206_vm7, %v8893_v59  ;;  %vm18234_vm7 = vmmov %vm18226_vm3 }
 0x7aa   : > { %v15811_v39 = vpop.permute.xlu2 %8064  ;;  %v8386_v61 = vsel %vm18229_vm0, %v7858_v58, %v8061_v27  ;;  %v6721_v27 = vld [vmem:[#allocation2 + $0x90] sm:$0xff]  ;;  %vm18235_vm6 = vmmov %vm18229_vm0 }
 0x7ab   : > { %9811 = vmatmul.msk.f32.gmra.mxu2 %vm18202_vm1, %v7294_v3  ;;  %9860 = vmatmul.msk.f32.gmra.mxu3 %vm18216_vm12, %v7292_v8  ;;  %v7857_v8 = vld [vmem:[#allocation2 + $0x78] sm:$0xff]  ;;  %vm18230_vm1 = vmmov %vm18228_vm2 }
 0x7ac   : > { %9906 = vmatmul.msk.f32.gmra.mxu0 %vm18218_vm5, %v8432_v16  ;;  %v8385_v36 = vsel %vm18221_vm13, %v7857_v8, %v8059_v40  ;;  %v6720_v40 = vld [vmem:[#allocation2 + $0x88] sm:$0xff]  ;;  %vm18231_vm12 = vmmov %vm18218_vm5  ;;  %v7249_v16 = vsel %vm18235_vm6, %v6721_v27, %v15526_v14 }
 0x7ad   : > { %v8433_v57 = vsel %vm18222_vm8, %v8385_v36, %v8251_v38  ;;  %vm18233_vm5 = vmmov %vm18232_vm4  ;;  %v7925_v36 = vld [vmem:[#allocation2 + $0x119] sm:$0xff] }
 0x7ae   : > { %vm18236_vm15 = vmmov %vm18230_vm1 }
 0x7af   : > { %8284 = vrot.lane.b32.xlu0 %v15817_v15, %s10048_s9  ;;  %8092 = vrot.lane.b32.xlu1 %v7922_v55, %s10045_s12  ;;  %v7297_v19 = vsel %vm18236_vm15, %v7249_v16, %v15778_v47  ;;  %vm18237_vm13 = vmmov %vm18229_vm0  ;;  %v8896_v47 = vld [vmem:[%s10108_s10 + $0x91] sm:$0xff] }
 0x7b0   : > { %7145 = vrot.lane.b32.xlu2 %v7967_v28, %s10048_s9  ;;  %v15836_v28 = vld [vmem:[#allocation2 + $0x10a] sm:$0xff]  ;;  %vm18238_vm8 = vmmov %vm18230_vm1 }
 0x7b1   : > { %v8063_v11 = vpop.permute.xlu0 %8062  ;;  %v8253_v13 = vpop.permute.xlu1 %8252  ;;  %9960 = vmatmul.msk.f32.gmra.mxu1 %vm18226_vm3, %v8894_v60  ;;  %vm18247_vm6 = vmmov %vm18226_vm3 }
 0x7b2   : > { %v15830_v53 = vpop.permute.xlu2 %8066  ;;  %v8434_v38 = vsel %vm18230_vm1, %v8386_v61, %v8253_v13  ;;  %vm18248_vm15 = vmmov %vm18229_vm0 }
 0x7b3   : > { %9812 = vmatmul.msk.f32.gmra.mxu2 %vm18223_vm11, %v7295_v20  ;;  %9861 = vmatmul.msk.f32.gmra.mxu3 %vm18224_vm14, %v7293_v34  ;;  %v7248_v34 = vsel %vm18227_vm9, %v6720_v40, %v15506_v52  ;;  %v7924_v52 = vld [vmem:[#allocation2 + $0x111] sm:$0xff]  ;;  %vm18239_vm11 = vmmov %vm18232_vm4 }
 0x7b4   : > { %9907 = vmatmul.msk.f32.gmra.mxu0 %vm18225_vm10, %v8433_v57  ;;  %v7296_v62 = vsel %vm18228_vm2, %v7248_v34, %v15774_v26  ;;  %v8895_v26 = vld [vmem:[%s10108_s10 + $0x89] sm:$0xff]  ;;  %vm18240_vm14 = vmmov %vm18232_vm4 }
 0x7b5   : > { %vm18241_vm10 = vmmov %vm18232_vm4  ;;  %v7860_v57 = vld [vmem:[#allocation2 + $0x90] sm:$0xff] }
 0x7b6   : > { %vm18242_vm9 = vmmov %vm18229_vm0  ;;  %v8388_v34 = vsel %vm18229_vm0, %v7860_v57, %v15811_v39  ;;  %v6723_v39 = vld [vmem:[#allocation2 + $0xa0] sm:$0xff] }
 0x7b7   : > { %8286 = vrot.lane.b32.xlu0 %v15836_v28, %s10048_s9  ;;  %8094 = vrot.lane.b32.xlu1 %v7923_v63, %s10045_s12  ;;  %vm18243_vm2 = vmmov %vm18230_vm1 }
 0x7b8   : > { %7147 = vrot.lane.b32.xlu2 %v7968_v17, %s10048_s9  ;;  %v15855_v17 = vld [vmem:[#allocation2 + $0x112] sm:$0xff] }
 0x7b9   : > { %v8257_v10 = vpop.permute.xlu0 %8256  ;;  %v8255_v37 = vpop.permute.xlu1 %8254  ;;  %9961 = vmatmul.msk.f32.gmra.mxu1 %vm18234_vm7, %v8895_v26  ;;  %vm18246_vm7 = vmmov %vm18229_vm0  ;;  %v7861_v26 = vld [vmem:[#allocation2 + $0x98] sm:$0xff] }
 0x7ba   : > { %v15849_v7 = vpop.permute.xlu2 %8068 }
 0x7bb   : > { %9813 = vmatmul.msk.f32.gmra.mxu2 %vm18231_vm12, %v7296_v62  ;;  %9862 = vmatmul.msk.f32.gmra.mxu3 %vm18232_vm4, %v7294_v3  ;;  %v7859_v3 = vld [vmem:[#allocation2 + $0x88] sm:$0xff]  ;;  %vm18244_vm12 = vmmov %vm18232_vm4 }
 0x7bc   : > { %9908 = vmatmul.msk.f32.gmra.mxu0 %vm18233_vm5, %v8434_v38  ;;  %v8387_v48 = vsel %vm18237_vm13, %v7859_v3, %v8063_v11  ;;  %v6722_v11 = vld [vmem:[#allocation2 + $0x98] sm:$0xff]  ;;  %vm18245_vm5 = vmmov %vm18232_vm4  ;;  %v15897_v38 = vld [vmem:[#allocation2 + $0x122] sm:$0xff]  ;;  %v8389_v3 = vsel %vm18248_vm15, %v7861_v26, %v15830_v53 }
 0x7bd   : > { %v8435_v13 = vsel %vm18238_vm8, %v8387_v48, %v8255_v37  ;;  %v8436_v37 = vsel %vm18230_vm1, %v8388_v34, %v8257_v10  ;;  %v8897_v10 = vld [vmem:[%s10108_s10 + $0x99] sm:$0xff]  ;;  %vm18249_vm13 = vmmov %vm18230_vm1  ;;  %v7927_v53 = vld [vmem:[#allocation2 + $0x129] sm:$0xff] }
 0x7be   : > { %vm18250_vm8 = vmmov %vm18230_vm1  ;;  %v8899_v26 = vld [vmem:[%s10108_s10 + $0xa9] sm:$0xff] }
 0x7bf   : > { %8288 = vrot.lane.b32.xlu0 %v15855_v17, %s10048_s9  ;;  %8096 = vrot.lane.b32.xlu1 %v7924_v52, %s10045_s12 }
 0x7c0   : > { %7149 = vrot.lane.b32.xlu2 %v7969_v6, %s10048_s9  ;;  %v15874_v6 = vld [vmem:[#allocation2 + $0x11a] sm:$0xff] }
 0x7c1   : > { %v8259_v55 = vpop.permute.xlu0 %8258  ;;  %v7128_v59 = vpop.permute.xlu1 %7127  ;;  %9962 = vmatmul.msk.f32.gmra.mxu1 %vm18226_vm3, %v8896_v47  ;;  %v15921_v47 = vld [vmem:[#allocation2 + $0x12a] sm:$0xff]  ;;  %vm18254_vm3 = vmmov %vm18229_vm0 }
 0x7c2   : > { %v15868_v8 = vpop.permute.xlu2 %8262 }
 0x7c3   : > { %9814 = vmatmul.msk.f32.gmra.mxu2 %vm18239_vm11, %v7297_v19  ;;  %9863 = vmatmul.msk.f32.gmra.mxu3 %vm18240_vm14, %v7295_v20  ;;  %v7250_v20 = vsel %vm18242_vm9, %v6722_v11, %v15533_v2  ;;  %vm18251_vm11 = vmmov %vm18232_vm4 }
 0x7c4   : > { %9909 = vmatmul.msk.f32.gmra.mxu0 %vm18241_vm10, %v8435_v13  ;;  %v7298_v40 = vsel %vm18243_vm2, %v7250_v20, %v15794_v44  ;;  %v7926_v44 = vld [vmem:[#allocation2 + $0x121] sm:$0xff]  ;;  %vm18252_vm14 = vmmov %vm18232_vm4 }
 0x7c5   : > { %v15895_v2 = vpop.f32.mrf.mxu1  ;;  %vm18253_vm10 = vmmov %vm18232_vm4  ;;  %v7862_v20 = vld [vmem:[#allocation2 + $0xa0] sm:$0xff] }
 0x7c6   : > { %v7704_v14 = vpop.f32.mrf.mxu3  ;;  %vm18255_vm9 = vmmov %vm18247_vm6 }
 0x7c7   : > { %8290 = vrot.lane.b32.xlu0 %v15874_v6, %s10048_s9  ;;  %8098 = vrot.lane.b32.xlu1 %v7925_v36, %s10045_s12  ;;  %vm18256_vm2 = vmmov %vm18229_vm0 }
 0x7c8   : > { %7151 = vrot.lane.b32.xlu2 %v15817_v15, %s10048_s9  ;;  %vm18257_vm0 = vmmov %vm18230_vm1 }
 0x7c9   : > { %v8261_v63 = vpop.permute.xlu0 %8260  ;;  %v7130_v60 = vpop.permute.xlu1 %7129  ;;  %9963 = vmatmul.msk.f32.gmra.mxu1 %vm18247_vm6, %v8897_v10  ;;  %vm18258_vm1 = vmmov %vm18257_vm0  ;;  %v15945_v10 = vld [vmem:[#allocation2 + $0x132] sm:$0xff] }
 0x7ca   : > { %v15889_v58 = vpop.permute.xlu2 %8264  ;;  %vm18262_vm6 = vmmov %vm18256_vm2 }
 0x7cb   : > { %9815 = vmatmul.msk.f32.gmra.mxu2 %vm18244_vm12, %v7298_v40  ;;  %9864 = vmatmul.msk.f32.gmra.mxu3 %vm18232_vm4, %v7296_v62  ;;  %v7251_v62 = vsel %vm18246_vm7, %v6723_v39, %v15519_v51  ;;  %vm18259_vm12 = vmmov %vm18232_vm4 }
 0x7cc   : > { %9910 = vmatmul.msk.f32.gmra.mxu0 %vm18245_vm5, %v8436_v37  ;;  %v7299_v48 = vsel %vm18249_vm13, %v7251_v62, %v7128_v59  ;;  %v8898_v59 = vld [vmem:[%s10108_s10 + $0xa1] sm:$0xff]  ;;  %v8390_v37 = vsel %vm18256_vm2, %v7862_v20, %v15849_v7  ;;  %vm18260_vm5 = vmmov %vm18232_vm4  ;;  %v7928_v7 = vld [vmem:[#allocation2 + $0x131] sm:$0xff] }
 0x7cd   : > { %v15919_v51 = vpop.f32.mrf.mxu1  ;;  %v7863_v62 = vld [vmem:[#allocation2 + $0xa8] sm:$0xff]  ;;  %vm18261_vm7 = vmmov %vm18256_vm2 }
 0x7ce   : > { %v7534_v15 = vpop.f32.mrf.mxu2  ;;  %v7707_v61 = vpop.f32.mrf.mxu3  ;;  %vm18263_vm15 = vmmov %vm18255_vm9 }
 0x7cf   : > { %v15899_v52 = vadd.f32 %v7704_v14, %v7534_v15  ;;  %8292 = vrot.lane.b32.xlu0 %v15897_v38, %s10048_s9  ;;  %8100 = vrot.lane.b32.xlu1 %v7926_v44, %s10045_s12  ;;  %v8437_v14 = vsel %vm18250_vm8, %v8389_v3, %v8259_v55  ;;  %v6724_v55 = vld [vmem:[#allocation2 + $0xa8] sm:$0xff]  ;;  %v8438_v44 = vsel %vm18258_vm1, %v8390_v37, %v8261_v63  ;;  %v6725_v63 = vld [vmem:[#allocation2 + $0xb0] sm:$0xff]  ;;  %vm18264_vm13 = vmmov %vm18257_vm0 }
 0x7d0   : > { %7153 = vrot.lane.b32.xlu2 %v15836_v28, %s10048_s9  ;;  %v7253_v3 = vsel %vm18262_vm6, %v6725_v63, %v15542_v23  ;;  %vm18265_vm8 = vmmov %vm18232_vm4  ;;  %v15984_v37 = vld [vmem:[%s16889_s6] ss:$0 sm:$0xff] }
 0x7d1   : > { %v7132_v27 = vpop.permute.xlu0 %7131  ;;  %v8071_v16 = vpop.permute.xlu1 %8070  ;;  %9964 = vmatmul.msk.f32.gmra.mxu1 %vm18255_vm9, %v8898_v59  ;;  %v15971_v59 = vld [vmem:[#allocation2 + $0x13a] sm:$0xff]  ;;  %vm18270_vm9 = vmmov %vm18256_vm2 }
 0x7d2   : > { %v15913_v13 = vpop.permute.xlu2 %8266  ;;  %vm18272_vm1 = vmmov %vm18232_vm4 }
 0x7d3   : > { %9816 = vmatmul.msk.f32.gmra.mxu2 %vm18251_vm11, %v7299_v48  ;;  %9865 = vmatmul.msk.f32.gmra.mxu3 %vm18252_vm14, %v7297_v19  ;;  %v7252_v19 = vsel %vm18254_vm3, %v6724_v55, %v15535_v4  ;;  %vm18266_vm11 = vmmov %vm18232_vm4 }
 0x7d4   : > { %9911 = vmatmul.msk.f32.gmra.mxu0 %vm18253_vm10, %v8437_v14  ;;  %v7300_v15 = vsel %vm18257_vm0, %v7252_v19, %v7130_v60  ;;  %vm18267_vm14 = vmmov %vm18257_vm0  ;;  %v7929_v19 = vld [vmem:[#allocation2 + $0x139] sm:$0xff] }
 0x7d5   : > { %v15943_v4 = vpop.f32.mrf.mxu1  ;;  %vm18268_vm10 = vmmov %vm18232_vm4 }
 0x7d6   : > { %v7537_v28 = vpop.f32.mrf.mxu2  ;;  %v7710_v36 = vpop.f32.mrf.mxu3  ;;  %vm18269_vm3 = vmmov %vm18256_vm2 }
 0x7d7   : > { %v15923_v11 = vadd.f32 %v7707_v61, %v7537_v28  ;;  %8294 = vrot.lane.b32.xlu0 %v15921_v47, %s10048_s9  ;;  %8102 = vrot.lane.b32.xlu1 %v7927_v53, %s10045_s12  ;;  %vm18271_vm2 = vmmov %vm18263_vm15 }
 0x7d8   : > { %7155 = vrot.lane.b32.xlu2 %v15855_v17, %s10048_s9  ;;  %vm18277_vm6 = vmmov %vm18269_vm3 }
 0x7d9   : > { %v7134_v57 = vpop.permute.xlu0 %7133  ;;  %v8073_v34 = vpop.permute.xlu1 %8072  ;;  %9965 = vmatmul.msk.f32.gmra.mxu1 %vm18263_vm15, %v8899_v26  ;;  %vm18278_vm15 = vmmov %vm18271_vm2 }
 0x7da   : > { %v15937_v61 = vpop.permute.xlu2 %7135 }
 0x7db   : > { %9817 = vmatmul.msk.f32.gmra.mxu2 %vm18259_vm12, %v7300_v15  ;;  %9866 = vmatmul.msk.f32.gmra.mxu3 %vm18232_vm4, %v7298_v40  ;;  %v8391_v40 = vsel %vm18261_vm7, %v7863_v62, %v8071_v16  ;;  %vm18273_vm12 = vmmov %vm18272_vm1 }
 0x7dc   : > { %9912 = vmatmul.msk.f32.gmra.mxu0 %vm18260_vm5, %v8438_v44  ;;  %v8900_v44 = vld [vmem:[%s10108_s10 + $0xb1] sm:$0xff]  ;;  %vm18274_vm4 = vmmov %vm18257_vm0 }
 0x7dd   : > { %v15969_v23 = vpop.f32.mrf.mxu1  ;;  %vm18275_vm5 = vmmov %vm18272_vm1 }
 0x7de   : > { %v7540_v17 = vpop.f32.mrf.mxu2  ;;  %v7713_v39 = vpop.f32.mrf.mxu3  ;;  %vm18276_vm7 = vmmov %vm18269_vm3 }
 0x7df   : > { %v15947_v60 = vadd.f32 %v7710_v36, %v7540_v17  ;;  %8296 = vrot.lane.b32.xlu0 %v15945_v10, %s10048_s9  ;;  %8104 = vrot.lane.b32.xlu1 %v7928_v7, %s10045_s12  ;;  %v7301_v36 = vsel %vm18264_vm13, %v7253_v3, %v7132_v27  ;;  %v7864_v27 = vld [vmem:[#allocation2 + $0xb0] sm:$0xff]  ;;  %vm18279_vm13 = vmmov %vm18257_vm0 }
 0x7e0   : > { %7157 = vrot.lane.b32.xlu2 %v15874_v6, %s10048_s9  ;;  %v8439_v6 = vsel %vm18267_vm14, %v8391_v40, %v15868_v8  ;;  %v8392_v8 = vsel %vm18269_vm3, %v7864_v27, %v8073_v34  ;;  %vm18282_vm14 = vmmov %vm18257_vm0 }
 0x7e1   : > { %v15958_v14 = vpop.permute.xlu0 %8076  ;;  %v8075_v28 = vpop.permute.xlu1 %8074  ;;  %9966 = vmatmul.msk.f32.gmra.mxu1 %vm18271_vm2, %v8900_v44  ;;  %v8440_v40 = vsel %vm18274_vm4, %v8392_v8, %v15889_v58  ;;  %v6727_v58 = vld [vmem:[#allocation2 + $0xc0] sm:$0xff]  ;;  %vm18288_vm4 = vmmov %vm18275_vm5 }
 0x7e2   : > { %v15962_v53 = vpop.permute.xlu2 %7137 }
 0x7e3   : > { %9818 = vmatmul.msk.f32.gmra.mxu2 %vm18265_vm8, %v7301_v36  ;;  %9867 = vmatmul.msk.f32.gmra.mxu3 %vm18266_vm11, %v7299_v48  ;;  %v6726_v48 = vld [vmem:[#allocation2 + $0xb8] sm:$0xff]  ;;  %vm18280_vm8 = vmmov %vm18272_vm1 }
 0x7e4   : > { %9913 = vmatmul.msk.f32.gmra.mxu0 %vm18268_vm10, %v8439_v6  ;;  %v7254_v17 = vsel %vm18270_vm9, %v6726_v48, %v15528_v9  ;;  %v16007_v6 = vld [vmem:[#allocation2 + $0x142] sm:$0xff]  ;;  %v7255_v48 = vsel %vm18277_vm6, %v6727_v58, %v15544_v1  ;;  %vm18281_vm11 = vmmov %vm18272_vm1 }
 0x7e5   : > { %v7302_v62 = vsel %vm18257_vm0, %v7254_v17, %v7134_v57  ;;  %v16002_v26 = vpop.f32.mrf.mxu1  ;;  %vm18283_vm10 = vmmov %vm18272_vm1 }
 0x7e6   : > { %v7543_v16 = vpop.f32.mrf.mxu2  ;;  %v7716_v55 = vpop.f32.mrf.mxu3  ;;  %vm18284_vm9 = vmmov %vm18271_vm2 }
 0x7e7   : > { %v15973_v20 = vadd.f32 %v7713_v39, %v7543_v16  ;;  %8298 = vrot.lane.b32.xlu0 %v15971_v59, %s10048_s9  ;;  %8106 = vrot.lane.b32.xlu1 %v7929_v19, %s10045_s12  ;;  %v7930_v16 = vld [vmem:[#allocation2 + $0x141] sm:$0xff]  ;;  %v7865_v19 = vld [vmem:[#allocation2 + $0xb8] sm:$0xff]  ;;  %vm18285_vm2 = vmmov %vm18269_vm3 }
 0x7e8   : > { %7159 = vrot.lane.b32.xlu2 %v15897_v38, %s10048_s9  ;;  %v8393_v27 = vsel %vm18276_vm7, %v7865_v19, %v8075_v28  ;;  %v7866_v19 = vld [vmem:[#allocation2 + $0xc0] sm:$0xff]  ;;  %vm18290_vm7 = vmmov %vm18284_vm9 }
 0x7e9   : > { %v8637_v39 = vpop.f32.mrf.mxu0  ;;  %v15989_v7 = vpop.permute.xlu0 %8078  ;;  %v8441_v1 = vsel %vm18282_vm14, %v8393_v27, %v15913_v13  ;;  %v6728_v13 = vld [vmem:[#allocation2 + $0xc8] sm:$0xff]  ;;  %vm18291_vm6 = vmmov %vm18285_vm2 }
 0x7ea   : > { %v8781_v34 = vadd.f32 %v8637_v39, %v15899_v52  ;;  %v8269_v63 = vpop.permute.xlu1 %8268  ;;  %v15994_v38 = vpop.permute.xlu2 %8082  ;;  %vm18296_vm14 = vmmov %vm18288_vm4 }
 0x7eb   : > { %9819 = vmatmul.msk.f32.gmra.mxu2 %vm18272_vm1, %v7302_v62  ;;  %9868 = vmatmul.msk.f32.gmra.mxu3 %vm18273_vm12, %v7300_v15  ;;  %vm18286_vm1 = vmmov %vm18257_vm0 }
 0x7ec   : > { %9914 = vmatmul.msk.f32.gmra.mxu0 %vm18275_vm5, %v8440_v40  ;;  %v8833_v9 = vadd.f32 %v15984_v37, %v8781_v34  ;;  %vm18287_vm12 = vmmov %vm18275_vm5 }
 0x7ed   : > { %vm18289_vm5 = vmmov %vm18288_vm4 }
 0x7ee   : > { %v16005_v57 = vadd.f32 %v15895_v2, %v8833_v9  ;;  %v7546_v52 = vpop.f32.mrf.mxu2  ;;  %v7719_v3 = vpop.f32.mrf.mxu3  ;;  %v8901_v2 = vld [vmem:[%s10108_s10 + $0xb9] sm:$0xff]  ;;  %v16039_v9 = vld [vmem:[#allocation2 + $0x14a] sm:$0xff] }
 0x7ef   : > { %v16009_v15 = vadd.f32 %v7716_v55, %v7546_v52  ;;  %8300 = vrot.lane.b32.xlu0 %v16007_v6, %s10048_s9  ;;  %8108 = vrot.lane.b32.xlu1 %v7930_v16, %s10045_s12  ;;  %v7303_v55 = vsel %vm18279_vm13, %v7255_v48, %v15937_v61  ;;  %v16034_v28 = vpop.f32.mrf.mxu1  ;;  %v7931_v52 = vld [vmem:[#allocation2 + $0x149] sm:$0xff]  ;;  %vm18293_vm13 = vmmov %vm18257_vm0 }
 0x7f0   : > { %7161 = vrot.lane.b32.xlu2 %v15921_v47, %s10048_s9  ;;  %9967 = vmatmul.msk.f32.gmra.mxu1 %vm18278_vm15, %v8901_v2  ;;  %vm18292_vm15 = vmmov %vm18285_vm2 }
 0x7f1   : > { %v8640_v8 = vpop.f32.mrf.mxu0  ;;  %v16020_v44 = vpop.permute.xlu0 %8080 }
 0x7f2   : > { %v8782_v17 = vadd.f32 %v8640_v8, %v15923_v11  ;;  %v8271_v39 = vpop.permute.xlu1 %8270  ;;  %v16026_v34 = vpop.permute.xlu2 %8084 }
 0x7f3   : > { %9820 = vmatmul.msk.f32.gmra.mxu2 %vm18280_vm8, %v7303_v55  ;;  %9869 = vmatmul.msk.f32.gmra.mxu3 %vm18281_vm11, %v7301_v36  ;;  %v8902_v36 = vld [vmem:[%s10108_s10 + $0xc1] sm:$0xff]  ;;  %vm18294_vm8 = vmmov %vm18257_vm0 }
 0x7f4   : > { %9915 = vmatmul.msk.f32.gmra.mxu0 %vm18283_vm10, %v8441_v1  ;;  %v8834_v47 = vadd.f32 %v15984_v37, %v8782_v17  ;;  %vm18295_vm11 = vmmov %vm18288_vm4 }
 0x7f5   : > { %vm18297_vm10 = vmmov %vm18288_vm4 }
 0x7f6   : > { %v16037_v61 = vadd.f32 %v15919_v51, %v8834_v47  ;;  %v7549_v11 = vpop.f32.mrf.mxu2  ;;  %v7722_v40 = vpop.f32.mrf.mxu3  ;;  %v7256_v51 = vsel %vm18269_vm3, %v6728_v13, %v15551_v43  ;;  %v16071_v47 = vld [vmem:[#allocation2 + $0x152] sm:$0xff]  ;;  %v7867_v13 = vld [vmem:[#allocation2 + $0xc8] sm:$0xff]  ;;  %vm18298_vm3 = vmmov %vm18290_vm7 }
 0x7f7   : > { %v16041_v16 = vadd.f32 %v7719_v3, %v7549_v11  ;;  %8302 = vrot.lane.b32.xlu0 %v16039_v9, %s10048_s9  ;;  %8110 = vrot.lane.b32.xlu1 %v7931_v52, %s10045_s12  ;;  %v8394_v3 = vsel %vm18285_vm2, %v7866_v19, %v15958_v14  ;;  %v7304_v2 = vsel %vm18257_vm0, %v7256_v51, %v15962_v53  ;;  %v16066_v14 = vpop.f32.mrf.mxu1  ;;  %v7932_v11 = vld [vmem:[#allocation2 + $0x151] sm:$0xff] }
 0x7f8   : > { %7163 = vrot.lane.b32.xlu2 %v15945_v10, %s10048_s9  ;;  %9968 = vmatmul.msk.f32.gmra.mxu1 %vm18284_vm9, %v8902_v36  ;;  %v8442_v43 = vsel %vm18286_vm1, %v8394_v3, %v8269_v63  ;;  %v6729_v63 = vld [vmem:[#allocation2 + $0xd0] sm:$0xff]  ;;  %v8395_v51 = vsel %vm18292_vm15, %v7867_v13, %v15989_v7  ;;  %vm18299_vm9 = vmmov %vm18285_vm2 }
 0x7f9   : > { %v8643_v58 = vpop.f32.mrf.mxu0  ;;  %v16051_v27 = vpop.permute.xlu0 %8274  ;;  %vm18300_vm1 = vmmov %vm18257_vm0 }
 0x7fa   : > { %v8783_v48 = vadd.f32 %v8643_v58, %v15947_v60  ;;  %v8273_v8 = vpop.permute.xlu1 %8272  ;;  %v16059_v10 = vpop.permute.xlu2 %8086  ;;  %vm18305_vm15 = vmmov %vm18285_vm2 }
 0x7fb   : > { %9821 = vmatmul.msk.f32.gmra.mxu2 %vm18287_vm12, %v7304_v2  ;;  %9870 = vmatmul.msk.f32.gmra.mxu3 %vm18288_vm4, %v7302_v62  ;;  %v8903_v62 = vld [vmem:[%s10108_s10 + $0xc9] sm:$0xff]  ;;  %vm18301_vm12 = vmmov %vm18288_vm4 }
 0x7fc   : > { %9916 = vmatmul.msk.f32.gmra.mxu0 %vm18289_vm5, %v8442_v43  ;;  %v8835_v17 = vadd.f32 %v15984_v37, %v8783_v48  ;;  %vm18302_vm5 = vmmov %vm18288_vm4 }
 0x7fe   : > { %v16069_v53 = vadd.f32 %v15943_v4, %v8835_v17  ;;  %v7552_v60 = vpop.f32.mrf.mxu2  ;;  %v7725_v1 = vpop.f32.mrf.mxu3 }
 0x7ff   : > { %v16073_v52 = vadd.f32 %v7722_v40, %v7552_v60  ;;  %8304 = vrot.lane.b32.xlu0 %v16071_v47, %s10048_s9  ;;  %8112 = vrot.lane.b32.xlu1 %v7932_v11, %s10045_s12  ;;  %v7257_v40 = vsel %vm18291_vm6, %v6729_v63, %v15537_v31  ;;  %v16095_v43 = vpop.f32.mrf.mxu1  ;;  %v16100_v60 = vld [vmem:[#allocation2 + $0x15a] sm:$0xff]  ;;  %v7868_v63 = vld [vmem:[#allocation2 + $0xd0] sm:$0xff]  ;;  %vm18304_vm6 = vmmov %vm18285_vm2 }
 0x800   : > { %7165 = vrot.lane.b32.xlu2 %v15971_v59, %s10048_s9  ;;  %9969 = vmatmul.msk.f32.gmra.mxu1 %vm18290_vm7, %v8903_v62  ;;  %v8443_v59 = vsel %vm18293_vm13, %v8395_v51, %v8271_v39  ;;  %v7933_v39 = vld [vmem:[#allocation2 + $0x159] sm:$0xff]  ;;  %vm18303_vm7 = vmmov %vm18298_vm3 }
 0x801   : > { %v8646_v4 = vpop.f32.mrf.mxu0  ;;  %v16081_v36 = vpop.permute.xlu0 %8276  ;;  %v6730_v62 = vld [vmem:[#allocation2 + $0xd8] sm:$0xff]  ;;  %vm18306_vm13 = vmmov %vm18257_vm0 }
 0x802   : > { %v8784_v19 = vadd.f32 %v8646_v4, %v15973_v20  ;;  %v7140_v58 = vpop.permute.xlu1 %7139  ;;  %v7144_v3 = vpop.permute.xlu2 %7143  ;;  %v8396_v4 = vsel %vm18285_vm2, %v7868_v63, %v16020_v44 }
 0x803   : > { %v7305_v48 = vsel %vm18294_vm8, %v7257_v40, %v7140_v58  ;;  %9871 = vmatmul.msk.f32.gmra.mxu3 %vm18295_vm11, %v7303_v55  ;;  %v8904_v55 = vld [vmem:[%s10108_s10 + $0xd1] sm:$0xff]  ;;  %vm18307_vm8 = vmmov %vm18257_vm0 }
 0x804   : > { %9822 = vmatmul.msk.f32.gmra.mxu2 %vm18296_vm14, %v7305_v48  ;;  %9917 = vmatmul.msk.f32.gmra.mxu0 %vm18297_vm10, %v8443_v59  ;;  %v8836_v31 = vadd.f32 %v15984_v37, %v8784_v19  ;;  %vm18308_vm11 = vmmov %vm18288_vm4 }
 0x805   : > { %vm18309_vm14 = vmmov %vm18288_vm4 }
 0x806   : > { %v16098_v7 = vadd.f32 %v15969_v23, %v8836_v31  ;;  %v7555_v20 = vpop.f32.mrf.mxu2  ;;  %v7728_v17 = vpop.f32.mrf.mxu3  ;;  %vm18310_vm10 = vmmov %vm18288_vm4 }
 0x807   : > { %v16102_v11 = vadd.f32 %v7725_v1, %v7555_v20  ;;  %8306 = vrot.lane.b32.xlu0 %v16100_v60, %s10048_s9  ;;  %8114 = vrot.lane.b32.xlu1 %v7933_v39, %s10045_s12  ;;  %v7258_v1 = vsel %vm18299_vm9, %v6730_v62, %v15553_v35  ;;  %v16124_v59 = vpop.f32.mrf.mxu1  ;;  %v16129_v20 = vld [vmem:[#allocation2 + $0x162] sm:$0xff]  ;;  %v7869_v62 = vld [vmem:[#allocation2 + $0xd8] sm:$0xff]  ;;  %vm18311_vm9 = vmmov %vm18285_vm2 }
 0x808   : > { %7167 = vrot.lane.b32.xlu2 %v16007_v6, %s10048_s9  ;;  %9970 = vmatmul.msk.f32.gmra.mxu1 %vm18298_vm3, %v8904_v55  ;;  %v8444_v6 = vsel %vm18257_vm0, %v8396_v4, %v8273_v8  ;;  %v7934_v8 = vld [vmem:[#allocation2 + $0x161] sm:$0xff] }
 0x809   : > { %v8649_v23 = vpop.f32.mrf.mxu0  ;;  %v16110_v13 = vpop.permute.xlu0 %8278  ;;  %v6731_v55 = vld [vmem:[#allocation2 + $0xe0] sm:$0xff] }
 0x80a   : > { %v8785_v40 = vadd.f32 %v8649_v23, %v16009_v15  ;;  %v7142_v51 = vpop.permute.xlu1 %7141  ;;  %v7146_v19 = vpop.permute.xlu2 %7145  ;;  %v8397_v23 = vsel %vm18305_vm15, %v7869_v62, %v15994_v38  ;;  %vm18317_vm15 = vmmov %vm18285_vm2 }
 0x80b   : > { %v7306_v58 = vsel %vm18300_vm1, %v7258_v1, %v7142_v51  ;;  %9872 = vmatmul.msk.f32.gmra.mxu3 %vm18301_vm12, %v7304_v2  ;;  %v8905_v2 = vld [vmem:[%s10108_s10 + $0xd9] sm:$0xff]  ;;  %vm18312_vm1 = vmmov %vm18257_vm0 }
 0x80c   : > { %9823 = vmatmul.msk.f32.gmra.mxu2 %vm18288_vm4, %v7306_v58  ;;  %9918 = vmatmul.msk.f32.gmra.mxu0 %vm18302_vm5, %v8444_v6  ;;  %v8837_v35 = vadd.f32 %v15984_v37, %v8785_v40  ;;  %vm18313_vm12 = vmmov %vm18288_vm4 }
 0x80d   : > { %vm18314_vm5 = vmmov %vm18288_vm4 }
 0x80e   : > { %v16127_v44 = vadd.f32 %v16002_v26, %v8837_v35  ;;  %v7558_v15 = vpop.f32.mrf.mxu2  ;;  %v7731_v31 = vpop.f32.mrf.mxu3 }
 0x80f   : > { %v16131_v39 = vadd.f32 %v7728_v17, %v7558_v15  ;;  %8308 = vrot.lane.b32.xlu0 %v16129_v20, %s10048_s9  ;;  %8116 = vrot.lane.b32.xlu1 %v7934_v8, %s10045_s12  ;;  %v7259_v17 = vsel %vm18304_vm6, %v6731_v55, %v15560_v50  ;;  %v16156_v38 = vpop.f32.mrf.mxu1  ;;  %v16161_v15 = vld [vmem:[#allocation2 + $0x16a] sm:$0xff]  ;;  %vm18316_vm6 = vmmov %vm18285_vm2 }
 0x810   : > { %7169 = vrot.lane.b32.xlu2 %v16039_v9, %s10048_s9  ;;  %9971 = vmatmul.msk.f32.gmra.mxu1 %vm18303_vm7, %v8905_v2  ;;  %v8445_v9 = vsel %vm18306_vm13, %v8397_v23, %v16051_v27  ;;  %v7307_v51 = vsel %vm18307_vm8, %v7259_v17, %v7144_v3  ;;  %v7935_v27 = vld [vmem:[#allocation2 + $0x169] sm:$0xff]  ;;  %v8906_v3 = vld [vmem:[%s10108_s10 + $0xe1] sm:$0xff]  ;;  %vm18315_vm7 = vmmov %vm18298_vm3 }
 0x811   : > { %v8652_v26 = vpop.f32.mrf.mxu0  ;;  %v16139_v63 = vpop.permute.xlu0 %8280  ;;  %v7870_v2 = vld [vmem:[#allocation2 + $0xe0] sm:$0xff]  ;;  %vm18318_vm13 = vmmov %vm18257_vm0 }
 0x812   : > { %v8786_v1 = vadd.f32 %v8652_v26, %v16041_v16  ;;  %v16147_v4 = vpop.permute.xlu1 %8088  ;;  %v7148_v40 = vpop.permute.xlu2 %7147  ;;  %v8398_v62 = vsel %vm18285_vm2, %v7870_v2, %v16026_v34  ;;  %vm18319_vm8 = vmmov %vm18257_vm0 }
 0x813   : > { %9873 = vmatmul.msk.f32.gmra.mxu3 %vm18308_vm11, %v7305_v48  ;;  %v6732_v48 = vld [vmem:[#allocation2 + $0xe8] sm:$0xff]  ;;  %vm18320_vm11 = vmmov %vm18288_vm4 }
 0x814   : > { %9824 = vmatmul.msk.f32.gmra.mxu2 %vm18309_vm14, %v7307_v51  ;;  %9919 = vmatmul.msk.f32.gmra.mxu0 %vm18310_vm10, %v8445_v9  ;;  %v8838_v50 = vadd.f32 %v15984_v37, %v8786_v1  ;;  %vm18321_vm14 = vmmov %vm18288_vm4 }
 0x815   : > { %vm18322_vm10 = vmmov %vm18288_vm4 }
 0x816   : > { %v16159_v16 = vadd.f32 %v16034_v28, %v8838_v50  ;;  %v7561_v6 = vpop.f32.mrf.mxu2  ;;  %v7734_v35 = vpop.f32.mrf.mxu3 }
 0x817   : > { %v16163_v8 = vadd.f32 %v7731_v31, %v7561_v6  ;;  %8310 = vrot.lane.b32.xlu0 %v16161_v15, %s10048_s9  ;;  %8118 = vrot.lane.b32.xlu1 %v7935_v27, %s10045_s12  ;;  %v7260_v31 = vsel %vm18311_vm9, %v6732_v48, %v15546_v0  ;;  %v16188_v34 = vpop.f32.mrf.mxu1  ;;  %v7936_v6 = vld [vmem:[#allocation2 + $0x171] sm:$0xff]  ;;  %vm18324_vm9 = vmmov %vm18315_vm7 }
 0x818   : > { %7171 = vrot.lane.b32.xlu2 %v16071_v47, %s10048_s9  ;;  %9972 = vmatmul.msk.f32.gmra.mxu1 %vm18298_vm3, %v8906_v3  ;;  %v8446_v47 = vsel %vm18257_vm0, %v8398_v62, %v16081_v36  ;;  %v7308_v1 = vsel %vm18312_vm1, %v7260_v31, %v7146_v19  ;;  %v16193_v36 = vld [vmem:[#allocation2 + $0x172] sm:$0xff]  ;;  %v8907_v19 = vld [vmem:[%s10108_s10 + $0xe9] sm:$0xff]  ;;  %vm18323_vm3 = vmmov %vm18285_vm2 }
 0x819   : > { %v8655_v28 = vpop.f32.mrf.mxu0  ;;  %v16171_v55 = vpop.permute.xlu0 %8282  ;;  %v7871_v3 = vld [vmem:[#allocation2 + $0xe8] sm:$0xff]  ;;  %vm18325_vm1 = vmmov %vm18288_vm4 }
 0x81a   : > { %v8787_v26 = vadd.f32 %v8655_v28, %v16073_v52  ;;  %v16179_v17 = vpop.permute.xlu1 %8090  ;;  %v7150_v23 = vpop.permute.xlu2 %7149  ;;  %v8399_v2 = vsel %vm18317_vm15, %v7871_v3, %v16059_v10  ;;  %vm18331_vm15 = vmmov %vm18285_vm2 }
 0x81b   : > { %9874 = vmatmul.msk.f32.gmra.mxu3 %vm18313_vm12, %v7306_v58  ;;  %v6733_v58 = vld [vmem:[#allocation2 + $0xf0] sm:$0xff]  ;;  %vm18326_vm12 = vmmov %vm18257_vm0 }
 0x81c   : > { %9825 = vmatmul.msk.f32.gmra.mxu2 %vm18288_vm4, %v7308_v1  ;;  %9920 = vmatmul.msk.f32.gmra.mxu0 %vm18314_vm5, %v8446_v47  ;;  %v8839_v0 = vadd.f32 %v15984_v37, %v8787_v26  ;;  %vm18327_vm4 = vmmov %vm18325_vm1 }
 0x81d   : > { %vm18328_vm5 = vmmov %vm18325_vm1 }
 0x81e   : > { %v16191_v52 = vadd.f32 %v16066_v14, %v8839_v0  ;;  %v7564_v9 = vpop.f32.mrf.mxu2  ;;  %v7737_v50 = vpop.f32.mrf.mxu3 }
 0x81f   : > { %v16195_v27 = vadd.f32 %v7734_v35, %v7564_v9  ;;  %8120 = vrot.lane.b32.xlu1 %v7936_v6, %s10045_s12  ;;  %8312 = vrot.lane.b32.xlu0 %v16193_v36, %s10048_s9  ;;  %v7261_v35 = vsel %vm18316_vm6, %v6733_v58, %v15562_v22  ;;  %v16220_v10 = vpop.f32.mrf.mxu1  ;;  %v7937_v9 = vld [vmem:[#allocation2 + $0x179] sm:$0xff]  ;;  %vm18330_vm6 = vmmov %vm18324_vm9 }
 0x820   : > { %7173 = vrot.lane.b32.xlu2 %v16100_v60, %s10048_s9  ;;  %9973 = vmatmul.msk.f32.gmra.mxu1 %vm18315_vm7, %v8907_v19  ;;  %v8447_v60 = vsel %vm18318_vm13, %v8399_v2, %v16110_v13  ;;  %v7309_v26 = vsel %vm18319_vm8, %v7261_v35, %v7148_v40  ;;  %v16225_v13 = vld [vmem:[#allocation2 + $0x17a] sm:$0xff]  ;;  %v7872_v40 = vld [vmem:[#allocation2 + $0xf0] sm:$0xff]  ;;  %vm18329_vm7 = vmmov %vm18285_vm2 }
 0x821   : > { %v8658_v14 = vpop.f32.mrf.mxu0  ;;  %v16203_v48 = vpop.permute.xlu0 %8284  ;;  %v6734_v19 = vld [vmem:[#allocation2 + $0xf8] sm:$0xff]  ;;  %vm18332_vm13 = vmmov %vm18257_vm0 }
 0x822   : > { %v8788_v28 = vadd.f32 %v8658_v14, %v16102_v11  ;;  %v16211_v31 = vpop.permute.xlu1 %8092  ;;  %v7152_v62 = vpop.permute.xlu2 %7151  ;;  %vm18333_vm8 = vmmov %vm18325_vm1 }
 0x823   : > { %9875 = vmatmul.msk.f32.gmra.mxu3 %vm18320_vm11, %v7307_v51  ;;  %v8400_v51 = vsel %vm18323_vm3, %v7872_v40, %v16147_v4  ;;  %v8909_v40 = vld [vmem:[%s10108_s10 + $0xf9] sm:$0xff]  ;;  %vm18334_vm11 = vmmov %vm18257_vm0 }
 0x824   : > { %9826 = vmatmul.msk.f32.gmra.mxu2 %vm18321_vm14, %v7309_v26  ;;  %9921 = vmatmul.msk.f32.gmra.mxu0 %vm18322_vm10, %v8447_v60  ;;  %v8840_v22 = vadd.f32 %v15984_v37, %v8788_v28  ;;  %vm18335_vm14 = vmmov %vm18325_vm1 }
 0x825   : > { %vm18336_vm10 = vmmov %vm18325_vm1 }
 0x826   : > { %v16223_v11 = vadd.f32 %v16095_v43, %v8840_v22  ;;  %v7567_v47 = vpop.f32.mrf.mxu2  ;;  %v7740_v0 = vpop.f32.mrf.mxu3  ;;  %v8908_v43 = vld [vmem:[%s10108_s10 + $0xf1] sm:$0xff]  ;;  %vm18337_vm3 = vmmov %vm18285_vm2 }
 0x827   : > { %v16227_v6 = vadd.f32 %v7737_v50, %v7567_v47  ;;  %8122 = vrot.lane.b32.xlu1 %v7937_v9, %s10045_s12  ;;  %8314 = vrot.lane.b32.xlu0 %v16225_v13, %s10048_s9  ;;  %v7262_v50 = vsel %vm18285_vm2, %v6734_v19, %v15569_v24  ;;  %v16252_v24 = vpop.f32.mrf.mxu1  ;;  %v7986_v47 = vld [vmem:[#allocation2 + $0x182] sm:$0xff] }
 0x828   : > { %7175 = vrot.lane.b32.xlu2 %v16129_v20, %s10048_s9  ;;  %9974 = vmatmul.msk.f32.gmra.mxu1 %vm18324_vm9, %v8908_v43  ;;  %v7310_v4 = vsel %vm18257_vm0, %v7262_v50, %v7150_v23  ;;  %v8448_v20 = vsel %vm18326_vm12, %v8400_v51, %v16139_v63  ;;  %v7938_v23 = vld [vmem:[#allocation2 + $0x181] sm:$0xff]  ;;  %vm18338_vm9 = vmmov %vm18330_vm6 }
 0x829   : > { %v8661_v58 = vpop.f32.mrf.mxu0  ;;  %v16237_v3 = vpop.permute.xlu0 %8286  ;;  %vm18339_vm12 = vmmov %vm18257_vm0 }
 0x82a   : > { %v8789_v14 = vadd.f32 %v8661_v58, %v16131_v39  ;;  %v16243_v35 = vpop.permute.xlu1 %8094  ;;  %v7154_v2 = vpop.permute.xlu2 %7153 }
 0x82b   : > { %9876 = vmatmul.msk.f32.gmra.mxu3 %vm18325_vm1, %v7308_v1  ;;  %v7873_v1 = vld [vmem:[#allocation2 + $0xf8] sm:$0xff] }
 0x82c   : > { %9827 = vmatmul.msk.f32.gmra.mxu2 %vm18327_vm4, %v7310_v4  ;;  %9922 = vmatmul.msk.f32.gmra.mxu0 %vm18328_vm5, %v8448_v20  ;;  %v8841_v28 = vadd.f32 %v15984_v37, %v8789_v14  ;;  %v8401_v63 = vsel %vm18329_vm7, %v7873_v1, %v16179_v17  ;;  %vm18340_vm4 = vmmov %vm18325_vm1 }
 0x82d   : > { %vm18341_vm5 = vmmov %vm18325_vm1 }
 0x82e   : > { %v16255_v39 = vadd.f32 %v16124_v59, %v8841_v28  ;;  %v7570_v60 = vpop.f32.mrf.mxu2  ;;  %v7743_v22 = vpop.f32.mrf.mxu3  ;;  %v6735_v59 = vld [vmem:[#allocation2 + $0x100] sm:$0xff]  ;;  %vm18342_vm7 = vmmov %vm18285_vm2 }
 0x82f   : > { %v16257_v9 = vadd.f32 %v7740_v0, %v7570_v60  ;;  %8124 = vrot.lane.b32.xlu1 %v7938_v23, %s10045_s12  ;;  %8316 = vrot.lane.b32.xlu0 %v7986_v47, %s10048_s9  ;;  %v7263_v0 = vsel %vm18331_vm15, %v6735_v59, %v15555_v54  ;;  %v16281_v54 = vpop.f32.mrf.mxu1  ;;  %v7874_v60 = vld [vmem:[#allocation2 + $0x100] sm:$0xff]  ;;  %vm18343_vm15 = vmmov %vm18285_vm2 }
 0x830   : > { %7177 = vrot.lane.b32.xlu2 %v16161_v15, %s10048_s9  ;;  %9975 = vmatmul.msk.f32.gmra.mxu1 %vm18330_vm6, %v8909_v40  ;;  %v7311_v17 = vsel %vm18332_vm13, %v7263_v0, %v7152_v62  ;;  %v8449_v15 = vsel %vm18334_vm11, %v8401_v63, %v16171_v55  ;;  %v16286_v62 = vld [vmem:[#allocation2 + $0x189] sm:$0xff]  ;;  %v8402_v1 = vsel %vm18337_vm3, %v7874_v60, %v16211_v31  ;;  %vm18344_vm13 = vmmov %vm18257_vm0 }
 0x831   : > { %v8664_v51 = vpop.f32.mrf.mxu0  ;;  %v16266_v43 = vpop.permute.xlu0 %8288  ;;  %v6736_v63 = vld [vmem:[#allocation2 + $0x108] sm:$0xff]  ;;  %vm18346_vm11 = vmmov %vm18257_vm0 }
 0x832   : > { %v8790_v19 = vadd.f32 %v8664_v51, %v16163_v8  ;;  %v16272_v58 = vpop.permute.xlu1 %8096  ;;  %v7156_v50 = vpop.permute.xlu2 %7155  ;;  %vm18349_vm3 = vmmov %vm18285_vm2 }
 0x833   : > { %9877 = vmatmul.msk.f32.gmra.mxu3 %vm18333_vm8, %v7309_v26  ;;  %v16288_v26 = vld [vmem:[#allocation2 + $0x18a] sm:$0xff]  ;;  %vm18345_vm8 = vmmov %vm18325_vm1 }
 0x834   : > { %9828 = vmatmul.msk.f32.gmra.mxu2 %vm18335_vm14, %v7311_v17  ;;  %9923 = vmatmul.msk.f32.gmra.mxu0 %vm18336_vm10, %v8449_v15  ;;  %v8842_v14 = vadd.f32 %v15984_v37, %v8790_v19  ;;  %vm18347_vm14 = vmmov %vm18325_vm1 }
 0x835   : > { %vm18348_vm10 = vmmov %vm18325_vm1 }
 0x836   : > { %v16284_v8 = vadd.f32 %v16156_v38, %v8842_v14  ;;  %v7573_v20 = vpop.f32.mrf.mxu2  ;;  %v7746_v28 = vpop.f32.mrf.mxu3  ;;  %v8910_v38 = vld [vmem:[%s10108_s10 + $0x101] sm:$0xff] }
 0x837   : > { %v16290_v55 = vadd.f32 %v7743_v22, %v7573_v20  ;;  %8126 = vrot.lane.b32.xlu1 %v16286_v62, %s10045_s12  ;;  %8318 = vrot.lane.b32.xlu0 %v16288_v26, %s10048_s9  ;;  %v7264_v22 = vsel %vm18285_vm2, %v6736_v63, %v15571_v12  ;;  %v16316_v12 = vpop.f32.mrf.mxu1 }
 0x838   : > { %7179 = vrot.lane.b32.xlu2 %v16193_v36, %s10048_s9  ;;  %9976 = vmatmul.msk.f32.gmra.mxu1 %vm18338_vm9, %v8910_v38  ;;  %v7312_v31 = vsel %vm18257_vm0, %v7264_v22, %v7154_v2  ;;  %v8450_v36 = vsel %vm18339_vm12, %v8402_v1, %v16203_v48  ;;  %v7875_v2 = vld [vmem:[#allocation2 + $0x108] sm:$0xff]  ;;  %v6737_v1 = vld [vmem:[#allocation2 + $0x110] sm:$0xff]  ;;  %vm18350_vm9 = vmmov %vm18330_vm6 }
 0x839   : > { %v8667_v40 = vpop.f32.mrf.mxu0  ;;  %v16301_v59 = vpop.permute.xlu0 %8290  ;;  %v8403_v48 = vsel %vm18342_vm7, %v7875_v2, %v16243_v35  ;;  %v6738_v2 = vld [vmem:[#allocation2 + $0x118] sm:$0xff]  ;;  %vm18351_vm12 = vmmov %vm18257_vm0 }
 0x83a   : > { %v8791_v51 = vadd.f32 %v8667_v40, %v16195_v27  ;;  %v16307_v0 = vpop.permute.xlu1 %8098  ;;  %v7158_v19 = vpop.permute.xlu2 %7157  ;;  %vm18355_vm7 = vmmov %vm18285_vm2 }
 0x83b   : > { %9878 = vmatmul.msk.f32.gmra.mxu3 %vm18325_vm1, %v7310_v4  ;;  %v8911_v4 = vld [vmem:[%s10108_s10 + $0x109] sm:$0xff] }
 0x83c   : > { %9829 = vmatmul.msk.f32.gmra.mxu2 %vm18340_vm4, %v7312_v31  ;;  %9924 = vmatmul.msk.f32.gmra.mxu0 %vm18341_vm5, %v8450_v36  ;;  %v8843_v15 = vadd.f32 %v15984_v37, %v8791_v51  ;;  %v7876_v36 = vld [vmem:[#allocation2 + $0x110] sm:$0xff]  ;;  %vm18352_vm4 = vmmov %vm18325_vm1 }
 0x83d   : > { %vm18353_vm5 = vmmov %vm18325_vm1 }
 0x83e   : > { %v16319_v27 = vadd.f32 %v16188_v34, %v8843_v15  ;;  %v7576_v14 = vpop.f32.mrf.mxu2  ;;  %v7749_v20 = vpop.f32.mrf.mxu3  ;;  %v7940_v15 = vld [vmem:[#allocation2 + $0x191] sm:$0xff] }
 0x83f   : > { %v16321_v60 = vadd.f32 %v7746_v28, %v7576_v14  ;;  %7342 = vrot.lane.b32.xlu1 %v7938_v23, %s10045_s12  ;;  %7354 = vrot.lane.b32.xlu0 %v7986_v47, %s10048_s9  ;;  %v7265_v28 = vsel %vm18343_vm15, %v6737_v1, %v15578_v5  ;;  %v7941_v5 = vld [vmem:[#allocation2 + $0x199] sm:$0xff]  ;;  %v16345_v22 = vpop.f32.mrf.mxu1  ;;  %v8404_v14 = vsel %vm18349_vm3, %v7876_v36, %v16272_v58  ;;  %vm18356_vm15 = vmmov %vm18285_vm2 }
 0x840   : > { %7181 = vrot.lane.b32.xlu2 %v16225_v13, %s10048_s9  ;;  %9977 = vmatmul.msk.f32.gmra.mxu1 %vm18330_vm6, %v8911_v4  ;;  %v7313_v35 = vsel %vm18344_vm13, %v7265_v28, %v7156_v50  ;;  %v8451_v13 = vsel %vm18346_vm11, %v8403_v48, %v16237_v3  ;;  %vm18357_vm13 = vmmov %vm18257_vm0 }
 0x841   : > { %v8670_v38 = vpop.f32.mrf.mxu0  ;;  %v16330_v34 = vpop.permute.xlu0 %8292  ;;  %vm18359_vm11 = vmmov %vm18257_vm0 }
 0x842   : > { %v8792_v23 = vadd.f32 %v8670_v38, %v16227_v6  ;;  %v16336_v63 = vpop.permute.xlu1 %8100  ;;  %v7160_v47 = vpop.permute.xlu2 %7159  ;;  %vm18363_vm3 = vmmov %vm18285_vm2 }
 0x843   : > { %9879 = vmatmul.msk.f32.gmra.mxu3 %vm18345_vm8, %v7311_v17  ;;  %v16352_v17 = vld [vmem:[#allocation2 + $0x192] sm:$0xff]  ;;  %vm18358_vm8 = vmmov %vm18325_vm1 }
 0x844   : > { %9830 = vmatmul.msk.f32.gmra.mxu2 %vm18347_vm14, %v7313_v35  ;;  %9925 = vmatmul.msk.f32.gmra.mxu0 %vm18348_vm10, %v8451_v13  ;;  %v8844_v40 = vadd.f32 %v15984_v37, %v8792_v23  ;;  %v8452_v23 = vsel %vm18351_vm12, %v8404_v14, %v16266_v43  ;;  %vm18360_vm14 = vmmov %vm18325_vm1 }
 0x845   : > { %vm18361_vm10 = vmmov %vm18325_vm1 }
 0x846   : > { %v16348_v6 = vadd.f32 %v16220_v10, %v8844_v40  ;;  %v7579_v51 = vpop.f32.mrf.mxu2  ;;  %v16350_v50 = vpop.f32.mrf.mxu3  ;;  %v8912_v10 = vld [vmem:[%s10108_s10 + $0x111] sm:$0xff]  ;;  %vm18365_vm12 = vmmov %vm18257_vm0 }
 0x847   : > { %v16354_v3 = vadd.f32 %v7749_v20, %v7579_v51  ;;  %8320 = vrot.lane.b32.xlu1 %v16352_v17, %s10048_s9  ;;  %8130 = vrot.lane.b32.xlu0 %v7941_v5, %s10045_s12  ;;  %v7266_v20 = vsel %vm18285_vm2, %v6738_v2, %v15564_v56  ;;  %v7877_v5 = vld [vmem:[#allocation2 + $0x118] sm:$0xff]  ;;  %v16388_v43 = vpop.f32.mrf.mxu1 }
 0x848   : > { %8128 = vrot.lane.b32.xlu2 %v7940_v15, %s10045_s12  ;;  %9978 = vmatmul.msk.f32.gmra.mxu1 %vm18350_vm9, %v8912_v10  ;;  %v7314_v58 = vsel %vm18257_vm0, %v7266_v20, %v7158_v19  ;;  %v8405_v19 = vsel %vm18355_vm7, %v7877_v5, %v16307_v0  ;;  %v6740_v5 = vld [vmem:[#allocation2 + $0x128] sm:$0xff]  ;;  %vm18364_vm9 = vmmov %vm18330_vm6 }
 0x849   : > { %v8673_v48 = vpop.f32.mrf.mxu0  ;;  %v16363_v4 = vpop.permute.xlu0 %8294  ;;  %vm18369_vm7 = vmmov %vm18285_vm2 }
 0x84a   : > { %v8793_v1 = vadd.f32 %v8673_v48, %v16257_v9  ;;  %v16369_v38 = vpop.permute.xlu1 %8102  ;;  %v7162_v28 = vpop.permute.xlu2 %7161  ;;  %v7990_v48 = vld [vmem:[#allocation2 + $0x1a2] sm:$0xff] }
 0x84b   : > { %9880 = vmatmul.msk.f32.gmra.mxu3 %vm18325_vm1, %v7312_v31  ;;  %v6739_v31 = vld [vmem:[#allocation2 + $0x120] sm:$0xff] }
 0x84c   : > { %9831 = vmatmul.msk.f32.gmra.mxu2 %vm18352_vm4, %v7314_v58  ;;  %9926 = vmatmul.msk.f32.gmra.mxu0 %vm18353_vm5, %v8452_v23  ;;  %v8845_v13 = vadd.f32 %v15984_v37, %v8793_v1  ;;  %vm18366_vm4 = vmmov %vm18325_vm1 }
 0x84d   : > { %vm18367_vm5 = vmmov %vm18325_vm1 }
 0x84e   : > { %v16379_v56 = vadd.f32 %v16252_v24, %v8845_v13  ;;  %v16381_v9 = vpop.f32.mrf.mxu2  ;;  %v16383_v40 = vpop.f32.mrf.mxu3  ;;  %v8913_v24 = vld [vmem:[%s10108_s10 + $0x119] sm:$0xff]  ;;  %v8914_v13 = vld [vmem:[%s10108_s10 + $0x121] sm:$0xff] }
 0x84f   : > { %7356 = vrot.lane.b32.xlu1 %v16288_v26, %s10048_s9  ;;  %7346 = vrot.lane.b32.xlu0 %v7940_v15, %s10045_s12  ;;  %v7267_v26 = vsel %vm18356_vm15, %v6739_v31, %v15580_v33  ;;  %v7942_v33 = vld [vmem:[#allocation2 + $0x1a1] sm:$0xff]  ;;  %vm18370_vm15 = vmmov %vm18285_vm2 }
 0x850   : > { %18354 = vst [vmem:[#allocation66_spill] sm:$0xff] %v16379_v56  ;;  %7344 = vrot.lane.b32.xlu2 %v16286_v62, %s10045_s12  ;;  %9979 = vmatmul.msk.f32.gmra.mxu1 %vm18330_vm6, %v8913_v24  ;;  %v7315_v0 = vsel %vm18357_vm13, %v7267_v26, %v7160_v47  ;;  %v8453_v62 = vsel %vm18359_vm11, %v8405_v19, %v16301_v59  ;;  %v16419_v59 = vpop.f32.mrf.mxu1  ;;  %vm18371_vm13 = vmmov %vm18257_vm0 }
 0x851   : > { %v8676_v51 = vpop.f32.mrf.mxu0  ;;  %v16395_v36 = vpop.permute.xlu0 %8296  ;;  %v7268_v24 = vsel %vm18285_vm2, %v6740_v5, %v15587_v42  ;;  %vm18373_vm11 = vmmov %vm18257_vm0 }
 0x852   : > { %v8794_v15 = vadd.f32 %v8676_v51, %v16290_v55  ;;  %v16401_v14 = vpop.permute.xlu1 %8104  ;;  %v7164_v10 = vpop.permute.xlu2 %7163  ;;  %v7989_v55 = vld [vmem:[#allocation2 + $0x19a] sm:$0xff] }
 0x853   : > { %9881 = vmatmul.msk.f32.gmra.mxu3 %vm18358_vm8, %v7313_v35  ;;  %v7878_v35 = vld [vmem:[#allocation2 + $0x120] sm:$0xff]  ;;  %vm18372_vm8 = vmmov %vm18325_vm1 }
 0x854   : > { %9832 = vmatmul.msk.f32.gmra.mxu2 %vm18360_vm14, %v7315_v0  ;;  %9927 = vmatmul.msk.f32.gmra.mxu0 %vm18361_vm10, %v8453_v62  ;;  %v8846_v2 = vadd.f32 %v15984_v37, %v8794_v15  ;;  %v8406_v23 = vsel %vm18363_vm3, %v7878_v35, %v16336_v63  ;;  %v7316_v15 = vsel %vm18257_vm0, %v7268_v24, %v7162_v28  ;;  %v7879_v28 = vld [vmem:[#allocation2 + $0x128] sm:$0xff]  ;;  %vm18374_vm14 = vmmov %vm18325_vm1 }
 0x855   : > { %v8454_v63 = vsel %vm18365_vm12, %v8406_v23, %v16330_v34  ;;  %v8407_v34 = vsel %vm18369_vm7, %v7879_v28, %v16369_v38  ;;  %vm18375_vm10 = vmmov %vm18325_vm1 }
 0x856   : > { %v16411_v20 = vadd.f32 %v16281_v54, %v8846_v2  ;;  %v16413_v1 = vpop.f32.mrf.mxu2  ;;  %v16415_v47 = vpop.f32.mrf.mxu3  ;;  %v7943_v2 = vld [vmem:[#allocation2 + $0x1a9] sm:$0xff]  ;;  %vm18377_vm3 = vmmov %vm18285_vm2 }
 0x857   : > { %8132 = vrot.lane.b32.xlu1 %v7942_v33, %s10045_s12  ;;  %8324 = vrot.lane.b32.xlu0 %v7990_v48, %s10048_s9  ;;  %v8915_v48 = vld [vmem:[%s10108_s10 + $0x129] sm:$0xff]  ;;  %vm18379_vm12 = vmmov %vm18257_vm0 }
 0x858   : > { %18362 = vst [vmem:[#allocation60_spill] sm:$0xff] %v16411_v20  ;;  %8322 = vrot.lane.b32.xlu2 %v7989_v55, %s10048_s9  ;;  %9980 = vmatmul.msk.f32.gmra.mxu1 %vm18364_vm9, %v8914_v13  ;;  %v6741_v55 = vld [vmem:[#allocation2 + $0x130] sm:$0xff]  ;;  %vm18378_vm9 = vmmov %vm18330_vm6  ;;  %v6746_v20 = vld [vmem:[#allocation2 + $0x158] sm:$0xff] }
 0x859   : > { %v8679_v54 = vpop.f32.mrf.mxu0  ;;  %v16425_v19 = vpop.permute.xlu0 %8298  ;;  %v7269_v23 = vsel %vm18370_vm15, %v6741_v55, %v15573_v32  ;;  %vm18382_vm7 = vmmov %vm18285_vm2 }
 0x85a   : > { %v8795_v31 = vadd.f32 %v8679_v54, %v16321_v60  ;;  %v8107_v51 = vpop.permute.xlu1 %8106  ;;  %v7166_v26 = vpop.permute.xlu2 %7165  ;;  %v7317_v38 = vsel %vm18371_vm13, %v7269_v23, %v7164_v10  ;;  %vm18383_vm15 = vmmov %vm18285_vm2 }
 0x85b   : > { %9882 = vmatmul.msk.f32.gmra.mxu3 %vm18325_vm1, %v7314_v58  ;;  %v16446_v58 = vpop.f32.mrf.mxu1  ;;  %vm18384_vm13 = vmmov %vm18257_vm0 }
 0x85c   : > { %9833 = vmatmul.msk.f32.gmra.mxu2 %vm18366_vm4, %v7316_v15  ;;  %9928 = vmatmul.msk.f32.gmra.mxu0 %vm18367_vm5, %v8454_v63  ;;  %v8847_v62 = vadd.f32 %v15984_v37, %v8795_v31  ;;  %v7880_v63 = vld [vmem:[#allocation2 + $0x130] sm:$0xff]  ;;  %vm18380_vm4 = vmmov %vm18325_vm1 }
 0x85d   : > { %vm18381_vm5 = vmmov %vm18325_vm1 }
 0x85e   : > { %v16439_v42 = vadd.f32 %v16316_v12, %v8847_v62  ;;  %v16441_v60 = vpop.f32.mrf.mxu2  ;;  %v16443_v33 = vpop.f32.mrf.mxu3  ;;  %v7991_v62 = vld [vmem:[#allocation2 + $0x1aa] sm:$0xff] }
 0x85f   : > { %8134 = vrot.lane.b32.xlu1 %v7943_v2, %s10045_s12  ;;  %v6742_v2 = vld [vmem:[#allocation2 + $0x138] sm:$0xff] }
 0x860   : > { %18368 = vst [vmem:[#allocation64_spill] sm:$0xff] %v16439_v42  ;;  %7358 = vrot.lane.b32.xlu2 %v16352_v17, %s10048_s9  ;;  %9981 = vmatmul.msk.f32.gmra.mxu1 %vm18330_vm6, %v8915_v48  ;;  %v8455_v17 = vsel %vm18373_vm11, %v8407_v34, %v16363_v4  ;;  %v8916_v4 = vld [vmem:[%s10108_s10 + $0x131] sm:$0xff]  ;;  %vm18386_vm11 = vmmov %vm18257_vm0 }
 0x861   : > { %v8682_v35 = vpop.f32.mrf.mxu0  ;;  %v16453_v12 = vpop.permute.xlu0 %8300 }
 0x862   : > { %v8796_v13 = vadd.f32 %v8682_v35, %v16354_v3  ;;  %v8109_v5 = vpop.permute.xlu1 %8108  ;;  %v7168_v54 = vpop.permute.xlu2 %7167 }
 0x863   : > { %9883 = vmatmul.msk.f32.gmra.mxu3 %vm18372_vm8, %v7315_v0  ;;  %v16473_v10 = vpop.f32.mrf.mxu1  ;;  %v8408_v0 = vsel %vm18377_vm3, %v7880_v63, %v16401_v14  ;;  %v8917_v63 = vld [vmem:[%s10108_s10 + $0x139] sm:$0xff]  ;;  %vm18385_vm8 = vmmov %vm18325_vm1 }
 0x864   : > { %9834 = vmatmul.msk.f32.gmra.mxu2 %vm18374_vm14, %v7317_v38  ;;  %9929 = vmatmul.msk.f32.gmra.mxu0 %vm18375_vm10, %v8455_v17  ;;  %v8848_v24 = vadd.f32 %v15984_v37, %v8796_v13  ;;  %v8456_v14 = vsel %vm18379_vm12, %v8408_v0, %v16395_v36  ;;  %v7881_v17 = vld [vmem:[#allocation2 + $0x138] sm:$0xff]  ;;  %vm18387_vm14 = vmmov %vm18325_vm1 }
 0x865   : > { %vm18388_vm10 = vmmov %vm18325_vm1 }
 0x866   : > { %v16467_v32 = vadd.f32 %v16345_v22, %v8848_v24  ;;  %v16469_v31 = vpop.f32.mrf.mxu2  ;;  %v16471_v3 = vpop.f32.mrf.mxu3  ;;  %v7270_v22 = vsel %vm18285_vm2, %v6742_v2, %v15589_v18  ;;  %v8409_v18 = vsel %vm18382_vm7, %v7881_v17, %v8107_v51  ;;  %v9286_v17 = vmax.f32 %v16005_v57, 0.0  ;;  %vm18389_vm3 = vmmov %vm18285_vm2 }
 0x867   : > { %v7318_v35 = vsel %vm18257_vm0, %v7270_v22, %v7166_v26  ;;  %v6743_v26 = vld [vmem:[#allocation2 + $0x140] sm:$0xff]  ;;  %v8457_v51 = vsel %vm18386_vm11, %v8409_v18, %v16425_v19  ;;  %vm18391_vm12 = vmmov %vm18257_vm0 }
 0x868   : > { %18376 = vst [vmem:[#allocation16_spill] sm:$0xff] %v16467_v32  ;;  %9982 = vmatmul.msk.f32.gmra.mxu1 %vm18378_vm9, %v8916_v4  ;;  %8326 = vrot.lane.b32.xlu2 %v7991_v62, %s10048_s9  ;;  %v7271_v36 = vsel %vm18383_vm15, %v6743_v26, %v15596_v49  ;;  %v7882_v49 = vld [vmem:[#allocation2 + $0x140] sm:$0xff]  ;;  %vm18390_vm9 = vmmov %vm18330_vm6 }
 0x869   : > { %v16478_v28 = vpop.f32.mrf.mxu0  ;;  %v16480_v34 = vpop.permute.xlu0 %8302  ;;  %v7319_v2 = vsel %vm18384_vm13, %v7271_v36, %v7168_v54  ;;  %v8410_v54 = vsel %vm18389_vm3, %v7882_v49, %v8109_v5  ;;  %v8918_v26 = vld [vmem:[%s10108_s10 + $0x141] sm:$0xff]  ;;  %vm18394_vm7 = vmmov %vm18285_vm2 }
 0x86a   : > { %v8111_v48 = vpop.permute.xlu1 %8110  ;;  %v7170_v55 = vpop.permute.xlu2 %7169  ;;  %v8458_v5 = vsel %vm18391_vm12, %v8410_v54, %v16453_v12  ;;  %vm18395_vm15 = vmmov %vm18285_vm2 }
 0x86b   : > { %9884 = vmatmul.msk.f32.gmra.mxu3 %vm18325_vm1, %v7316_v15  ;;  %vm18396_vm13 = vmmov %vm18257_vm0 }
 0x86c   : > { %9835 = vmatmul.msk.f32.gmra.mxu2 %vm18380_vm4, %v7318_v35  ;;  %9930 = vmatmul.msk.f32.gmra.mxu0 %vm18381_vm5, %v8456_v14  ;;  %vm18392_vm4 = vmmov %vm18325_vm1 }
 0x86d   : > { %v16496_v24 = vpop.f32.mrf.mxu1  ;;  %vm18393_vm5 = vmmov %vm18325_vm1 }
 0x86e   : > { %v16492_v23 = vpop.f32.mrf.mxu2  ;;  %v16494_v13 = vpop.f32.mrf.mxu3  ;;  %vm18398_vm11 = vmmov %vm18257_vm0 }
 0x86f   : > { %vm18401_vm3 = vmmov %vm18285_vm2 }
 0x870   : > { %9983 = vmatmul.msk.f32.gmra.mxu1 %vm18330_vm6, %v8917_v63  ;;  %vm18403_vm12 = vmmov %vm18257_vm0 }
 0x871   : > { %v16500_v4 = vpop.f32.mrf.mxu0  ;;  %v16502_v15 = vpop.permute.xlu0 %8304 }
 0x872   : > { %v8113_v0 = vpop.permute.xlu1 %8112  ;;  %v7172_v62 = vpop.permute.xlu2 %7171 }
 0x873   : > { %9885 = vmatmul.msk.f32.gmra.mxu3 %vm18385_vm8, %v7317_v38  ;;  %v6744_v38 = vld [vmem:[#allocation2 + $0x148] sm:$0xff]  ;;  %vm18397_vm8 = vmmov %vm18325_vm1 }
 0x874   : > { %9836 = vmatmul.msk.f32.gmra.mxu2 %vm18387_vm14, %v7319_v2  ;;  %9931 = vmatmul.msk.f32.gmra.mxu0 %vm18388_vm10, %v8457_v51  ;;  %v7272_v18 = vsel %vm18285_vm2, %v6744_v38, %v15582_v25  ;;  %v7883_v25 = vld [vmem:[#allocation2 + $0x148] sm:$0xff]  ;;  %vm18399_vm14 = vmmov %vm18325_vm1 }
 0x875   : > { %v16518_v63 = vpop.f32.mrf.mxu1  ;;  %v7320_v32 = vsel %vm18257_vm0, %v7272_v18, %v7170_v55  ;;  %v8411_v55 = vsel %vm18394_vm7, %v7883_v25, %v8111_v48  ;;  %v8919_v18 = vld [vmem:[%s10108_s10 + $0x149] sm:$0xff]  ;;  %vm18400_vm10 = vmmov %vm18325_vm1 }
 0x876   : > { %v16513_v22 = vpop.f32.mrf.mxu2  ;;  %v16515_v14 = vpop.f32.mrf.mxu3  ;;  %v8459_v48 = vsel %vm18398_vm11, %v8411_v55, %v16480_v34  ;;  %v8920_v55 = vld [vmem:[%s10108_s10 + $0x151] sm:$0xff]  ;;  %vm18406_vm7 = vmmov %vm18285_vm2 }
 0x877   : > { %vm18410_vm11 = vmmov %vm18257_vm0 }
 0x878   : > { %9984 = vmatmul.msk.f32.gmra.mxu1 %vm18390_vm9, %v8918_v26  ;;  %v9287_v26 = vmax.f32 %v16037_v61, 0.0  ;;  %vm18402_vm9 = vmmov %vm18330_vm6 }
 0x879   : > { %v16522_v36 = vpop.f32.mrf.mxu0  ;;  %v16524_v19 = vpop.permute.xlu0 %8306  ;;  %9334 = vxpose.xlu0.b32.start [1/16] (narrow) %v9286_v17, 8 }
 0x87a   : > { %v8115_v51 = vpop.permute.xlu1 %8114  ;;  %v7174_v57 = vpop.permute.xlu2 %7173 }
 0x87b   : > { %9886 = vmatmul.msk.f32.gmra.mxu3 %vm18325_vm1, %v7318_v35  ;;  %v6745_v35 = vld [vmem:[#allocation2 + $0x150] sm:$0xff] }
 0x87c   : > { %9837 = vmatmul.msk.f32.gmra.mxu2 %vm18392_vm4, %v7320_v32  ;;  %9932 = vmatmul.msk.f32.gmra.mxu0 %vm18393_vm5, %v8458_v5  ;;  %v7273_v54 = vsel %vm18395_vm15, %v6745_v35, %v15598_v41  ;;  %v9288_v41 = vmax.f32 %v16069_v53, 0.0  ;;  %v7274_v53 = vsel %vm18285_vm2, %v6746_v20, %v15605_v21  ;;  %vm18404_vm4 = vmmov %vm18325_vm1 }
 0x87d   : > { %v16540_v38 = vpop.f32.mrf.mxu1  ;;  %v7321_v61 = vsel %vm18396_vm13, %v7273_v54, %v7172_v62  ;;  %v7884_v62 = vld [vmem:[#allocation2 + $0x150] sm:$0xff]  ;;  %vm18405_vm5 = vmmov %vm18325_vm1 }
 0x87e   : > { %v16535_v17 = vpop.f32.mrf.mxu2  ;;  %v16537_v49 = vpop.f32.mrf.mxu3  ;;  %v8412_v34 = vsel %vm18401_vm3, %v7884_v62, %v8113_v0  ;;  %vm18407_vm15 = vmmov %vm18285_vm2 }
 0x87f   : > { %v8460_v0 = vsel %vm18403_vm12, %v8412_v34, %v16502_v15  ;;  %v8921_v34 = vld [vmem:[%s10108_s10 + $0x159] sm:$0xff]  ;;  %vm18408_vm13 = vmmov %vm18257_vm0 }
 0x880   : > { %9985 = vmatmul.msk.f32.gmra.mxu1 %vm18330_vm6, %v8919_v18  ;;  %vm18413_vm3 = vmmov %vm18285_vm2 }
 0x881   : > { %v16544_v42 = vpop.f32.mrf.mxu0  ;;  %v16546_v12 = vpop.permute.xlu0 %8308  ;;  %9335 = vxpose.xlu0.b32.cont [2/16] (narrow) %v9287_v26, 8  ;;  %v7753_v26 = vadd.f32 %v16350_v50, %v16381_v9  ;;  %vm18415_vm12 = vmmov %vm18257_vm0 }
 0x882   : > { %v16551_v5 = vpop.permute.xlu1 %8116  ;;  %v7176_v25 = vpop.permute.xlu2 %7175 }
 0x883   : > { %9887 = vmatmul.msk.f32.gmra.mxu3 %vm18397_vm8, %v7319_v2  ;;  %v8797_v35 = vadd.f32 %v16478_v28, %v7753_v26  ;;  %v7322_v28 = vsel %vm18257_vm0, %v7274_v53, %v7174_v57  ;;  %v7756_v26 = vadd.f32 %v16383_v40, %v16413_v1  ;;  %vm18409_vm8 = vmmov %vm18325_vm1 }
 0x884   : > { %9838 = vmatmul.msk.f32.gmra.mxu2 %vm18399_vm14, %v7321_v61  ;;  %9933 = vmatmul.msk.f32.gmra.mxu0 %vm18400_vm10, %v8459_v48  ;;  %vm18411_vm14 = vmmov %vm18325_vm1 }
 0x885   : > { %v16567_v2 = vpop.f32.mrf.mxu1  ;;  %v8849_v9 = vadd.f32 %v15984_v37, %v8797_v35  ;;  %v9289_v37 = vmax.f32 %v16098_v7, 0.0  ;;  %v8798_v57 = vadd.f32 %v16500_v4, %v7756_v26  ;;  %v16612_v4 = vld [vmem:[%s16889_s6] ss:$0 sm:$0xff]  ;;  %vm18412_vm10 = vmmov %vm18325_vm1 }
 0x886   : > { %v16561_v18 = vpop.f32.mrf.mxu3 }
 0x887   : > { %v16565_v54 = vpop.f32.mrf.mxu2 }
 0x888   : > { %9986 = vmatmul.msk.f32.gmra.mxu1 %vm18402_vm9, %v8920_v55  ;;  %v6747_v55 = vld [vmem:[#allocation2 + $0x160] sm:$0xff]  ;;  %vm18414_vm9 = vmmov %vm18330_vm6 }
 0x889   : > { %v16571_v56 = vpop.f32.mrf.mxu0  ;;  %v16573_v48 = vpop.permute.xlu0 %8310  ;;  %9336 = vxpose.xlu0.b32.cont [3/16] (narrow) %v9288_v41, 8  ;;  %v9254_v41 = vadd.f32 %v16388_v43, %v8849_v9  ;;  %v7275_v7 = vsel %vm18407_vm15, %v6747_v55, %v15591_v30  ;;  %v7759_v30 = vadd.f32 %v16415_v47, %v16441_v60  ;;  %v6748_v47 = vld [vmem:[#allocation2 + $0x168] sm:$0xff]  ;;  %vm18419_vm15 = vmmov %vm18285_vm2 }
 0x88a   : > { %v16578_v50 = vpop.permute.xlu1 %8118  ;;  %v7178_v21 = vpop.permute.xlu2 %7177  ;;  %v7323_v9 = vsel %vm18408_vm13, %v7275_v7, %v7176_v25  ;;  %vm18420_vm13 = vmmov %vm18257_vm0 }
 0x88b   : > { %9888 = vmatmul.msk.f32.gmra.mxu3 %vm18325_vm1, %v7320_v32  ;;  %v7885_v32 = vld [vmem:[#allocation2 + $0x158] sm:$0xff]  ;;  %v9302_v1 = vmax.f32 %v9254_v41, 0.0  ;;  %v8799_v41 = vadd.f32 %v16522_v36, %v7759_v30 }
 0x88c   : > { %9839 = vmatmul.msk.f32.gmra.mxu2 %vm18404_vm4, %v7322_v28  ;;  %9934 = vmatmul.msk.f32.gmra.mxu0 %vm18405_vm5, %v8460_v0  ;;  %v8413_v62 = vsel %vm18406_vm7, %v7885_v32, %v8115_v51  ;;  %v8850_v51 = vadd.f32 %v16612_v4, %v8798_v57  ;;  %vm18416_vm4 = vmmov %vm18325_vm1 }
 0x88d   : > { %v16596_v15 = vpop.f32.mrf.mxu1  ;;  %v8461_v0 = vsel %vm18410_vm11, %v8413_v62, %v16524_v19  ;;  %v8851_v7 = vadd.f32 %v16612_v4, %v8799_v41  ;;  %vm18417_vm5 = vmmov %vm18325_vm1  ;;  %v8923_v41 = vld [vmem:[%s10108_s10 + $0x169] sm:$0xff] }
 0x88e   : > { %v16589_v20 = vpop.f32.mrf.mxu3  ;;  %v9255_v25 = vadd.f32 %v16419_v59, %v8850_v51  ;;  %vm18418_vm7 = vmmov %vm18285_vm2 }
 0x88f   : > { %v16594_v35 = vpop.f32.mrf.mxu2  ;;  %v9256_v30 = vadd.f32 %v16446_v58, %v8851_v7  ;;  %vm18422_vm11 = vmmov %vm18257_vm0 }
 0x890   : > { %9987 = vmatmul.msk.f32.gmra.mxu1 %vm18330_vm6, %v8921_v34  ;;  %v8922_v34 = vld [vmem:[%s10108_s10 + $0x161] sm:$0xff]  ;;  %v9303_v36 = vmax.f32 %v9255_v25, 0.0 }
 0x891   : > { %v16600_v53 = vpop.f32.mrf.mxu0  ;;  %v16602_v40 = vpop.permute.xlu0 %8312  ;;  %9337 = vxpose.xlu0.b32.cont [4/16] (narrow) %v9289_v37, 8  ;;  %v9290_v37 = vmax.f32 %v16127_v44, 0.0  ;;  %v7276_v44 = vsel %vm18285_vm2, %v6748_v47, %v15607_v46  ;;  %v7762_v46 = vadd.f32 %v16443_v33, %v16469_v31 }
 0x892   : > { %v16607_v43 = vpop.permute.xlu1 %8120  ;;  %v7180_v62 = vpop.permute.xlu2 %7179 }
 0x893   : > { %9889 = vmatmul.msk.f32.gmra.mxu3 %vm18409_vm8, %v7321_v61  ;;  %v7886_v61 = vld [vmem:[#allocation2 + $0x160] sm:$0xff]  ;;  %vm18421_vm8 = vmmov %vm18325_vm1 }
 0x894   : > { %9840 = vmatmul.msk.f32.gmra.mxu2 %vm18411_vm14, %v7323_v9  ;;  %9935 = vmatmul.msk.f32.gmra.mxu0 %vm18412_vm10, %v8461_v0  ;;  %v8414_v32 = vsel %vm18413_vm3, %v7886_v61, %v16551_v5  ;;  %v7324_v5 = vsel %vm18257_vm0, %v7276_v44, %v7178_v21  ;;  %v9291_v0 = vmax.f32 %v16159_v16, 0.0  ;;  %v8800_v21 = vadd.f32 %v16544_v42, %v7762_v46  ;;  %v6749_v61 = vld [vmem:[#allocation2 + $0x170] sm:$0xff]  ;;  %vm18423_vm14 = vmmov %vm18325_vm1 }
 0x895   : > { %9366 = vxpose.xlu1.b32.start [1/16] (narrow) %v9302_v1, 8  ;;  %v16630_v19 = vpop.f32.mrf.mxu1  ;;  %v8462_v1 = vsel %vm18415_vm12, %v8414_v32, %v16546_v12  ;;  %v7277_v16 = vsel %vm18419_vm15, %v6749_v61, %v15614_v29  ;;  %v9304_v32 = vmax.f32 %v9256_v30, 0.0  ;;  %vm18424_vm10 = vmmov %vm18325_vm1  ;;  %v7765_v29 = vadd.f32 %v16471_v3, %v16492_v23  ;;  %v6750_v30 = vld [vmem:[#allocation2 + $0x178] sm:$0xff] }
 0x896   : > { %v16623_v26 = vpop.f32.mrf.mxu3  ;;  %vm18425_vm3 = vmmov %vm18285_vm2  ;;  %v9293_v61 = vmax.f32 %v16223_v11, 0.0  ;;  %v7890_v11 = vld [vmem:[#allocation2 + $0x180] sm:$0xff] }
 0x897   : > { %v16628_v57 = vpop.f32.mrf.mxu2  ;;  %vm18428_vm12 = vmmov %vm18416_vm4 }
 0x898   : > { %9988 = vmatmul.msk.f32.gmra.mxu1 %vm18414_vm9, %v8922_v34  ;;  %v8852_v34 = vadd.f32 %v16612_v4, %v8800_v21  ;;  %vm18426_vm9 = vmmov %vm18330_vm6 }
 0x899   : > { %v16635_v60 = vpop.f32.mrf.mxu0  ;;  %v16637_v55 = vpop.permute.xlu0 %8314  ;;  %9338 = vxpose.xlu0.b32.cont [5/16] (narrow) %v9290_v37, 8  ;;  %vm18431_vm15 = vmmov %vm18257_vm0 }
 0x89a   : > { %v16642_v59 = vpop.permute.xlu1 %8122  ;;  %v7182_v42 = vpop.permute.xlu2 %7181  ;;  %v9257_v7 = vadd.f32 %v16473_v10, %v8852_v34 }
 0x89b   : > { %9890 = vmatmul.msk.f32.gmra.mxu3 %vm18325_vm1, %v7322_v28  ;;  %v7887_v28 = vld [vmem:[#allocation2 + $0x168] sm:$0xff]  ;;  %vm18427_vm1 = vmmov %vm18257_vm0 }
 0x89c   : > { %9841 = vmatmul.msk.f32.gmra.mxu2 %vm18416_vm4, %v7324_v5  ;;  %9936 = vmatmul.msk.f32.gmra.mxu0 %vm18417_vm5, %v8462_v1  ;;  %v8415_v25 = vsel %vm18418_vm7, %v7887_v28, %v16578_v50  ;;  %v7325_v50 = vsel %vm18420_vm13, %v7277_v16, %v7180_v62  ;;  %v8801_v62 = vadd.f32 %v16571_v56, %v7765_v29  ;;  %v9305_v10 = vmax.f32 %v9257_v7, 0.0  ;;  %vm18429_vm5 = vmmov %vm18416_vm4 }
 0x89d   : > { %9367 = vxpose.xlu1.b32.cont [2/16] (narrow) %v9303_v36, 8  ;;  %v16660_v12 = vpop.f32.mrf.mxu1  ;;  %v8463_v47 = vsel %vm18422_vm11, %v8415_v25, %v16573_v48  ;;  %v9292_v36 = vmax.f32 %v16191_v52, 0.0  ;;  %v7278_v52 = vsel %vm18285_vm2, %v6750_v30, %v15600_v45  ;;  %v7768_v45 = vadd.f32 %v16494_v13, %v16513_v22  ;;  %vm18430_vm7 = vmmov %vm18285_vm2 }
 0x89e   : > { %v16653_v51 = vpop.f32.mrf.mxu3  ;;  %v8853_v21 = vadd.f32 %v16612_v4, %v8801_v62  ;;  %v7326_v28 = vsel %vm18427_vm1, %v7278_v52, %v7182_v42  ;;  %v7889_v42 = vld [vmem:[#allocation2 + $0x178] sm:$0xff]  ;;  %vm18432_vm13 = vmmov %vm18285_vm2  ;;  %v7771_v62 = vadd.f32 %v16515_v14, %v16535_v17  ;;  %v8926_v14 = vld [vmem:[%s10108_s10 + $0x181] sm:$0xff] }
 0x89f   : > { %v16658_v37 = vpop.f32.mrf.mxu2  ;;  %v8802_v16 = vadd.f32 %v16600_v53, %v7768_v45  ;;  %v8417_v34 = vsel %vm18430_vm7, %v7889_v42, %v16642_v59  ;;  %vm18434_vm11 = vmmov %vm18257_vm0  ;;  %v7891_v42 = vld [vmem:[#allocation2 + $0x188] sm:$0xff] }
 0x8a0   : > { %9989 = vmatmul.msk.f32.gmra.mxu1 %vm18330_vm6, %v8923_v41  ;;  %v8803_v30 = vadd.f32 %v16635_v60, %v7771_v62 }
 0x8a1   : > { %v16665_v33 = vpop.f32.mrf.mxu0  ;;  %v16667_v31 = vpop.permute.xlu0 %8316  ;;  %9339 = vxpose.xlu0.b32.cont [6/16] (narrow) %v9291_v0, 8  ;;  %v8924_v0 = vld [vmem:[%s10108_s10 + $0x171] sm:$0xff]  ;;  %v8854_v53 = vadd.f32 %v16612_v4, %v8802_v16 }
 0x8a2   : > { %v16672_v58 = vpop.permute.xlu1 %8124  ;;  %v16709_v25 = vpop.permute.xlu2 %8128 }
 0x8a3   : > { %9891 = vmatmul.msk.f32.gmra.mxu3 %vm18421_vm8, %v7323_v9  ;;  %v7888_v9 = vld [vmem:[#allocation2 + $0x170] sm:$0xff]  ;;  %vm18433_vm8 = vmmov %vm18416_vm4 }
 0x8a4   : > { %9842 = vmatmul.msk.f32.gmra.mxu2 %vm18423_vm14, %v7325_v50  ;;  %9937 = vmatmul.msk.f32.gmra.mxu0 %vm18424_vm10, %v8463_v47  ;;  %v8416_v46 = vsel %vm18425_vm3, %v7888_v9, %v16607_v43  ;;  %v8925_v47 = vld [vmem:[%s10108_s10 + $0x179] sm:$0xff]  ;;  %vm18435_vm14 = vmmov %vm18416_vm4 }
 0x8a5   : > { %9368 = vxpose.xlu1.b32.cont [3/16] (narrow) %v9304_v32, 8  ;;  %v16690_v48 = vpop.f32.mrf.mxu1  ;;  %v8464_v43 = vsel %vm18257_vm0, %v8416_v46, %v16602_v40  ;;  %v9258_v40 = vadd.f32 %v16496_v24, %v8853_v21  ;;  %vm18436_vm10 = vmmov %vm18416_vm4 }
 0x8a6   : > { %v16683_v44 = vpop.f32.mrf.mxu3  ;;  %vm18437_vm3 = vmmov %vm18285_vm2 }
 0x8a7   : > { %v16688_v1 = vpop.f32.mrf.mxu2  ;;  %v9306_v24 = vmax.f32 %v9258_v40, 0.0  ;;  %vm18439_vm2 = vmmov %vm18257_vm0 }
 0x8a8   : > { %9990 = vmatmul.msk.f32.gmra.mxu1 %vm18426_vm9, %v8924_v0  ;;  %v9259_v0 = vadd.f32 %v16518_v63, %v8854_v53  ;;  %vm18438_vm9 = vmmov %vm18330_vm6  ;;  %v9296_v53 = vmax.f32 %v16319_v27, 0.0 }
 0x8a9   : > { %v16695_v3 = vpop.f32.mrf.mxu0  ;;  %v16697_v23 = vpop.permute.xlu0 %8318  ;;  %9340 = vxpose.xlu0.b32.cont [7/16] (narrow) %v9292_v36, 8  ;;  %v8465_v36 = vsel %vm18431_vm15, %v8417_v34, %v16637_v55  ;;  %v9294_v55 = vmax.f32 %v16255_v39, 0.0  ;;  %v8855_v39 = vadd.f32 %v16612_v4, %v8803_v30  ;;  %vm18440_vm0 = vmmov %vm18416_vm4 }
 0x8aa   : > { %v16702_v56 = vpop.permute.xlu1 %8126  ;;  %v7345_v9 = vpop.permute.xlu2 %7344  ;;  %vm18441_vm1 = vmmov %vm18440_vm0 }
 0x8ab   : > { %9892 = vmatmul.msk.f32.gmra.mxu3 %vm18428_vm12, %v7324_v5  ;;  %v9260_v40 = vadd.f32 %v16540_v38, %v8855_v39  ;;  %vm18442_vm12 = vmmov %vm18437_vm3 }
 0x8ac   : > { %9843 = vmatmul.msk.f32.gmra.mxu2 %vm18416_vm4, %v7326_v28  ;;  %9938 = vmatmul.msk.f32.gmra.mxu0 %vm18429_vm5, %v8464_v43  ;;  %v9307_v43 = vmax.f32 %v9259_v0, 0.0  ;;  %vm18443_vm4 = vmmov %vm18330_vm6  ;;  %v8928_v0 = vld [vmem:[%s10108_s10 + $0x191] sm:$0xff] }
 0x8ad   : > { %9369 = vxpose.xlu1.b32.cont [4/16] (narrow) %v9305_v10, 8  ;;  %v16722_v32 = vpop.f32.mrf.mxu1  ;;  %v8418_v10 = vsel %vm18437_vm3, %v7890_v11, %v16672_v58  ;;  %v7774_v58 = vadd.f32 %v16537_v49, %v16565_v54  ;;  %vm18444_vm5 = vmmov %vm18437_vm3  ;;  %v9308_v54 = vmax.f32 %v9260_v40, 0.0 }
 0x8ae   : > { %v16715_v41 = vpop.f32.mrf.mxu3  ;;  %v8466_v63 = vsel %vm18439_vm2, %v8418_v10, %v16667_v31  ;;  %vm18445_vm7 = vmmov %vm18439_vm2 }
 0x8af   : > { %v16720_v5 = vpop.f32.mrf.mxu2  ;;  %v8804_v16 = vadd.f32 %v16665_v33, %v7774_v58  ;;  %vm18447_vm15 = vmmov %vm18440_vm0 }
 0x8b0   : > { %9991 = vmatmul.msk.f32.gmra.mxu1 %vm18330_vm6, %v8925_v47  ;;  %vm18446_vm6 = vmmov %vm18439_vm2 }
 0x8b1   : > { %v16727_v29 = vpop.f32.mrf.mxu0  ;;  %v7355_v13 = vpop.permute.xlu0 %7354  ;;  %9341 = vxpose.xlu0.b32.cont [8/16] (narrow) %v9293_v61, 8  ;;  %v9295_v61 = vmax.f32 %v16284_v8, 0.0  ;;  %v7364_v8 = vsel %vm18444_vm5, %v7891_v42, %v7345_v9  ;;  %v8856_v33 = vadd.f32 %v16612_v4, %v8804_v16 }
 0x8b2   : > { %v7343_v22 = vpop.permute.xlu1 %7342  ;;  %v8323_v47 = vpop.permute.xlu2 %8322 }
 0x8b3   : > { %v7363_v7 = vsel %vm18432_vm13, %v7890_v11, %v7343_v22  ;;  %9893 = vmatmul.msk.f32.gmra.mxu3 %vm18433_vm8, %v7325_v50  ;;  %vm18448_vm13 = vmmov %vm18440_vm0 }
 0x8b4   : > { %v7366_v59 = vsel %vm18434_vm11, %v7363_v7, %v7355_v13  ;;  %9939 = vmatmul.msk.f32.gmra.mxu0 %vm18435_vm14, %v8465_v36  ;;  %v8927_v13 = vld [vmem:[%s10108_s10 + $0x189] sm:$0xff]  ;;  %v9261_v7 = vadd.f32 %v16567_v2, %v8856_v33  ;;  %vm18449_vm8 = vmmov %vm18437_vm3  ;;  %s10002_s10 = smul.u32 24, %s18470_s28 }
 0x8b5   : > { %9844 = vmatmul.msk.f32.gmra.mxu2 %vm18436_vm10, %v7366_v59  ;;  %9370 = vxpose.xlu1.b32.cont [5/16] (narrow) %v9306_v24, 8  ;;  %v16747_v52 = vpop.f32.mrf.mxu1  ;;  %v7892_v36 = vld [vmem:[#allocation2 + $0x190] sm:$0xff]  ;;  %vm18450_vm11 = vmmov %vm18443_vm4 }
 0x8b6   : > { %v16740_v46 = vpop.f32.mrf.mxu3  ;;  %vm18451_vm14 = vmmov %vm18437_vm3  ;;  %v9309_v2 = vmax.f32 %v9261_v7, 0.0  ;;  %v18464_v7 = vld [vmem:[#allocation60_spill] sm:$0xff]  ;;  %s16871_s30 = scalar_lea.vmem %s16891_s8, %s10002_s10 }
 0x8b7   : > { %v16745_v50 = vpop.f32.mrf.mxu2  ;;  %v8420_v27 = vsel %vm18451_vm14, %v7892_v36, %v16709_v25  ;;  %vm18452_vm10 = vmmov %vm18439_vm2 }
 0x8b8   : > { %9992 = vmatmul.msk.f32.gmra.mxu1 %vm18438_vm9, %v8926_v14  ;;  %vm18453_vm3 = vmmov %vm18439_vm2  ;;  %v7780_v14 = vadd.f32 %v16589_v20, %v16628_v57  ;;  %v7894_v57 = vld [vmem:[#allocation2 + $0x1a0] sm:$0xff] }
 0x8b9   : > { %v16752_v17 = vpop.f32.mrf.mxu0  ;;  %9342 = vxpose.xlu0.b32.cont [9/16] (narrow) %v9294_v55, 8  ;;  %v8131_v60 = vpop.permute.xlu0 %8130  ;;  %vm18454_vm9 = vmmov %vm18440_vm0 }
 0x8ba   : > { %v8321_v21 = vpop.permute.xlu1 %8320  ;;  %vm18455_vm2 = vmmov %vm18440_vm0  ;;  %v8806_v39 = vadd.f32 %v16727_v29, %v7780_v14  ;;  %v18467_v14 = vld [vmem:[#allocation64_spill] sm:$0xff] }
 0x8bb   : > { %9894 = vmatmul.msk.f32.gmra.mxu3 %vm18440_vm0, %v7326_v28  ;;  %v8419_v28 = vsel %vm18442_vm12, %v7891_v42, %v16702_v56  ;;  %v7777_v56 = vadd.f32 %v16561_v18, %v16594_v35  ;;  %v7359_v18 = vpop.permute.xlu2 %7358  ;;  %vm18456_vm0 = vmmov %vm18444_vm5 }
 0x8bc   : > { %9940 = vmatmul.msk.f32.gmra.mxu0 %vm18441_vm1, %v8466_v63  ;;  %v8467_v11 = vsel %vm18445_vm7, %v8419_v28, %v16697_v23  ;;  %v7893_v63 = vld [vmem:[#allocation2 + $0x198] sm:$0xff]  ;;  %vm18457_vm1 = vmmov %vm18453_vm3 }
 0x8bd   : > { %9371 = vxpose.xlu1.b32.cont [6/16] (narrow) %v9307_v43, 8  ;;  %v16769_v31 = vpop.f32.mrf.mxu1  ;;  %v8805_v59 = vadd.f32 %v16695_v3, %v7777_v56  ;;  %v8468_v3 = vsel %vm18452_vm10, %v8420_v27, %v8321_v21  ;;  %v9297_v43 = vmax.f32 %v16348_v6, 0.0  ;;  %v8421_v21 = vsel %vm18456_vm0, %v7893_v63, %v8131_v60  ;;  %vm18458_vm12 = vmmov %vm18455_vm2  ;;  %v18460_v60 = vld [vmem:[#allocation66_spill] sm:$0xff] }
 0x8be   : > { %v16762_v45 = vpop.f32.mrf.mxu3  ;;  %v8469_v20 = vsel %vm18457_vm1, %v8421_v21, %v8323_v47  ;;  %v7783_v6 = vadd.f32 %v16623_v26, %v16658_v37  ;;  %vm18461_vm5 = vmmov %vm18457_vm1  ;;  %v7895_v26 = vld [vmem:[#allocation2 + $0x1a8] sm:$0xff] }
 0x8bf   : > { %v16767_v34 = vpop.f32.mrf.mxu2  ;;  %v8857_v35 = vadd.f32 %v16612_v4, %v8805_v59  ;;  %vm18462_vm7 = vmmov %vm18455_vm2  ;;  %v9299_v59 = vmax.f32 %v18464_v7, 0.0 }
 0x8c0   : > { %9993 = vmatmul.msk.f32.gmra.mxu1 %vm18443_vm4, %v8927_v13  ;;  %v8858_v13 = vadd.f32 %v16612_v4, %v8806_v39  ;;  %vm18459_vm4 = vmmov %vm18456_vm0 }
 0x8c1   : > { %v16774_v49 = vpop.f32.mrf.mxu0  ;;  %9343 = vxpose.xlu0.b32.cont [10/16] (narrow) %v9295_v61, 8  ;;  %v7347_v24 = vpop.permute.xlu0 %7346  ;;  %v9262_v25 = vadd.f32 %v16596_v15, %v8857_v35 }
 0x8c2   : > { %v7357_v38 = vpop.permute.xlu1 %7356  ;;  %v7365_v9 = vsel %vm18449_vm8, %v7892_v36, %v7347_v24  ;;  %v7786_v36 = vadd.f32 %v16653_v51, %v16688_v1  ;;  %v7789_v51 = vadd.f32 %v16683_v44, %v16720_v5  ;;  %v7792_v5 = vadd.f32 %v16715_v41, %v16745_v50 }
 0x8c3   : > { %v7367_v22 = vsel %vm18446_vm6, %v7364_v8, %v7357_v38  ;;  %v7368_v10 = vsel %vm18453_vm3, %v7365_v9, %v7359_v18  ;;  %v9310_v28 = vmax.f32 %v9262_v25, 0.0  ;;  %v9298_v8 = vmax.f32 %v18460_v60, 0.0  ;;  %vm18463_vm6 = vmmov %vm18456_vm0 }
 0x8c4   : > { %9845 = vmatmul.msk.f32.gmra.mxu2 %vm18447_vm15, %v7367_v22  ;;  %9941 = vmatmul.msk.f32.gmra.mxu0 %vm18448_vm13, %v8467_v11  ;;  %v9263_v38 = vadd.f32 %v16630_v19, %v8858_v13  ;;  %vm18465_vm15 = vmmov %vm18457_vm1  ;;  %v7795_v50 = vadd.f32 %v16740_v46, %v16767_v34 }
 0x8c5   : > { %9372 = vxpose.xlu1.b32.cont [7/16] (narrow) %v9308_v54, 8  ;;  %v16791_v23 = vpop.f32.mrf.mxu1  ;;  %v8807_v54 = vadd.f32 %v16752_v17, %v7783_v6  ;;  %v8327_v17 = vpop.permute.xlu2 %8326  ;;  %vm18466_vm13 = vmmov %vm18455_vm2 }
 0x8c6   : > { %v16794_v55 = vpop.f32.mrf.mxu3  ;;  %v9311_v56 = vmax.f32 %v9263_v38, 0.0 }
 0x8c7   : > { %v16789_v62 = vpop.f32.mrf.mxu2  ;;  %v8859_v24 = vadd.f32 %v16612_v4, %v8807_v54 }
 0x8c8   : > { %9994 = vmatmul.msk.f32.gmra.mxu1 %vm18450_vm11, %v8928_v0  ;;  %v8808_v0 = vadd.f32 %v16774_v49, %v7786_v36  ;;  %v7798_v46 = vadd.f32 %v16762_v45, %v16789_v62 }
 0x8c9   : > { %v16797_v30 = vpop.f32.mrf.mxu0  ;;  %9344 = vxpose.xlu0.b32.cont [11/16] (narrow) %v9296_v53, 8  ;;  %v8325_v29 = vpop.permute.xlu0 %8324  ;;  %v9264_v9 = vadd.f32 %v16660_v12, %v8859_v24  ;;  %v9300_v12 = vmax.f32 %v18467_v14, 0.0 }
 0x8ca   : > { %v8133_v16 = vpop.permute.xlu1 %8132 }
 0x8cb   : > { %v8422_v15 = vsel %vm18459_vm4, %v7894_v57, %v8133_v16 }
 0x8cc   : > { %9846 = vmatmul.msk.f32.gmra.mxu2 %vm18454_vm9, %v7368_v10  ;;  %9942 = vmatmul.msk.f32.gmra.mxu0 %vm18455_vm2, %v8468_v3  ;;  %v8470_v47 = vsel %vm18461_vm5, %v8422_v15, %v8325_v29  ;;  %v9312_v3 = vmax.f32 %v9264_v9, 0.0  ;;  %v8860_v10 = vadd.f32 %v16612_v4, %v8808_v0 }
 0x8cd   : > { %9373 = vxpose.xlu1.b32.cont [8/16] (narrow) %v9309_v2, 8  ;;  %v9190_v61 = vpop.f32.mrf.mxu1 }
 0x8ce   : > { %v7803_v42 = vpop.f32.mrf.mxu3  ;;  %v9265_v49 = vadd.f32 %v16690_v48, %v8860_v10  ;;  %v18468_v48 = vld [vmem:[#allocation16_spill] sm:$0xff] }
 0x8cf   : > { %v7630_v58 = vpop.f32.mrf.mxu2  ;;  %v9301_v57 = vmax.f32 %v18468_v48, 0.0 }
 0x8d0   : > { %v7801_v39 = vadd.f32 %v16794_v55, %v7630_v58  ;;  %v9313_v16 = vmax.f32 %v9265_v49, 0.0 }
 0x8d1   : > { %v8724_v40 = vpop.f32.mrf.mxu0  ;;  %9345 = vxpose.xlu0.b32.cont [12/16] (narrow) %v9297_v43, 8  ;;  %v8809_v43 = vadd.f32 %v16797_v30, %v7789_v51 }
 0x8d2   : > { %v8135_v37 = vpop.permute.xlu1 %8134  ;;  %v8810_v6 = vadd.f32 %v8724_v40, %v7792_v5 }
 0x8d3   : > { %v8423_v19 = vsel %vm18463_vm6, %v7895_v26, %v8135_v37 }
 0x8d4   : > { %9943 = vmatmul.msk.f32.gmra.mxu0 %vm18458_vm12, %v8469_v20  ;;  %v8471_v2 = vsel %vm18465_vm15, %v8423_v19, %v8327_v17  ;;  %v8862_v54 = vadd.f32 %v16612_v4, %v8810_v6 }
 0x8d5   : > { %9374 = vxpose.xlu1.b32.cont [9/16] (narrow) %v9310_v28, 8  ;;  %v9193_v11 = vpop.f32.mrf.mxu1  ;;  %v8861_v28 = vadd.f32 %v16612_v4, %v8809_v43 }
 0x8d6   : > { %v7806_v53 = vpop.f32.mrf.mxu3  ;;  %v9267_v40 = vadd.f32 %v16747_v52, %v8862_v54 }
 0x8d7   : > { %v7633_v33 = vpop.f32.mrf.mxu2  ;;  %v9266_v30 = vadd.f32 %v16722_v32, %v8861_v28 }
 0x8d8   : > { %v7804_v55 = vadd.f32 %v7803_v42, %v7633_v33  ;;  %v9315_v37 = vmax.f32 %v9267_v40, 0.0 }
 0x8d9   : > { %v8727_v22 = vpop.f32.mrf.mxu0  ;;  %9346 = vxpose.xlu0.b32.cont [13/16] (narrow) %v9298_v8, 8  ;;  %v9314_v38 = vmax.f32 %v9266_v30, 0.0 }
 0x8da   : > { %v8811_v42 = vadd.f32 %v8727_v22, %v7795_v50 }
 0x8dc   : > { %9944 = vmatmul.msk.f32.gmra.mxu0 %vm18462_vm7, %v8470_v47  ;;  %v8863_v36 = vadd.f32 %v16612_v4, %v8811_v42 }
 0x8dd   : > { %9375 = vxpose.xlu1.b32.cont [10/16] (narrow) %v9311_v56, 8  ;;  %v9196_v35 = vpop.f32.mrf.mxu1 }
 0x8de   : > { %v7809_v1 = vpop.f32.mrf.mxu3  ;;  %v9268_v52 = vadd.f32 %v16769_v31, %v8863_v36 }
 0x8df   : > { %v7636_v27 = vpop.f32.mrf.mxu2 }
 0x8e0   : > { %v7807_v33 = vadd.f32 %v7806_v53, %v7636_v27  ;;  %v9316_v0 = vmax.f32 %v9268_v52, 0.0 }
 0x8e1   : > { %v8730_v18 = vpop.f32.mrf.mxu0  ;;  %9347 = vxpose.xlu0.b32.cont [14/16] (narrow) %v9299_v59, 8 }
 0x8e4   : > { %9945 = vmatmul.msk.f32.gmra.mxu0 %vm18466_vm13, %v8471_v2 }
 0x8e5   : > { %9376 = vxpose.xlu1.b32.cont [11/16] (narrow) %v9312_v3, 8  ;;  %v9199_v13 = vpop.f32.mrf.mxu1 }
 0x8e6   : > { %v7812_v58 = vpop.f32.mrf.mxu3 }
 0x8e7   : > { %v7639_v25 = vpop.f32.mrf.mxu2 }
 0x8e8   : > { %v7810_v53 = vadd.f32 %v7809_v1, %v7639_v25 }
 0x8e9   : > { %v8733_v63 = vpop.f32.mrf.mxu0  ;;  %9348 = vxpose.xlu0.b32.cont [15/16] (narrow) %v9300_v12, 8 }
 0x8ea   : > { %v8813_v21 = vadd.f32 %v8733_v63, %v7801_v39 }
 0x8ec   : > { %v8865_v44 = vadd.f32 %v16612_v4, %v8813_v21 }
 0x8ed   : > { %9377 = vxpose.xlu1.b32.cont [12/16] (narrow) %v9313_v16, 8 }
 0x8ee   : > { %v9270_v20 = vadd.f32 %v9190_v61, %v8865_v44  ;;  %v9202_v61 = vpop.f32.mrf.mxu1  ;;  %v7815_v24 = vpop.f32.mrf.mxu3 }
 0x8ef   : > { %v7642_v29 = vpop.f32.mrf.mxu2 }
 0x8f0   : > { %v9318_v15 = vmax.f32 %v9270_v20, 0.0 }
 0x8f1   : > { %v8736_v60 = vpop.f32.mrf.mxu0  ;;  %9349 = vxpose.xlu0.b32.end [16/16] (narrow) %v9301_v57, 8 }
 0x8f2   : > { %v8814_v8 = vadd.f32 %v8736_v60, %v7804_v55  ;;  %9398 = vxpose.xlu2.b32.start [1/16] (narrow) %v9318_v15, 8 }
 0x8f4   : > { %v8866_v41 = vadd.f32 %v16612_v4, %v8814_v8 }
 0x8f5   : > { %9378 = vxpose.xlu1.b32.cont [13/16] (narrow) %v9314_v38, 8 }
 0x8f6   : > { %v9271_v32 = vadd.f32 %v9193_v11, %v8866_v41  ;;  %v8812_v11 = vadd.f32 %v8730_v18, %v7798_v46  ;;  %v9205_v22 = vpop.f32.mrf.mxu1  ;;  %v7818_v2 = vpop.f32.mrf.mxu3 }
 0x8f7   : > { %v7645_v19 = vpop.f32.mrf.mxu2 }
 0x8f8   : > { %v9319_v47 = vmax.f32 %v9271_v32, 0.0  ;;  %v8864_v27 = vadd.f32 %v16612_v4, %v8812_v11  ;;  %v7816_v39 = vadd.f32 %v7815_v24, %v7645_v19 }
 0x8f9   : > { %v8739_v56 = vpop.f32.mrf.mxu0 }
 0x8fa   : > { %v8815_v26 = vadd.f32 %v8739_v56, %v7807_v33  ;;  %9399 = vxpose.xlu2.b32.cont [2/16] (narrow) %v9319_v47, 8  ;;  %v9269_v62 = vadd.f32 %v16791_v23, %v8864_v27 }
 0x8fc   : > { %v8867_v17 = vadd.f32 %v16612_v4, %v8815_v26  ;;  %v9317_v14 = vmax.f32 %v9269_v62, 0.0 }
 0x8fd   : > { %9379 = vxpose.xlu1.b32.cont [14/16] (narrow) %v9315_v37, 8 }
 0x8fe   : > { %v9272_v34 = vadd.f32 %v9196_v35, %v8867_v17  ;;  %v7813_v35 = vadd.f32 %v7812_v58, %v7642_v29  ;;  %v9208_v51 = vpop.f32.mrf.mxu1  ;;  %v7821_v49 = vpop.f32.mrf.mxu3 }
 0x8ff   : > { %v7648_v10 = vpop.f32.mrf.mxu2 }
 0x900   : > { %v9320_v7 = vmax.f32 %v9272_v34, 0.0  ;;  %v7819_v44 = vadd.f32 %v7818_v2, %v7648_v10 }
 0x901   : > { %v8742_v59 = vpop.f32.mrf.mxu0 }
 0x902   : > { %v8816_v9 = vadd.f32 %v8742_v59, %v7810_v53  ;;  %9400 = vxpose.xlu2.b32.cont [3/16] (narrow) %v9320_v7, 8 }
 0x904   : > { %v8868_v3 = vadd.f32 %v16612_v4, %v8816_v9 }
 0x905   : > { %9380 = vxpose.xlu1.b32.cont [15/16] (narrow) %v9316_v0, 8 }
 0x906   : > { %v9273_v45 = vadd.f32 %v9199_v13, %v8868_v3  ;;  %v9211_v28 = vpop.f32.mrf.mxu1  ;;  %v7824_v5 = vpop.f32.mrf.mxu3 }
 0x907   : > { %v7651_v25 = vpop.f32.mrf.mxu2 }
 0x908   : > { %v9321_v31 = vmax.f32 %v9273_v45, 0.0  ;;  %v7822_v15 = vadd.f32 %v7821_v49, %v7651_v25 }
 0x909   : > { %v8745_v18 = vpop.f32.mrf.mxu0 }
 0x90a   : > { %v8817_v1 = vadd.f32 %v8745_v18, %v7813_v35  ;;  %9401 = vxpose.xlu2.b32.cont [4/16] (narrow) %v9321_v31, 8 }
 0x90c   : > { %v8869_v12 = vadd.f32 %v16612_v4, %v8817_v1 }
 0x90d   : > { %9381 = vxpose.xlu1.b32.end [16/16] (narrow) %v9317_v14, 8 }
 0x90e   : > { %v9274_v43 = vadd.f32 %v9202_v61, %v8869_v12  ;;  %v9214_v55 = vpop.f32.mrf.mxu1  ;;  %v7827_v8 = vpop.f32.mrf.mxu3 }
 0x90f   : > { %v7654_v48 = vpop.f32.mrf.mxu2 }
 0x910   : > { %v9322_v63 = vmax.f32 %v9274_v43, 0.0  ;;  %v7825_v32 = vadd.f32 %v7824_v5, %v7654_v48 }
 0x911   : > { %v8748_v21 = vpop.f32.mrf.mxu0 }
 0x912   : > { %v8818_v16 = vadd.f32 %v8748_v21, %v7816_v39  ;;  %9402 = vxpose.xlu2.b32.cont [5/16] (narrow) %v9322_v63, 8 }
 0x914   : > { %v8870_v23 = vadd.f32 %v16612_v4, %v8818_v16 }
 0x916   : > { %v9275_v13 = vadd.f32 %v9205_v22, %v8870_v23  ;;  %v9217_v61 = vpop.f32.mrf.mxu1  ;;  %v7830_v47 = vpop.f32.mrf.mxu3 }
 0x917   : > { %v7657_v54 = vpop.f32.mrf.mxu2 }
 0x918   : > { %v9323_v20 = vmax.f32 %v9275_v13, 0.0  ;;  %v7828_v37 = vadd.f32 %v7827_v8, %v7657_v54 }
 0x919   : > { %v8751_v57 = vpop.f32.mrf.mxu0 }
 0x91a   : > { %v8819_v30 = vadd.f32 %v8751_v57, %v7819_v44  ;;  %9403 = vxpose.xlu2.b32.cont [6/16] (narrow) %v9323_v20, 8 }
 0x91c   : > { %v8871_v6 = vadd.f32 %v16612_v4, %v8819_v30 }
 0x91d   : > { %v9350_v39 = vpop.trf.xlu0 }
 0x91e   : > { %v9276_v58 = vadd.f32 %v9208_v51, %v8871_v6  ;;  %v9220_v17 = vpop.f32.mrf.mxu1  ;;  %v7833_v52 = vpop.f32.mrf.mxu3  ;;  %9430 = vst [vmem:[%s16871_s30] sm:$0xff] %v9350_v39 }
 0x91f   : > { %v7660_v24 = vpop.f32.mrf.mxu2 }
 0x920   : > { %v9324_v29 = vmax.f32 %v9276_v58, 0.0  ;;  %v7831_v53 = vadd.f32 %v7830_v47, %v7660_v24 }
 0x921   : > { %v8754_v60 = vpop.f32.mrf.mxu0 }
 0x922   : > { %v8820_v38 = vadd.f32 %v8754_v60, %v7822_v15  ;;  %9404 = vxpose.xlu2.b32.cont [7/16] (narrow) %v9324_v29, 8 }
 0x924   : > { %v8872_v41 = vadd.f32 %v16612_v4, %v8820_v38 }
 0x926   : > { %v9277_v50 = vadd.f32 %v9211_v28, %v8872_v41  ;;  %v9223_v0 = vpop.f32.mrf.mxu1  ;;  %v7836_v10 = vpop.f32.mrf.mxu3 }
 0x927   : > { %v7663_v22 = vpop.f32.mrf.mxu2 }
 0x928   : > { %v9325_v40 = vmax.f32 %v9277_v50, 0.0  ;;  %v7834_v3 = vadd.f32 %v7833_v52, %v7663_v22 }
 0x929   : > { %v8757_v42 = vpop.f32.mrf.mxu0 }
 0x92a   : > { %v8821_v33 = vadd.f32 %v8757_v42, %v7825_v32  ;;  %9405 = vxpose.xlu2.b32.cont [8/16] (narrow) %v9325_v40, 8 }
 0x92c   : > { %v8873_v56 = vadd.f32 %v16612_v4, %v8821_v33 }
 0x92e   : > { %v9278_v26 = vadd.f32 %v9214_v55, %v8873_v56  ;;  %v9226_v51 = vpop.f32.mrf.mxu1  ;;  %v7839_v63 = vpop.f32.mrf.mxu3 }
 0x92f   : > { %v7666_v62 = vpop.f32.mrf.mxu2 }
 0x930   : > { %v9326_v36 = vmax.f32 %v9278_v26, 0.0  ;;  %v7837_v14 = vadd.f32 %v7836_v10, %v7666_v62 }
 0x931   : > { %v8760_v19 = vpop.f32.mrf.mxu0 }
 0x932   : > { %v8822_v46 = vadd.f32 %v8760_v19, %v7828_v37  ;;  %9406 = vxpose.xlu2.b32.cont [9/16] (narrow) %v9326_v36, 8 }
 0x934   : > { %v8874_v34 = vadd.f32 %v16612_v4, %v8822_v46 }
 0x936   : > { %v9279_v11 = vadd.f32 %v9217_v61, %v8874_v34  ;;  %v9229_v23 = vpop.f32.mrf.mxu1  ;;  %v7842_v30 = vpop.f32.mrf.mxu3 }
 0x938   : > { %v9327_v7 = vmax.f32 %v9279_v11, 0.0  ;;  %v7669_v21 = vpop.f32.mrf.mxu2 }
 0x939   : > { %v8763_v59 = vpop.f32.mrf.mxu0  ;;  %v9382_v25 = vpop.trf.xlu1  ;;  %v7840_v13 = vadd.f32 %v7839_v63, %v7669_v21 }
 0x93a   : > { %v8823_v9 = vadd.f32 %v8763_v59, %v7831_v53  ;;  %9407 = vxpose.xlu2.b32.cont [10/16] (narrow) %v9327_v7, 8  ;;  %9431 = vst [vmem:[%s16871_s30 + $0x8] sm:$0xff] %v9382_v25 }
 0x93c   : > { %v8875_v27 = vadd.f32 %v16612_v4, %v8823_v9 }
 0x93e   : > { %v9280_v2 = vadd.f32 %v9220_v17, %v8875_v27  ;;  %v9232_v29 = vpop.f32.mrf.mxu1  ;;  %v7845_v41 = vpop.f32.mrf.mxu3 }
 0x940   : > { %v9328_v45 = vmax.f32 %v9280_v2, 0.0 }
 0x941   : > { %v8766_v35 = vpop.f32.mrf.mxu0 }
 0x942   : > { %v8824_v31 = vadd.f32 %v8766_v35, %v7834_v3  ;;  %9408 = vxpose.xlu2.b32.cont [11/16] (narrow) %v9328_v45, 8 }
 0x944   : > { %v8876_v18 = vadd.f32 %v16612_v4, %v8824_v31 }
 0x946   : > { %v9281_v1 = vadd.f32 %v9223_v0, %v8876_v18  ;;  %v9235_v42 = vpop.f32.mrf.mxu1 }
 0x947   : > { %v7672_v48 = vpop.f32.mrf.mxu2 }
 0x948   : > { %v9329_v12 = vmax.f32 %v9281_v1, 0.0  ;;  %v7843_v55 = vadd.f32 %v7842_v30, %v7672_v48 }
 0x949   : > { %v8769_v49 = vpop.f32.mrf.mxu0 }
 0x94a   : > { %v8825_v43 = vadd.f32 %v8769_v49, %v7837_v14  ;;  %9409 = vxpose.xlu2.b32.cont [12/16] (narrow) %v9329_v12, 8 }
 0x94c   : > { %v8877_v16 = vadd.f32 %v16612_v4, %v8825_v43 }
 0x94e   : > { %v9282_v28 = vadd.f32 %v9226_v51, %v8877_v16 }
 0x94f   : > { %v7675_v38 = vpop.f32.mrf.mxu2 }
 0x950   : > { %v9330_v44 = vmax.f32 %v9282_v28, 0.0  ;;  %v7846_v50 = vadd.f32 %v7845_v41, %v7675_v38 }
 0x951   : > { %v8772_v5 = vpop.f32.mrf.mxu0 }
 0x952   : > { %v8826_v20 = vadd.f32 %v8772_v5, %v7840_v13  ;;  %9410 = vxpose.xlu2.b32.cont [13/16] (narrow) %v9330_v44, 8 }
 0x954   : > { %v8878_v57 = vadd.f32 %v16612_v4, %v8826_v20 }
 0x956   : > { %v9283_v6 = vadd.f32 %v9229_v23, %v8878_v57 }
 0x958   : > { %v9331_v58 = vmax.f32 %v9283_v6, 0.0 }
 0x959   : > { %v8775_v15 = vpop.f32.mrf.mxu0 }
 0x95a   : > { %v8827_v60 = vadd.f32 %v8775_v15, %v7843_v55  ;;  %9411 = vxpose.xlu2.b32.cont [14/16] (narrow) %v9331_v58, 8 }
 0x95c   : > { %v8879_v8 = vadd.f32 %v16612_v4, %v8827_v60 }
 0x95e   : > { %v9284_v54 = vadd.f32 %v9232_v29, %v8879_v8 }
 0x960   : > { %v9332_v61 = vmax.f32 %v9284_v54, 0.0 }
 0x961   : > { %v8778_v32 = vpop.f32.mrf.mxu0 }
 0x962   : > { %v8828_v40 = vadd.f32 %v8778_v32, %v7846_v50  ;;  %9412 = vxpose.xlu2.b32.cont [15/16] (narrow) %v9332_v61, 8 }
 0x964   : > { %v8880_v33 = vadd.f32 %v16612_v4, %v8828_v40 }
 0x966   : > { %v9285_v47 = vadd.f32 %v9235_v42, %v8880_v33 }
 0x968   : > { %v9333_v56 = vmax.f32 %v9285_v47, 0.0 }
 0x96a   : > { %9413 = vxpose.xlu2.b32.end [16/16] (narrow) %v9333_v56, 8 }
 0x98b   : > { %v9414_v24 = vpop.trf.xlu2 }
 0x98c   : > { %9432 = vst [vmem:[%s16871_s30 + $0x10] sm:$0xff] %v9414_v24 }
 0x98d PF: > { %s18_s27 = sadd.s32 1, %s10042_s27  }
 0x98e   : > { %p15_p4 = scmp.ge.s32.totalorder %s18_s27, 4  }
 0x990   :  { %17 = sbr.rel (!%p15_p4) target bundleno = 1 (0x1), region = 88 }

</bundles_post_ra>
